<compile_context>
chip_gen: v5e
topology: v5e:2x2
jax: 0.10.0
libtpu: 0.0.40
codegen_flags: <defaults>
</compile_context>

<pallas_src>
import jax
import jax.numpy as jnp
from jax.experimental import pallas as pl
from jax.experimental.pallas import tpu as pltpu


NUM_LABELS = 10
IMG_FEATURES = 28 * 28          # 784
EMB_PAD = 128                   # embedding slot padded to one 128-lane tile
CAT_W = 1024                    # concat width padded to a K-slab multiple (4 x 256)
H1, H2, H3 = 1024, 512, 256
LEAKY_SLOPE = 0.2


def _leaky_relu(x, slope):
    return jnp.where(x >= 0, x, slope * x)


def _round_up(a, b):
    return ((a + b - 1) // b) * b


def _choose_tm(n):
    """Batch-tile size: multiple of 16 (bf16 sublane packing); large tiles amortize the
    ~0.35us/step pipeline overhead; >=2 grid steps whenever possible for v7x megacore."""
    if n >= 4096:
        return 1024
    if n >= 1024:
        return 512
    if n > 16:
        return max(16, _round_up((n + 1) // 2, 16))   # guarantees >= 2 tiles
    return 16


def disc_kernel(x_ref, e_ref,
                w1_ref, b1_ref, w2_ref, b2_ref, w3_ref, b3_ref, w4_ref, b4_ref,
                o_ref, cat_ref):
    """Fused MLP tile: single merged layer-1 matmul + 2 hidden matmuls + transposed
    output layer + sigmoid.  All MXU matmuls take bf16 operands, f32 accumulation."""
    tm = x_ref.shape[0]

    # Build concat([emb(128) | x(784) | zeros(112)]) in VMEM with 128-lane-aligned stores.
    # The zero store precedes the x store (they overlap in lanes 896..911; program order
    # on the same ref is preserved), so every lane of the scratch is defined.
    cat_ref[:, :EMB_PAD] = e_ref[...]                                        # lanes 0..127
    cat_ref[:, CAT_W - 128:] = jnp.zeros((tm, 128), jnp.bfloat16)            # lanes 896..1023
    cat_ref[:, EMB_PAD:EMB_PAD + IMG_FEATURES] = x_ref[...].astype(jnp.bfloat16)  # 128..911

    # Layer 1: one K=1024 matmul (embedding rows live in the first 10 weight rows).
    h = jnp.dot(cat_ref[...], w1_ref[...], preferred_element_type=jnp.float32)
    h = _leaky_relu(h + b1_ref[...], LEAKY_SLOPE)
    # Dropout(p=0.3) is identity in eval-mode forward.

    # Layer 2.
    h = jnp.dot(h.astype(jnp.bfloat16), w2_ref[...], preferred_element_type=jnp.float32)
    h = _leaky_relu(h + b2_ref[...], LEAKY_SLOPE)

    # Layer 3.
    h = jnp.dot(h.astype(jnp.bfloat16), w3_ref[...], preferred_element_type=jnp.float32)
    h = _leaky_relu(h + b3_ref[...], LEAKY_SLOPE)

    # Output layer 256 -> 1, computed transposed on the MXU so the result is lane-dense:
    #   w4_pad (8, 256) @ h (TM, 256)^T -> (8, TM); only row 0 carries the real weights.
    r = jax.lax.dot_general(
        w4_ref[...], h.astype(jnp.bfloat16),
        dimension_numbers=(((1,), (1,)), ((), ())),
        preferred_element_type=jnp.float32)                                  # (8, TM)
    logits = r[0:1, :] + b4_ref[...]                                         # (1, TM)

    # Exact sigmoid (divide) keeps probabilities strictly inside [0, 1].
    o_ref[0] = 1.0 / (1.0 + jnp.exp(-logits))


def discriminator_forward(x, labels, params):
    """x: (N, 1, 28, 28) float32, labels: (N,) int -> (N, 1) float32 probabilities."""
    # Plain-JAX glue: embedding gather (table pre-padded to 128 lanes) + flatten.
    emb = jnp.take(params["emb_pad"], labels.astype(jnp.int32), axis=0)      # (N, 128) bf16
    x_flat = x.reshape(-1, IMG_FEATURES)                                     # (N, 784)
    if x_flat.dtype != jnp.float32:
        x_flat = x_flat.astype(jnp.float32)
    n = x_flat.shape[0]

    tm = _choose_tm(n)
    num_tiles = -(-n // tm)          # cdiv; last tile is implicitly (ragged) padded

    def tile2d(f):
        return pl.BlockSpec((tm, f), lambda i: (i, 0))

    def resident(p):                 # constant block index -> stays VMEM-resident
        return pl.BlockSpec(p.shape, lambda i: (0, 0))

    in_specs = [
        tile2d(IMG_FEATURES),               # x tile   (TM, 784) f32, cast in-kernel
        tile2d(EMB_PAD),                    # emb tile (TM, 128) bf16
        resident(params["w1c"]),            # (1024, 1024) bf16 (combined W1)
        resident(params["b1"]),             # (1, 1024)    f32
        resident(params["w2"]),             # (1024, 512)  bf16
        resident(params["b2"]),             # (1, 512)     f32
        resident(params["w3"]),             # (512, 256)   bf16
        resident(params["b3"]),             # (1, 256)     f32
        resident(params["w4_pad"]),         # (8, 256)     bf16 (row 0 real)
        resident(params["b4"]),             # (1, 1)       f32
    ]

    out = pl.pallas_call(
        disc_kernel,
        out_shape=jax.ShapeDtypeStruct((num_tiles, 1, tm), jnp.float32),
        grid_spec=pltpu.PrefetchScalarGridSpec(
            num_scalar_prefetch=0,
            grid=(num_tiles,),
            in_specs=in_specs,
            out_specs=pl.BlockSpec((1, 1, tm), lambda i: (i, 0, 0)),   # lane-dense row
            scratch_shapes=[pltpu.VMEM((tm, CAT_W), jnp.bfloat16)],
        ),
        compiler_params=pltpu.CompilerParams(
            dimension_semantics=("parallel",),
            vmem_limit_bytes=48 << 20,
        ),
    )(x_flat, emb,
      params["w1c"], params["b1"], params["w2"], params["b2"],
      params["w3"], params["b3"], params["w4_pad"], params["b4"])

    return out.reshape(num_tiles * tm, 1)[:n]


def init_params(key):
    """Deterministic synthetic parameters matching the PyTorch module's shapes."""
    ks = jax.random.split(key, 9)

    def linear(kw, kb, fan_in, fan_out):
        bound = 1.0 / (float(fan_in) ** 0.5)
        w = jax.random.uniform(kw, (fan_in, fan_out), jnp.float32, -bound, bound)
        b = jax.random.uniform(kb, (1, fan_out), jnp.float32, -bound, bound)
        return w, b

    emb = jax.random.normal(ks[0], (NUM_LABELS, NUM_LABELS), jnp.float32)    # nn.Embedding(10,10)
    w1, b1 = linear(ks[1], ks[2], IMG_FEATURES + NUM_LABELS, H1)
    w2, b2 = linear(ks[3], ks[4], H1, H2)
    w3, b3 = linear(ks[5], ks[6], H2, H3)
    w4, b4 = linear(ks[7], ks[8], H3, 1)

    # Embedding table padded to one 128-lane tile (columns 10..127 are zero).
    emb_pad = jnp.zeros((NUM_LABELS, EMB_PAD), jnp.float32).at[:, :NUM_LABELS].set(emb)

    # Combined W1 laid out to match the in-kernel concat [emb(128) | x(784) | 0(112)]:
    #   rows 0..9    -> W1 embedding rows (original rows 784..793)
    #   rows 10..127 -> zero
    #   rows 128..911-> W1 image rows (original rows 0..783)
    #   rows 912..1023 -> zero
    w1c = jnp.zeros((CAT_W, H1), jnp.float32)
    w1c = w1c.at[:NUM_LABELS, :].set(w1[IMG_FEATURES:, :])
    w1c = w1c.at[EMB_PAD:EMB_PAD + IMG_FEATURES, :].set(w1[:IMG_FEATURES, :])

    # Final layer weight as an 8-row bf16 block (row 0 real, rows 1..7 zero) for the
    # transposed MXU matmul.
    w4_pad = jnp.zeros((8, H3), jnp.float32).at[0, :].set(w4[:, 0])

    return dict(
        emb_pad=emb_pad.astype(jnp.bfloat16),
        w1c=w1c.astype(jnp.bfloat16), b1=b1,
        w2=w2.astype(jnp.bfloat16), b2=b2,
        w3=w3.astype(jnp.bfloat16), b3=b3,
        w4_pad=w4_pad.astype(jnp.bfloat16), b4=b4,
    )


if __name__ == "__main__":
    key = jax.random.PRNGKey(0)
    k_params, k_x, k_lbl = jax.random.split(key, 3)

    params = init_params(k_params)
    batch = 2
    x = jax.random.normal(k_x, (batch, 1, 28, 28), jnp.float32)              # NCHW MNIST-like
    labels = jax.random.randint(k_lbl, (batch,), 0, NUM_LABELS, jnp.int32)

    fwd = jax.jit(discriminator_forward)
    out = jax.block_until_ready(fwd(x, labels, params))
    assert out.shape == (batch, 1)
    assert bool(jnp.all((out >= 0.0) & (out <= 1.0)))
    print("KERNEL_OK")
</pallas_src>

<mosaic_0001>
module attributes {stable_mosaic.version = 11 : i64} {
  func.func @disc_kernel(%arg0: i32, %arg1: memref<16x784xf32, #tpu.memory_space<vmem>>, %arg2: memref<16x128xbf16, #tpu.memory_space<vmem>>, %arg3: memref<1024x1024xbf16, #tpu.memory_space<vmem>>, %arg4: memref<1x1024xf32, #tpu.memory_space<vmem>>, %arg5: memref<1024x512xbf16, #tpu.memory_space<vmem>>, %arg6: memref<1x512xf32, #tpu.memory_space<vmem>>, %arg7: memref<512x256xbf16, #tpu.memory_space<vmem>>, %arg8: memref<1x256xf32, #tpu.memory_space<vmem>>, %arg9: memref<8x256xbf16, #tpu.memory_space<vmem>>, %arg10: memref<1x1xf32, #tpu.memory_space<vmem>>, %arg11: memref<1x1x16xf32, #tpu.memory_space<vmem>>, %arg12: memref<16x1024xbf16, #tpu.memory_space<vmem>>) attributes {dimension_semantics = [#tpu.dimension_semantics<parallel>], iteration_bounds = array<i64: 1>, scalar_prefetch = 0 : i64, scratch_operands = 1 : i64, tpu.core_type = #tpu.core_type<tc>, window_params = [{transform_indices = @transform_0, window_bounds = array<i64: 16, 784>}, {transform_indices = @transform_1, window_bounds = array<i64: 16, 128>}, {pipeline_mode = #tpu.pipeline_mode<synchronous>, transform_indices = @transform_2, window_bounds = array<i64: 1024, 1024>}, {pipeline_mode = #tpu.pipeline_mode<synchronous>, transform_indices = @transform_3, window_bounds = array<i64: 1, 1024>}, {pipeline_mode = #tpu.pipeline_mode<synchronous>, transform_indices = @transform_4, window_bounds = array<i64: 1024, 512>}, {pipeline_mode = #tpu.pipeline_mode<synchronous>, transform_indices = @transform_5, window_bounds = array<i64: 1, 512>}, {pipeline_mode = #tpu.pipeline_mode<synchronous>, transform_indices = @transform_6, window_bounds = array<i64: 512, 256>}, {pipeline_mode = #tpu.pipeline_mode<synchronous>, transform_indices = @transform_7, window_bounds = array<i64: 1, 256>}, {pipeline_mode = #tpu.pipeline_mode<synchronous>, transform_indices = @transform_8, window_bounds = array<i64: 8, 256>}, {pipeline_mode = #tpu.pipeline_mode<synchronous>, transform_indices = @transform_9, window_bounds = array<i64: 1, 1>}, {transform_indices = @transform_10, window_bounds = array<i64: 1, 1, 16>}]} {
    %c0 = arith.constant 0 : index
    %c0_0 = arith.constant 0 : index
    %0 = vector.load %arg2[%c0, %c0_0] : memref<16x128xbf16, #tpu.memory_space<vmem>>, vector<16x128xbf16>
    %c0_1 = arith.constant 0 : index
    %c0_2 = arith.constant 0 : index
    %1 = vector.load %arg12[%c0_1, %c0_2] : memref<16x1024xbf16, #tpu.memory_space<vmem>>, vector<16x128xbf16>
    tpu.vector_store %arg12[%c0_1, %c0_2], %0 {strides = array<i32>} : memref<16x1024xbf16, #tpu.memory_space<vmem>>, vector<16x128xbf16>,
    %cst = arith.constant 0.000000e+00 : bf16
    %2 = vector.broadcast %cst : bf16 to vector<16x128xbf16>
    %c0_3 = arith.constant 0 : index
    %c896 = arith.constant 896 : index
    %3 = vector.load %arg12[%c0_3, %c896] : memref<16x1024xbf16, #tpu.memory_space<vmem>>, vector<16x128xbf16>
    tpu.vector_store %arg12[%c0_3, %c896], %2 {strides = array<i32>} : memref<16x1024xbf16, #tpu.memory_space<vmem>>, vector<16x128xbf16>,
    %c0_4 = arith.constant 0 : index
    %c0_5 = arith.constant 0 : index
    %4 = vector.load %arg1[%c0_4, %c0_5] : memref<16x784xf32, #tpu.memory_space<vmem>>, vector<16x784xf32>
    %5 = arith.truncf %4 : vector<16x784xf32> to vector<16x784xbf16>
    %c0_6 = arith.constant 0 : index
    %c128 = arith.constant 128 : index
    %6 = vector.load %arg12[%c0_6, %c128] : memref<16x1024xbf16, #tpu.memory_space<vmem>>, vector<16x784xbf16>
    tpu.vector_store %arg12[%c0_6, %c128], %5 {strides = array<i32>} : memref<16x1024xbf16, #tpu.memory_space<vmem>>, vector<16x784xbf16>,
    %c0_7 = arith.constant 0 : index
    %c0_8 = arith.constant 0 : index
    %7 = vector.load %arg12[%c0_7, %c0_8] : memref<16x1024xbf16, #tpu.memory_space<vmem>>, vector<16x1024xbf16>
    %c0_9 = arith.constant 0 : index
    %c0_10 = arith.constant 0 : index
    %8 = vector.load %arg3[%c0_9, %c0_10] : memref<1024x1024xbf16, #tpu.memory_space<vmem>>, vector<1024x1024xbf16>
    %cst_11 = arith.constant dense<0.000000e+00> : vector<16x1024xf32>
    %9 = tpu.matmul %7, %8, %cst_11 {dimension_numbers = #tpu.dot_dimension_numbers<[1], [0], [0], [1], [0, 0, 1, 1], [], []>} : vector<16x1024xbf16>, vector<1024x1024xbf16>, vector<16x1024xf32> -> vector<16x1024xf32>
    %c0_12 = arith.constant 0 : index
    %c0_13 = arith.constant 0 : index
    %10 = vector.load %arg4[%c0_12, %c0_13] : memref<1x1024xf32, #tpu.memory_space<vmem>>, vector<1x1024xf32>
    %11 = vector.broadcast %10 : vector<1x1024xf32> to vector<16x1024xf32>
    %12 = arith.addf %9, %11 : vector<16x1024xf32>
    %cst_14 = arith.constant 0.000000e+00 : f32
    %13 = vector.broadcast %cst_14 : f32 to vector<16x1024xf32>
    %14 = arith.cmpf oge, %12, %13 : vector<16x1024xf32>
    %cst_15 = arith.constant 2.000000e-01 : f32
    %15 = vector.broadcast %cst_15 : f32 to vector<16x1024xf32>
    %16 = arith.mulf %15, %12 : vector<16x1024xf32>
    %17 = arith.select %14, %12, %16 : vector<16x1024xi1>, vector<16x1024xf32>
    %18 = arith.truncf %17 : vector<16x1024xf32> to vector<16x1024xbf16>
    %c0_16 = arith.constant 0 : index
    %c0_17 = arith.constant 0 : index
    %19 = vector.load %arg5[%c0_16, %c0_17] : memref<1024x512xbf16, #tpu.memory_space<vmem>>, vector<1024x512xbf16>
    %cst_18 = arith.constant dense<0.000000e+00> : vector<16x512xf32>
    %20 = tpu.matmul %18, %19, %cst_18 {dimension_numbers = #tpu.dot_dimension_numbers<[1], [0], [0], [1], [0, 0, 1, 1], [], []>} : vector<16x1024xbf16>, vector<1024x512xbf16>, vector<16x512xf32> -> vector<16x512xf32>
    %c0_19 = arith.constant 0 : index
    %c0_20 = arith.constant 0 : index
    %21 = vector.load %arg6[%c0_19, %c0_20] : memref<1x512xf32, #tpu.memory_space<vmem>>, vector<1x512xf32>
    %22 = vector.broadcast %21 : vector<1x512xf32> to vector<16x512xf32>
    %23 = arith.addf %20, %22 : vector<16x512xf32>
    %cst_21 = arith.constant 0.000000e+00 : f32
    %24 = vector.broadcast %cst_21 : f32 to vector<16x512xf32>
    %25 = arith.cmpf oge, %23, %24 : vector<16x512xf32>
    %cst_22 = arith.constant 2.000000e-01 : f32
    %26 = vector.broadcast %cst_22 : f32 to vector<16x512xf32>
    %27 = arith.mulf %26, %23 : vector<16x512xf32>
    %28 = arith.select %25, %23, %27 : vector<16x512xi1>, vector<16x512xf32>
    %29 = arith.truncf %28 : vector<16x512xf32> to vector<16x512xbf16>
    %c0_23 = arith.constant 0 : index
    %c0_24 = arith.constant 0 : index
    %30 = vector.load %arg7[%c0_23, %c0_24] : memref<512x256xbf16, #tpu.memory_space<vmem>>, vector<512x256xbf16>
    %cst_25 = arith.constant dense<0.000000e+00> : vector<16x256xf32>
    %31 = tpu.matmul %29, %30, %cst_25 {dimension_numbers = #tpu.dot_dimension_numbers<[1], [0], [0], [1], [0, 0, 1, 1], [], []>} : vector<16x512xbf16>, vector<512x256xbf16>, vector<16x256xf32> -> vector<16x256xf32>
    %c0_26 = arith.constant 0 : index
    %c0_27 = arith.constant 0 : index
    %32 = vector.load %arg8[%c0_26, %c0_27] : memref<1x256xf32, #tpu.memory_space<vmem>>, vector<1x256xf32>
    %33 = vector.broadcast %32 : vector<1x256xf32> to vector<16x256xf32>
    %34 = arith.addf %31, %33 : vector<16x256xf32>
    %cst_28 = arith.constant 0.000000e+00 : f32
    %35 = vector.broadcast %cst_28 : f32 to vector<16x256xf32>
    %36 = arith.cmpf oge, %34, %35 : vector<16x256xf32>
    %cst_29 = arith.constant 2.000000e-01 : f32
    %37 = vector.broadcast %cst_29 : f32 to vector<16x256xf32>
    %38 = arith.mulf %37, %34 : vector<16x256xf32>
    %39 = arith.select %36, %34, %38 : vector<16x256xi1>, vector<16x256xf32>
    %c0_30 = arith.constant 0 : index
    %c0_31 = arith.constant 0 : index
    %40 = vector.load %arg9[%c0_30, %c0_31] : memref<8x256xbf16, #tpu.memory_space<vmem>>, vector<8x256xbf16>
    %41 = arith.truncf %39 : vector<16x256xf32> to vector<16x256xbf16>
    %cst_32 = arith.constant dense<0.000000e+00> : vector<8x16xf32>
    %42 = tpu.matmul %40, %41, %cst_32 {dimension_numbers = #tpu.dot_dimension_numbers<[1], [1], [0], [0], [0, 0, 1, 0], [], []>} : vector<8x256xbf16>, vector<16x256xbf16>, vector<8x16xf32> -> vector<8x16xf32>
    %43 = vector.extract_strided_slice %42 {offsets = [0, 0], sizes = [1, 16], strides = [1, 1]} : vector<8x16xf32> to vector<1x16xf32>
    %c0_33 = arith.constant 0 : index
    %c0_34 = arith.constant 0 : index
    %44 = vector.load %arg10[%c0_33, %c0_34] : memref<1x1xf32, #tpu.memory_space<vmem>>, vector<1x1xf32>
    %45 = vector.broadcast %44 : vector<1x1xf32> to vector<1x16xf32>
    %46 = arith.addf %43, %45 : vector<1x16xf32>
    %cst_35 = arith.constant 0.000000e+00 : f32
    %47 = vector.broadcast %cst_35 : f32 to vector<1x16xf32>
    %48 = arith.subf %47, %46 : vector<1x16xf32>
    %49 = math.exp %48 : vector<1x16xf32>
    %cst_36 = arith.constant 1.000000e+00 : f32
    %50 = vector.broadcast %cst_36 : f32 to vector<1x16xf32>
    %51 = arith.addf %50, %49 : vector<1x16xf32>
    %cst_37 = arith.constant 1.000000e+00 : f32
    %52 = vector.broadcast %cst_37 : f32 to vector<1x16xf32>
    %53 = arith.divf %52, %51 : vector<1x16xf32>
    %c0_38 = arith.constant 0 : index
    %c0_39 = arith.constant 0 : index
    %c0_40 = arith.constant 0 : index
    %54 = vector.load %arg11[%c0_38, %c0_39, %c0_40] : memref<1x1x16xf32, #tpu.memory_space<vmem>>, vector<1x1x16xf32>
    %55 = vector.shape_cast %54 : vector<1x1x16xf32> to vector<1x16xf32>
    %56 = vector.shape_cast %53 : vector<1x16xf32> to vector<1x1x16xf32>
    tpu.vector_store %arg11[%c0_38, %c0_39, %c0_40], %56 {strides = array<i32>} : memref<1x1x16xf32, #tpu.memory_space<vmem>>, vector<1x1x16xf32>,
    return
  }
  func.func @transform_0(%arg0: i32) -> (i32, i32) {
    %c0_i32 = arith.constant 0 : i32
    %c0_i32_0 = arith.constant 0 : i32
    return %arg0, %c0_i32 : i32, i32
  }
  func.func @transform_1(%arg0: i32) -> (i32, i32) {
    %c0_i32 = arith.constant 0 : i32
    %c0_i32_0 = arith.constant 0 : i32
    return %arg0, %c0_i32 : i32, i32
  }
  func.func @transform_2(%arg0: i32) -> (i32, i32) {
    %c0_i32 = arith.constant 0 : i32
    %c0_i32_0 = arith.constant 0 : i32
    %c0_i32_1 = arith.constant 0 : i32
    return %c0_i32, %c0_i32_0 : i32, i32
  }
  func.func @transform_3(%arg0: i32) -> (i32, i32) {
    %c0_i32 = arith.constant 0 : i32
    %c0_i32_0 = arith.constant 0 : i32
    %c0_i32_1 = arith.constant 0 : i32
    return %c0_i32, %c0_i32_0 : i32, i32
  }
  func.func @transform_4(%arg0: i32) -> (i32, i32) {
    %c0_i32 = arith.constant 0 : i32
    %c0_i32_0 = arith.constant 0 : i32
    %c0_i32_1 = arith.constant 0 : i32
    return %c0_i32, %c0_i32_0 : i32, i32
  }
  func.func @transform_5(%arg0: i32) -> (i32, i32) {
    %c0_i32 = arith.constant 0 : i32
    %c0_i32_0 = arith.constant 0 : i32
    %c0_i32_1 = arith.constant 0 : i32
    return %c0_i32, %c0_i32_0 : i32, i32
  }
  func.func @transform_6(%arg0: i32) -> (i32, i32) {
    %c0_i32 = arith.constant 0 : i32
    %c0_i32_0 = arith.constant 0 : i32
    %c0_i32_1 = arith.constant 0 : i32
    return %c0_i32, %c0_i32_0 : i32, i32
  }
  func.func @transform_7(%arg0: i32) -> (i32, i32) {
    %c0_i32 = arith.constant 0 : i32
    %c0_i32_0 = arith.constant 0 : i32
    %c0_i32_1 = arith.constant 0 : i32
    return %c0_i32, %c0_i32_0 : i32, i32
  }
  func.func @transform_8(%arg0: i32) -> (i32, i32) {
    %c0_i32 = arith.constant 0 : i32
    %c0_i32_0 = arith.constant 0 : i32
    %c0_i32_1 = arith.constant 0 : i32
    return %c0_i32, %c0_i32_0 : i32, i32
  }
  func.func @transform_9(%arg0: i32) -> (i32, i32) {
    %c0_i32 = arith.constant 0 : i32
    %c0_i32_0 = arith.constant 0 : i32
    %c0_i32_1 = arith.constant 0 : i32
    return %c0_i32, %c0_i32_0 : i32, i32
  }
  func.func @transform_10(%arg0: i32) -> (i32, i32, i32) {
    %c0_i32 = arith.constant 0 : i32
    %c0_i32_0 = arith.constant 0 : i32
    %c0_i32_1 = arith.constant 0 : i32
    return %arg0, %c0_i32, %c0_i32_0 : i32, i32, i32
  }
}

</mosaic_0001>

<bundles_post_ra>
// kernel: discriminator_forward.1
= control target key start
LH: loop header
LB: loop body
LE: loop exit
PB: predicated region body
PF: predicated region fallthrough
CT: control target
= control target key end

     0   :  { %s11987_s0 = inlined_call_operand.vmem [shape: f32[2,784], index: 0, kind: input, shape index: {}]   ;;  %s11988_s1 = inlined_call_operand.vmem [shape: bf16[2,128], index: 1, kind: input, shape index: {}]   ;;  %s11989_s2 = inlined_call_operand.hbm [shape: bf16[1024,1024], index: 2, kind: input, shape index: {}]   ;;  %s11990_s3 = inlined_call_operand.hbm [shape: f32[1,1024], index: 3, kind: input, shape index: {}]   ;;  %s11991_s4 = inlined_call_operand.hbm [shape: bf16[1024,512], index: 4, kind: input, shape index: {}]   ;;  %s11992_s5 = inlined_call_operand.hbm [shape: f32[1,512], index: 5, kind: input, shape index: {}]   ;;  %s11993_s6 = inlined_call_operand.hbm [shape: bf16[512,256], index: 6, kind: input, shape index: {}]   ;;  %s11994_s7 = inlined_call_operand.hbm [shape: f32[1,256], index: 7, kind: input, shape index: {}]   ;;  %s11995_s8 = inlined_call_operand.hbm [shape: bf16[8,256], index: 8, kind: input, shape index: {}]   ;;  %s11996_s9 = inlined_call_operand.<no memory space> [shape: f32[1,1], index: 9, kind: input, shape index: {}]   ;;  %s11997_s10 = inlined_call_operand.vmem [shape: f32[1,1,16], index: 10, kind: output, shape index: {}]  }
   0x1   :  { %v15_v0 = vstv %s11996_s9 }
   0x2   :  { %16 = vst [vmem:[#allocation3] sm:$0x1] %v15_v0 }
   0x3   :  { %17 = vsyncpa [#allocation5], 0 }
   0x4   :  { %18 = vsyncpa [#allocation7], 0 }
   0x5   :  { %19 = vsyncpa [#allocation10], 0  ;;  %s43_s17 = sshll.u32 %s11990_s3, 4  ;;  %s44_s17 = int_to_ptr.hbm [resolvable:$true] %s43_s17 }
   0x6   :  { %20 = vsyncpa [#allocation13], 0  ;;  %s11374_s18 = smov [#allocation6]   ;;  %s67_s22 = sshll.u32 %s11992_s5, 4  ;;  %s68_s22 = int_to_ptr.hbm [resolvable:$true] %s67_s22 }
   0x7   :  { %s45_s19 = sshll.u32 %s11374_s18, 4  ;;  %s11375_s9 = smov [#allocation9]   ;;  %s46_s19 = int_to_ptr.vmem [resolvable:$true] %s45_s19 }
   0x8   :  { %48 = dma.hbm_to_vmem [thread:$0]  %s44_s17, 128, %s46_s19, [#allocation7]  }
   0x9   :  { %s69_s23 = sshll.u32 %s11375_s9, 4  ;;  %s91_s26 = sshll.u32 %s11994_s7, 4  ;;  %s70_s23 = int_to_ptr.vmem [resolvable:$true] %s69_s23  ;;  %s92_s26 = int_to_ptr.hbm [resolvable:$true] %s91_s26 }
   0xa   :  { %72 = dma.hbm_to_vmem [thread:$0]  %s68_s22, 64, %s70_s23, [#allocation10]  }
   0xb   :  { %s29_s28 = sshll.u32 %s11989_s2, 4  ;;  %s11376_s29 = smov [#allocation12]   ;;  %s30_s28 = int_to_ptr.hbm [resolvable:$true] %s29_s28 }
   0xc   :  { %s93_s30 = sshll.u32 %s11376_s29, 4  ;;  %s11377_s5 = smov [#allocation4]   ;;  %s94_s30 = int_to_ptr.vmem [resolvable:$true] %s93_s30 }
   0xd   :  { %96 = dma.hbm_to_vmem [thread:$0]  %s92_s26, 32, %s94_s30, [#allocation13]  }
   0xe   :  { %s31_s11 = sshll.u32 %s11377_s5, 4  ;;  %s11378_s12 = smov 512   ;;  %s32_s11 = int_to_ptr.vmem [resolvable:$true] %s31_s11 }
   0xf   :  { %s11379_s13 = smov 32   ;;  %s53_s15 = sshll.u32 %s11991_s4, 4  ;;  %s54_s15 = int_to_ptr.hbm [resolvable:$true] %s53_s15 }
  0x10   :  { %37 = dma.hbm_to_vmem [thread:$0]  %s30_s28, 65536, %s32_s11, [#allocation5], %s11378_s12, %s11378_s12, %s11379_s13  }
  0x11   :  { %s11380_s16 = smov [#allocation8]   ;;  %s77_s19 = sshll.u32 %s11993_s6, 4  ;;  %s78_s19 = int_to_ptr.hbm [resolvable:$true] %s77_s19 }
  0x12   :  { %s55_s17 = sshll.u32 %s11380_s16, 4  ;;  %s11381_s20 = smov 256   ;;  %s56_s17 = int_to_ptr.vmem [resolvable:$true] %s55_s17 }
  0x13   :  { %s11382_s21 = smov 16   ;;  %s11383_s22 = smov [#allocation11]  }
  0x14   :  { %61 = dma.hbm_to_vmem [thread:$0]  %s54_s15, 32768, %s56_s17, [#allocation7], %s11381_s20, %s11381_s20, %s11382_s21  }
  0x15   :  { %s79_s9 = sshll.u32 %s11383_s22, 4  ;;  %s11384_s23 = smov 128   ;;  %s80_s9 = int_to_ptr.vmem [resolvable:$true] %s79_s9 }
  0x16   :  { %s11385_s24 = smov 8   ;;  %s102_s26 = sshll.u32 %s11995_s8, 4  ;;  %s103_s26 = int_to_ptr.hbm [resolvable:$true] %s102_s26 }
  0x17   :  { %85 = dma.hbm_to_vmem [thread:$0]  %s78_s19, 8192, %s80_s9, [#allocation10], %s11384_s23, %s11384_s23, %s11385_s24  }
  0x18   :  { %s11386_s3 = smov [#allocation14]  }
  0x19   :  { %s104_s27 = sshll.u32 %s11386_s3, 4  ;;  %s105_s27 = int_to_ptr.vmem [resolvable:$true] %s104_s27 }
  0x1a   :  { %107 = dma.hbm_to_vmem [thread:$0]  %s103_s26, 128, %s105_s27, [#allocation13]  }
  0x1b   :  { %11366 = dma.done.wait [#allocation5], 65536  }
  0x1c   :  { %11367 = vsyncadd [#allocation5], 4294901760 }
  0x1d   :  { %11368 = dma.done.wait [#allocation7], 32896  }
  0x1e   :  { %11369 = vsyncadd [#allocation7], 4294934400 }
  0x1f   :  { %11370 = dma.done.wait [#allocation10], 8256  }
  0x20   :  { %11371 = vsyncadd [#allocation10], 4294959040 }
  0x21   :  { %11372 = dma.done.wait [#allocation13], 160  }
  0x22   :  { %11373 = vsyncadd [#allocation13], 4294967136  ;;  %v7235_v1 = vld [vmem:[#allocation4 + $0x1c0] sm:$0xf]  ;;  %vm272_vm0 = vcmask 125952  }
  0x23   :  { %v10405_v2 = vld [vmem:[#allocation4 + $0x1dc] sm:$0xf0] }
  0x24   :  { %v7491_v3 = vld [vmem:[#allocation4 + $0x3c0] sm:$0xf]  ;;  %v7236_v4 = vor.u32 %v10405_v2, %v7235_v1 }
  0x25   :  { %v10469_v5 = vld [vmem:[#allocation4 + $0x3dc] sm:$0xf0] }
  0x26   :  { %v7747_v6 = vld [vmem:[#allocation4 + $0x5c0] sm:$0xf]  ;;  %v7492_v8 = vor.u32 %v10469_v5, %v7491_v3  ;;  %3416 = vmatpush.bf16.msra.mxu0 %v7236_v4 }
  0x27   :  { %v10533_v7 = vld [vmem:[#allocation4 + $0x5dc] sm:$0xf0] }
  0x28   :  { %v7748_v9 = vor.u32 %v10533_v7, %v7747_v6  ;;  %v8003_v10 = vld [vmem:[#allocation4 + $0x7c0] sm:$0xf]  ;;  %3430 = vmatpush.bf16.msra.mxu1 %v7492_v8 }
  0x29   :  { %v10597_v11 = vld [vmem:[#allocation4 + $0x7dc] sm:$0xf0] }
  0x2a   :  { %v7203_v12 = vld [vmem:[#allocation4 + $0x180] sm:$0xf]  ;;  %v8004_v13 = vor.u32 %v10597_v11, %v8003_v10  ;;  %3444 = vmatpush.bf16.msra.mxu2 %v7748_v9 }
  0x2b   :  { %v10397_v14 = vld [vmem:[#allocation4 + $0x19c] sm:$0xf0] }
  0x2c   :  { %v7459_v15 = vld [vmem:[#allocation4 + $0x380] sm:$0xf]  ;;  %v7204_v17 = vor.u32 %v10397_v14, %v7203_v12  ;;  %3458 = vmatpush.bf16.msra.mxu3 %v8004_v13 }
  0x2d   :  { %v10461_v16 = vld [vmem:[#allocation4 + $0x39c] sm:$0xf0] }
  0x2e   :  { %v7460_v18 = vor.u32 %v10461_v16, %v7459_v15  ;;  %v7715_v19 = vld [vmem:[#allocation4 + $0x580] sm:$0xf]  ;;  %3417 = vmatpush.bf16.msra.mxu0 %v7204_v17 }
  0x2f   :  { %v10525_v20 = vld [vmem:[#allocation4 + $0x59c] sm:$0xf0] }
  0x30   :  { %v7971_v21 = vld [vmem:[#allocation4 + $0x780] sm:$0xf]  ;;  %v7716_v22 = vor.u32 %v10525_v20, %v7715_v19  ;;  %3431 = vmatpush.bf16.msra.mxu1 %v7460_v18 }
  0x31   :  { %v10589_v23 = vld [vmem:[#allocation4 + $0x79c] sm:$0xf0] }
  0x32   :  { %v7171_v24 = vld [vmem:[#allocation4 + $0x140] sm:$0xf]  ;;  %v7972_v26 = vor.u32 %v10589_v23, %v7971_v21  ;;  %3445 = vmatpush.bf16.msra.mxu2 %v7716_v22 }
  0x33   :  { %v10389_v25 = vld [vmem:[#allocation4 + $0x15c] sm:$0xf0] }
  0x34   :  { %v7427_v27 = vld [vmem:[#allocation4 + $0x340] sm:$0xf]  ;;  %v7172_v30 = vor.u32 %v10389_v25, %v7171_v24  ;;  %3459 = vmatpush.bf16.msra.mxu3 %v7972_v26 }
  0x35   :  { %v10453_v28 = vld [vmem:[#allocation4 + $0x35c] sm:$0xf0] }
  0x36   :  { %v7683_v29 = vld [vmem:[#allocation4 + $0x540] sm:$0xf]  ;;  %v7428_v34 = vor.u32 %v10453_v28, %v7427_v27  ;;  %3418 = vmatpush.bf16.msra.mxu0 %v7172_v30 }
  0x37   :  { %v10517_v31 = vld [vmem:[#allocation4 + $0x55c] sm:$0xf0] }
  0x38   :  { %v7939_v32 = vld [vmem:[#allocation4 + $0x740] sm:$0xf]  ;;  %v7684_v35 = vor.u32 %v10517_v31, %v7683_v29  ;;  %3432 = vmatpush.bf16.msra.mxu1 %v7428_v34 }
  0x39   :  { %v10581_v33 = vld [vmem:[#allocation4 + $0x75c] sm:$0xf0] }
  0x3a   :  { %v7139_v36 = vld [vmem:[#allocation4 + $0x100] sm:$0xf]  ;;  %v7940_v39 = vor.u32 %v10581_v33, %v7939_v32  ;;  %3446 = vmatpush.bf16.msra.mxu2 %v7684_v35 }
  0x3b   :  { %v10381_v37 = vld [vmem:[#allocation4 + $0x11c] sm:$0xf0] }
  0x3c   :  { %v7395_v38 = vld [vmem:[#allocation4 + $0x300] sm:$0xf]  ;;  %v7140_v45 = vor.u32 %v10381_v37, %v7139_v36  ;;  %3460 = vmatpush.bf16.msra.mxu3 %v7940_v39 }
  0x3d   :  { %v10445_v40 = vld [vmem:[#allocation4 + $0x31c] sm:$0xf0] }
  0x3e   :  { %v7651_v41 = vld [vmem:[#allocation4 + $0x500] sm:$0xf]  ;;  %v7396_v46 = vor.u32 %v10445_v40, %v7395_v38  ;;  %3419 = vmatpush.bf16.msra.mxu0 %v7140_v45 }
  0x3f   :  { %v10509_v42 = vld [vmem:[#allocation4 + $0x51c] sm:$0xf0] }
  0x40   :  { %v7907_v43 = vld [vmem:[#allocation4 + $0x700] sm:$0xf]  ;;  %v7652_v47 = vor.u32 %v10509_v42, %v7651_v41  ;;  %3433 = vmatpush.bf16.msra.mxu1 %v7396_v46 }
  0x41   :  { %v10573_v44 = vld [vmem:[#allocation4 + $0x71c] sm:$0xf0] }
  0x42   :  { %v7107_v48 = vld [vmem:[#allocation4 + $0xc0] sm:$0xf]  ;;  %v7908_v51 = vor.u32 %v10573_v44, %v7907_v43  ;;  %3447 = vmatpush.bf16.msra.mxu2 %v7652_v47 }
  0x43   :  { %v10373_v49 = vld [vmem:[#allocation4 + $0xdc] sm:$0xf0] }
  0x44   :  { %v7363_v50 = vld [vmem:[#allocation4 + $0x2c0] sm:$0xf]  ;;  %v7108_v57 = vor.u32 %v10373_v49, %v7107_v48  ;;  %3461 = vmatpush.bf16.msra.mxu3 %v7908_v51 }
  0x45   :  { %v10437_v52 = vld [vmem:[#allocation4 + $0x2dc] sm:$0xf0] }
  0x46   :  { %v7619_v53 = vld [vmem:[#allocation4 + $0x4c0] sm:$0xf]  ;;  %v7364_v58 = vor.u32 %v10437_v52, %v7363_v50  ;;  %3420 = vmatpush.bf16.msra.mxu0 %v7108_v57 }
  0x47   :  { %v10501_v54 = vld [vmem:[#allocation4 + $0x4dc] sm:$0xf0] }
  0x48   :  { %v7875_v55 = vld [vmem:[#allocation4 + $0x6c0] sm:$0xf]  ;;  %v7620_v59 = vor.u32 %v10501_v54, %v7619_v53  ;;  %3434 = vmatpush.bf16.msra.mxu1 %v7364_v58 }
  0x49   :  { %v10565_v56 = vld [vmem:[#allocation4 + $0x6dc] sm:$0xf0] }
  0x4a   :  { %v7075_v60 = vld [vmem:[#allocation4 + $0x80] sm:$0xf]  ;;  %v7876_v63 = vor.u32 %v10565_v56, %v7875_v55  ;;  %3448 = vmatpush.bf16.msra.mxu2 %v7620_v59  ;;  %v139_v55 = vld [vmem:[%s11988_s1] sm:$0x1]  ;;  %v140_v56 = vld [vmem:[%s11988_s1 + $0x1] sm:$0x1] }
  0x4b   :  { %v10365_v61 = vld [vmem:[#allocation4 + $0x9c] sm:$0xf0]  ;;  %148 = vst [vmem:[#allocation1] ss:$4 sm:$0xff] %v139_v55 }
  0x4c   :  { %v7331_v62 = vld [vmem:[#allocation4 + $0x280] sm:$0xf]  ;;  %v7076_v5 = vor.u32 %v10365_v61, %v7075_v60  ;;  %3462 = vmatpush.bf16.msra.mxu3 %v7876_v63  ;;  %151 = vst [vmem:[#allocation1 + $0x1] ss:$4 sm:$0xff] %v140_v56 }
  0x4d   :  { %v10429_v0 = vld [vmem:[#allocation4 + $0x29c] sm:$0xf0] }
  0x4e   :  { %v7587_v1 = vld [vmem:[#allocation4 + $0x480] sm:$0xf]  ;;  %v7332_v6 = vor.u32 %v10429_v0, %v7331_v62  ;;  %3421 = vmatpush.bf16.msra.mxu0 %v7076_v5  ;;  %v141_v62 = vld [vmem:[%s11988_s1 + $0x2] sm:$0x1]  ;;  %v143_v5 = vld [vmem:[%s11988_s1 + $0x4] sm:$0x1] }
  0x4f   :  { %v10493_v2 = vld [vmem:[#allocation4 + $0x49c] sm:$0xf0]  ;;  %154 = vst [vmem:[#allocation1 + $0x2] ss:$4 sm:$0xff] %v141_v62  ;;  %v190_v62 = vld [vmem:[%s11987_s0 + $0x54] sm:$0xff] }
  0x50   :  { %v7843_v3 = vld [vmem:[#allocation4 + $0x680] sm:$0xf]  ;;  %v7588_v7 = vor.u32 %v10493_v2, %v7587_v1  ;;  %3435 = vmatpush.bf16.msra.mxu1 %v7332_v6  ;;  %v142_v2 = vld [vmem:[%s11988_s1 + $0x3] sm:$0x1]  ;;  %160 = vst [vmem:[#allocation1 + $0x20] ss:$4 sm:$0xff] %v143_v5 }
  0x51   :  { %v10557_v4 = vld [vmem:[#allocation4 + $0x69c] sm:$0xf0]  ;;  %157 = vst [vmem:[#allocation1 + $0x3] ss:$4 sm:$0xff] %v142_v2 }
  0x52   :  { %v7043_v8 = vld [vmem:[#allocation4 + $0x40] sm:$0xf]  ;;  %v7844_v11 = vor.u32 %v10557_v4, %v7843_v3  ;;  %3449 = vmatpush.bf16.msra.mxu2 %v7588_v7 }
  0x53   :  { %v10357_v9 = vld [vmem:[#allocation4 + $0x5c] sm:$0xf0] }
  0x54   :  { %v7299_v10 = vld [vmem:[#allocation4 + $0x240] sm:$0xf]  ;;  %v7044_v17 = vor.u32 %v10357_v9, %v7043_v8  ;;  %3463 = vmatpush.bf16.msra.mxu3 %v7844_v11  ;;  %v144_v8 = vld [vmem:[%s11988_s1 + $0x5] sm:$0x1]  ;;  %v145_v11 = vld [vmem:[%s11988_s1 + $0x6] sm:$0x1] }
  0x55   :  { %v10421_v12 = vld [vmem:[#allocation4 + $0x25c] sm:$0xf0]  ;;  %163 = vst [vmem:[#allocation1 + $0x21] ss:$4 sm:$0xff] %v144_v8 }
  0x56   :  { %v7555_v13 = vld [vmem:[#allocation4 + $0x440] sm:$0xf]  ;;  %v7300_v20 = vor.u32 %v10421_v12, %v7299_v10  ;;  %3422 = vmatpush.bf16.msra.mxu0 %v7044_v17  ;;  %166 = vst [vmem:[#allocation1 + $0x22] ss:$4 sm:$0xff] %v145_v11 }
  0x57   :  { %v10485_v14 = vld [vmem:[#allocation4 + $0x45c] sm:$0xf0] }
  0x58   :  { %v7811_v15 = vld [vmem:[#allocation4 + $0x640] sm:$0xf]  ;;  %v7556_v21 = vor.u32 %v10485_v14, %v7555_v13  ;;  %3436 = vmatpush.bf16.msra.mxu1 %v7300_v20 }
  0x59   :  { %v10549_v16 = vld [vmem:[#allocation4 + $0x65c] sm:$0xf0] }
  0x5a   :  { %v7011_v18 = vld [vmem:[#allocation4] sm:$0xf]  ;;  %v7812_v25 = vor.u32 %v10549_v16, %v7811_v15  ;;  %3450 = vmatpush.bf16.msra.mxu2 %v7556_v21  ;;  %v146_v15 = vld [vmem:[%s11988_s1 + $0x7] sm:$0x1] }
  0x5b   :  { %v10349_v19 = vld [vmem:[#allocation4 + $0x1c] sm:$0xf0]  ;;  %169 = vst [vmem:[#allocation1 + $0x23] ss:$4 sm:$0xff] %v146_v15 }
  0x5c   :  { %v7267_v22 = vld [vmem:[#allocation4 + $0x200] sm:$0xf]  ;;  %v7012_v32 = vor.u32 %v10349_v19, %v7011_v18  ;;  %3464 = vmatpush.bf16.msra.mxu3 %v7812_v25  ;;  %v178_v25 = vld [vmem:[%s11987_s0] sm:$0xff] }
  0x5d   :  { %v10413_v23 = vld [vmem:[#allocation4 + $0x21c] sm:$0xf0] }
  0x5e   :  { %v7523_v24 = vld [vmem:[#allocation4 + $0x400] sm:$0xf]  ;;  %v7268_v36 = vor.u32 %v10413_v23, %v7267_v22  ;;  %3423 = vmatpush.bf16.msra.mxu0 %v7012_v32 }
  0x5f   :  { %v10477_v26 = vld [vmem:[#allocation4 + $0x41c] sm:$0xf0] }
  0x60   :  { %v7779_v27 = vld [vmem:[#allocation4 + $0x600] sm:$0xf]  ;;  %v7524_v37 = vor.u32 %v10477_v26, %v7523_v24  ;;  %3437 = vmatpush.bf16.msra.mxu1 %v7268_v36  ;;  %v170_v26 = vld [vmem:[#allocation1] sm:$0xff] }
  0x61   :  { %v10541_v28 = vld [vmem:[#allocation4 + $0x61c] sm:$0xf0]  ;;  %174 = vst [vmem:[#allocation2] sm:$0xf] %v170_v26 }
  0x62   :  { %v8259_v29 = vld [vmem:[#allocation4 + $0x9c0] sm:$0xf]  ;;  %v7780_v40 = vor.u32 %v10541_v28, %v7779_v27  ;;  %3451 = vmatpush.bf16.msra.mxu2 %v7524_v37  ;;  %v180_v27 = vld [vmem:[%s11987_s0 + $0xe] sm:$0xff]  ;;  %v182_v28 = vld [vmem:[%s11987_s0 + $0x1c] sm:$0xff]  ;;  %210 = vst [vmem:[#allocation1] ss:$4 sm:$0xff] %v178_v25 }
  0x63   :  { %v10661_v30 = vld [vmem:[#allocation4 + $0x9dc] sm:$0xf0]  ;;  %212 = vst [vmem:[#allocation1 + $0x1] ss:$4 sm:$0xff] %v180_v27 }
  0x64   :  { %v8515_v31 = vld [vmem:[#allocation4 + $0xbc0] sm:$0xf]  ;;  %v8260_v41 = vor.u32 %v10661_v30, %v8259_v29  ;;  %3465 = vmatpush.bf16.msra.mxu3 %v7780_v40  ;;  %v171_v30 = vld [vmem:[#allocation1 + $0x20] sm:$0xff]  ;;  %214 = vst [vmem:[#allocation1 + $0x2] ss:$4 sm:$0xff] %v182_v28 }
  0x65   :  { %v10725_v33 = vld [vmem:[#allocation4 + $0xbdc] sm:$0xf0]  ;;  %175 = vst [vmem:[#allocation2 + $0x20] sm:$0xf] %v171_v30  ;;  %v10401_v28 = vld [vmem:[#allocation4 + $0x1c4] sm:$0xf] }
  0x66   :  { %v8771_v34 = vld [vmem:[#allocation4 + $0xdc0] sm:$0xf]  ;;  %v8516_v44 = vor.u32 %v10725_v33, %v8515_v31  ;;  %3472 = vmatpush.bf16.msrb.mxu0 %v8260_v41  ;;  %v7237_v30 = vld [vmem:[#allocation4 + $0x1e0] sm:$0xf0] }
  0x67   :  { %v10789_v35 = vld [vmem:[#allocation4 + $0xddc] sm:$0xf0] }
  0x68   :  { %v9027_v38 = vld [vmem:[#allocation4 + $0xfc0] sm:$0xf]  ;;  %v8772_v45 = vor.u32 %v10789_v35, %v8771_v34  ;;  %3486 = vmatpush.bf16.msrb.mxu1 %v8516_v44 }
  0x69   :  { %v10853_v39 = vld [vmem:[#allocation4 + $0xfdc] sm:$0xf0] }
  0x6a   :  { %v8227_v42 = vld [vmem:[#allocation4 + $0x980] sm:$0xf]  ;;  %v9028_v49 = vor.u32 %v10853_v39, %v9027_v38  ;;  %3500 = vmatpush.bf16.msrb.mxu2 %v8772_v45 }
  0x6b   :  { %v10653_v43 = vld [vmem:[#allocation4 + $0x99c] sm:$0xf0] }
  0x6c   :  { %v8483_v46 = vld [vmem:[#allocation4 + $0xb80] sm:$0xf]  ;;  %v8228_v57 = vor.u32 %v10653_v43, %v8227_v42  ;;  %3514 = vmatpush.bf16.msrb.mxu3 %v9028_v49 }
  0x6d   :  { %v10717_v47 = vld [vmem:[#allocation4 + $0xb9c] sm:$0xf0] }
  0x6e   :  { %v8739_v48 = vld [vmem:[#allocation4 + $0xd80] sm:$0xf]  ;;  %v8484_v63 = vor.u32 %v10717_v47, %v8483_v46  ;;  %3473 = vmatpush.bf16.msrb.mxu0 %v8228_v57 }
  0x6f   :  { %v10781_v50 = vld [vmem:[#allocation4 + $0xd9c] sm:$0xf0] }
  0x70   :  { %v8995_v51 = vld [vmem:[#allocation4 + $0xf80] sm:$0xf]  ;;  %v8740_v0 = vor.u32 %v10781_v50, %v8739_v48  ;;  %3487 = vmatpush.bf16.msrb.mxu1 %v8484_v63  ;;  %v186_v50 = vld [vmem:[%s11987_s0 + $0x38] sm:$0xff] }
  0x71   :  { %v10845_v52 = vld [vmem:[#allocation4 + $0xf9c] sm:$0xf0] }
  0x72   :  { %v8195_v53 = vld [vmem:[#allocation4 + $0x940] sm:$0xf]  ;;  %v8996_v3 = vor.u32 %v10845_v52, %v8995_v51  ;;  %3501 = vmatpush.bf16.msrb.mxu2 %v8740_v0 }
  0x73   :  { %v10645_v54 = vld [vmem:[#allocation4 + $0x95c] sm:$0xf0] }
  0x74   :  { %v8451_v58 = vld [vmem:[#allocation4 + $0xb40] sm:$0xf]  ;;  %v8196_v9 = vor.u32 %v10645_v54, %v8195_v53  ;;  %3515 = vmatpush.bf16.msrb.mxu3 %v8996_v3 }
  0x75   :  { %v10709_v59 = vld [vmem:[#allocation4 + $0xb5c] sm:$0xf0] }
  0x76   :  { %v8707_v60 = vld [vmem:[#allocation4 + $0xd40] sm:$0xf]  ;;  %v8452_v12 = vor.u32 %v10709_v59, %v8451_v58  ;;  %3474 = vmatpush.bf16.msrb.mxu0 %v8196_v9 }
  0x77   :  { %v10773_v61 = vld [vmem:[#allocation4 + $0xd5c] sm:$0xf0] }
  0x78   :  { %v8963_v1 = vld [vmem:[#allocation4 + $0xf40] sm:$0xf]  ;;  %v8708_v13 = vor.u32 %v10773_v61, %v8707_v60  ;;  %3488 = vmatpush.bf16.msrb.mxu1 %v8452_v12 }
  0x79   :  { %v10837_v4 = vld [vmem:[#allocation4 + $0xf5c] sm:$0xf0] }
  0x7a   :  { %v8163_v6 = vld [vmem:[#allocation4 + $0x900] sm:$0xf]  ;;  %v8964_v16 = vor.u32 %v10837_v4, %v8963_v1  ;;  %3502 = vmatpush.bf16.msrb.mxu2 %v8708_v13 }
  0x7b   :  { %v10637_v7 = vld [vmem:[#allocation4 + $0x91c] sm:$0xf0] }
  0x7c   :  { %v8419_v10 = vld [vmem:[#allocation4 + $0xb00] sm:$0xf]  ;;  %v8164_v21 = vor.u32 %v10637_v7, %v8163_v6  ;;  %3516 = vmatpush.bf16.msrb.mxu3 %v8964_v16 }
  0x7d   :  { %v10701_v14 = vld [vmem:[#allocation4 + $0xb1c] sm:$0xf0] }
  0x7e   :  { %v8675_v17 = vld [vmem:[#allocation4 + $0xd00] sm:$0xf]  ;;  %v8420_v22 = vor.u32 %v10701_v14, %v8419_v10  ;;  %3475 = vmatpush.bf16.msrb.mxu0 %v8164_v21 }
  0x7f   :  { %v10765_v18 = vld [vmem:[#allocation4 + $0xd1c] sm:$0xf0] }
  0x80   :  { %v8931_v19 = vld [vmem:[#allocation4 + $0xf00] sm:$0xf]  ;;  %v8676_v23 = vor.u32 %v10765_v18, %v8675_v17  ;;  %3489 = vmatpush.bf16.msrb.mxu1 %v8420_v22 }
  0x81   :  { %v10829_v20 = vld [vmem:[#allocation4 + $0xf1c] sm:$0xf0] }
  0x82   :  { %v8932_v24 = vor.u32 %v10829_v20, %v8931_v19  ;;  %3503 = vmatpush.bf16.msrb.mxu2 %v8676_v23  ;;  %v184_v29 = vld [vmem:[%s11987_s0 + $0x2a] sm:$0xff]  ;;  %v192_v3 = vld [vmem:[%s11987_s0 + $0x62] sm:$0xff] }
  0x83   :  { %v8131_v31 = vld [vmem:[#allocation4 + $0x8c0] sm:$0xf]  ;;  %216 = vst [vmem:[#allocation1 + $0x3] ss:$4 sm:$0xff] %v184_v29 }
  0x84   :  { %3517 = vmatpush.bf16.msrb.mxu3 %v8932_v24  ;;  %v10629_v32 = vld [vmem:[#allocation4 + $0x8dc] sm:$0xf0] }
  0x85   :  { %v8387_v33 = vld [vmem:[#allocation4 + $0xac0] sm:$0xf]  ;;  %v8132_v34 = vor.u32 %v10629_v32, %v8131_v31  ;;  %v181_v31 = vld [vmem:[%s11987_s0 + $0x16] sm:$0x3f]  ;;  %v11387_v32 = vmov 0  }
  0x86   :  { %v10693_v35 = vld [vmem:[#allocation4 + $0xadc] sm:$0xf0]  ;;  %11191 = vset.pattern.permute.xlu0 %v11387_v32  ;;  %220 = vst [vmem:[#allocation1 + $0x21] ss:$4 sm:$0xff] %v181_v31  ;;  %v10577_v31 = vld [vmem:[#allocation4 + $0x744] sm:$0xf] }
  0x87   :  { %v8643_v36 = vld [vmem:[#allocation4 + $0xcc0] sm:$0xf]  ;;  %v8388_v37 = vor.u32 %v10693_v35, %v8387_v33  ;;  %3476 = vmatpush.bf16.msrb.mxu0 %v8132_v34  ;;  %v7240_v33 = vor.u32 %v10401_v28, %v7237_v30  ;;  %176 = vst [vmem:[#allocation2 + $0x1c] sm:$0xf] %v11387_v32  ;;  %v7685_v28 = vld [vmem:[#allocation4 + $0x560] sm:$0xf0] }
  0x88   :  { %v10757_v38 = vld [vmem:[#allocation4 + $0xcdc] sm:$0xf0]  ;;  %177 = vst [vmem:[#allocation2 + $0x3c] sm:$0xf] %v11387_v32  ;;  %v7941_v32 = vld [vmem:[#allocation4 + $0x760] sm:$0xf0] }
  0x89   :  { %v8899_v39 = vld [vmem:[#allocation4 + $0xec0] sm:$0xf]  ;;  %v8644_v42 = vor.u32 %v10757_v38, %v8643_v36  ;;  %3490 = vmatpush.bf16.msrb.mxu1 %v8388_v37  ;;  %v185_v38 = vld [vmem:[%s11987_s0 + $0x32] sm:$0x3f] }
  0x8a   :  { %v10821_v40 = vld [vmem:[#allocation4 + $0xedc] sm:$0xf0]  ;;  %v225_v4 = vld.sshfl [vmem:[#allocation1] sm:$0xff pattern:$0x73625140] }
  0x8b   :  { %v6979_v41 = vld [vmem:[#allocation2] sm:$0xf]  ;;  %v8900_v43 = vor.u32 %v10821_v40, %v8899_v39  ;;  %3504 = vmatpush.bf16.msrb.mxu2 %v8644_v42  ;;  %v227_v7 = vld.sshfl [vmem:[#allocation1 + $0x10] sm:$0xff pattern:$0x73625140] }
  0x8c   :  { %v8099_v44 = vld [vmem:[#allocation4 + $0x880] sm:$0xf]  ;;  %v228_v8 = vld.sshfl [vmem:[#allocation1 + $0x18] sm:$0xff pattern:$0x73625140] }
  0x8d   :  { %v10621_v45 = vld [vmem:[#allocation4 + $0x89c] sm:$0xf0]  ;;  %3518 = vmatpush.bf16.msrb.mxu3 %v8900_v43  ;;  %v262_v12 = vpack.c.bf16 %v228_v8, %v227_v7  ;;  %224 = vst [vmem:[#allocation1 + $0x23] ss:$4 sm:$0xff] %v185_v38  ;;  %v10393_v42 = vld [vmem:[#allocation4 + $0x184] sm:$0xf] }
  0x8e   :  { %v8100_v46 = vor.u32 %v10621_v45, %v8099_v44  ;;  %v8355_v47 = vld [vmem:[#allocation4 + $0xa80] sm:$0xf]  ;;  %v7205_v43 = vld [vmem:[#allocation4 + $0x1a0] sm:$0xf0]  ;;  %v191_v7 = vld [vmem:[%s11987_s0 + $0x5c] sm:$0x3f] }
  0x8f   :  { %v10685_v48 = vld [vmem:[#allocation4 + $0xa9c] sm:$0xf0]  ;;  %270 = vst [vmem:[#allocation2 + $0xc] sm:$0xff] %v262_v12  ;;  %v10465_v44 = vld [vmem:[#allocation4 + $0x3c4] sm:$0xf] }
  0x90   :  { %v8611_v49 = vld [vmem:[#allocation4 + $0xc80] sm:$0xf]  ;;  %v8356_v51 = vor.u32 %v10685_v48, %v8355_v47  ;;  %3477 = vmatpush.bf16.msrb.mxu0 %v8100_v46  ;;  %v7493_v45 = vld [vmem:[#allocation4 + $0x3e0] sm:$0xf0]  ;;  %v7208_v46 = vor.u32 %v10393_v42, %v7205_v43  ;;  %v7944_v42 = vor.u32 %v10577_v31, %v7941_v32 }
  0x91   :  { %v10749_v52 = vld [vmem:[#allocation4 + $0xc9c] sm:$0xf0]  ;;  %v10529_v47 = vld [vmem:[#allocation4 + $0x5c4] sm:$0xf] }
  0x92   :  { %v8867_v53 = vld [vmem:[#allocation4 + $0xe80] sm:$0xf]  ;;  %v8612_v56 = vor.u32 %v10749_v52, %v8611_v49  ;;  %3491 = vmatpush.bf16.msrb.mxu1 %v8356_v51  ;;  %v7749_v48 = vld [vmem:[#allocation4 + $0x5e0] sm:$0xf0] }
  0x93   :  { %v10813_v54 = vld [vmem:[#allocation4 + $0xe9c] sm:$0xf0]  ;;  %v10593_v51 = vld [vmem:[#allocation4 + $0x7c4] sm:$0xf] }
  0x94   :  { %v188_v55 = vld [vmem:[%s11987_s0 + $0x46] sm:$0xff]  ;;  %v8868_v57 = vor.u32 %v10813_v54, %v8867_v53  ;;  %3505 = vmatpush.bf16.msrb.mxu2 %v8612_v56 }
  0x95   :  { %v8067_v58 = vld [vmem:[#allocation4 + $0x840] sm:$0xf]  ;;  %v8005_v52 = vld [vmem:[#allocation4 + $0x7e0] sm:$0xf0] }
  0x96   :  { %v10613_v59 = vld [vmem:[#allocation4 + $0x85c] sm:$0xf0]  ;;  %3519 = vmatpush.bf16.msrb.mxu3 %v8868_v57  ;;  %v10338_v53 = vld [vmem:[#allocation2 + $0xc] sm:$0xf]  ;;  %v6995_v54 = vld [vmem:[#allocation2 + $0x10] sm:$0xf]  ;;  %v8008_v12 = vor.u32 %v10593_v51, %v8005_v52 }
  0x97   :  { %v8323_v60 = vld [vmem:[#allocation4 + $0xa40] sm:$0xf]  ;;  %v8068_v63 = vor.u32 %v10613_v59, %v8067_v58  ;;  %v7173_v56 = vld [vmem:[#allocation4 + $0x160] sm:$0xf0]  ;;  %v187_v57 = vld [vmem:[%s11987_s0 + $0x40] sm:$0x3f] }
  0x98   :  { %v10341_v61 = vld [vmem:[#allocation2 + $0x1c] sm:$0xf0]  ;;  %v10457_v58 = vld [vmem:[#allocation4 + $0x384] sm:$0xf] }
  0x99   :  { %v10677_v0 = vld [vmem:[#allocation4 + $0xa5c] sm:$0xf0]  ;;  %v11512_v2 = vor.u32 %v10341_v61, %v6979_v41  ;;  %3478 = vmatpush.bf16.msrb.mxu0 %v8068_v63  ;;  %v7461_v59 = vld [vmem:[#allocation4 + $0x3a0] sm:$0xf0] }
  0x9a   :  { %v8579_v1 = vld [vmem:[#allocation4 + $0xc40] sm:$0xf]  ;;  %v8324_v6 = vor.u32 %v10677_v0, %v8323_v60  ;;  %v10521_v60 = vld [vmem:[#allocation4 + $0x584] sm:$0xf]  ;;  %v7496_v0 = vor.u32 %v10465_v44, %v7493_v45 }
  0x9b   :  { %v226_v5 = vld.sshfl [vmem:[#allocation1 + $0x8] sm:$0xff pattern:$0x73625140]  ;;  %3424 = vmatmul.bf16.vlgmr.msra.gmra.mxu0 %v11512_v2 }
  0x9c   :  { %232 = vst [vmem:[#allocation1] ss:$4 sm:$0xff] %v186_v50  ;;  %v261_v9 = vpack.c.bf16 %v226_v5, %v225_v4  ;;  %v10741_v10 = vld [vmem:[#allocation4 + $0xc5c] sm:$0xf0]  ;;  %3492 = vmatpush.bf16.msrb.mxu1 %v8324_v6  ;;  %v7717_v4 = vld [vmem:[#allocation4 + $0x5a0] sm:$0xf0] }
  0x9d   :  { %v8835_v11 = vld [vmem:[#allocation4 + $0xe40] sm:$0xf]  ;;  %233 = vst [vmem:[#allocation1 + $0x1] ss:$4 sm:$0xff] %v188_v55  ;;  %v8580_v13 = vor.u32 %v10741_v10, %v8579_v1  ;;  %v10385_v55 = vld [vmem:[#allocation4 + $0x144] sm:$0xf]  ;;  %v7752_v1 = vor.u32 %v10529_v47, %v7749_v48 }
  0x9e   :  { %v10805_v14 = vld [vmem:[#allocation4 + $0xe5c] sm:$0xf0]  ;;  %234 = vst [vmem:[#allocation1 + $0x2] ss:$4 sm:$0xff] %v190_v62  ;;  %v7176_v61 = vor.u32 %v10385_v55, %v7173_v56  ;;  %v10585_v10 = vld [vmem:[#allocation4 + $0x784] sm:$0xf] }
  0x9f   :  { %v8035_v15 = vld [vmem:[#allocation4 + $0x800] sm:$0xf]  ;;  %v8836_v16 = vor.u32 %v10805_v14, %v8835_v11  ;;  %235 = vst [vmem:[#allocation1 + $0x3] ss:$4 sm:$0xff] %v192_v3  ;;  %3506 = vmatpush.bf16.msrb.mxu2 %v8580_v13  ;;  %v189_v3 = vld [vmem:[%s11987_s0 + $0x4e] sm:$0x3f] }
  0xa0   :  { %v10605_v17 = vld [vmem:[#allocation4 + $0x81c] sm:$0xf0]  ;;  %269 = vst [vmem:[#allocation2 + $0x4] sm:$0xff] %v261_v9  ;;  %v7109_v38 = vld [vmem:[#allocation4 + $0xe0] sm:$0xf0] }
  0xa1   :  { %v8291_v18 = vld [vmem:[#allocation4 + $0xa00] sm:$0xf]  ;;  %v8036_v19 = vor.u32 %v10605_v17, %v8035_v15  ;;  %3520 = vmatpush.bf16.msrb.mxu3 %v8836_v16  ;;  %v7973_v15 = vld [vmem:[#allocation4 + $0x7a0] sm:$0xf0] }
  0xa2   :  { %v10669_v20 = vld [vmem:[#allocation4 + $0xa1c] sm:$0xf0]  ;;  %v7976_v30 = vor.u32 %v10585_v10, %v7973_v15  ;;  %v10569_v43 = vld [vmem:[#allocation4 + $0x704] sm:$0xf] }
  0xa3   :  { %v8547_v21 = vld [vmem:[#allocation4 + $0xc00] sm:$0xf]  ;;  %v8292_v23 = vor.u32 %v10669_v20, %v8291_v18  ;;  %3479 = vmatpush.bf16.msrb.mxu0 %v8036_v19  ;;  %v10449_v19 = vld [vmem:[#allocation4 + $0x344] sm:$0xf] }
  0xa4   :  { %v179_v22 = vld [vmem:[%s11987_s0 + $0x8] sm:$0x3f] }
  0xa5   :  { %v10733_v24 = vld [vmem:[#allocation4 + $0xc1c] sm:$0xf0]  ;;  %3493 = vmatpush.bf16.msrb.mxu1 %v8292_v23  ;;  %218 = vst [vmem:[#allocation1 + $0x20] ss:$4 sm:$0xff] %v179_v22  ;;  %v10377_v20 = vld [vmem:[#allocation4 + $0x104] sm:$0xf]  ;;  %v7464_v22 = vor.u32 %v10457_v58, %v7461_v59  ;;  %v7720_v23 = vor.u32 %v10521_v60, %v7717_v4 }
  0xa6   :  { %v8803_v25 = vld [vmem:[#allocation4 + $0xe00] sm:$0xf]  ;;  %v8548_v26 = vor.u32 %v10733_v24, %v8547_v21  ;;  %v240_v35 = vld.sshfl [vmem:[#allocation1] sm:$0xff pattern:$0x73625140] }
  0xa7   :  { %v10797_v27 = vld [vmem:[#allocation4 + $0xe1c] sm:$0xf0]  ;;  %3528 = vmatpush.bf16.msra.mxu0 %v7240_v33  ;;  %v242_v39 = vld.sshfl [vmem:[#allocation1 + $0x10] sm:$0xff pattern:$0x73625140] }
  0xa8   :  { %v8804_v29 = vor.u32 %v10797_v27, %v8803_v25  ;;  %3507 = vmatpush.bf16.msrb.mxu2 %v8548_v26  ;;  %v183_v34 = vld [vmem:[%s11987_s0 + $0x24] sm:$0x3f]  ;;  %v243_v40 = vld.sshfl [vmem:[#allocation1 + $0x18] sm:$0xff pattern:$0x73625140] }
  0xa9   :  { %v241_v36 = vld.sshfl [vmem:[#allocation1 + $0x8] sm:$0xff pattern:$0x73625140]  ;;  %222 = vst [vmem:[#allocation1 + $0x22] ss:$4 sm:$0xff] %v183_v34  ;;  %v266_v41 = vpack.c.bf16 %v243_v40, %v242_v39 }
  0xaa   :  { %3521 = vmatpush.bf16.msrb.mxu3 %v8804_v29  ;;  %v265_v37 = vpack.c.bf16 %v241_v36, %v240_v35  ;;  %v6987_v49 = vld [vmem:[#allocation2 + $0x8] sm:$0xf]  ;;  %v10337_v50 = vld [vmem:[#allocation2 + $0x4] sm:$0xf] }
  0xab   :  { %275 = vst [vmem:[#allocation2 + $0x2c] sm:$0xff] %v266_v41  ;;  %3529 = vmatpush.bf16.msra.mxu0 %v7208_v46  ;;  %v193_v14 = vld [vmem:[%s11987_s0 + $0x6a] sm:$0x3f] }
  0xac   :  { %274 = vst [vmem:[#allocation2 + $0x24] sm:$0xff] %v265_v37  ;;  %v7429_v24 = vld [vmem:[#allocation4 + $0x360] sm:$0xf0] }
  0xad   :  { %v7141_v25 = vld [vmem:[#allocation4 + $0x120] sm:$0xf0]  ;;  %v7432_v35 = vor.u32 %v10449_v19, %v7429_v24 }
  0xae   :  { %v10513_v27 = vld [vmem:[#allocation4 + $0x544] sm:$0xf]  ;;  %v7144_v29 = vor.u32 %v10377_v20, %v7141_v25 }
  0xaf   :  { %3530 = vmatpush.bf16.msra.mxu0 %v7176_v61  ;;  %v10441_v33 = vld [vmem:[#allocation4 + $0x304] sm:$0xf]  ;;  %v7688_v36 = vor.u32 %v10513_v27, %v7685_v28 }
  0xb0   :  { %v229_v8 = vld.sshfl [vmem:[#allocation1 + $0x20] sm:$0xff pattern:$0x73625140]  ;;  %v230_v9 = vld.sshfl [vmem:[#allocation1 + $0x28] sm:$0xff pattern:$0x73625140] }
  0xb1   :  { %v231_v18 = vld.sshfl [vmem:[#allocation1 + $0x30] sm:$0xff pattern:$0x73625140]  ;;  %v263_v21 = vpack.c.bf16 %v230_v9, %v229_v8 }
  0xb2   :  { %v6989_v11 = vld [vmem:[#allocation2 + $0x28] sm:$0xf0]  ;;  %v10343_v13 = vld [vmem:[#allocation2 + $0x2c] sm:$0xf0]  ;;  %236 = vst [vmem:[#allocation1 + $0x20] ss:$4 sm:$0xff] %v187_v57  ;;  %v264_v26 = vpack.c.bf16 %v231_v18, %v231_v18 }
  0xb3   :  { %v10342_v62 = vld [vmem:[#allocation2 + $0x24] sm:$0xf0]  ;;  %v6981_v63 = vld [vmem:[#allocation2 + $0x20] sm:$0xf0]  ;;  %v11548_v16 = vor.u32 %v10338_v53, %v6989_v11  ;;  %v11550_v17 = vor.u32 %v10343_v13, %v6995_v54  ;;  %237 = vst [vmem:[#allocation1 + $0x21] ss:$4 sm:$0xff] %v189_v3  ;;  %3531 = vmatpush.bf16.msra.mxu0 %v7144_v29 }
  0xb4   :  { %v11536_v5 = vor.u32 %v10342_v62, %v6987_v49  ;;  %v11538_v6 = vor.u32 %v10337_v50, %v6981_v63  ;;  %238 = vst [vmem:[#allocation1 + $0x22] ss:$4 sm:$0xff] %v191_v7  ;;  %v10369_v34 = vld [vmem:[#allocation4 + $0xc4] sm:$0xf] }
  0xb5   :  { %3466 = vmatmul.bf16.vlgmr.msra.gmra.mxu3 %v11548_v16  ;;  %3480 = vmatmul.bf16.vlgmr.msrb.gmra.mxu0 %v11550_v17  ;;  %239 = vst [vmem:[#allocation1 + $0x23] ss:$4 sm:$0xff] %v193_v14  ;;  %v7397_v37 = vld [vmem:[#allocation4 + $0x320] sm:$0xf0]  ;;  %v7112_v41 = vor.u32 %v10369_v34, %v7109_v38 }
  0xb6   :  { %3452 = vmatmul.bf16.vlgmr.msra.gmra.mxu2 %v11536_v5  ;;  %3438 = vmatmul.bf16.vlgmr.msra.gmra.mxu1 %v11538_v6  ;;  %271 = vst [vmem:[#allocation2 + $0x14] sm:$0xff] %v263_v21  ;;  %v10505_v39 = vld [vmem:[#allocation4 + $0x504] sm:$0xf]  ;;  %v7400_v47 = vor.u32 %v10441_v33, %v7397_v37 }
  0xb7   :  { %3542 = vmatpush.bf16.msra.mxu1 %v7496_v0  ;;  %3556 = vmatpush.bf16.msra.mxu2 %v7752_v1  ;;  %273 = vst.msk [vmem:[#allocation2 + $0x1c] sm:$0xf] %vm272_vm0, %v264_v26  ;;  %v7653_v40 = vld [vmem:[#allocation4 + $0x520] sm:$0xf0] }
  0xb8   :  { %3570 = vmatpush.bf16.msra.mxu3 %v8008_v12  ;;  %v7909_v44 = vld [vmem:[#allocation4 + $0x720] sm:$0xf0]  ;;  %3532 = vmatpush.bf16.msra.mxu0 %v7112_v41  ;;  %v7656_v48 = vor.u32 %v10505_v39, %v7653_v40 }
  0xb9   :  { %v10361_v45 = vld [vmem:[#allocation4 + $0x84] sm:$0xf]  ;;  %v7912_v58 = vor.u32 %v10569_v43, %v7909_v44 }
  0xba   :  { %v7077_v46 = vld [vmem:[#allocation4 + $0xa0] sm:$0xf0] }
  0xbb   :  { %3543 = vmatpush.bf16.msra.mxu1 %v7464_v22  ;;  %3557 = vmatpush.bf16.msra.mxu2 %v7720_v23  ;;  %v10433_v49 = vld [vmem:[#allocation4 + $0x2c4] sm:$0xf]  ;;  %v7080_v52 = vor.u32 %v10361_v45, %v7077_v46 }
  0xbc   :  { %3571 = vmatpush.bf16.msra.mxu3 %v7976_v30  ;;  %v7365_v50 = vld [vmem:[#allocation4 + $0x2e0] sm:$0xf0]  ;;  %v244_v56 = vld.sshfl [vmem:[#allocation1 + $0x20] sm:$0xff pattern:$0x73625140] }
  0xbd   :  { %v10497_v51 = vld [vmem:[#allocation4 + $0x4c4] sm:$0xf]  ;;  %3533 = vmatpush.bf16.msra.mxu0 %v7080_v52  ;;  %v7368_v0 = vor.u32 %v10433_v49, %v7365_v50  ;;  %v7003_v14 = vld [vmem:[#allocation2 + $0x18] sm:$0xf]  ;;  %v10339_v15 = vld [vmem:[#allocation2 + $0x14] sm:$0xf] }
  0xbe   :  { %v7621_v53 = vld [vmem:[#allocation4 + $0x4e0] sm:$0xf0]  ;;  %v10340_v27 = vld [vmem:[#allocation2 + $0x1c] sm:$0xf] }
  0xbf   :  { %3544 = vmatpush.bf16.msra.mxu1 %v7432_v35  ;;  %3558 = vmatpush.bf16.msra.mxu2 %v7688_v36  ;;  %v10561_v54 = vld [vmem:[#allocation4 + $0x6c4] sm:$0xf]  ;;  %v7624_v1 = vor.u32 %v10497_v51, %v7621_v53 }
  0xc0   :  { %v10353_v55 = vld [vmem:[#allocation4 + $0x44] sm:$0xf]  ;;  %3572 = vmatpush.bf16.msra.mxu3 %v7944_v42 }
  0xc1   :  { %v245_v57 = vld.sshfl [vmem:[#allocation1 + $0x28] sm:$0xff pattern:$0x73625140]  ;;  %v246_v63 = vld.sshfl [vmem:[#allocation1 + $0x30] sm:$0xff pattern:$0x73625140] }
  0xc2   :  { %v267_v59 = vpack.c.bf16 %v245_v57, %v244_v56  ;;  %v7877_v60 = vld [vmem:[#allocation4 + $0x6e0] sm:$0xf0]  ;;  %v268_v7 = vpack.c.bf16 %v246_v63, %v246_v63 }
  0xc3   :  { %v10425_v61 = vld [vmem:[#allocation4 + $0x284] sm:$0xf]  ;;  %3545 = vmatpush.bf16.msra.mxu1 %v7400_v47  ;;  %3559 = vmatpush.bf16.msra.mxu2 %v7656_v48  ;;  %v7880_v10 = vor.u32 %v10561_v54, %v7877_v60 }
  0xc4   :  { %v7045_v62 = vld [vmem:[#allocation4 + $0x60] sm:$0xf0]  ;;  %276 = vst [vmem:[#allocation2 + $0x34] sm:$0xff] %v267_v59  ;;  %3573 = vmatpush.bf16.msra.mxu3 %v7912_v58 }
  0xc5   :  { %v7333_v3 = vld [vmem:[#allocation4 + $0x2a0] sm:$0xf0]  ;;  %v7048_v4 = vor.u32 %v10353_v55, %v7045_v62  ;;  %277 = vst.msk [vmem:[#allocation2 + $0x3c] sm:$0xf] %vm272_vm0, %v268_v7 }
  0xc6   :  { %v10489_v8 = vld [vmem:[#allocation4 + $0x484] sm:$0xf]  ;;  %v7336_v18 = vor.u32 %v10425_v61, %v7333_v3 }
  0xc7   :  { %v7589_v9 = vld [vmem:[#allocation4 + $0x4a0] sm:$0xf0]  ;;  %3534 = vmatpush.bf16.msra.mxu0 %v7048_v4  ;;  %3546 = vmatpush.bf16.msra.mxu1 %v7368_v0 }
  0xc8   :  { %v10553_v11 = vld [vmem:[#allocation4 + $0x684] sm:$0xf]  ;;  %3560 = vmatpush.bf16.msra.mxu2 %v7624_v1  ;;  %v7592_v19 = vor.u32 %v10489_v8, %v7589_v9  ;;  %3574 = vmatpush.bf16.msra.mxu3 %v7880_v10 }
  0xc9   :  { %v7845_v12 = vld [vmem:[#allocation4 + $0x6a0] sm:$0xf0] }
  0xca   :  { %v10345_v13 = vld [vmem:[#allocation4 + $0x4] sm:$0xf]  ;;  %v7848_v28 = vor.u32 %v10553_v11, %v7845_v12 }
  0xcb   :  { %v10417_v20 = vld [vmem:[#allocation4 + $0x244] sm:$0xf]  ;;  %v10344_v37 = vld [vmem:[#allocation2 + $0x34] sm:$0xf0]  ;;  %v6997_v38 = vld [vmem:[#allocation2 + $0x30] sm:$0xf0]  ;;  %3547 = vmatpush.bf16.msra.mxu1 %v7336_v18 }
  0xcc   :  { %v7301_v21 = vld [vmem:[#allocation4 + $0x260] sm:$0xf0]  ;;  %3561 = vmatpush.bf16.msra.mxu2 %v7592_v19  ;;  %v11556_v42 = vor.u32 %v10344_v37, %v7003_v14  ;;  %v11558_v43 = vor.u32 %v10339_v15, %v6997_v38  ;;  %v7005_v47 = vld [vmem:[#allocation2 + $0x38] sm:$0xf0]  ;;  %3575 = vmatpush.bf16.msra.mxu3 %v7848_v28 }
  0xcd   :  { %v7013_v22 = vld [vmem:[#allocation4 + $0x20] sm:$0xf0]  ;;  %v7304_v39 = vor.u32 %v10417_v20, %v7301_v21  ;;  %v11563_v51 = vor.u32 %v10340_v27, %v7005_v47 }
  0xce   :  { %v10481_v23 = vld [vmem:[#allocation4 + $0x444] sm:$0xf]  ;;  %v7016_v26 = vor.u32 %v10345_v13, %v7013_v22  ;;  %3508 = vmatmul.bf16.vlgmr.msrb.gmra.mxu2 %v11556_v42  ;;  %3494 = vmatmul.bf16.vlgmr.msrb.gmra.mxu1 %v11558_v43 }
  0xcf   :  { %v7557_v24 = vld [vmem:[#allocation4 + $0x460] sm:$0xf0]  ;;  %12005 = vst [vmem:[#allocation19_spill] sm:$0xff] %v11563_v51  ;;  %3548 = vmatpush.bf16.msra.mxu1 %v7304_v39  ;;  %3522 = vmatmul.bf16.vlgmr.msrb.gmra.mxu3 %v11563_v51 }
  0xd0   :  { %v10545_v25 = vld [vmem:[#allocation4 + $0x644] sm:$0xf]  ;;  %3535 = vmatpush.bf16.msra.mxu0 %v7016_v26  ;;  %v7560_v40 = vor.u32 %v10481_v23, %v7557_v24 }
  0xd1   :  { %v7813_v29 = vld [vmem:[#allocation4 + $0x660] sm:$0xf0] }
  0xd2   :  { %v10657_v30 = vld [vmem:[#allocation4 + $0x9c4] sm:$0xf]  ;;  %v7816_v48 = vor.u32 %v10545_v25, %v7813_v29  ;;  %3562 = vmatpush.bf16.msra.mxu2 %v7560_v40 }
  0xd3   :  { %v8261_v31 = vld [vmem:[#allocation4 + $0x9e0] sm:$0xf0]  ;;  %3536 = vmatmul.bf16.vlgmr.msra.gmra.mxu0 %v11512_v2 }
  0xd4   :  { %v10409_v32 = vld [vmem:[#allocation4 + $0x204] sm:$0xf]  ;;  %v8264_v36 = vor.u32 %v10657_v30, %v8261_v31  ;;  %3576 = vmatpush.bf16.msra.mxu3 %v7816_v48 }
  0xd5   :  { %v7269_v33 = vld [vmem:[#allocation4 + $0x220] sm:$0xf0] }
  0xd6   :  { %v10473_v34 = vld [vmem:[#allocation4 + $0x404] sm:$0xf]  ;;  %3584 = vmatpush.bf16.msrb.mxu0 %v8264_v36  ;;  %v7272_v55 = vor.u32 %v10409_v32, %v7269_v33 }
  0xd7   :  { %v7525_v35 = vld [vmem:[#allocation4 + $0x420] sm:$0xf0] }
  0xd8   :  { %v10721_v41 = vld [vmem:[#allocation4 + $0xbc4] sm:$0xf]  ;;  %v7528_v56 = vor.u32 %v10473_v34, %v7525_v35  ;;  %3549 = vmatpush.bf16.msra.mxu1 %v7272_v55 }
  0xd9   :  { %v8517_v44 = vld [vmem:[#allocation4 + $0xbe0] sm:$0xf0] }
  0xda   :  { %v10785_v45 = vld [vmem:[#allocation4 + $0xdc4] sm:$0xf]  ;;  %v8520_v60 = vor.u32 %v10721_v41, %v8517_v44  ;;  %3563 = vmatpush.bf16.msra.mxu2 %v7528_v56 }
  0xdb   :  { %v10649_v46 = vld [vmem:[#allocation4 + $0x984] sm:$0xf] }
  0xdc   :  { %v8773_v49 = vld [vmem:[#allocation4 + $0xde0] sm:$0xf0]  ;;  %3598 = vmatpush.bf16.msrb.mxu1 %v8520_v60 }
  0xdd   :  { %v8229_v50 = vld [vmem:[#allocation4 + $0x9a0] sm:$0xf0]  ;;  %v8776_v61 = vor.u32 %v10785_v45, %v8773_v49 }
  0xde   :  { %v10537_v52 = vld [vmem:[#allocation4 + $0x604] sm:$0xf]  ;;  %v8232_v54 = vor.u32 %v10649_v46, %v8229_v50  ;;  %3564 = vmatmul.bf16.vlgmr.msra.gmra.mxu2 %v11536_v5  ;;  %3550 = vmatmul.bf16.vlgmr.msra.gmra.mxu1 %v11538_v6 }
  0xdf   :  { %v7781_v53 = vld [vmem:[#allocation4 + $0x620] sm:$0xf0]  ;;  %3612 = vmatpush.bf16.msrb.mxu2 %v8776_v61 }
  0xe0   :  { %v10849_v57 = vld [vmem:[#allocation4 + $0xfc4] sm:$0xf]  ;;  %3585 = vmatpush.bf16.msrb.mxu0 %v8232_v54  ;;  %v7784_v0 = vor.u32 %v10537_v52, %v7781_v53 }
  0xe1   :  { %v9029_v58 = vld [vmem:[#allocation4 + $0xfe0] sm:$0xf0] }
  0xe2   :  { %v10641_v59 = vld [vmem:[#allocation4 + $0x944] sm:$0xf]  ;;  %v9032_v8 = vor.u32 %v10849_v57, %v9029_v58  ;;  %3577 = vmatpush.bf16.msra.mxu3 %v7784_v0 }
  0xe3   :  { %v10713_v62 = vld [vmem:[#allocation4 + $0xb84] sm:$0xf] }
  0xe4   :  { %v8197_v63 = vld [vmem:[#allocation4 + $0x960] sm:$0xf0] }
  0xe5   :  { %v8485_v1 = vld [vmem:[#allocation4 + $0xba0] sm:$0xf0]  ;;  %v8200_v7 = vor.u32 %v10641_v59, %v8197_v63  ;;  %3578 = vmatmul.bf16.vlgmr.msra.gmra.mxu3 %v11548_v16 }
  0xe6   :  { %v10777_v3 = vld [vmem:[#allocation4 + $0xd84] sm:$0xf]  ;;  %v8488_v13 = vor.u32 %v10713_v62, %v8485_v1  ;;  %3626 = vmatpush.bf16.msrb.mxu3 %v9032_v8 }
  0xe7   :  { %v8741_v4 = vld [vmem:[#allocation4 + $0xda0] sm:$0xf0]  ;;  %3586 = vmatpush.bf16.msrb.mxu0 %v8200_v7 }
  0xe8   :  { %v10633_v9 = vld [vmem:[#allocation4 + $0x904] sm:$0xf]  ;;  %v8744_v14 = vor.u32 %v10777_v3, %v8741_v4  ;;  %3599 = vmatpush.bf16.msrb.mxu1 %v8488_v13  ;;  %v7243_v3 = vld [vmem:[#allocation4 + $0x1c8] sm:$0xf] }
  0xe9   :  { %v8165_v10 = vld [vmem:[#allocation4 + $0x920] sm:$0xf0]  ;;  %v10406_v4 = vld [vmem:[#allocation4 + $0x1e4] sm:$0xf0] }
  0xea   :  { %v10841_v11 = vld [vmem:[#allocation4 + $0xf84] sm:$0xf]  ;;  %v8168_v21 = vor.u32 %v10633_v9, %v8165_v10  ;;  %3613 = vmatpush.bf16.msrb.mxu2 %v8744_v14 }
  0xeb   :  { %v8997_v12 = vld [vmem:[#allocation4 + $0xfa0] sm:$0xf0] }
  0xec   :  { %v10705_v15 = vld [vmem:[#allocation4 + $0xb44] sm:$0xf]  ;;  %v9000_v22 = vor.u32 %v10841_v11, %v8997_v12  ;;  %3587 = vmatpush.bf16.msrb.mxu0 %v8168_v21  ;;  %v10398_v21 = vld [vmem:[#allocation4 + $0x1a4] sm:$0xf0] }
  0xed   :  { %v8453_v18 = vld [vmem:[#allocation4 + $0xb60] sm:$0xf0] }
  0xee   :  { %v10769_v19 = vld [vmem:[#allocation4 + $0xd44] sm:$0xf]  ;;  %v8456_v27 = vor.u32 %v10705_v15, %v8453_v18  ;;  %3627 = vmatpush.bf16.msrb.mxu3 %v9000_v22  ;;  %v7244_v18 = vor.u32 %v10406_v4, %v7243_v3  ;;  %v7115_v3 = vld [vmem:[#allocation4 + $0xc8] sm:$0xf] }
  0xef   :  { %v8709_v20 = vld [vmem:[#allocation4 + $0xd60] sm:$0xf0]  ;;  %v10374_v4 = vld [vmem:[#allocation4 + $0xe4] sm:$0xf0] }
  0xf0   :  { %v10625_v23 = vld [vmem:[#allocation4 + $0x8c4] sm:$0xf]  ;;  %v8712_v28 = vor.u32 %v10769_v19, %v8709_v20  ;;  %3600 = vmatpush.bf16.msrb.mxu1 %v8456_v27  ;;  %v7211_v20 = vld [vmem:[#allocation4 + $0x188] sm:$0xf] }
  0xf1   :  { %v8133_v24 = vld [vmem:[#allocation4 + $0x8e0] sm:$0xf0] }
  0xf2   :  { %v10833_v25 = vld [vmem:[#allocation4 + $0xf44] sm:$0xf]  ;;  %v8136_v33 = vor.u32 %v10625_v23, %v8133_v24  ;;  %3614 = vmatpush.bf16.msrb.mxu2 %v8712_v28 }
  0xf3   :  { %v8965_v26 = vld [vmem:[#allocation4 + $0xf60] sm:$0xf0] }
  0xf4   :  { %v10697_v29 = vld [vmem:[#allocation4 + $0xb04] sm:$0xf]  ;;  %v8968_v34 = vor.u32 %v10833_v25, %v8965_v26  ;;  %3588 = vmatpush.bf16.msrb.mxu0 %v8136_v33  ;;  %v10534_v33 = vld [vmem:[#allocation4 + $0x5e4] sm:$0xf0] }
  0xf5   :  { %v8421_v30 = vld [vmem:[#allocation4 + $0xb20] sm:$0xf0] }
  0xf6   :  { %v10761_v31 = vld [vmem:[#allocation4 + $0xd04] sm:$0xf]  ;;  %v8424_v39 = vor.u32 %v10697_v29, %v8421_v30  ;;  %3628 = vmatpush.bf16.msrb.mxu3 %v8968_v34  ;;  %v7499_v29 = vld [vmem:[#allocation4 + $0x3c8] sm:$0xf]  ;;  %v7212_v34 = vor.u32 %v10398_v21, %v7211_v20 }
  0xf7   :  { %v8677_v32 = vld [vmem:[#allocation4 + $0xd20] sm:$0xf0]  ;;  %v10366_v20 = vld [vmem:[#allocation4 + $0xa4] sm:$0xf0] }
  0xf8   :  { %v10617_v35 = vld [vmem:[#allocation4 + $0x884] sm:$0xf]  ;;  %v8680_v40 = vor.u32 %v10761_v31, %v8677_v32  ;;  %3601 = vmatpush.bf16.msrb.mxu1 %v8424_v39  ;;  %v10470_v31 = vld [vmem:[#allocation4 + $0x3e4] sm:$0xf0] }
  0xf9   :  { %v8101_v36 = vld [vmem:[#allocation4 + $0x8a0] sm:$0xf0]  ;;  %v7755_v32 = vld [vmem:[#allocation4 + $0x5c8] sm:$0xf] }
  0xfa   :  { %v10825_v37 = vld [vmem:[#allocation4 + $0xf04] sm:$0xf]  ;;  %v8104_v47 = vor.u32 %v10617_v35, %v8101_v36  ;;  %3615 = vmatpush.bf16.msrb.mxu2 %v8680_v40  ;;  %v7179_v36 = vld [vmem:[#allocation4 + $0x148] sm:$0xf] }
  0xfb   :  { %v8933_v38 = vld [vmem:[#allocation4 + $0xf20] sm:$0xf0]  ;;  %v8011_v40 = vld [vmem:[#allocation4 + $0x7c8] sm:$0xf] }
  0xfc   :  { %v10689_v41 = vld [vmem:[#allocation4 + $0xac4] sm:$0xf]  ;;  %v8936_v48 = vor.u32 %v10825_v37, %v8933_v38  ;;  %3589 = vmatpush.bf16.msrb.mxu0 %v8104_v47  ;;  %v10390_v37 = vld [vmem:[#allocation4 + $0x164] sm:$0xf0] }
  0xfd   :  { %v8389_v44 = vld [vmem:[#allocation4 + $0xae0] sm:$0xf0]  ;;  %v7467_v47 = vld [vmem:[#allocation4 + $0x388] sm:$0xf] }
  0xfe   :  { %v10753_v45 = vld [vmem:[#allocation4 + $0xcc4] sm:$0xf]  ;;  %v8392_v54 = vor.u32 %v10689_v41, %v8389_v44  ;;  %3629 = vmatpush.bf16.msrb.mxu3 %v8936_v48  ;;  %v10598_v41 = vld [vmem:[#allocation4 + $0x7e4] sm:$0xf0]  ;;  %v7500_v44 = vor.u32 %v10470_v31, %v7499_v29 }
  0xff   :  { %v8645_v46 = vld [vmem:[#allocation4 + $0xce0] sm:$0xf0]  ;;  %v10462_v48 = vld [vmem:[#allocation4 + $0x3a4] sm:$0xf0] }
 0x100   :  { %v10609_v49 = vld [vmem:[#allocation4 + $0x844] sm:$0xf]  ;;  %v8648_v55 = vor.u32 %v10753_v45, %v8645_v46  ;;  %3602 = vmatpush.bf16.msrb.mxu1 %v8392_v54  ;;  %v7756_v45 = vor.u32 %v10534_v33, %v7755_v32  ;;  %v7147_v54 = vld [vmem:[#allocation4 + $0x108] sm:$0xf] }
 0x101   :  { %v8069_v50 = vld [vmem:[#allocation4 + $0x860] sm:$0xf0]  ;;  %v7915_v21 = vld [vmem:[#allocation4 + $0x708] sm:$0xf] }
 0x102   :  { %v10817_v52 = vld [vmem:[#allocation4 + $0xec4] sm:$0xf]  ;;  %v8072_v60 = vor.u32 %v10609_v49, %v8069_v50  ;;  %3616 = vmatpush.bf16.msrb.mxu2 %v8648_v55  ;;  %v7723_v49 = vld [vmem:[#allocation4 + $0x588] sm:$0xf]  ;;  %v7180_v50 = vor.u32 %v10390_v37, %v7179_v36 }
 0x103   :  { %v8901_v53 = vld [vmem:[#allocation4 + $0xee0] sm:$0xf0]  ;;  %v10382_v55 = vld [vmem:[#allocation4 + $0x124] sm:$0xf0] }
 0x104   :  { %v10681_v56 = vld [vmem:[#allocation4 + $0xa84] sm:$0xf]  ;;  %v8904_v61 = vor.u32 %v10817_v52, %v8901_v53  ;;  %3590 = vmatpush.bf16.msrb.mxu0 %v8072_v60  ;;  %v8012_v52 = vor.u32 %v10598_v41, %v8011_v40  ;;  %v10526_v53 = vld [vmem:[#allocation4 + $0x5a4] sm:$0xf0] }
 0x105   :  { %v8357_v57 = vld [vmem:[#allocation4 + $0xaa0] sm:$0xf0]  ;;  %v7435_v60 = vld [vmem:[#allocation4 + $0x348] sm:$0xf] }
 0x106   :  { %v10745_v58 = vld [vmem:[#allocation4 + $0xc84] sm:$0xf]  ;;  %v8360_v7 = vor.u32 %v10681_v56, %v8357_v57  ;;  %3630 = vmatpush.bf16.msrb.mxu3 %v8904_v61  ;;  %v7979_v56 = vld [vmem:[#allocation4 + $0x788] sm:$0xf] }
 0x107   :  { %v8613_v59 = vld [vmem:[#allocation4 + $0xca0] sm:$0xf0]  ;;  %v10590_v57 = vld [vmem:[#allocation4 + $0x7a4] sm:$0xf0] }
 0x108   :  { %v10809_v62 = vld [vmem:[#allocation4 + $0xe84] sm:$0xf]  ;;  %v8616_v8 = vor.u32 %v10745_v58, %v8613_v59  ;;  %3603 = vmatpush.bf16.msrb.mxu1 %v8360_v7  ;;  %v7468_v58 = vor.u32 %v10462_v48, %v7467_v47  ;;  %v7724_v59 = vor.u32 %v10526_v53, %v7723_v49  ;;  %v10454_v61 = vld [vmem:[#allocation4 + $0x364] sm:$0xf0] }
 0x109   :  { %v10601_v63 = vld [vmem:[#allocation4 + $0x804] sm:$0xf]  ;;  %v7947_v7 = vld [vmem:[#allocation4 + $0x748] sm:$0xf] }
 0x10a   :  { %v8037_v0 = vld [vmem:[#allocation4 + $0x820] sm:$0xf0]  ;;  %3617 = vmatpush.bf16.msrb.mxu2 %v8616_v8  ;;  %v10582_v8 = vld [vmem:[#allocation4 + $0x764] sm:$0xf0] }
 0x10b   :  { %v8869_v1 = vld [vmem:[#allocation4 + $0xea0] sm:$0xf0]  ;;  %v8040_v13 = vor.u32 %v10601_v63, %v8037_v0  ;;  %v7148_v63 = vor.u32 %v10382_v55, %v7147_v54  ;;  %v7980_v0 = vor.u32 %v10590_v57, %v7979_v56  ;;  %v7051_v31 = vld [vmem:[#allocation4 + $0x48] sm:$0xf] }
 0x10c   :  { %v10673_v9 = vld [vmem:[#allocation4 + $0xa44] sm:$0xf]  ;;  %v8872_v14 = vor.u32 %v10809_v62, %v8869_v1  ;;  %v7691_v62 = vld [vmem:[#allocation4 + $0x548] sm:$0xf] }
 0x10d   :  { %v8325_v10 = vld [vmem:[#allocation4 + $0xa60] sm:$0xf0]  ;;  %3591 = vmatpush.bf16.msrb.mxu0 %v8040_v13  ;;  %v10518_v1 = vld [vmem:[#allocation4 + $0x564] sm:$0xf0] }
 0x10e   :  { %v10737_v11 = vld [vmem:[#allocation4 + $0xc44] sm:$0xf]  ;;  %v8328_v22 = vor.u32 %v10673_v9, %v8325_v10  ;;  %3631 = vmatpush.bf16.msrb.mxu3 %v8872_v14  ;;  %v7436_v9 = vor.u32 %v10454_v61, %v7435_v60  ;;  %v7692_v10 = vor.u32 %v10518_v1, %v7691_v62  ;;  %v7659_v13 = vld [vmem:[#allocation4 + $0x508] sm:$0xf]  ;;  %v7116_v14 = vor.u32 %v10374_v4, %v7115_v3 }
 0x10f   :  { %v8581_v12 = vld [vmem:[#allocation4 + $0xc60] sm:$0xf0]  ;;  %v10358_v32 = vld [vmem:[#allocation4 + $0x64] sm:$0xf0] }
 0x110   :  { %v10801_v15 = vld [vmem:[#allocation4 + $0xe44] sm:$0xf]  ;;  %v8584_v23 = vor.u32 %v10737_v11, %v8581_v12  ;;  %3604 = vmatpush.bf16.msrb.mxu1 %v8328_v22  ;;  %3592 = vmatmul.bf16.vlgmr.msrb.gmra.mxu0 %v11550_v17  ;;  %v7403_v11 = vld [vmem:[#allocation4 + $0x308] sm:$0xf]  ;;  %v7052_v41 = vor.u32 %v10358_v32, %v7051_v31 }
 0x111   :  { %v8837_v19 = vld [vmem:[#allocation4 + $0xe60] sm:$0xf0]  ;;  %3640 = vmatpush.bf16.msra.mxu0 %v7244_v18  ;;  %v10446_v12 = vld [vmem:[#allocation4 + $0x324] sm:$0xf0] }
 0x112   :  { %v10665_v24 = vld [vmem:[#allocation4 + $0xa04] sm:$0xf]  ;;  %v8840_v30 = vor.u32 %v10801_v15, %v8837_v19  ;;  %3618 = vmatpush.bf16.msrb.mxu2 %v8584_v23  ;;  %v7948_v15 = vor.u32 %v10582_v8, %v7947_v7  ;;  %v10510_v18 = vld [vmem:[#allocation4 + $0x524] sm:$0xf0]  ;;  %v7404_v23 = vor.u32 %v10446_v12, %v7403_v11 }
 0x113   :  { %v8293_v25 = vld [vmem:[#allocation4 + $0xa20] sm:$0xf0]  ;;  %v7083_v19 = vld [vmem:[#allocation4 + $0x88] sm:$0xf] }
 0x114   :  { %v10729_v26 = vld [vmem:[#allocation4 + $0xc04] sm:$0xf]  ;;  %v8296_v38 = vor.u32 %v10665_v24, %v8293_v25  ;;  %3632 = vmatpush.bf16.msrb.mxu3 %v8840_v30  ;;  %v10574_v22 = vld [vmem:[#allocation4 + $0x724] sm:$0xf0]  ;;  %v7660_v24 = vor.u32 %v10510_v18, %v7659_v13 }
 0x115   :  { %v8549_v27 = vld [vmem:[#allocation4 + $0xc20] sm:$0xf0]  ;;  %3641 = vmatpush.bf16.msra.mxu0 %v7212_v34  ;;  %v7371_v25 = vld [vmem:[#allocation4 + $0x2c8] sm:$0xf]  ;;  %v7916_v29 = vor.u32 %v10574_v22, %v7915_v21 }
 0x116   :  { %v10793_v28 = vld [vmem:[#allocation4 + $0xe04] sm:$0xf]  ;;  %v8552_v39 = vor.u32 %v10729_v26, %v8549_v27  ;;  %3605 = vmatpush.bf16.msrb.mxu1 %v8296_v38  ;;  %v10438_v26 = vld [vmem:[#allocation4 + $0x2e4] sm:$0xf0] }
 0x117   :  { %v8805_v35 = vld [vmem:[#allocation4 + $0xe20] sm:$0xf0]  ;;  %v7627_v27 = vld [vmem:[#allocation4 + $0x4c8] sm:$0xf] }
 0x118   :  { %v8808_v46 = vor.u32 %v10793_v28, %v8805_v35  ;;  %3619 = vmatpush.bf16.msrb.mxu2 %v8552_v39  ;;  %v7084_v28 = vor.u32 %v10366_v20, %v7083_v19  ;;  %v10502_v30 = vld [vmem:[#allocation4 + $0x4e4] sm:$0xf0]  ;;  %v7372_v35 = vor.u32 %v10438_v26, %v7371_v25 }
 0x119   :  { %3642 = vmatpush.bf16.msra.mxu0 %v7180_v50  ;;  %3606 = vmatmul.bf16.vlgmr.msrb.gmra.mxu1 %v11558_v43  ;;  %v7883_v33 = vld [vmem:[#allocation4 + $0x6c8] sm:$0xf]  ;;  %v7628_v37 = vor.u32 %v10502_v30, %v7627_v27 }
 0x11a   :  { %3654 = vmatpush.bf16.msra.mxu1 %v7500_v44  ;;  %3633 = vmatpush.bf16.msrb.mxu3 %v8808_v46  ;;  %v10566_v34 = vld [vmem:[#allocation4 + $0x6e4] sm:$0xf0] }
 0x11b   :  { %3620 = vmatmul.bf16.vlgmr.msrb.gmra.mxu2 %v11556_v42  ;;  %v7339_v36 = vld [vmem:[#allocation4 + $0x288] sm:$0xf]  ;;  %v7884_v44 = vor.u32 %v10566_v34, %v7883_v33 }
 0x11c   :  { %3668 = vmatpush.bf16.msra.mxu2 %v7756_v45  ;;  %v10430_v38 = vld [vmem:[#allocation4 + $0x2a4] sm:$0xf0] }
 0x11d   :  { %3634 = vmatmul.bf16.vlgmr.msrb.gmra.mxu3 %v11563_v51  ;;  %3643 = vmatpush.bf16.msra.mxu0 %v7148_v63  ;;  %v7595_v39 = vld [vmem:[#allocation4 + $0x488] sm:$0xf] }
 0x11e   :  { %3682 = vmatpush.bf16.msra.mxu3 %v8012_v52  ;;  %3655 = vmatpush.bf16.msra.mxu1 %v7468_v58  ;;  %v10494_v40 = vld [vmem:[#allocation4 + $0x4a4] sm:$0xf0]  ;;  %v7340_v52 = vor.u32 %v10430_v38, %v7339_v36 }
 0x11f   :  { %v7851_v45 = vld [vmem:[#allocation4 + $0x688] sm:$0xf]  ;;  %v7596_v53 = vor.u32 %v10494_v40, %v7595_v39 }
 0x120   :  { %3669 = vmatpush.bf16.msra.mxu2 %v7724_v59  ;;  %v7019_v46 = vld [vmem:[#allocation4 + $0x8] sm:$0xf] }
 0x121   :  { %3644 = vmatpush.bf16.msra.mxu0 %v7116_v14  ;;  %v10350_v47 = vld [vmem:[#allocation4 + $0x24] sm:$0xf0] }
 0x122   :  { %3683 = vmatpush.bf16.msra.mxu3 %v7980_v0  ;;  %3656 = vmatpush.bf16.msra.mxu1 %v7436_v9  ;;  %v10558_v48 = vld [vmem:[#allocation4 + $0x6a4] sm:$0xf0]  ;;  %v7020_v56 = vor.u32 %v10350_v47, %v7019_v46 }
 0x123   :  { %v8267_v49 = vld [vmem:[#allocation4 + $0x9c8] sm:$0xf]  ;;  %v7852_v57 = vor.u32 %v10558_v48, %v7851_v45 }
 0x124   :  { %3670 = vmatpush.bf16.msra.mxu2 %v7692_v10  ;;  %v10662_v50 = vld [vmem:[#allocation4 + $0x9e4] sm:$0xf0] }
 0x125   :  { %3645 = vmatpush.bf16.msra.mxu0 %v7084_v28  ;;  %v7307_v54 = vld [vmem:[#allocation4 + $0x248] sm:$0xf]  ;;  %v8268_v61 = vor.u32 %v10662_v50, %v8267_v49 }
 0x126   :  { %3684 = vmatpush.bf16.msra.mxu3 %v7948_v15  ;;  %3657 = vmatpush.bf16.msra.mxu1 %v7404_v23  ;;  %v10422_v55 = vld [vmem:[#allocation4 + $0x264] sm:$0xf0] }
 0x127   :  { %v7563_v58 = vld [vmem:[#allocation4 + $0x448] sm:$0xf]  ;;  %v7308_v1 = vor.u32 %v10422_v55, %v7307_v54 }
 0x128   :  { %3671 = vmatpush.bf16.msra.mxu2 %v7660_v24  ;;  %v10486_v59 = vld [vmem:[#allocation4 + $0x464] sm:$0xf0] }
 0x129   :  { %3646 = vmatpush.bf16.msra.mxu0 %v7052_v41  ;;  %v7819_v60 = vld [vmem:[#allocation4 + $0x648] sm:$0xf]  ;;  %v7564_v7 = vor.u32 %v10486_v59, %v7563_v58 }
 0x12a   :  { %3685 = vmatpush.bf16.msra.mxu3 %v7916_v29  ;;  %3658 = vmatpush.bf16.msra.mxu1 %v7372_v35  ;;  %v10550_v62 = vld [vmem:[#allocation4 + $0x664] sm:$0xf0] }
 0x12b   :  { %v8235_v63 = vld [vmem:[#allocation4 + $0x988] sm:$0xf]  ;;  %v7820_v11 = vor.u32 %v10550_v62, %v7819_v60 }
 0x12c   :  { %3672 = vmatpush.bf16.msra.mxu2 %v7628_v37  ;;  %v10654_v0 = vld [vmem:[#allocation4 + $0x9a4] sm:$0xf0] }
 0x12d   :  { %v7275_v3 = vld [vmem:[#allocation4 + $0x208] sm:$0xf]  ;;  %3647 = vmatpush.bf16.msra.mxu0 %v7020_v56  ;;  %v8236_v15 = vor.u32 %v10654_v0, %v8235_v63 }
 0x12e   :  { %3686 = vmatpush.bf16.msra.mxu3 %v7884_v44  ;;  %3659 = vmatpush.bf16.msra.mxu1 %v7340_v52  ;;  %v10414_v4 = vld [vmem:[#allocation4 + $0x224] sm:$0xf0] }
 0x12f   :  { %v7531_v8 = vld [vmem:[#allocation4 + $0x408] sm:$0xf]  ;;  %v7276_v21 = vor.u32 %v10414_v4, %v7275_v3 }
 0x130   :  { %3673 = vmatpush.bf16.msra.mxu2 %v7596_v53  ;;  %v10478_v9 = vld [vmem:[#allocation4 + $0x424] sm:$0xf0]  ;;  %3648 = vmatmul.bf16.vlgmr.msra.gmra.mxu0 %v11512_v2 }
 0x131   :  { %v7787_v10 = vld [vmem:[#allocation4 + $0x608] sm:$0xf]  ;;  %3696 = vmatpush.bf16.msrb.mxu0 %v8268_v61  ;;  %v7532_v25 = vor.u32 %v10478_v9, %v7531_v8 }
 0x132   :  { %3687 = vmatpush.bf16.msra.mxu3 %v7852_v57  ;;  %v10542_v12 = vld [vmem:[#allocation4 + $0x624] sm:$0xf0]  ;;  %3660 = vmatpush.bf16.msra.mxu1 %v7308_v1 }
 0x133   :  { %v8523_v13 = vld [vmem:[#allocation4 + $0xbc8] sm:$0xf]  ;;  %v7788_v27 = vor.u32 %v10542_v12, %v7787_v10 }
 0x134   :  { %v10726_v14 = vld [vmem:[#allocation4 + $0xbe4] sm:$0xf0]  ;;  %3674 = vmatpush.bf16.msra.mxu2 %v7564_v7 }
 0x135   :  { %v8779_v18 = vld [vmem:[#allocation4 + $0xdc8] sm:$0xf]  ;;  %v8524_v26 = vor.u32 %v10726_v14, %v8523_v13  ;;  %3697 = vmatpush.bf16.msrb.mxu0 %v8236_v15 }
 0x136   :  { %v10790_v19 = vld [vmem:[#allocation4 + $0xde4] sm:$0xf0]  ;;  %3688 = vmatpush.bf16.msra.mxu3 %v7820_v11  ;;  %3661 = vmatpush.bf16.msra.mxu1 %v7276_v21 }
 0x137   :  { %v9035_v20 = vld [vmem:[#allocation4 + $0xfc8] sm:$0xf]  ;;  %v8780_v28 = vor.u32 %v10790_v19, %v8779_v18 }
 0x138   :  { %v10854_v22 = vld [vmem:[#allocation4 + $0xfe4] sm:$0xf0]  ;;  %3675 = vmatpush.bf16.msra.mxu2 %v7532_v25 }
 0x139   :  { %v8203_v23 = vld [vmem:[#allocation4 + $0x948] sm:$0xf]  ;;  %v9036_v31 = vor.u32 %v10854_v22, %v9035_v20  ;;  %3662 = vmatmul.bf16.vlgmr.msra.gmra.mxu1 %v11538_v6 }
 0x13a   :  { %v10646_v24 = vld [vmem:[#allocation4 + $0x964] sm:$0xf0]  ;;  %3710 = vmatpush.bf16.msrb.mxu1 %v8524_v26  ;;  %3689 = vmatpush.bf16.msra.mxu3 %v7788_v27 }
 0x13b   :  { %v8491_v29 = vld [vmem:[#allocation4 + $0xb88] sm:$0xf]  ;;  %v8204_v35 = vor.u32 %v10646_v24, %v8203_v23  ;;  %3676 = vmatmul.bf16.vlgmr.msra.gmra.mxu2 %v11536_v5 }
 0x13c   :  { %v10718_v30 = vld [vmem:[#allocation4 + $0xba4] sm:$0xf0]  ;;  %3724 = vmatpush.bf16.msrb.mxu2 %v8780_v28 }
 0x13d   :  { %v8747_v32 = vld [vmem:[#allocation4 + $0xd88] sm:$0xf]  ;;  %v8492_v39 = vor.u32 %v10718_v30, %v8491_v29  ;;  %3698 = vmatpush.bf16.msrb.mxu0 %v8204_v35  ;;  %3690 = vmatmul.bf16.vlgmr.msra.gmra.mxu3 %v11548_v16 }
 0x13e   :  { %v10782_v33 = vld [vmem:[#allocation4 + $0xda4] sm:$0xf0]  ;;  %3738 = vmatpush.bf16.msrb.mxu3 %v9036_v31 }
 0x13f   :  { %v9003_v34 = vld [vmem:[#allocation4 + $0xf88] sm:$0xf]  ;;  %v8748_v40 = vor.u32 %v10782_v33, %v8747_v32  ;;  %3711 = vmatpush.bf16.msrb.mxu1 %v8492_v39  ;;  %v10402_v32 = vld [vmem:[#allocation4 + $0x1cc] sm:$0xf] }
 0x140   :  { %v10846_v36 = vld [vmem:[#allocation4 + $0xfa4] sm:$0xf0]  ;;  %v7245_v33 = vld [vmem:[#allocation4 + $0x1e8] sm:$0xf0] }
 0x141   :  { %v8171_v37 = vld [vmem:[#allocation4 + $0x908] sm:$0xf]  ;;  %v9004_v45 = vor.u32 %v10846_v36, %v9003_v34  ;;  %3725 = vmatpush.bf16.msrb.mxu2 %v8748_v40 }
 0x142   :  { %v10638_v38 = vld [vmem:[#allocation4 + $0x924] sm:$0xf0] }
 0x143   :  { %v8459_v41 = vld [vmem:[#allocation4 + $0xb48] sm:$0xf]  ;;  %v8172_v49 = vor.u32 %v10638_v38, %v8171_v37  ;;  %3739 = vmatpush.bf16.msrb.mxu3 %v9004_v45  ;;  %v7248_v45 = vor.u32 %v10402_v32, %v7245_v33  ;;  %v7693_v32 = vld [vmem:[#allocation4 + $0x568] sm:$0xf0] }
 0x144   :  { %v10710_v44 = vld [vmem:[#allocation4 + $0xb64] sm:$0xf0]  ;;  %v10578_v33 = vld [vmem:[#allocation4 + $0x74c] sm:$0xf] }
 0x145   :  { %v8715_v46 = vld [vmem:[#allocation4 + $0xd48] sm:$0xf]  ;;  %v8460_v54 = vor.u32 %v10710_v44, %v8459_v41  ;;  %3699 = vmatpush.bf16.msrb.mxu0 %v8172_v49  ;;  %v7213_v49 = vld [vmem:[#allocation4 + $0x1a8] sm:$0xf0] }
 0x146   :  { %v10774_v47 = vld [vmem:[#allocation4 + $0xd64] sm:$0xf0] }
 0x147   :  { %v8971_v48 = vld [vmem:[#allocation4 + $0xf48] sm:$0xf]  ;;  %v8716_v55 = vor.u32 %v10774_v47, %v8715_v46  ;;  %3712 = vmatpush.bf16.msrb.mxu1 %v8460_v54 }
 0x148   :  { %v10838_v50 = vld [vmem:[#allocation4 + $0xf64] sm:$0xf0] }
 0x149   :  { %v8139_v52 = vld [vmem:[#allocation4 + $0x8c8] sm:$0xf]  ;;  %v8972_v58 = vor.u32 %v10838_v50, %v8971_v48  ;;  %3726 = vmatpush.bf16.msrb.mxu2 %v8716_v55  ;;  %v10394_v48 = vld [vmem:[#allocation4 + $0x18c] sm:$0xf] }
 0x14a   :  { %v10630_v53 = vld [vmem:[#allocation4 + $0x8e4] sm:$0xf0] }
 0x14b   :  { %v8427_v56 = vld [vmem:[#allocation4 + $0xb08] sm:$0xf]  ;;  %v8140_v62 = vor.u32 %v10630_v53, %v8139_v52  ;;  %3740 = vmatpush.bf16.msrb.mxu3 %v8972_v58  ;;  %v7501_v58 = vld [vmem:[#allocation4 + $0x3e8] sm:$0xf0] }
 0x14c   :  { %v10702_v57 = vld [vmem:[#allocation4 + $0xb24] sm:$0xf0] }
 0x14d   :  { %v8683_v59 = vld [vmem:[#allocation4 + $0xd08] sm:$0xf]  ;;  %v8428_v3 = vor.u32 %v10702_v57, %v8427_v56  ;;  %3700 = vmatpush.bf16.msrb.mxu0 %v8140_v62  ;;  %v10466_v57 = vld [vmem:[#allocation4 + $0x3cc] sm:$0xf]  ;;  %v7216_v62 = vor.u32 %v10394_v48, %v7213_v49 }
 0x14e   :  { %v10766_v60 = vld [vmem:[#allocation4 + $0xd24] sm:$0xf0]  ;;  %v10570_v48 = vld [vmem:[#allocation4 + $0x70c] sm:$0xf] }
 0x14f   :  { %v8939_v61 = vld [vmem:[#allocation4 + $0xf08] sm:$0xf]  ;;  %v8684_v4 = vor.u32 %v10766_v60, %v8683_v59  ;;  %3713 = vmatpush.bf16.msrb.mxu1 %v8428_v3  ;;  %v10530_v60 = vld [vmem:[#allocation4 + $0x5cc] sm:$0xf] }
 0x150   :  { %v10830_v63 = vld [vmem:[#allocation4 + $0xf24] sm:$0xf0]  ;;  %v7917_v49 = vld [vmem:[#allocation4 + $0x728] sm:$0xf0] }
 0x151   :  { %v8107_v0 = vld [vmem:[#allocation4 + $0x888] sm:$0xf]  ;;  %v8940_v9 = vor.u32 %v10830_v63, %v8939_v61  ;;  %3727 = vmatpush.bf16.msrb.mxu2 %v8684_v4  ;;  %v7757_v61 = vld [vmem:[#allocation4 + $0x5e8] sm:$0xf0]  ;;  %v7504_v4 = vor.u32 %v10466_v57, %v7501_v58 }
 0x152   :  { %v10622_v1 = vld [vmem:[#allocation4 + $0x8a4] sm:$0xf0] }
 0x153   :  { %v8395_v7 = vld [vmem:[#allocation4 + $0xac8] sm:$0xf]  ;;  %v8108_v13 = vor.u32 %v10622_v1, %v8107_v0  ;;  %3741 = vmatpush.bf16.msrb.mxu3 %v8940_v9  ;;  %v10594_v0 = vld [vmem:[#allocation4 + $0x7cc] sm:$0xf] }
 0x154   :  { %v10694_v8 = vld [vmem:[#allocation4 + $0xae4] sm:$0xf0]  ;;  %v8013_v1 = vld [vmem:[#allocation4 + $0x7e8] sm:$0xf0] }
 0x155   :  { %v8651_v10 = vld [vmem:[#allocation4 + $0xcc8] sm:$0xf]  ;;  %v8396_v19 = vor.u32 %v10694_v8, %v8395_v7  ;;  %3701 = vmatpush.bf16.msrb.mxu0 %v8108_v13  ;;  %v10386_v7 = vld [vmem:[#allocation4 + $0x14c] sm:$0xf]  ;;  %v11578_v13 = vld [vmem:[#allocation6] sm:$0xff] }
 0x156   :  { %v10758_v11 = vld [vmem:[#allocation4 + $0xce4] sm:$0xf0]  ;;  %v7181_v8 = vld [vmem:[#allocation4 + $0x168] sm:$0xf0] }
 0x157   :  { %v8907_v12 = vld [vmem:[#allocation4 + $0xec8] sm:$0xf]  ;;  %v8652_v20 = vor.u32 %v10758_v11, %v8651_v10  ;;  %3714 = vmatpush.bf16.msrb.mxu1 %v8396_v19  ;;  %v7760_v10 = vor.u32 %v10530_v60, %v7757_v61  ;;  %v10458_v11 = vld [vmem:[#allocation4 + $0x38c] sm:$0xf]  ;;  %v7920_v61 = vor.u32 %v10570_v48, %v7917_v49 }
 0x158   :  { %v10822_v14 = vld [vmem:[#allocation4 + $0xee4] sm:$0xf0]  ;;  %v7725_v19 = vld [vmem:[#allocation4 + $0x5a8] sm:$0xf0] }
 0x159   :  { %v8075_v15 = vld [vmem:[#allocation4 + $0x848] sm:$0xf]  ;;  %v8908_v23 = vor.u32 %v10822_v14, %v8907_v12  ;;  %3728 = vmatpush.bf16.msrb.mxu2 %v8652_v20  ;;  %v7469_v12 = vld [vmem:[#allocation4 + $0x3a8] sm:$0xf0]  ;;  %v3425_v14 = vpop.f32.mrf.mxu0 }
 0x15a   :  { %v10614_v18 = vld [vmem:[#allocation4 + $0x864] sm:$0xf0]  ;;  %v10586_v20 = vld [vmem:[#allocation4 + $0x78c] sm:$0xf] }
 0x15b   :  { %v8363_v21 = vld [vmem:[#allocation4 + $0xa88] sm:$0xf]  ;;  %v8076_v27 = vor.u32 %v10614_v18, %v8075_v15  ;;  %3742 = vmatpush.bf16.msrb.mxu3 %v8908_v23  ;;  %v8016_v15 = vor.u32 %v10594_v0, %v8013_v1  ;;  %v10522_v18 = vld [vmem:[#allocation4 + $0x58c] sm:$0xf]  ;;  %v7472_v23 = vor.u32 %v10458_v11, %v7469_v12  ;;  %v3453_v12 = vpop.f32.mrf.mxu2 }
 0x15c   :  { %v10686_v22 = vld [vmem:[#allocation4 + $0xaa4] sm:$0xf0]  ;;  %v7373_v60 = vld [vmem:[#allocation4 + $0x2e8] sm:$0xf0] }
 0x15d   :  { %v8619_v24 = vld [vmem:[#allocation4 + $0xc88] sm:$0xf]  ;;  %v8364_v31 = vor.u32 %v10686_v22, %v8363_v21  ;;  %3702 = vmatpush.bf16.msrb.mxu0 %v8076_v27  ;;  %v7981_v21 = vld [vmem:[#allocation4 + $0x7a8] sm:$0xf0]  ;;  %v7184_v22 = vor.u32 %v10386_v7, %v7181_v8  ;;  %v7728_v27 = vor.u32 %v10522_v18, %v7725_v19 }
 0x15e   :  { %v10750_v25 = vld [vmem:[#allocation4 + $0xca4] sm:$0xf0]  ;;  %v10562_v0 = vld [vmem:[#allocation4 + $0x6cc] sm:$0xf] }
 0x15f   :  { %v8875_v26 = vld [vmem:[#allocation4 + $0xe88] sm:$0xf]  ;;  %v8620_v34 = vor.u32 %v10750_v25, %v8619_v24  ;;  %3715 = vmatpush.bf16.msrb.mxu1 %v8364_v31  ;;  %v10378_v24 = vld [vmem:[#allocation4 + $0x10c] sm:$0xf] }
 0x160   :  { %v10814_v28 = vld [vmem:[#allocation4 + $0xea4] sm:$0xf0]  ;;  %v7149_v25 = vld [vmem:[#allocation4 + $0x128] sm:$0xf0] }
 0x161   :  { %v8043_v29 = vld [vmem:[#allocation4 + $0x808] sm:$0xf]  ;;  %v8876_v37 = vor.u32 %v10814_v28, %v8875_v26  ;;  %3729 = vmatpush.bf16.msrb.mxu2 %v8620_v34  ;;  %v12000_v26 = vperm.slane %v11578_v13, 0  ;;  %v10450_v28 = vld [vmem:[#allocation4 + $0x34c] sm:$0xf] }
 0x162   :  { %v10606_v30 = vld [vmem:[#allocation4 + $0x824] sm:$0xf0]  ;;  %v10514_v31 = vld [vmem:[#allocation4 + $0x54c] sm:$0xf] }
 0x163   :  { %v8331_v35 = vld [vmem:[#allocation4 + $0xa48] sm:$0xf]  ;;  %v8044_v40 = vor.u32 %v10606_v30, %v8043_v29  ;;  %3743 = vmatpush.bf16.msrb.mxu3 %v8876_v37  ;;  %v7437_v29 = vld [vmem:[#allocation4 + $0x368] sm:$0xf0]  ;;  %v7984_v30 = vor.u32 %v10586_v20, %v7981_v21 }
 0x164   :  { %v10678_v36 = vld [vmem:[#allocation4 + $0xa64] sm:$0xf0]  ;;  %v7949_v34 = vld [vmem:[#allocation4 + $0x768] sm:$0xf0] }
 0x165   :  { %v8587_v38 = vld [vmem:[#allocation4 + $0xc48] sm:$0xf]  ;;  %v8332_v46 = vor.u32 %v10678_v36, %v8331_v35  ;;  %3703 = vmatpush.bf16.msrb.mxu0 %v8044_v40  ;;  %v7152_v35 = vor.u32 %v10378_v24, %v7149_v25  ;;  %v7440_v36 = vor.u32 %v10450_v28, %v7437_v29  ;;  %v10370_v37 = vld [vmem:[#allocation4 + $0xcc] sm:$0xf]  ;;  %v7696_v40 = vor.u32 %v10514_v31, %v7693_v32 }
 0x166   :  { %v10742_v39 = vld [vmem:[#allocation4 + $0xc64] sm:$0xf0]  ;;  %v7885_v1 = vld [vmem:[#allocation4 + $0x6e8] sm:$0xf0] }
 0x167   :  { %v8843_v41 = vld [vmem:[#allocation4 + $0xe48] sm:$0xf]  ;;  %v8588_v50 = vor.u32 %v10742_v39, %v8587_v38  ;;  %3716 = vmatpush.bf16.msrb.mxu1 %v8332_v46  ;;  %v7117_v38 = vld [vmem:[#allocation4 + $0xe8] sm:$0xf0]  ;;  %v3426_v39 = vadd.f32 %v3425_v14, %v12000_v26  ;;  %v7888_v14 = vor.u32 %v10562_v0, %v7885_v1 }
 0x168   :  { %v10806_v44 = vld [vmem:[#allocation4 + $0xe64] sm:$0xf0]  ;;  %3704 = vmatmul.bf16.vlgmr.msrb.gmra.mxu0 %v11550_v17  ;;  %v10506_v46 = vld [vmem:[#allocation4 + $0x50c] sm:$0xf] }
 0x169   :  { %v8299_v47 = vld [vmem:[#allocation4 + $0xa08] sm:$0xf]  ;;  %v8844_v55 = vor.u32 %v10806_v44, %v8843_v41  ;;  %3752 = vmatpush.bf16.msra.mxu0 %v7248_v45  ;;  %3730 = vmatpush.bf16.msrb.mxu2 %v8588_v50  ;;  %v10442_v41 = vld [vmem:[#allocation4 + $0x30c] sm:$0xf]  ;;  %v7952_v45 = vor.u32 %v10578_v33, %v7949_v34  ;;  %v7120_v50 = vor.u32 %v10370_v37, %v7117_v38 }
 0x16a   :  { %v10670_v52 = vld [vmem:[#allocation4 + $0xa24] sm:$0xf0]  ;;  %v7405_v44 = vld [vmem:[#allocation4 + $0x328] sm:$0xf0] }
 0x16b   :  { %v8555_v53 = vld [vmem:[#allocation4 + $0xc08] sm:$0xf]  ;;  %v8300_v63 = vor.u32 %v10670_v52, %v8299_v47  ;;  %3744 = vmatpush.bf16.msrb.mxu3 %v8844_v55  ;;  %v7661_v47 = vld [vmem:[#allocation4 + $0x528] sm:$0xf0]  ;;  %v3439_v52 = vpop.f32.mrf.mxu1 }
 0x16c   :  { %v10734_v54 = vld [vmem:[#allocation4 + $0xc24] sm:$0xf0]  ;;  %v10362_v55 = vld [vmem:[#allocation4 + $0x8c] sm:$0xf]  ;;  %v3440_v57 = vadd.f32 %v3439_v52, %v3426_v39  ;;  %v7664_v58 = vor.u32 %v10506_v46, %v7661_v47 }
 0x16d   :  { %v8811_v56 = vld [vmem:[#allocation4 + $0xe08] sm:$0xf]  ;;  %v8556_v3 = vor.u32 %v10734_v54, %v8555_v53  ;;  %3753 = vmatpush.bf16.msra.mxu0 %v7216_v62  ;;  %3717 = vmatpush.bf16.msrb.mxu1 %v8300_v63  ;;  %v11586_v53 = vpop.f32.mrf.mxu0  ;;  %v7408_v54 = vor.u32 %v10442_v41, %v7405_v44  ;;  %v10498_v62 = vld [vmem:[#allocation4 + $0x4cc] sm:$0xf] }
 0x16e   :  { %v10798_v59 = vld [vmem:[#allocation4 + $0xe24] sm:$0xf0]  ;;  %v7629_v63 = vld [vmem:[#allocation4 + $0x4e8] sm:$0xf0]  ;;  %v3454_v19 = vadd.f32 %v3453_v12, %v3440_v57 }
 0x16f   :  { %v8812_v9 = vor.u32 %v10798_v59, %v8811_v56  ;;  %3731 = vmatpush.bf16.msrb.mxu2 %v8556_v3  ;;  %v7085_v56 = vld [vmem:[#allocation4 + $0xa8] sm:$0xf0] }
 0x170   :  { %3718 = vmatmul.bf16.vlgmr.msrb.gmra.mxu1 %v11558_v43  ;;  %v10434_v59 = vld [vmem:[#allocation4 + $0x2cc] sm:$0xf]  ;;  %v7088_v3 = vor.u32 %v10362_v55, %v7085_v56 }
 0x171   :  { %3766 = vmatpush.bf16.msra.mxu1 %v7504_v4  ;;  %3745 = vmatpush.bf16.msrb.mxu3 %v8812_v9  ;;  %v7376_v4 = vor.u32 %v10434_v59, %v7373_v60  ;;  %v10354_v7 = vld [vmem:[#allocation4 + $0x4c] sm:$0xf]  ;;  %v7632_v9 = vor.u32 %v10498_v62, %v7629_v63 }
 0x172   :  { %3732 = vmatmul.bf16.vlgmr.msrb.gmra.mxu2 %v11556_v42  ;;  %3754 = vmatpush.bf16.msra.mxu0 %v7184_v22  ;;  %v7053_v8 = vld [vmem:[#allocation4 + $0x68] sm:$0xf0] }
 0x173   :  { %3780 = vmatpush.bf16.msra.mxu2 %v7760_v10  ;;  %v10426_v10 = vld [vmem:[#allocation4 + $0x28c] sm:$0xf]  ;;  %v7056_v22 = vor.u32 %v10354_v7, %v7053_v8  ;;  %v11590_v55 = vpop.f32.mrf.mxu1 }
 0x174   :  { %3746 = vmatmul.bf16.vlgmr.msrb.gmra.mxu3 %v11563_v51  ;;  %v7341_v11 = vld [vmem:[#allocation4 + $0x2a8] sm:$0xf0] }
 0x175   :  { %3794 = vmatpush.bf16.msra.mxu3 %v8016_v15  ;;  %3767 = vmatpush.bf16.msra.mxu1 %v7472_v23  ;;  %v10490_v15 = vld [vmem:[#allocation4 + $0x48c] sm:$0xf]  ;;  %v3467_v23 = vpop.f32.mrf.mxu3  ;;  %v7344_v24 = vor.u32 %v10426_v10, %v7341_v11  ;;  %v3481_v34 = vpop.f32.mrf.mxu0 }
 0x176   :  { %3755 = vmatpush.bf16.msra.mxu0 %v7152_v35  ;;  %v7597_v18 = vld [vmem:[#allocation4 + $0x4a8] sm:$0xf0]  ;;  %v3468_v29 = vadd.f32 %v3467_v23, %v3454_v19 }
 0x177   :  { %3781 = vmatpush.bf16.msra.mxu2 %v7728_v27  ;;  %v10554_v20 = vld [vmem:[#allocation4 + $0x68c] sm:$0xf] }
 0x178   :  { %v7853_v21 = vld [vmem:[#allocation4 + $0x6a8] sm:$0xf0]  ;;  %v11588_v38 = vadd.f32 %v3481_v34, %v3468_v29 }
 0x179   :  { %3795 = vmatpush.bf16.msra.mxu3 %v7984_v30  ;;  %3768 = vmatpush.bf16.msra.mxu1 %v7440_v36  ;;  %v10418_v25 = vld [vmem:[#allocation4 + $0x24c] sm:$0xf]  ;;  %v7600_v30 = vor.u32 %v10490_v15, %v7597_v18  ;;  %v7856_v35 = vor.u32 %v10554_v20, %v7853_v21  ;;  %v11593_v20 = vpop.f32.mrf.mxu2 }
 0x17a   :  { %3756 = vmatpush.bf16.msra.mxu0 %v7120_v50  ;;  %v10346_v27 = vld [vmem:[#allocation4 + $0xc] sm:$0xf] }
 0x17b   :  { %3782 = vmatpush.bf16.msra.mxu2 %v7696_v40  ;;  %v7021_v28 = vld [vmem:[#allocation4 + $0x28] sm:$0xf0] }
 0x17c   :  { %v7309_v31 = vld [vmem:[#allocation4 + $0x268] sm:$0xf0]  ;;  %v7024_v41 = vor.u32 %v10346_v27, %v7021_v28 }
 0x17d   :  { %3796 = vmatpush.bf16.msra.mxu3 %v7952_v45  ;;  %3769 = vmatpush.bf16.msra.mxu1 %v7408_v54  ;;  %v10658_v32 = vld [vmem:[#allocation4 + $0x9cc] sm:$0xf]  ;;  %v7312_v44 = vor.u32 %v10418_v25, %v7309_v31  ;;  %v11595_v28 = vpop.f32.mrf.mxu3 }
 0x17e   :  { %3757 = vmatpush.bf16.msra.mxu0 %v7088_v3  ;;  %v8269_v33 = vld [vmem:[#allocation4 + $0x9e8] sm:$0xf0] }
 0x17f   :  { %3783 = vmatpush.bf16.msra.mxu2 %v7664_v58  ;;  %v10482_v36 = vld [vmem:[#allocation4 + $0x44c] sm:$0xf]  ;;  %v8272_v48 = vor.u32 %v10658_v32, %v8269_v33 }
 0x180   :  { %v7565_v37 = vld [vmem:[#allocation4 + $0x468] sm:$0xf0] }
 0x181   :  { %3797 = vmatpush.bf16.msra.mxu3 %v7920_v61  ;;  %3770 = vmatpush.bf16.msra.mxu1 %v7376_v4  ;;  %v10546_v39 = vld [vmem:[#allocation4 + $0x64c] sm:$0xf]  ;;  %v7568_v49 = vor.u32 %v10482_v36, %v7565_v37 }
 0x182   :  { %3758 = vmatpush.bf16.msra.mxu0 %v7056_v22  ;;  %v7821_v40 = vld [vmem:[#allocation4 + $0x668] sm:$0xf0] }
 0x183   :  { %3784 = vmatpush.bf16.msra.mxu2 %v7632_v9  ;;  %v10410_v45 = vld [vmem:[#allocation4 + $0x20c] sm:$0xf]  ;;  %v7824_v56 = vor.u32 %v10546_v39, %v7821_v40 }
 0x184   :  { %v7277_v46 = vld [vmem:[#allocation4 + $0x228] sm:$0xf0] }
 0x185   :  { %3798 = vmatpush.bf16.msra.mxu3 %v7888_v14  ;;  %3771 = vmatpush.bf16.msra.mxu1 %v7344_v24  ;;  %v10474_v47 = vld [vmem:[#allocation4 + $0x40c] sm:$0xf]  ;;  %v7280_v63 = vor.u32 %v10410_v45, %v7277_v46 }
 0x186   :  { %v7533_v50 = vld [vmem:[#allocation4 + $0x428] sm:$0xf0]  ;;  %3759 = vmatpush.bf16.msra.mxu0 %v7024_v41 }
 0x187   :  { %3785 = vmatpush.bf16.msra.mxu2 %v7600_v30  ;;  %v10650_v52 = vld [vmem:[#allocation4 + $0x98c] sm:$0xf]  ;;  %v7536_v4 = vor.u32 %v10474_v47, %v7533_v50 }
 0x188   :  { %v8237_v54 = vld [vmem:[#allocation4 + $0x9a8] sm:$0xf0] }
 0x189   :  { %3799 = vmatpush.bf16.msra.mxu3 %v7856_v35  ;;  %v10538_v57 = vld [vmem:[#allocation4 + $0x60c] sm:$0xf]  ;;  %3772 = vmatpush.bf16.msra.mxu1 %v7312_v44  ;;  %v8240_v3 = vor.u32 %v10650_v52, %v8237_v54  ;;  %v3495_v35 = vpop.f32.mrf.mxu1 }
 0x18a   :  { %v10722_v58 = vld [vmem:[#allocation4 + $0xbcc] sm:$0xf]  ;;  %3808 = vmatpush.bf16.msrb.mxu0 %v8272_v48  ;;  %v3496_v40 = vadd.f32 %v3495_v35, %v11588_v38 }
 0x18b   :  { %v8525_v59 = vld [vmem:[#allocation4 + $0xbe8] sm:$0xf0]  ;;  %3786 = vmatpush.bf16.msra.mxu2 %v7568_v49  ;;  %3760 = vmatmul.bf16.vlgmr.msra.gmra.mxu0 %v11512_v2  ;;  %v11601_v49 = vpop.f32.mrf.mxu0 }
 0x18c   :  { %v7789_v60 = vld [vmem:[#allocation4 + $0x628] sm:$0xf0]  ;;  %v8528_v7 = vor.u32 %v10722_v58, %v8525_v59 }
 0x18d   :  { %v10786_v61 = vld [vmem:[#allocation4 + $0xdcc] sm:$0xf]  ;;  %3800 = vmatpush.bf16.msra.mxu3 %v7824_v56  ;;  %v7792_v10 = vor.u32 %v10538_v57, %v7789_v60  ;;  %3773 = vmatpush.bf16.msra.mxu1 %v7280_v63 }
 0x18e   :  { %v8781_v62 = vld [vmem:[#allocation4 + $0xde8] sm:$0xf0]  ;;  %3809 = vmatpush.bf16.msrb.mxu0 %v8240_v3 }
 0x18f   :  { %v10850_v0 = vld [vmem:[#allocation4 + $0xfcc] sm:$0xf]  ;;  %v8784_v11 = vor.u32 %v10786_v61, %v8781_v62  ;;  %3787 = vmatpush.bf16.msra.mxu2 %v7536_v4  ;;  %v3509_v61 = vpop.f32.mrf.mxu2 }
 0x190   :  { %v9037_v1 = vld [vmem:[#allocation4 + $0xfe8] sm:$0xf0]  ;;  %3774 = vmatmul.bf16.vlgmr.msra.gmra.mxu1 %v11538_v6 }
 0x191   :  { %v10642_v8 = vld [vmem:[#allocation4 + $0x94c] sm:$0xf]  ;;  %v9040_v15 = vor.u32 %v10850_v0, %v9037_v1  ;;  %3822 = vmatpush.bf16.msrb.mxu1 %v8528_v7  ;;  %3801 = vmatpush.bf16.msra.mxu3 %v7792_v10  ;;  %v3510_v1 = vadd.f32 %v3509_v61, %v3496_v40 }
 0x192   :  { %v8205_v9 = vld [vmem:[#allocation4 + $0x968] sm:$0xf0]  ;;  %3788 = vmatmul.bf16.vlgmr.msra.gmra.mxu2 %v11536_v5 }
 0x193   :  { %v10714_v12 = vld [vmem:[#allocation4 + $0xb8c] sm:$0xf]  ;;  %v8208_v23 = vor.u32 %v10642_v8, %v8205_v9  ;;  %3836 = vmatpush.bf16.msrb.mxu2 %v8784_v11  ;;  %v3523_v8 = vpop.f32.mrf.mxu3 }
 0x194   :  { %v8493_v14 = vld [vmem:[#allocation4 + $0xba8] sm:$0xf0]  ;;  %3802 = vmatmul.bf16.vlgmr.msra.gmra.mxu3 %v11548_v16 }
 0x195   :  { %v10778_v18 = vld [vmem:[#allocation4 + $0xd8c] sm:$0xf]  ;;  %v8496_v24 = vor.u32 %v10714_v12, %v8493_v14  ;;  %3850 = vmatpush.bf16.msrb.mxu3 %v9040_v15  ;;  %3810 = vmatpush.bf16.msrb.mxu0 %v8208_v23  ;;  %v11603_v12 = vadd.f32 %v3523_v8, %v3510_v1  ;;  %v11605_v14 = vpop.f32.mrf.mxu1 }
 0x196   :  { %v8749_v19 = vld [vmem:[#allocation4 + $0xda8] sm:$0xf0] }
 0x197   :  { %v10842_v21 = vld [vmem:[#allocation4 + $0xf8c] sm:$0xf]  ;;  %v8752_v29 = vor.u32 %v10778_v18, %v8749_v19  ;;  %3823 = vmatpush.bf16.msrb.mxu1 %v8496_v24  ;;  %12006 = vst [vmem:[#allocation20_spill] sm:$0xff] %v11603_v12  ;;  %v11999_v24 = vperm.slane %v11578_v13, 1 }
 0x198   :  { %v9005_v22 = vld [vmem:[#allocation4 + $0xfa8] sm:$0xf0] }
 0x199   :  { %v10634_v25 = vld [vmem:[#allocation4 + $0x90c] sm:$0xf]  ;;  %v9008_v32 = vor.u32 %v10842_v21, %v9005_v22  ;;  %3837 = vmatpush.bf16.msrb.mxu2 %v8752_v29 }
 0x19a   :  { %v8173_v27 = vld [vmem:[#allocation4 + $0x928] sm:$0xf0] }
 0x19b   :  { %v10706_v30 = vld [vmem:[#allocation4 + $0xb4c] sm:$0xf]  ;;  %v8176_v39 = vor.u32 %v10634_v25, %v8173_v27  ;;  %3851 = vmatpush.bf16.msrb.mxu3 %v9008_v32 }
 0x19c   :  { %v8461_v31 = vld [vmem:[#allocation4 + $0xb68] sm:$0xf0] }
 0x19d   :  { %v10770_v33 = vld [vmem:[#allocation4 + $0xd4c] sm:$0xf]  ;;  %v8464_v41 = vor.u32 %v10706_v30, %v8461_v31  ;;  %3811 = vmatpush.bf16.msrb.mxu0 %v8176_v39  ;;  %v3537_v30 = vpop.f32.mrf.mxu0  ;;  %v11608_v39 = vpop.f32.mrf.mxu2 }
 0x19e   :  { %v8717_v34 = vld [vmem:[#allocation4 + $0xd68] sm:$0xf0] }
 0x19f   :  { %v10834_v36 = vld [vmem:[#allocation4 + $0xf4c] sm:$0xf]  ;;  %v8720_v46 = vor.u32 %v10770_v33, %v8717_v34  ;;  %3824 = vmatpush.bf16.msrb.mxu1 %v8464_v41  ;;  %v3538_v41 = vadd.f32 %v3537_v30, %v11999_v24  ;;  %v8571_v24 = vld [vmem:[#allocation4 + $0xc18] sm:$0xf] }
 0x1a0   :  { %v8973_v37 = vld [vmem:[#allocation4 + $0xf68] sm:$0xf0] }
 0x1a1   :  { %v10626_v44 = vld [vmem:[#allocation4 + $0x8cc] sm:$0xf]  ;;  %v8976_v50 = vor.u32 %v10834_v36, %v8973_v37  ;;  %3838 = vmatpush.bf16.msrb.mxu2 %v8720_v46  ;;  %v10407_v46 = vld [vmem:[#allocation4 + $0x1ec] sm:$0xf0] }
 0x1a2   :  { %v8141_v45 = vld [vmem:[#allocation4 + $0x8e8] sm:$0xf0] }
 0x1a3   :  { %v10698_v47 = vld [vmem:[#allocation4 + $0xb0c] sm:$0xf]  ;;  %v8144_v38 = vor.u32 %v10626_v44, %v8141_v45  ;;  %3852 = vmatpush.bf16.msrb.mxu3 %v8976_v50  ;;  %v7251_v45 = vld [vmem:[#allocation4 + $0x1d0] sm:$0xf] }
 0x1a4   :  { %v8429_v48 = vld [vmem:[#allocation4 + $0xb28] sm:$0xf0] }
 0x1a5   :  { %v10762_v52 = vld [vmem:[#allocation4 + $0xd0c] sm:$0xf]  ;;  %v8432_v58 = vor.u32 %v10698_v47, %v8429_v48  ;;  %3812 = vmatpush.bf16.msrb.mxu0 %v8144_v38  ;;  %v3565_v30 = vpop.f32.mrf.mxu2 }
 0x1a6   :  { %v8685_v54 = vld [vmem:[#allocation4 + $0xd28] sm:$0xf0] }
 0x1a7   :  { %v10826_v56 = vld [vmem:[#allocation4 + $0xf0c] sm:$0xf]  ;;  %v8688_v62 = vor.u32 %v10762_v52, %v8685_v54  ;;  %3825 = vmatpush.bf16.msrb.mxu1 %v8432_v58  ;;  %v3551_v58 = vpop.f32.mrf.mxu1 }
 0x1a8   :  { %v8941_v57 = vld [vmem:[#allocation4 + $0xf28] sm:$0xf0] }
 0x1a9   :  { %v10618_v59 = vld [vmem:[#allocation4 + $0x88c] sm:$0xf]  ;;  %v8944_v3 = vor.u32 %v10826_v56, %v8941_v57  ;;  %3839 = vmatpush.bf16.msrb.mxu2 %v8688_v62  ;;  %v11612_v57 = vpop.f32.mrf.mxu3  ;;  %v7252_v62 = vor.u32 %v10407_v46, %v7251_v45  ;;  %v7987_v46 = vld [vmem:[#allocation4 + $0x790] sm:$0xf] }
 0x1aa   :  { %v8109_v60 = vld [vmem:[#allocation4 + $0x8a8] sm:$0xf0] }
 0x1ab   :  { %v10690_v63 = vld [vmem:[#allocation4 + $0xacc] sm:$0xf]  ;;  %v8112_v11 = vor.u32 %v10618_v59, %v8109_v60  ;;  %3853 = vmatpush.bf16.msrb.mxu3 %v8944_v3  ;;  %v7219_v3 = vld [vmem:[#allocation4 + $0x190] sm:$0xf] }
 0x1ac   :  { %v8397_v0 = vld [vmem:[#allocation4 + $0xae8] sm:$0xf0] }
 0x1ad   :  { %v10754_v4 = vld [vmem:[#allocation4 + $0xccc] sm:$0xf]  ;;  %v8400_v15 = vor.u32 %v10690_v63, %v8397_v0  ;;  %3813 = vmatpush.bf16.msrb.mxu0 %v8112_v11  ;;  %v3552_v0 = vadd.f32 %v3551_v58, %v3538_v41  ;;  %v7731_v41 = vld [vmem:[#allocation4 + $0x590] sm:$0xf] }
 0x1ae   :  { %v8653_v7 = vld [vmem:[#allocation4 + $0xce8] sm:$0xf0]  ;;  %v7443_v58 = vld [vmem:[#allocation4 + $0x350] sm:$0xf] }
 0x1af   :  { %v10818_v9 = vld [vmem:[#allocation4 + $0xecc] sm:$0xf]  ;;  %v8656_v21 = vor.u32 %v10754_v4, %v8653_v7  ;;  %3826 = vmatpush.bf16.msrb.mxu1 %v8400_v15  ;;  %v10399_v4 = vld [vmem:[#allocation4 + $0x1ac] sm:$0xf0] }
 0x1b0   :  { %v8909_v10 = vld [vmem:[#allocation4 + $0xee8] sm:$0xf0]  ;;  %v7763_v15 = vld [vmem:[#allocation4 + $0x5d0] sm:$0xf] }
 0x1b1   :  { %v10610_v18 = vld [vmem:[#allocation4 + $0x84c] sm:$0xf]  ;;  %v8912_v25 = vor.u32 %v10818_v9, %v8909_v10  ;;  %3840 = vmatpush.bf16.msrb.mxu2 %v8656_v21  ;;  %v7507_v9 = vld [vmem:[#allocation4 + $0x3d0] sm:$0xf]  ;;  %v3579_v45 = vpop.f32.mrf.mxu3 }
 0x1b2   :  { %v8077_v19 = vld [vmem:[#allocation4 + $0x868] sm:$0xf0]  ;;  %v10471_v10 = vld [vmem:[#allocation4 + $0x3ec] sm:$0xf0] }
 0x1b3   :  { %v10682_v22 = vld [vmem:[#allocation4 + $0xa8c] sm:$0xf]  ;;  %v8080_v33 = vor.u32 %v10610_v18, %v8077_v19  ;;  %3854 = vmatpush.bf16.msrb.mxu3 %v8912_v25  ;;  %v10535_v18 = vld [vmem:[#allocation4 + $0x5ec] sm:$0xf0]  ;;  %v7220_v25 = vor.u32 %v10399_v4, %v7219_v3 }
 0x1b4   :  { %v8365_v23 = vld [vmem:[#allocation4 + $0xaa8] sm:$0xf0]  ;;  %v8019_v21 = vld [vmem:[#allocation4 + $0x7d0] sm:$0xf] }
 0x1b5   :  { %v10746_v27 = vld [vmem:[#allocation4 + $0xc8c] sm:$0xf]  ;;  %v8368_v34 = vor.u32 %v10682_v22, %v8365_v23  ;;  %3814 = vmatpush.bf16.msrb.mxu0 %v8080_v33  ;;  %v10599_v22 = vld [vmem:[#allocation4 + $0x7ec] sm:$0xf0]  ;;  %v11614_v23 = vpop.f32.mrf.mxu0 }
 0x1b6   :  { %v8621_v29 = vld [vmem:[#allocation4 + $0xca8] sm:$0xf0] }
 0x1b7   :  { %v10810_v31 = vld [vmem:[#allocation4 + $0xe8c] sm:$0xf]  ;;  %v8624_v40 = vor.u32 %v10746_v27, %v8621_v29  ;;  %3827 = vmatpush.bf16.msrb.mxu1 %v8368_v34  ;;  %v7508_v29 = vor.u32 %v10471_v10, %v7507_v9  ;;  %v7764_v34 = vor.u32 %v10535_v18, %v7763_v15  ;;  %v10447_v15 = vld [vmem:[#allocation4 + $0x32c] sm:$0xf0] }
 0x1b8   :  { %v8877_v32 = vld [vmem:[#allocation4 + $0xea8] sm:$0xf0] }
 0x1b9   :  { %v10674_v35 = vld [vmem:[#allocation4 + $0xa4c] sm:$0xf]  ;;  %v8880_v47 = vor.u32 %v10810_v31, %v8877_v32  ;;  %3841 = vmatpush.bf16.msrb.mxu2 %v8624_v40  ;;  %v7187_v31 = vld [vmem:[#allocation4 + $0x150] sm:$0xf]  ;;  %v8020_v40 = vor.u32 %v10599_v22, %v8019_v21 }
 0x1ba   :  { %v10602_v36 = vld [vmem:[#allocation4 + $0x80c] sm:$0xf]  ;;  %v10391_v32 = vld [vmem:[#allocation4 + $0x16c] sm:$0xf0] }
 0x1bb   :  { %v8045_v37 = vld [vmem:[#allocation4 + $0x828] sm:$0xf0]  ;;  %3855 = vmatpush.bf16.msrb.mxu3 %v8880_v47  ;;  %v10591_v47 = vld [vmem:[#allocation4 + $0x7ac] sm:$0xf0] }
 0x1bc   :  { %v8333_v44 = vld [vmem:[#allocation4 + $0xa68] sm:$0xf0]  ;;  %v8048_v56 = vor.u32 %v10602_v36, %v8045_v37  ;;  %v7475_v36 = vld [vmem:[#allocation4 + $0x390] sm:$0xf] }
 0x1bd   :  { %v10738_v48 = vld [vmem:[#allocation4 + $0xc4c] sm:$0xf]  ;;  %v8336_v38 = vor.u32 %v10674_v35, %v8333_v44  ;;  %v3566_v35 = vadd.f32 %v3565_v30, %v3552_v0  ;;  %v10463_v37 = vld [vmem:[#allocation4 + $0x3ac] sm:$0xf0]  ;;  %v3593_v10 = vpop.f32.mrf.mxu0 }
 0x1be   :  { %v8589_v50 = vld [vmem:[#allocation4 + $0xc68] sm:$0xf0]  ;;  %3815 = vmatpush.bf16.msrb.mxu0 %v8048_v56  ;;  %v10527_v44 = vld [vmem:[#allocation4 + $0x5ac] sm:$0xf0] }
 0x1bf   :  { %v10802_v52 = vld [vmem:[#allocation4 + $0xe4c] sm:$0xf]  ;;  %v8592_v63 = vor.u32 %v10738_v48, %v8589_v50  ;;  %3828 = vmatpush.bf16.msrb.mxu1 %v8336_v38  ;;  %v7188_v48 = vor.u32 %v10391_v32, %v7187_v31  ;;  %v3580_v50 = vadd.f32 %v3579_v45, %v3566_v35  ;;  %v10383_v56 = vld [vmem:[#allocation4 + $0x12c] sm:$0xf0]  ;;  %v7732_v38 = vor.u32 %v10527_v44, %v7731_v41 }
 0x1c0   :  { %v8845_v54 = vld [vmem:[#allocation4 + $0xe68] sm:$0xf0]  ;;  %v7955_v0 = vld [vmem:[#allocation4 + $0x750] sm:$0xf] }
 0x1c1   :  { %v10666_v59 = vld [vmem:[#allocation4 + $0xa0c] sm:$0xf]  ;;  %v8848_v7 = vor.u32 %v10802_v52, %v8845_v54  ;;  %3842 = vmatpush.bf16.msrb.mxu2 %v8592_v63  ;;  %3816 = vmatmul.bf16.vlgmr.msrb.gmra.mxu0 %v11550_v17  ;;  %v7476_v52 = vor.u32 %v10463_v37, %v7475_v36  ;;  %v7155_v54 = vld [vmem:[#allocation4 + $0x110] sm:$0xf] }
 0x1c2   :  { %v8301_v60 = vld [vmem:[#allocation4 + $0xa28] sm:$0xf0]  ;;  %3864 = vmatpush.bf16.msra.mxu0 %v7252_v62  ;;  %v7699_v62 = vld [vmem:[#allocation4 + $0x550] sm:$0xf]  ;;  %v7156_v3 = vor.u32 %v10383_v56, %v7155_v54 }
 0x1c3   :  { %v10730_v61 = vld [vmem:[#allocation4 + $0xc0c] sm:$0xf]  ;;  %v8304_v19 = vor.u32 %v10666_v59, %v8301_v60  ;;  %3856 = vmatpush.bf16.msrb.mxu3 %v8848_v7  ;;  %v10455_v59 = vld [vmem:[#allocation4 + $0x36c] sm:$0xf0]  ;;  %v7988_v60 = vor.u32 %v10591_v47, %v7987_v46 }
 0x1c4   :  { %v8557_v1 = vld [vmem:[#allocation4 + $0xc28] sm:$0xf0]  ;;  %v10519_v63 = vld [vmem:[#allocation4 + $0x56c] sm:$0xf0]  ;;  %v7444_v4 = vor.u32 %v10455_v59, %v7443_v58 }
 0x1c5   :  { %v10794_v8 = vld [vmem:[#allocation4 + $0xe0c] sm:$0xf]  ;;  %v8560_v27 = vor.u32 %v10730_v61, %v8557_v1  ;;  %3829 = vmatpush.bf16.msrb.mxu1 %v8304_v19  ;;  %v11618_v61 = vpop.f32.mrf.mxu1  ;;  %v10583_v1 = vld [vmem:[#allocation4 + $0x76c] sm:$0xf0]  ;;  %v7700_v9 = vor.u32 %v10519_v63, %v7699_v62  ;;  %v3594_v19 = vadd.f32 %v3593_v10, %v3580_v50 }
 0x1c6   :  { %v8813_v11 = vld [vmem:[#allocation4 + $0xe28] sm:$0xf0]  ;;  %3865 = vmatpush.bf16.msra.mxu0 %v7220_v25  ;;  %v7123_v7 = vld [vmem:[#allocation4 + $0xd0] sm:$0xf]  ;;  %v7956_v18 = vor.u32 %v10583_v1, %v7955_v0  ;;  %v11622_v25 = vpop.f32.mrf.mxu2 }
 0x1c7   :  { %v8816_v33 = vor.u32 %v10794_v8, %v8813_v11  ;;  %3843 = vmatpush.bf16.msrb.mxu2 %v8560_v27  ;;  %v10375_v8 = vld [vmem:[#allocation4 + $0xec] sm:$0xf0] }
 0x1c8   :  { %3830 = vmatmul.bf16.vlgmr.msrb.gmra.mxu1 %v11558_v43  ;;  %v7411_v11 = vld [vmem:[#allocation4 + $0x310] sm:$0xf]  ;;  %v7124_v30 = vor.u32 %v10375_v8, %v7123_v7 }
 0x1c9   :  { %3878 = vmatpush.bf16.msra.mxu1 %v7508_v29  ;;  %3857 = vmatpush.bf16.msrb.mxu3 %v8816_v33  ;;  %v7667_v21 = vld [vmem:[#allocation4 + $0x510] sm:$0xf]  ;;  %v7412_v31 = vor.u32 %v10447_v15, %v7411_v11 }
 0x1ca   :  { %3844 = vmatmul.bf16.vlgmr.msrb.gmra.mxu2 %v11556_v42  ;;  %3866 = vmatpush.bf16.msra.mxu0 %v7188_v48  ;;  %v10511_v22 = vld [vmem:[#allocation4 + $0x52c] sm:$0xf0] }
 0x1cb   :  { %3892 = vmatpush.bf16.msra.mxu2 %v7764_v34  ;;  %v7923_v27 = vld [vmem:[#allocation4 + $0x710] sm:$0xf]  ;;  %v11624_v34 = vpop.f32.mrf.mxu3  ;;  %v7668_v35 = vor.u32 %v10511_v22, %v7667_v21 }
 0x1cc   :  { %3858 = vmatmul.bf16.vlgmr.msrb.gmra.mxu3 %v11563_v51  ;;  %v10575_v29 = vld [vmem:[#allocation4 + $0x72c] sm:$0xf0] }
 0x1cd   :  { %3906 = vmatpush.bf16.msra.mxu3 %v8020_v40  ;;  %3879 = vmatpush.bf16.msra.mxu1 %v7476_v52  ;;  %v7091_v32 = vld [vmem:[#allocation4 + $0x90] sm:$0xf]  ;;  %v7924_v40 = vor.u32 %v10575_v29, %v7923_v27  ;;  %v3607_v48 = vpop.f32.mrf.mxu1 }
 0x1ce   :  { %3867 = vmatpush.bf16.msra.mxu0 %v7156_v3  ;;  %v10367_v33 = vld [vmem:[#allocation4 + $0xac] sm:$0xf0]  ;;  %v3608_v56 = vadd.f32 %v3607_v48, %v3594_v19  ;;  %v3621_v10 = vpop.f32.mrf.mxu2 }
 0x1cf   :  { %3893 = vmatpush.bf16.msra.mxu2 %v7732_v38  ;;  %v7379_v36 = vld [vmem:[#allocation4 + $0x2d0] sm:$0xf]  ;;  %v7092_v47 = vor.u32 %v10367_v33, %v7091_v32 }
 0x1d0   :  { %v10439_v37 = vld [vmem:[#allocation4 + $0x2ec] sm:$0xf0]  ;;  %v3622_v21 = vadd.f32 %v3621_v10, %v3608_v56 }
 0x1d1   :  { %3907 = vmatpush.bf16.msra.mxu3 %v7988_v60  ;;  %3880 = vmatpush.bf16.msra.mxu1 %v7444_v4  ;;  %v7635_v41 = vld [vmem:[#allocation4 + $0x4d0] sm:$0xf]  ;;  %v7380_v50 = vor.u32 %v10439_v37, %v7379_v36 }
 0x1d2   :  { %v10503_v44 = vld [vmem:[#allocation4 + $0x4ec] sm:$0xf0]  ;;  %3868 = vmatpush.bf16.msra.mxu0 %v7124_v30 }
 0x1d3   :  { %3894 = vmatpush.bf16.msra.mxu2 %v7700_v9  ;;  %v7891_v45 = vld [vmem:[#allocation4 + $0x6d0] sm:$0xf]  ;;  %v7636_v38 = vor.u32 %v10503_v44, %v7635_v41  ;;  %v3635_v30 = vpop.f32.mrf.mxu3 }
 0x1d4   :  { %v10567_v46 = vld [vmem:[#allocation4 + $0x6ec] sm:$0xf0] }
 0x1d5   :  { %3908 = vmatpush.bf16.msra.mxu3 %v7956_v18  ;;  %3881 = vmatpush.bf16.msra.mxu1 %v7412_v31  ;;  %v7059_v52 = vld [vmem:[#allocation4 + $0x50] sm:$0xf]  ;;  %v7892_v60 = vor.u32 %v10567_v46, %v7891_v45 }
 0x1d6   :  { %v10359_v54 = vld [vmem:[#allocation4 + $0x6c] sm:$0xf0]  ;;  %3869 = vmatpush.bf16.msra.mxu0 %v7092_v47 }
 0x1d7   :  { %3895 = vmatpush.bf16.msra.mxu2 %v7668_v35  ;;  %v7347_v58 = vld [vmem:[#allocation4 + $0x290] sm:$0xf]  ;;  %v7060_v3 = vor.u32 %v10359_v54, %v7059_v52  ;;  %v11626_v35 = vadd.f32 %v3635_v30, %v3622_v21 }
 0x1d8   :  { %v10431_v59 = vld [vmem:[#allocation4 + $0x2ac] sm:$0xf0] }
 0x1d9   :  { %3909 = vmatpush.bf16.msra.mxu3 %v7924_v40  ;;  %v7603_v62 = vld [vmem:[#allocation4 + $0x490] sm:$0xf]  ;;  %3882 = vmatpush.bf16.msra.mxu1 %v7380_v50  ;;  %v7348_v4 = vor.u32 %v10431_v59, %v7347_v58  ;;  %12007 = vst [vmem:[#allocation21_spill] sm:$0xff] %v11626_v35  ;;  %v7741_v35 = vld [vmem:[#allocation4 + $0x5b8] sm:$0xf0] }
 0x1da   :  { %v10495_v63 = vld [vmem:[#allocation4 + $0x4ac] sm:$0xf0]  ;;  %3870 = vmatpush.bf16.msra.mxu0 %v7060_v3 }
 0x1db   :  { %v7859_v0 = vld [vmem:[#allocation4 + $0x690] sm:$0xf]  ;;  %3896 = vmatpush.bf16.msra.mxu2 %v7636_v38  ;;  %v7604_v11 = vor.u32 %v10495_v63, %v7603_v62 }
 0x1dc   :  { %v10559_v1 = vld [vmem:[#allocation4 + $0x6ac] sm:$0xf0] }
 0x1dd   :  { %v7315_v7 = vld [vmem:[#allocation4 + $0x250] sm:$0xf]  ;;  %3910 = vmatpush.bf16.msra.mxu3 %v7892_v60  ;;  %v7860_v22 = vor.u32 %v10559_v1, %v7859_v0  ;;  %3883 = vmatpush.bf16.msra.mxu1 %v7348_v4 }
 0x1de   :  { %v7027_v8 = vld [vmem:[#allocation4 + $0x10] sm:$0xf] }
 0x1df   :  { %v10351_v9 = vld [vmem:[#allocation4 + $0x2c] sm:$0xf0]  ;;  %3897 = vmatpush.bf16.msra.mxu2 %v7604_v11 }
 0x1e0   :  { %v10423_v15 = vld [vmem:[#allocation4 + $0x26c] sm:$0xf0]  ;;  %v7028_v33 = vor.u32 %v10351_v9, %v7027_v8 }
 0x1e1   :  { %v8275_v18 = vld [vmem:[#allocation4 + $0x9d0] sm:$0xf]  ;;  %v7316_v36 = vor.u32 %v10423_v15, %v7315_v7  ;;  %3911 = vmatpush.bf16.msra.mxu3 %v7860_v22 }
 0x1e2   :  { %v10663_v19 = vld [vmem:[#allocation4 + $0x9ec] sm:$0xf0]  ;;  %3871 = vmatpush.bf16.msra.mxu0 %v7028_v33 }
 0x1e3   :  { %v7571_v27 = vld [vmem:[#allocation4 + $0x450] sm:$0xf]  ;;  %v8276_v44 = vor.u32 %v10663_v19, %v8275_v18  ;;  %3884 = vmatpush.bf16.msra.mxu1 %v7316_v36 }
 0x1e4   :  { %v10487_v29 = vld [vmem:[#allocation4 + $0x46c] sm:$0xf0] }
 0x1e5   :  { %v7827_v31 = vld [vmem:[#allocation4 + $0x650] sm:$0xf]  ;;  %v7572_v45 = vor.u32 %v10487_v29, %v7571_v27  ;;  %3872 = vmatmul.bf16.vlgmr.msra.gmra.mxu0 %v11512_v2  ;;  %v11629_v29 = vpop.f32.mrf.mxu0 }
 0x1e6   :  { %v10551_v32 = vld [vmem:[#allocation4 + $0x66c] sm:$0xf0]  ;;  %3920 = vmatpush.bf16.msrb.mxu0 %v8276_v44 }
 0x1e7   :  { %v7283_v37 = vld [vmem:[#allocation4 + $0x210] sm:$0xf]  ;;  %v7828_v50 = vor.u32 %v10551_v32, %v7827_v31  ;;  %3898 = vmatpush.bf16.msra.mxu2 %v7572_v45 }
 0x1e8   :  { %v10415_v40 = vld [vmem:[#allocation4 + $0x22c] sm:$0xf0] }
 0x1e9   :  { %v7539_v41 = vld [vmem:[#allocation4 + $0x410] sm:$0xf]  ;;  %v7284_v60 = vor.u32 %v10415_v40, %v7283_v37  ;;  %3912 = vmatpush.bf16.msra.mxu3 %v7828_v50 }
 0x1ea   :  { %v10479_v46 = vld [vmem:[#allocation4 + $0x42c] sm:$0xf0] }
 0x1eb   :  { %v8243_v47 = vld [vmem:[#allocation4 + $0x990] sm:$0xf]  ;;  %v7540_v1 = vor.u32 %v10479_v46, %v7539_v41  ;;  %3885 = vmatpush.bf16.msra.mxu1 %v7284_v60 }
 0x1ec   :  { %v10655_v48 = vld [vmem:[#allocation4 + $0x9ac] sm:$0xf0] }
 0x1ed   :  { %v7795_v52 = vld [vmem:[#allocation4 + $0x610] sm:$0xf]  ;;  %v8244_v0 = vor.u32 %v10655_v48, %v8243_v47  ;;  %3899 = vmatpush.bf16.msra.mxu2 %v7540_v1  ;;  %v11633_v48 = vpop.f32.mrf.mxu1 }
 0x1ee   :  { %v8531_v54 = vld [vmem:[#allocation4 + $0xbd0] sm:$0xf]  ;;  %3886 = vmatmul.bf16.vlgmr.msra.gmra.mxu1 %v11538_v6 }
 0x1ef   :  { %v10727_v56 = vld [vmem:[#allocation4 + $0xbec] sm:$0xf0]  ;;  %3921 = vmatpush.bf16.msrb.mxu0 %v8244_v0 }
 0x1f0   :  { %v10543_v38 = vld [vmem:[#allocation4 + $0x62c] sm:$0xf0]  ;;  %v8532_v3 = vor.u32 %v10727_v56, %v8531_v54  ;;  %3900 = vmatmul.bf16.vlgmr.msra.gmra.mxu2 %v11536_v5 }
 0x1f1   :  { %v8787_v58 = vld [vmem:[#allocation4 + $0xdd0] sm:$0xf]  ;;  %v7796_v8 = vor.u32 %v10543_v38, %v7795_v52 }
 0x1f2   :  { %v10791_v59 = vld [vmem:[#allocation4 + $0xdec] sm:$0xf0]  ;;  %3934 = vmatpush.bf16.msrb.mxu1 %v8532_v3 }
 0x1f3   :  { %v9043_v62 = vld [vmem:[#allocation4 + $0xfd0] sm:$0xf]  ;;  %v8788_v9 = vor.u32 %v10791_v59, %v8787_v58  ;;  %3913 = vmatpush.bf16.msra.mxu3 %v7796_v8  ;;  %v11998_v59 = vperm.slane %v11578_v13, 2 }
 0x1f4   :  { %v10855_v63 = vld [vmem:[#allocation4 + $0xfec] sm:$0xf0] }
 0x1f5   :  { %v8211_v4 = vld [vmem:[#allocation4 + $0x950] sm:$0xf]  ;;  %v9044_v15 = vor.u32 %v10855_v63, %v9043_v62  ;;  %3948 = vmatpush.bf16.msrb.mxu2 %v8788_v9  ;;  %v3649_v9 = vpop.f32.mrf.mxu0 }
 0x1f6   :  { %v10647_v7 = vld [vmem:[#allocation4 + $0x96c] sm:$0xf0]  ;;  %3914 = vmatmul.bf16.vlgmr.msra.gmra.mxu3 %v11548_v16 }
 0x1f7   :  { %v8499_v10 = vld [vmem:[#allocation4 + $0xb90] sm:$0xf]  ;;  %v8212_v27 = vor.u32 %v10647_v7, %v8211_v4  ;;  %3962 = vmatpush.bf16.msrb.mxu3 %v9044_v15 }
 0x1f8   :  { %v10719_v11 = vld [vmem:[#allocation4 + $0xbac] sm:$0xf0] }
 0x1f9   :  { %v8755_v18 = vld [vmem:[#allocation4 + $0xd90] sm:$0xf]  ;;  %v8500_v30 = vor.u32 %v10719_v11, %v8499_v10  ;;  %3922 = vmatpush.bf16.msrb.mxu0 %v8212_v27 }
 0x1fa   :  { %v10783_v19 = vld [vmem:[#allocation4 + $0xdac] sm:$0xf0] }
 0x1fb   :  { %v9011_v21 = vld [vmem:[#allocation4 + $0xf90] sm:$0xf]  ;;  %v8756_v33 = vor.u32 %v10783_v19, %v8755_v18  ;;  %3935 = vmatpush.bf16.msrb.mxu1 %v8500_v30  ;;  %v3650_v18 = vadd.f32 %v3649_v9, %v11998_v59  ;;  %v11639_v19 = vpop.f32.mrf.mxu2  ;;  %v10779_v59 = vld [vmem:[#allocation4 + $0xd94] sm:$0xf] }
 0x1fc   :  { %v10847_v22 = vld [vmem:[#allocation4 + $0xfac] sm:$0xf0] }
 0x1fd   :  { %v8179_v31 = vld [vmem:[#allocation4 + $0x910] sm:$0xf]  ;;  %v9012_v40 = vor.u32 %v10847_v22, %v9011_v21  ;;  %3949 = vmatpush.bf16.msrb.mxu2 %v8756_v33  ;;  %v11641_v33 = vpop.f32.mrf.mxu3 }
 0x1fe   :  { %v10639_v32 = vld [vmem:[#allocation4 + $0x92c] sm:$0xf0]  ;;  %12008 = vst [vmem:[#allocation22_spill] sm:$0xff] %v11641_v33 }
 0x1ff   :  { %v8467_v36 = vld [vmem:[#allocation4 + $0xb50] sm:$0xf]  ;;  %v8180_v47 = vor.u32 %v10639_v32, %v8179_v31  ;;  %3963 = vmatpush.bf16.msrb.mxu3 %v9012_v40 }
 0x200   :  { %v10711_v37 = vld [vmem:[#allocation4 + $0xb6c] sm:$0xf0] }
 0x201   :  { %v8723_v41 = vld [vmem:[#allocation4 + $0xd50] sm:$0xf]  ;;  %v8468_v50 = vor.u32 %v10711_v37, %v8467_v36  ;;  %3923 = vmatpush.bf16.msrb.mxu0 %v8180_v47 }
 0x202   :  { %v10775_v44 = vld [vmem:[#allocation4 + $0xd6c] sm:$0xf0] }
 0x203   :  { %v8979_v45 = vld [vmem:[#allocation4 + $0xf50] sm:$0xf]  ;;  %v8724_v56 = vor.u32 %v10775_v44, %v8723_v41  ;;  %3936 = vmatpush.bf16.msrb.mxu1 %v8468_v50  ;;  %v3663_v41 = vpop.f32.mrf.mxu1 }
 0x204   :  { %v10839_v46 = vld [vmem:[#allocation4 + $0xf6c] sm:$0xf0]  ;;  %v3664_v47 = vadd.f32 %v3663_v41, %v3650_v18 }
 0x205   :  { %v8147_v52 = vld [vmem:[#allocation4 + $0x8d0] sm:$0xf]  ;;  %v8980_v60 = vor.u32 %v10839_v46, %v8979_v45  ;;  %3950 = vmatpush.bf16.msrb.mxu2 %v8724_v56 }
 0x206   :  { %v10631_v54 = vld [vmem:[#allocation4 + $0x8ec] sm:$0xf0] }
 0x207   :  { %v8435_v38 = vld [vmem:[#allocation4 + $0xb10] sm:$0xf]  ;;  %v8148_v3 = vor.u32 %v10631_v54, %v8147_v52  ;;  %3964 = vmatpush.bf16.msrb.mxu3 %v8980_v60 }
 0x208   :  { %v10703_v58 = vld [vmem:[#allocation4 + $0xb2c] sm:$0xf0] }
 0x209   :  { %v8691_v62 = vld [vmem:[#allocation4 + $0xd10] sm:$0xf]  ;;  %v8436_v4 = vor.u32 %v10703_v58, %v8435_v38  ;;  %3924 = vmatpush.bf16.msrb.mxu0 %v8148_v3 }
 0x20a   :  { %v10767_v63 = vld [vmem:[#allocation4 + $0xd2c] sm:$0xf0] }
 0x20b   :  { %v8947_v0 = vld [vmem:[#allocation4 + $0xf10] sm:$0xf]  ;;  %v8692_v10 = vor.u32 %v10767_v63, %v8691_v62  ;;  %3937 = vmatpush.bf16.msrb.mxu1 %v8436_v4  ;;  %v10403_v4 = vld [vmem:[#allocation4 + $0x1d4] sm:$0xf] }
 0x20c   :  { %v10831_v1 = vld [vmem:[#allocation4 + $0xf2c] sm:$0xf0] }
 0x20d   :  { %v8115_v7 = vld [vmem:[#allocation4 + $0x890] sm:$0xf]  ;;  %v8948_v21 = vor.u32 %v10831_v1, %v8947_v0  ;;  %3951 = vmatpush.bf16.msrb.mxu2 %v8692_v10 }
 0x20e   :  { %v10623_v8 = vld [vmem:[#allocation4 + $0x8ac] sm:$0xf0] }
 0x20f   :  { %v8403_v11 = vld [vmem:[#allocation4 + $0xad0] sm:$0xf]  ;;  %v8116_v32 = vor.u32 %v10623_v8, %v8115_v7  ;;  %3965 = vmatpush.bf16.msrb.mxu3 %v8948_v21  ;;  %v7253_v7 = vld [vmem:[#allocation4 + $0x1f0] sm:$0xf0] }
 0x210   :  { %v10695_v15 = vld [vmem:[#allocation4 + $0xaec] sm:$0xf0] }
 0x211   :  { %v8659_v22 = vld [vmem:[#allocation4 + $0xcd0] sm:$0xf]  ;;  %v8404_v36 = vor.u32 %v10695_v15, %v8403_v11  ;;  %3925 = vmatpush.bf16.msrb.mxu0 %v8116_v32  ;;  %v3677_v11 = vpop.f32.mrf.mxu2 }
 0x212   :  { %v10759_v27 = vld [vmem:[#allocation4 + $0xcec] sm:$0xf0] }
 0x213   :  { %v8915_v30 = vld [vmem:[#allocation4 + $0xed0] sm:$0xf]  ;;  %v8660_v44 = vor.u32 %v10759_v27, %v8659_v22  ;;  %3938 = vmatpush.bf16.msrb.mxu1 %v8404_v36  ;;  %v3678_v22 = vadd.f32 %v3677_v11, %v3664_v47  ;;  %v7256_v36 = vor.u32 %v10403_v4, %v7253_v7  ;;  %v10387_v7 = vld [vmem:[#allocation4 + $0x154] sm:$0xf] }
 0x214   :  { %v10823_v31 = vld [vmem:[#allocation4 + $0xeec] sm:$0xf0]  ;;  %v10459_v11 = vld [vmem:[#allocation4 + $0x394] sm:$0xf] }
 0x215   :  { %v8083_v37 = vld [vmem:[#allocation4 + $0x850] sm:$0xf]  ;;  %v8916_v50 = vor.u32 %v10823_v31, %v8915_v30  ;;  %3952 = vmatpush.bf16.msrb.mxu2 %v8660_v44 }
 0x216   :  { %v10615_v40 = vld [vmem:[#allocation4 + $0x86c] sm:$0xf0] }
 0x217   :  { %v8371_v45 = vld [vmem:[#allocation4 + $0xa90] sm:$0xf]  ;;  %v8084_v58 = vor.u32 %v10615_v40, %v8083_v37  ;;  %3966 = vmatpush.bf16.msrb.mxu3 %v8916_v50  ;;  %v3691_v37 = vpop.f32.mrf.mxu3 }
 0x218   :  { %v10687_v46 = vld [vmem:[#allocation4 + $0xaac] sm:$0xf0]  ;;  %v11643_v44 = vadd.f32 %v3691_v37, %v3678_v22  ;;  %v7733_v22 = vld [vmem:[#allocation4 + $0x5b0] sm:$0xf0] }
 0x219   :  { %v8627_v52 = vld [vmem:[#allocation4 + $0xc90] sm:$0xf]  ;;  %v8372_v60 = vor.u32 %v10687_v46, %v8371_v45  ;;  %3926 = vmatpush.bf16.msrb.mxu0 %v8084_v58  ;;  %v10395_v45 = vld [vmem:[#allocation4 + $0x194] sm:$0xf] }
 0x21a   :  { %v10751_v54 = vld [vmem:[#allocation4 + $0xcac] sm:$0xf0]  ;;  %v7221_v46 = vld [vmem:[#allocation4 + $0x1b0] sm:$0xf0] }
 0x21b   :  { %v8883_v56 = vld [vmem:[#allocation4 + $0xe90] sm:$0xf]  ;;  %v8628_v1 = vor.u32 %v10751_v54, %v8627_v52  ;;  %3939 = vmatpush.bf16.msrb.mxu1 %v8372_v60  ;;  %v10467_v54 = vld [vmem:[#allocation4 + $0x3d4] sm:$0xf] }
 0x21c   :  { %v10815_v38 = vld [vmem:[#allocation4 + $0xeac] sm:$0xf0]  ;;  %v7765_v58 = vld [vmem:[#allocation4 + $0x5f0] sm:$0xf0] }
 0x21d   :  { %v8339_v62 = vld [vmem:[#allocation4 + $0xa50] sm:$0xf]  ;;  %v8884_v8 = vor.u32 %v10815_v38, %v8883_v56  ;;  %3953 = vmatpush.bf16.msrb.mxu2 %v8628_v1  ;;  %v7509_v56 = vld [vmem:[#allocation4 + $0x3f0] sm:$0xf0]  ;;  %v7224_v1 = vor.u32 %v10395_v45, %v7221_v46 }
 0x21e   :  { %v8051_v63 = vld [vmem:[#allocation4 + $0x810] sm:$0xf]  ;;  %v10531_v38 = vld [vmem:[#allocation4 + $0x5d4] sm:$0xf]  ;;  %v7512_v4 = vor.u32 %v10467_v54, %v7509_v56 }
 0x21f   :  { %v10607_v0 = vld [vmem:[#allocation4 + $0x82c] sm:$0xf0]  ;;  %3967 = vmatpush.bf16.msrb.mxu3 %v8884_v8  ;;  %v7189_v8 = vld [vmem:[#allocation4 + $0x170] sm:$0xf0] }
 0x220   :  { %v10679_v3 = vld [vmem:[#allocation4 + $0xa6c] sm:$0xf0]  ;;  %v8052_v21 = vor.u32 %v10607_v0, %v8051_v63  ;;  %v8021_v63 = vld [vmem:[#allocation4 + $0x7f0] sm:$0xf0]  ;;  %v11645_v0 = vpop.f32.mrf.mxu0 }
 0x221   :  { %v8595_v9 = vld [vmem:[#allocation4 + $0xc50] sm:$0xf]  ;;  %v8340_v27 = vor.u32 %v10679_v3, %v8339_v62  ;;  %v10595_v62 = vld [vmem:[#allocation4 + $0x7d4] sm:$0xf] }
 0x222   :  { %v10743_v10 = vld [vmem:[#allocation4 + $0xc6c] sm:$0xf0]  ;;  %3927 = vmatpush.bf16.msrb.mxu0 %v8052_v21  ;;  %v10523_v21 = vld [vmem:[#allocation4 + $0x594] sm:$0xf] }
 0x223   :  { %v8851_v15 = vld [vmem:[#allocation4 + $0xe50] sm:$0xf]  ;;  %v8596_v40 = vor.u32 %v10743_v10, %v8595_v9  ;;  %3940 = vmatpush.bf16.msrb.mxu1 %v8340_v27  ;;  %v7768_v10 = vor.u32 %v10531_v38, %v7765_v58  ;;  %v10587_v27 = vld [vmem:[#allocation4 + $0x794] sm:$0xf] }
 0x224   :  { %v10807_v18 = vld [vmem:[#allocation4 + $0xe6c] sm:$0xf0]  ;;  %v7157_v37 = vld [vmem:[#allocation4 + $0x130] sm:$0xf0] }
 0x225   :  { %v8307_v30 = vld [vmem:[#allocation4 + $0xa10] sm:$0xf]  ;;  %v8852_v50 = vor.u32 %v10807_v18, %v8851_v15  ;;  %3954 = vmatpush.bf16.msrb.mxu2 %v8596_v40  ;;  %3928 = vmatmul.bf16.vlgmr.msrb.gmra.mxu0 %v11550_v17  ;;  %v7477_v15 = vld [vmem:[#allocation4 + $0x3b0] sm:$0xf0]  ;;  %v8024_v18 = vor.u32 %v10595_v62, %v8021_v63  ;;  %v7736_v40 = vor.u32 %v10523_v21, %v7733_v22  ;;  %v11654_v21 = vpop.f32.mrf.mxu2 }
 0x226   :  { %v10671_v31 = vld [vmem:[#allocation4 + $0xa2c] sm:$0xf0]  ;;  %3976 = vmatpush.bf16.msra.mxu0 %v7256_v36  ;;  %v10379_v36 = vld [vmem:[#allocation4 + $0x114] sm:$0xf] }
 0x227   :  { %v8563_v32 = vld [vmem:[#allocation4 + $0xc10] sm:$0xf]  ;;  %v8308_v60 = vor.u32 %v10671_v31, %v8307_v30  ;;  %3968 = vmatpush.bf16.msrb.mxu3 %v8852_v50  ;;  %v7989_v30 = vld [vmem:[#allocation4 + $0x7b0] sm:$0xf0]  ;;  %v7192_v31 = vor.u32 %v10387_v7, %v7189_v8  ;;  %v7160_v38 = vor.u32 %v10379_v36, %v7157_v37  ;;  %v11656_v37 = vpop.f32.mrf.mxu3 }
 0x228   :  { %v10735_v41 = vld [vmem:[#allocation4 + $0xc2c] sm:$0xf0]  ;;  %v10451_v45 = vld [vmem:[#allocation4 + $0x354] sm:$0xf]  ;;  %v7992_v50 = vor.u32 %v10587_v27, %v7989_v30 }
 0x229   :  { %v8819_v52 = vld [vmem:[#allocation4 + $0xe10] sm:$0xf]  ;;  %v8564_v3 = vor.u32 %v10735_v41, %v8563_v32  ;;  %3941 = vmatpush.bf16.msrb.mxu1 %v8308_v60  ;;  %v7480_v32 = vor.u32 %v10459_v11, %v7477_v15  ;;  %v11648_v41 = vpop.f32.mrf.mxu1  ;;  %v7445_v46 = vld [vmem:[#allocation4 + $0x370] sm:$0xf0] }
 0x22a   :  { %v10799_v47 = vld [vmem:[#allocation4 + $0xe2c] sm:$0xf0]  ;;  %3977 = vmatpush.bf16.msra.mxu0 %v7224_v1  ;;  %v7701_v54 = vld [vmem:[#allocation4 + $0x570] sm:$0xf0]  ;;  %v7448_v58 = vor.u32 %v10451_v45, %v7445_v46  ;;  %v3705_v1 = vpop.f32.mrf.mxu0 }
 0x22b   :  { %v8820_v9 = vor.u32 %v10799_v47, %v8819_v52  ;;  %3955 = vmatpush.bf16.msrb.mxu2 %v8564_v3  ;;  %v10515_v52 = vld [vmem:[#allocation4 + $0x554] sm:$0xf]  ;;  %v3706_v8 = vadd.f32 %v3705_v1, %v11643_v44 }
 0x22c   :  { %3942 = vmatmul.bf16.vlgmr.msrb.gmra.mxu1 %v11558_v43  ;;  %v10579_v56 = vld [vmem:[#allocation4 + $0x754] sm:$0xf]  ;;  %v7704_v63 = vor.u32 %v10515_v52, %v7701_v54 }
 0x22d   :  { %3990 = vmatpush.bf16.msra.mxu1 %v7512_v4  ;;  %3969 = vmatpush.bf16.msrb.mxu3 %v8820_v9  ;;  %v7957_v47 = vld [vmem:[#allocation4 + $0x770] sm:$0xf0] }
 0x22e   :  { %3956 = vmatmul.bf16.vlgmr.msrb.gmra.mxu2 %v11556_v42  ;;  %3978 = vmatpush.bf16.msra.mxu0 %v7192_v31  ;;  %v10371_v60 = vld [vmem:[#allocation4 + $0xd4] sm:$0xf]  ;;  %v7960_v7 = vor.u32 %v10579_v56, %v7957_v47 }
 0x22f   :  { %4004 = vmatpush.bf16.msra.mxu2 %v7768_v10  ;;  %v7125_v62 = vld [vmem:[#allocation4 + $0xf0] sm:$0xf0] }
 0x230   :  { %3970 = vmatmul.bf16.vlgmr.msrb.gmra.mxu3 %v11563_v51  ;;  %v10443_v3 = vld [vmem:[#allocation4 + $0x314] sm:$0xf] }
 0x231   :  { %4018 = vmatpush.bf16.msra.mxu3 %v8024_v18  ;;  %3991 = vmatpush.bf16.msra.mxu1 %v7480_v32  ;;  %v7413_v4 = vld [vmem:[#allocation4 + $0x330] sm:$0xf0]  ;;  %v7128_v18 = vor.u32 %v10371_v60, %v7125_v62  ;;  %v3719_v46 = vpop.f32.mrf.mxu1 }
 0x232   :  { %v10507_v9 = vld [vmem:[#allocation4 + $0x514] sm:$0xf]  ;;  %3979 = vmatpush.bf16.msra.mxu0 %v7160_v38  ;;  %v7416_v22 = vor.u32 %v10443_v3, %v7413_v4  ;;  %v3720_v56 = vadd.f32 %v3719_v46, %v3706_v8 }
 0x233   :  { %4005 = vmatpush.bf16.msra.mxu2 %v7736_v40  ;;  %v7669_v10 = vld [vmem:[#allocation4 + $0x530] sm:$0xf0] }
 0x234   :  { %v10571_v11 = vld [vmem:[#allocation4 + $0x714] sm:$0xf]  ;;  %v7672_v31 = vor.u32 %v10507_v9, %v7669_v10 }
 0x235   :  { %4019 = vmatpush.bf16.msra.mxu3 %v7992_v50  ;;  %v7925_v15 = vld [vmem:[#allocation4 + $0x730] sm:$0xf0]  ;;  %3992 = vmatpush.bf16.msra.mxu1 %v7448_v58 }
 0x236   :  { %v10363_v27 = vld [vmem:[#allocation4 + $0x94] sm:$0xf]  ;;  %v7928_v44 = vor.u32 %v10571_v11, %v7925_v15  ;;  %3980 = vmatpush.bf16.msra.mxu0 %v7128_v18 }
 0x237   :  { %v7093_v30 = vld [vmem:[#allocation4 + $0xb0] sm:$0xf0]  ;;  %4006 = vmatpush.bf16.msra.mxu2 %v7704_v63 }
 0x238   :  { %v10435_v32 = vld [vmem:[#allocation4 + $0x2d4] sm:$0xf]  ;;  %v7096_v54 = vor.u32 %v10363_v27, %v7093_v30 }
 0x239   :  { %v7381_v36 = vld [vmem:[#allocation4 + $0x2f0] sm:$0xf0]  ;;  %4020 = vmatpush.bf16.msra.mxu3 %v7960_v7  ;;  %3993 = vmatpush.bf16.msra.mxu1 %v7416_v22 }
 0x23a   :  { %v10499_v40 = vld [vmem:[#allocation4 + $0x4d4] sm:$0xf]  ;;  %v7384_v47 = vor.u32 %v10435_v32, %v7381_v36  ;;  %3981 = vmatpush.bf16.msra.mxu0 %v7096_v54  ;;  %v3733_v32 = vpop.f32.mrf.mxu2  ;;  %v3747_v54 = vpop.f32.mrf.mxu3 }
 0x23b   :  { %v7637_v45 = vld [vmem:[#allocation4 + $0x4f0] sm:$0xf0]  ;;  %4007 = vmatpush.bf16.msra.mxu2 %v7672_v31 }
 0x23c   :  { %v10563_v50 = vld [vmem:[#allocation4 + $0x6d4] sm:$0xf]  ;;  %v7640_v60 = vor.u32 %v10499_v40, %v7637_v45  ;;  %v3734_v45 = vadd.f32 %v3733_v32, %v3720_v56 }
 0x23d   :  { %v7893_v52 = vld [vmem:[#allocation4 + $0x6f0] sm:$0xf0]  ;;  %4021 = vmatpush.bf16.msra.mxu3 %v7928_v44  ;;  %3994 = vmatpush.bf16.msra.mxu1 %v7384_v47 }
 0x23e   :  { %v10355_v38 = vld [vmem:[#allocation4 + $0x54] sm:$0xf]  ;;  %v7896_v1 = vor.u32 %v10563_v50, %v7893_v52 }
 0x23f   :  { %v7061_v58 = vld [vmem:[#allocation4 + $0x70] sm:$0xf0]  ;;  %4008 = vmatpush.bf16.msra.mxu2 %v7640_v60 }
 0x240   :  { %v10427_v62 = vld [vmem:[#allocation4 + $0x294] sm:$0xf]  ;;  %v7064_v10 = vor.u32 %v10355_v38, %v7061_v58 }
 0x241   :  { %v7349_v63 = vld [vmem:[#allocation4 + $0x2b0] sm:$0xf0]  ;;  %4022 = vmatpush.bf16.msra.mxu3 %v7896_v1 }
 0x242   :  { %v10491_v3 = vld [vmem:[#allocation4 + $0x494] sm:$0xf]  ;;  %v7352_v11 = vor.u32 %v10427_v62, %v7349_v63  ;;  %3982 = vmatpush.bf16.msra.mxu0 %v7064_v10  ;;  %v11658_v63 = vadd.f32 %v3747_v54, %v3734_v45 }
 0x243   :  { %v7605_v4 = vld [vmem:[#allocation4 + $0x4b0] sm:$0xf0] }
 0x244   :  { %v10555_v7 = vld [vmem:[#allocation4 + $0x694] sm:$0xf]  ;;  %v7608_v22 = vor.u32 %v10491_v3, %v7605_v4  ;;  %3995 = vmatpush.bf16.msra.mxu1 %v7352_v11  ;;  %12009 = vst [vmem:[#allocation23_spill] sm:$0xff] %v11658_v63  ;;  %v7517_v63 = vld [vmem:[#allocation4 + $0x3f8] sm:$0xf0] }
 0x245   :  { %v7861_v9 = vld [vmem:[#allocation4 + $0x6b0] sm:$0xf0] }
 0x246   :  { %v10419_v15 = vld [vmem:[#allocation4 + $0x254] sm:$0xf]  ;;  %v7864_v36 = vor.u32 %v10555_v7, %v7861_v9  ;;  %4009 = vmatpush.bf16.msra.mxu2 %v7608_v22 }
 0x247   :  { %v10347_v18 = vld [vmem:[#allocation4 + $0x14] sm:$0xf] }
 0x248   :  { %v7029_v8 = vld [vmem:[#allocation4 + $0x30] sm:$0xf0]  ;;  %4023 = vmatpush.bf16.msra.mxu3 %v7864_v36 }
 0x249   :  { %v7317_v27 = vld [vmem:[#allocation4 + $0x270] sm:$0xf0]  ;;  %v7032_v52 = vor.u32 %v10347_v18, %v7029_v8 }
 0x24a   :  { %v10659_v30 = vld [vmem:[#allocation4 + $0x9d4] sm:$0xf]  ;;  %v7320_v47 = vor.u32 %v10419_v15, %v7317_v27 }
 0x24b   :  { %v8277_v31 = vld [vmem:[#allocation4 + $0x9f0] sm:$0xf0]  ;;  %3983 = vmatpush.bf16.msra.mxu0 %v7032_v52 }
 0x24c   :  { %v10483_v44 = vld [vmem:[#allocation4 + $0x454] sm:$0xf]  ;;  %v8280_v62 = vor.u32 %v10659_v30, %v8277_v31  ;;  %3996 = vmatpush.bf16.msra.mxu1 %v7320_v47 }
 0x24d   :  { %v7573_v40 = vld [vmem:[#allocation4 + $0x470] sm:$0xf0] }
 0x24e   :  { %v10547_v46 = vld [vmem:[#allocation4 + $0x654] sm:$0xf]  ;;  %v7576_v1 = vor.u32 %v10483_v44, %v7573_v40  ;;  %3984 = vmatmul.bf16.vlgmr.msra.gmra.mxu0 %v11512_v2 }
 0x24f   :  { %v7829_v50 = vld [vmem:[#allocation4 + $0x670] sm:$0xf0]  ;;  %4032 = vmatpush.bf16.msrb.mxu0 %v8280_v62 }
 0x250   :  { %v10411_v38 = vld [vmem:[#allocation4 + $0x214] sm:$0xf]  ;;  %v7832_v56 = vor.u32 %v10547_v46, %v7829_v50  ;;  %4010 = vmatpush.bf16.msra.mxu2 %v7576_v1 }
 0x251   :  { %v7285_v58 = vld [vmem:[#allocation4 + $0x230] sm:$0xf0] }
 0x252   :  { %v10475_v60 = vld [vmem:[#allocation4 + $0x414] sm:$0xf]  ;;  %v7288_v8 = vor.u32 %v10411_v38, %v7285_v58  ;;  %4024 = vmatpush.bf16.msra.mxu3 %v7832_v56 }
 0x253   :  { %v7541_v3 = vld [vmem:[#allocation4 + $0x430] sm:$0xf0] }
 0x254   :  { %v10651_v4 = vld [vmem:[#allocation4 + $0x994] sm:$0xf]  ;;  %v7544_v22 = vor.u32 %v10475_v60, %v7541_v3  ;;  %3997 = vmatpush.bf16.msra.mxu1 %v7288_v8 }
 0x255   :  { %v8245_v7 = vld [vmem:[#allocation4 + $0x9b0] sm:$0xf0] }
 0x256   :  { %v10539_v9 = vld [vmem:[#allocation4 + $0x614] sm:$0xf]  ;;  %v8248_v31 = vor.u32 %v10651_v4, %v8245_v7  ;;  %4011 = vmatpush.bf16.msra.mxu2 %v7544_v22 }
 0x257   :  { %v10723_v10 = vld [vmem:[#allocation4 + $0xbd4] sm:$0xf]  ;;  %3998 = vmatmul.bf16.vlgmr.msra.gmra.mxu1 %v11538_v6 }
 0x258   :  { %v8533_v32 = vld [vmem:[#allocation4 + $0xbf0] sm:$0xf0]  ;;  %4033 = vmatpush.bf16.msrb.mxu0 %v8248_v31 }
 0x259   :  { %v7797_v18 = vld [vmem:[#allocation4 + $0x630] sm:$0xf0]  ;;  %v8536_v44 = vor.u32 %v10723_v10, %v8533_v32  ;;  %4012 = vmatmul.bf16.vlgmr.msra.gmra.mxu2 %v11536_v5 }
 0x25a   :  { %v10787_v11 = vld [vmem:[#allocation4 + $0xdd4] sm:$0xf]  ;;  %v7800_v36 = vor.u32 %v10539_v9, %v7797_v18 }
 0x25b   :  { %v8789_v15 = vld [vmem:[#allocation4 + $0xdf0] sm:$0xf0]  ;;  %4046 = vmatpush.bf16.msrb.mxu1 %v8536_v44 }
 0x25c   :  { %v10851_v27 = vld [vmem:[#allocation4 + $0xfd4] sm:$0xf]  ;;  %v8792_v46 = vor.u32 %v10787_v11, %v8789_v15  ;;  %4025 = vmatpush.bf16.msra.mxu3 %v7800_v36 }
 0x25d   :  { %v9045_v30 = vld [vmem:[#allocation4 + $0xff0] sm:$0xf0] }
 0x25e   :  { %v10643_v40 = vld [vmem:[#allocation4 + $0x954] sm:$0xf]  ;;  %v9048_v52 = vor.u32 %v10851_v27, %v9045_v30  ;;  %4060 = vmatpush.bf16.msrb.mxu2 %v8792_v46 }
 0x25f   :  { %v8213_v45 = vld [vmem:[#allocation4 + $0x970] sm:$0xf0]  ;;  %4026 = vmatmul.bf16.vlgmr.msra.gmra.mxu3 %v11548_v16 }
 0x260   :  { %v10715_v50 = vld [vmem:[#allocation4 + $0xb94] sm:$0xf]  ;;  %v8216_v62 = vor.u32 %v10643_v40, %v8213_v45  ;;  %4074 = vmatpush.bf16.msrb.mxu3 %v9048_v52 }
 0x261   :  { %v8501_v54 = vld [vmem:[#allocation4 + $0xbb0] sm:$0xf0] }
 0x262   :  { %v8757_v47 = vld [vmem:[#allocation4 + $0xdb0] sm:$0xf0]  ;;  %v8504_v60 = vor.u32 %v10715_v50, %v8501_v54  ;;  %4034 = vmatpush.bf16.msrb.mxu0 %v8216_v62 }
 0x263   :  { %v10843_v38 = vld [vmem:[#allocation4 + $0xf94] sm:$0xf]  ;;  %v8760_v4 = vor.u32 %v10779_v59, %v8757_v47 }
 0x264   :  { %v9013_v58 = vld [vmem:[#allocation4 + $0xfb0] sm:$0xf0]  ;;  %4047 = vmatpush.bf16.msrb.mxu1 %v8504_v60 }
 0x265   :  { %v10635_v1 = vld [vmem:[#allocation4 + $0x914] sm:$0xf]  ;;  %v9016_v9 = vor.u32 %v10843_v38, %v9013_v58  ;;  %4061 = vmatpush.bf16.msrb.mxu2 %v8760_v4 }
 0x266   :  { %v8181_v3 = vld [vmem:[#allocation4 + $0x930] sm:$0xf0] }
 0x267   :  { %v10707_v7 = vld [vmem:[#allocation4 + $0xb54] sm:$0xf]  ;;  %v8184_v15 = vor.u32 %v10635_v1, %v8181_v3  ;;  %4075 = vmatpush.bf16.msrb.mxu3 %v9016_v9 }
 0x268   :  { %v8469_v56 = vld [vmem:[#allocation4 + $0xb70] sm:$0xf0] }
 0x269   :  { %v10771_v10 = vld [vmem:[#allocation4 + $0xd54] sm:$0xf]  ;;  %v8472_v8 = vor.u32 %v10707_v7, %v8469_v56  ;;  %4035 = vmatpush.bf16.msrb.mxu0 %v8184_v15 }
 0x26a   :  { %v8725_v32 = vld [vmem:[#allocation4 + $0xd70] sm:$0xf0] }
 0x26b   :  { %v10835_v18 = vld [vmem:[#allocation4 + $0xf54] sm:$0xf]  ;;  %v8728_v59 = vor.u32 %v10771_v10, %v8725_v32  ;;  %4048 = vmatpush.bf16.msrb.mxu1 %v8472_v8 }
 0x26c   :  { %v8981_v11 = vld [vmem:[#allocation4 + $0xf70] sm:$0xf0] }
 0x26d   :  { %v10627_v27 = vld [vmem:[#allocation4 + $0x8d4] sm:$0xf]  ;;  %v8984_v44 = vor.u32 %v10835_v18, %v8981_v11  ;;  %4062 = vmatpush.bf16.msrb.mxu2 %v8728_v59 }
 0x26e   :  { %v8149_v30 = vld [vmem:[#allocation4 + $0x8f0] sm:$0xf0] }
 0x26f   :  { %v10699_v31 = vld [vmem:[#allocation4 + $0xb14] sm:$0xf]  ;;  %v8152_v50 = vor.u32 %v10627_v27, %v8149_v30  ;;  %4076 = vmatpush.bf16.msrb.mxu3 %v8984_v44 }
 0x270   :  { %v8437_v22 = vld [vmem:[#allocation4 + $0xb30] sm:$0xf0] }
 0x271   :  { %v10763_v40 = vld [vmem:[#allocation4 + $0xd14] sm:$0xf]  ;;  %v8440_v54 = vor.u32 %v10699_v31, %v8437_v22  ;;  %4036 = vmatpush.bf16.msrb.mxu0 %v8152_v50 }
 0x272   :  { %v8693_v45 = vld [vmem:[#allocation4 + $0xd30] sm:$0xf0] }
 0x273   :  { %v10827_v36 = vld [vmem:[#allocation4 + $0xf14] sm:$0xf]  ;;  %v8696_v38 = vor.u32 %v10763_v40, %v8693_v45  ;;  %4049 = vmatpush.bf16.msrb.mxu1 %v8440_v54  ;;  %v7259_v54 = vld [vmem:[#allocation4 + $0x1d8] sm:$0xf] }
 0x274   :  { %v8949_v46 = vld [vmem:[#allocation4 + $0xf30] sm:$0xf0] }
 0x275   :  { %v10619_v52 = vld [vmem:[#allocation4 + $0x894] sm:$0xf]  ;;  %v8952_v60 = vor.u32 %v10827_v36, %v8949_v46  ;;  %4063 = vmatpush.bf16.msrb.mxu2 %v8696_v38 }
 0x276   :  { %v8117_v47 = vld [vmem:[#allocation4 + $0x8b0] sm:$0xf0] }
 0x277   :  { %v10691_v58 = vld [vmem:[#allocation4 + $0xad4] sm:$0xf]  ;;  %v8120_v56 = vor.u32 %v10619_v52, %v8117_v47  ;;  %4077 = vmatpush.bf16.msrb.mxu3 %v8952_v60  ;;  %v10408_v52 = vld [vmem:[#allocation4 + $0x1f4] sm:$0xf0] }
 0x278   :  { %v8405_v62 = vld [vmem:[#allocation4 + $0xaf0] sm:$0xf0] }
 0x279   :  { %v10755_v1 = vld [vmem:[#allocation4 + $0xcd4] sm:$0xf]  ;;  %v8408_v9 = vor.u32 %v10691_v58, %v8405_v62  ;;  %4037 = vmatpush.bf16.msrb.mxu0 %v8120_v56 }
 0x27a   :  { %v8661_v3 = vld [vmem:[#allocation4 + $0xcf0] sm:$0xf0] }
 0x27b   :  { %v10819_v4 = vld [vmem:[#allocation4 + $0xed4] sm:$0xf]  ;;  %v8664_v18 = vor.u32 %v10755_v1, %v8661_v3  ;;  %4050 = vmatpush.bf16.msrb.mxu1 %v8408_v9  ;;  %v7260_v9 = vor.u32 %v10408_v52, %v7259_v54  ;;  %v7195_v54 = vld [vmem:[#allocation4 + $0x158] sm:$0xf] }
 0x27c   :  { %v8917_v7 = vld [vmem:[#allocation4 + $0xef0] sm:$0xf0]  ;;  %v10392_v52 = vld [vmem:[#allocation4 + $0x174] sm:$0xf0] }
 0x27d   :  { %v10611_v10 = vld [vmem:[#allocation4 + $0x854] sm:$0xf]  ;;  %v8920_v8 = vor.u32 %v10819_v4, %v8917_v7  ;;  %4064 = vmatpush.bf16.msrb.mxu2 %v8664_v18  ;;  %v7227_v18 = vld [vmem:[#allocation4 + $0x198] sm:$0xf] }
 0x27e   :  { %v8085_v32 = vld [vmem:[#allocation4 + $0x870] sm:$0xf0] }
 0x27f   :  { %v10683_v11 = vld [vmem:[#allocation4 + $0xa94] sm:$0xf]  ;;  %v8088_v22 = vor.u32 %v10611_v10, %v8085_v32  ;;  %4078 = vmatpush.bf16.msrb.mxu3 %v8920_v8 }
 0x280   :  { %v8373_v15 = vld [vmem:[#allocation4 + $0xab0] sm:$0xf0] }
 0x281   :  { %v10747_v27 = vld [vmem:[#allocation4 + $0xc94] sm:$0xf]  ;;  %v8376_v44 = vor.u32 %v10683_v11, %v8373_v15  ;;  %4038 = vmatpush.bf16.msrb.mxu0 %v8088_v22  ;;  %v10400_v11 = vld [vmem:[#allocation4 + $0x1b4] sm:$0xf0] }
 0x282   :  { %v8629_v30 = vld [vmem:[#allocation4 + $0xcb0] sm:$0xf0]  ;;  %v10536_v22 = vld [vmem:[#allocation4 + $0x5f4] sm:$0xf0] }
 0x283   :  { %v10811_v59 = vld [vmem:[#allocation4 + $0xe94] sm:$0xf]  ;;  %v8632_v46 = vor.u32 %v10747_v27, %v8629_v30  ;;  %4051 = vmatpush.bf16.msrb.mxu1 %v8376_v44  ;;  %v7515_v27 = vld [vmem:[#allocation4 + $0x3d8] sm:$0xf] }
 0x284   :  { %v8885_v31 = vld [vmem:[#allocation4 + $0xeb0] sm:$0xf0]  ;;  %v10472_v30 = vld [vmem:[#allocation4 + $0x3f4] sm:$0xf0] }
 0x285   :  { %v10675_v40 = vld [vmem:[#allocation4 + $0xa54] sm:$0xf]  ;;  %v8888_v47 = vor.u32 %v10811_v59, %v8885_v31  ;;  %4065 = vmatpush.bf16.msrb.mxu2 %v8632_v46  ;;  %v7771_v31 = vld [vmem:[#allocation4 + $0x5d8] sm:$0xf] }
 0x286   :  { %v10603_v45 = vld [vmem:[#allocation4 + $0x814] sm:$0xf] }
 0x287   :  { %v8053_v36 = vld [vmem:[#allocation4 + $0x830] sm:$0xf0]  ;;  %4079 = vmatpush.bf16.msrb.mxu3 %v8888_v47 }
 0x288   :  { %v8341_v50 = vld [vmem:[#allocation4 + $0xa70] sm:$0xf0]  ;;  %v8056_v1 = vor.u32 %v10603_v45, %v8053_v36  ;;  %v10600_v45 = vld [vmem:[#allocation4 + $0x7f4] sm:$0xf0]  ;;  %v7228_v36 = vor.u32 %v10400_v11, %v7227_v18 }
 0x289   :  { %v10739_v38 = vld [vmem:[#allocation4 + $0xc54] sm:$0xf]  ;;  %v8344_v3 = vor.u32 %v10675_v40, %v8341_v50  ;;  %v8027_v40 = vld [vmem:[#allocation4 + $0x7d8] sm:$0xf]  ;;  %v7516_v50 = vor.u32 %v10472_v30, %v7515_v27 }
 0x28a   :  { %v8597_v58 = vld [vmem:[#allocation4 + $0xc70] sm:$0xf0]  ;;  %4039 = vmatpush.bf16.msrb.mxu0 %v8056_v1  ;;  %v7739_v1 = vld [vmem:[#allocation4 + $0x598] sm:$0xf] }
 0x28b   :  { %v10803_v62 = vld [vmem:[#allocation4 + $0xe54] sm:$0xf]  ;;  %v8600_v10 = vor.u32 %v10739_v38, %v8597_v58  ;;  %4052 = vmatpush.bf16.msrb.mxu1 %v8344_v3  ;;  %v7772_v38 = vor.u32 %v10536_v22, %v7771_v31  ;;  %v7483_v58 = vld [vmem:[#allocation4 + $0x398] sm:$0xf] }
 0x28c   :  { %v8853_v60 = vld [vmem:[#allocation4 + $0xe70] sm:$0xf0]  ;;  %v10528_v3 = vld [vmem:[#allocation4 + $0x5b4] sm:$0xf0] }
 0x28d   :  { %v10667_v4 = vld [vmem:[#allocation4 + $0xa14] sm:$0xf]  ;;  %v8856_v15 = vor.u32 %v10803_v62, %v8853_v60  ;;  %4066 = vmatpush.bf16.msrb.mxu2 %v8600_v10  ;;  %4040 = vmatmul.bf16.vlgmr.msrb.gmra.mxu0 %v11550_v17  ;;  %v10464_v62 = vld [vmem:[#allocation4 + $0x3b4] sm:$0xf0]  ;;  %v8028_v60 = vor.u32 %v10600_v45, %v8027_v40  ;;  %v7740_v18 = vor.u32 %v10528_v3, %v7739_v1 }
 0x28e   :  { %v8309_v7 = vld [vmem:[#allocation4 + $0xa30] sm:$0xf0]  ;;  %4088 = vmatpush.bf16.msra.mxu0 %v7260_v9  ;;  %v7196_v9 = vor.u32 %v10392_v52, %v7195_v54  ;;  %v7163_v10 = vld [vmem:[#allocation4 + $0x118] sm:$0xf] }
 0x28f   :  { %v10731_v56 = vld [vmem:[#allocation4 + $0xc14] sm:$0xf]  ;;  %v8312_v44 = vor.u32 %v10667_v4, %v8309_v7  ;;  %4080 = vmatpush.bf16.msrb.mxu3 %v8856_v15  ;;  %v7995_v4 = vld [vmem:[#allocation4 + $0x798] sm:$0xf] }
 0x290   :  { %v8565_v32 = vld [vmem:[#allocation4 + $0xc30] sm:$0xf0]  ;;  %v10592_v7 = vld [vmem:[#allocation4 + $0x7b4] sm:$0xf0] }
 0x291   :  { %v10795_v8 = vld [vmem:[#allocation4 + $0xe14] sm:$0xf]  ;;  %v8568_v46 = vor.u32 %v10731_v56, %v8565_v32  ;;  %4053 = vmatpush.bf16.msrb.mxu1 %v8312_v44  ;;  %v7484_v56 = vor.u32 %v10464_v62, %v7483_v58  ;;  %v10384_v32 = vld [vmem:[#allocation4 + $0x134] sm:$0xf0] }
 0x292   :  { %v8821_v59 = vld [vmem:[#allocation4 + $0xe30] sm:$0xf0]  ;;  %4089 = vmatpush.bf16.msra.mxu0 %v7228_v36  ;;  %v7451_v11 = vld [vmem:[#allocation4 + $0x358] sm:$0xf]  ;;  %v7164_v22 = vor.u32 %v10384_v32, %v7163_v10 }
 0x293   :  { %v8824_v47 = vor.u32 %v10795_v8, %v8821_v59  ;;  %4067 = vmatpush.bf16.msrb.mxu2 %v8568_v46  ;;  %v10456_v15 = vld [vmem:[#allocation4 + $0x374] sm:$0xf0]  ;;  %v7996_v8 = vor.u32 %v10592_v7, %v7995_v4 }
 0x294   :  { %4054 = vmatmul.bf16.vlgmr.msrb.gmra.mxu1 %v11558_v43  ;;  %v7707_v27 = vld [vmem:[#allocation4 + $0x558] sm:$0xf]  ;;  %v7452_v44 = vor.u32 %v10456_v15, %v7451_v11 }
 0x295   :  { %4102 = vmatpush.bf16.msra.mxu1 %v7516_v50  ;;  %4081 = vmatpush.bf16.msrb.mxu3 %v8824_v47  ;;  %v10520_v30 = vld [vmem:[#allocation4 + $0x574] sm:$0xf0] }
 0x296   :  { %4068 = vmatmul.bf16.vlgmr.msrb.gmra.mxu2 %v11556_v42  ;;  %4090 = vmatpush.bf16.msra.mxu0 %v7196_v9  ;;  %v7963_v59 = vld [vmem:[#allocation4 + $0x758] sm:$0xf]  ;;  %v7708_v36 = vor.u32 %v10520_v30, %v7707_v27 }
 0x297   :  { %4116 = vmatpush.bf16.msra.mxu2 %v7772_v38  ;;  %v10584_v31 = vld [vmem:[#allocation4 + $0x774] sm:$0xf0] }
 0x298   :  { %4082 = vmatmul.bf16.vlgmr.msrb.gmra.mxu3 %v11563_v51  ;;  %v7131_v40 = vld [vmem:[#allocation4 + $0xd8] sm:$0xf]  ;;  %v7964_v54 = vor.u32 %v10584_v31, %v7963_v59 }
 0x299   :  { %4130 = vmatpush.bf16.msra.mxu3 %v8028_v60  ;;  %4103 = vmatpush.bf16.msra.mxu1 %v7484_v56  ;;  %v10376_v45 = vld [vmem:[#allocation4 + $0xf4] sm:$0xf0] }
 0x29a   :  { %v7419_v46 = vld [vmem:[#allocation4 + $0x318] sm:$0xf]  ;;  %4091 = vmatpush.bf16.msra.mxu0 %v7164_v22  ;;  %v7132_v62 = vor.u32 %v10376_v45, %v7131_v40 }
 0x29b   :  { %4117 = vmatpush.bf16.msra.mxu2 %v7740_v18  ;;  %v10448_v50 = vld [vmem:[#allocation4 + $0x334] sm:$0xf0] }
 0x29c   :  { %v7675_v52 = vld [vmem:[#allocation4 + $0x518] sm:$0xf]  ;;  %v7420_v60 = vor.u32 %v10448_v50, %v7419_v46 }
 0x29d   :  { %4131 = vmatpush.bf16.msra.mxu3 %v7996_v8  ;;  %v10512_v47 = vld [vmem:[#allocation4 + $0x534] sm:$0xf0]  ;;  %4104 = vmatpush.bf16.msra.mxu1 %v7452_v44 }
 0x29e   :  { %v7931_v38 = vld [vmem:[#allocation4 + $0x718] sm:$0xf]  ;;  %v7676_v4 = vor.u32 %v10512_v47, %v7675_v52  ;;  %4092 = vmatpush.bf16.msra.mxu0 %v7132_v62 }
 0x29f   :  { %v10576_v58 = vld [vmem:[#allocation4 + $0x734] sm:$0xf0]  ;;  %4118 = vmatpush.bf16.msra.mxu2 %v7708_v36 }
 0x2a0   :  { %v7099_v1 = vld [vmem:[#allocation4 + $0x98] sm:$0xf]  ;;  %v7932_v56 = vor.u32 %v10576_v58, %v7931_v38 }
 0x2a1   :  { %v10368_v3 = vld [vmem:[#allocation4 + $0xb4] sm:$0xf0]  ;;  %4132 = vmatpush.bf16.msra.mxu3 %v7964_v54  ;;  %4105 = vmatpush.bf16.msra.mxu1 %v7420_v60 }
 0x2a2   :  { %v7387_v7 = vld [vmem:[#allocation4 + $0x2d8] sm:$0xf]  ;;  %v7100_v15 = vor.u32 %v10368_v3, %v7099_v1 }
 0x2a3   :  { %v10440_v9 = vld [vmem:[#allocation4 + $0x2f4] sm:$0xf0]  ;;  %4119 = vmatpush.bf16.msra.mxu2 %v7676_v4 }
 0x2a4   :  { %v7643_v10 = vld [vmem:[#allocation4 + $0x4d8] sm:$0xf]  ;;  %v7388_v8 = vor.u32 %v10440_v9, %v7387_v7  ;;  %4093 = vmatpush.bf16.msra.mxu0 %v7100_v15 }
 0x2a5   :  { %v10504_v32 = vld [vmem:[#allocation4 + $0x4f4] sm:$0xf0]  ;;  %4133 = vmatpush.bf16.msra.mxu3 %v7932_v56 }
 0x2a6   :  { %v7899_v18 = vld [vmem:[#allocation4 + $0x6d8] sm:$0xf]  ;;  %v7644_v59 = vor.u32 %v10504_v32, %v7643_v10  ;;  %4106 = vmatpush.bf16.msra.mxu1 %v7388_v8 }
 0x2a7   :  { %v10568_v11 = vld [vmem:[#allocation4 + $0x6f4] sm:$0xf0] }
 0x2a8   :  { %v7067_v27 = vld [vmem:[#allocation4 + $0x58] sm:$0xf]  ;;  %v7900_v44 = vor.u32 %v10568_v11, %v7899_v18  ;;  %4120 = vmatpush.bf16.msra.mxu2 %v7644_v59 }
 0x2a9   :  { %v10360_v30 = vld [vmem:[#allocation4 + $0x74] sm:$0xf0] }
 0x2aa   :  { %v7355_v31 = vld [vmem:[#allocation4 + $0x298] sm:$0xf]  ;;  %v7068_v50 = vor.u32 %v10360_v30, %v7067_v27  ;;  %4134 = vmatpush.bf16.msra.mxu3 %v7900_v44 }
 0x2ab   :  { %v10432_v22 = vld [vmem:[#allocation4 + $0x2b4] sm:$0xf0] }
 0x2ac   :  { %v7611_v40 = vld [vmem:[#allocation4 + $0x498] sm:$0xf]  ;;  %v7356_v54 = vor.u32 %v10432_v22, %v7355_v31  ;;  %4094 = vmatpush.bf16.msra.mxu0 %v7068_v50 }
 0x2ad   :  { %v10496_v45 = vld [vmem:[#allocation4 + $0x4b4] sm:$0xf0] }
 0x2ae   :  { %v7867_v36 = vld [vmem:[#allocation4 + $0x698] sm:$0xf]  ;;  %v7612_v58 = vor.u32 %v10496_v45, %v7611_v40  ;;  %4107 = vmatpush.bf16.msra.mxu1 %v7356_v54 }
 0x2af   :  { %v10560_v46 = vld [vmem:[#allocation4 + $0x6b4] sm:$0xf0] }
 0x2b0   :  { %v7323_v52 = vld [vmem:[#allocation4 + $0x258] sm:$0xf]  ;;  %v7868_v3 = vor.u32 %v10560_v46, %v7867_v36  ;;  %4121 = vmatpush.bf16.msra.mxu2 %v7612_v58 }
 0x2b1   :  { %v7035_v47 = vld [vmem:[#allocation4 + $0x18] sm:$0xf] }
 0x2b2   :  { %v10352_v38 = vld [vmem:[#allocation4 + $0x34] sm:$0xf0]  ;;  %4135 = vmatpush.bf16.msra.mxu3 %v7868_v3 }
 0x2b3   :  { %v10424_v62 = vld [vmem:[#allocation4 + $0x274] sm:$0xf0]  ;;  %v7036_v10 = vor.u32 %v10352_v38, %v7035_v47 }
 0x2b4   :  { %v8283_v60 = vld [vmem:[#allocation4 + $0x9d8] sm:$0xf]  ;;  %v7324_v32 = vor.u32 %v10424_v62, %v7323_v52 }
 0x2b5   :  { %v10664_v1 = vld [vmem:[#allocation4 + $0x9f4] sm:$0xf0]  ;;  %4095 = vmatpush.bf16.msra.mxu0 %v7036_v10 }
 0x2b6   :  { %v7579_v4 = vld [vmem:[#allocation4 + $0x458] sm:$0xf]  ;;  %v8284_v8 = vor.u32 %v10664_v1, %v8283_v60  ;;  %4108 = vmatpush.bf16.msra.mxu1 %v7324_v32 }
 0x2b7   :  { %v10488_v7 = vld [vmem:[#allocation4 + $0x474] sm:$0xf0] }
 0x2b8   :  { %v7835_v9 = vld [vmem:[#allocation4 + $0x658] sm:$0xf]  ;;  %v7580_v27 = vor.u32 %v10488_v7, %v7579_v4  ;;  %4096 = vmatmul.bf16.vlgmr.msra.gmra.mxu0 %v11512_v2 }
 0x2b9   :  { %v10552_v56 = vld [vmem:[#allocation4 + $0x674] sm:$0xf0]  ;;  %4144 = vmatpush.bf16.msrb.mxu0 %v8284_v8 }
 0x2ba   :  { %v7291_v18 = vld [vmem:[#allocation4 + $0x218] sm:$0xf]  ;;  %v7836_v22 = vor.u32 %v10552_v56, %v7835_v9  ;;  %4122 = vmatpush.bf16.msra.mxu2 %v7580_v27 }
 0x2bb   :  { %v10416_v11 = vld [vmem:[#allocation4 + $0x234] sm:$0xf0] }
 0x2bc   :  { %v7547_v15 = vld [vmem:[#allocation4 + $0x418] sm:$0xf]  ;;  %v7292_v54 = vor.u32 %v10416_v11, %v7291_v18  ;;  %4136 = vmatpush.bf16.msra.mxu3 %v7836_v22 }
 0x2bd   :  { %v10480_v30 = vld [vmem:[#allocation4 + $0x434] sm:$0xf0] }
 0x2be   :  { %v8251_v59 = vld [vmem:[#allocation4 + $0x998] sm:$0xf]  ;;  %v7548_v58 = vor.u32 %v10480_v30, %v7547_v15  ;;  %4109 = vmatpush.bf16.msra.mxu1 %v7292_v54 }
 0x2bf   :  { %v10656_v31 = vld [vmem:[#allocation4 + $0x9b4] sm:$0xf0] }
 0x2c0   :  { %v7803_v44 = vld [vmem:[#allocation4 + $0x618] sm:$0xf]  ;;  %v8252_v38 = vor.u32 %v10656_v31, %v8251_v59  ;;  %4123 = vmatpush.bf16.msra.mxu2 %v7548_v58 }
 0x2c1   :  { %v8539_v40 = vld [vmem:[#allocation4 + $0xbd8] sm:$0xf]  ;;  %4110 = vmatmul.bf16.vlgmr.msra.gmra.mxu1 %v11538_v6 }
 0x2c2   :  { %v10728_v45 = vld [vmem:[#allocation4 + $0xbf4] sm:$0xf0]  ;;  %4145 = vmatpush.bf16.msrb.mxu0 %v8252_v38 }
 0x2c3   :  { %v10544_v36 = vld [vmem:[#allocation4 + $0x634] sm:$0xf0]  ;;  %v8540_v62 = vor.u32 %v10728_v45, %v8539_v40  ;;  %4124 = vmatmul.bf16.vlgmr.msra.gmra.mxu2 %v11536_v5 }
 0x2c4   :  { %v8795_v46 = vld [vmem:[#allocation4 + $0xdd8] sm:$0xf]  ;;  %v7804_v3 = vor.u32 %v10544_v36, %v7803_v44 }
 0x2c5   :  { %v10792_v50 = vld [vmem:[#allocation4 + $0xdf4] sm:$0xf0]  ;;  %4158 = vmatpush.bf16.msrb.mxu1 %v8540_v62 }
 0x2c6   :  { %v9051_v52 = vld [vmem:[#allocation4 + $0xfd8] sm:$0xf]  ;;  %v8796_v4 = vor.u32 %v10792_v50, %v8795_v46  ;;  %4137 = vmatpush.bf16.msra.mxu3 %v7804_v3 }
 0x2c7   :  { %v10856_v47 = vld [vmem:[#allocation4 + $0xff4] sm:$0xf0] }
 0x2c8   :  { %v8219_v60 = vld [vmem:[#allocation4 + $0x958] sm:$0xf]  ;;  %v9052_v56 = vor.u32 %v10856_v47, %v9051_v52  ;;  %4172 = vmatpush.bf16.msrb.mxu2 %v8796_v4  ;;  %v11672_v4 = vpop.f32.mrf.mxu0 }
 0x2c9   :  { %v10648_v1 = vld [vmem:[#allocation4 + $0x974] sm:$0xf0]  ;;  %4138 = vmatmul.bf16.vlgmr.msra.gmra.mxu3 %v11548_v16  ;;  %12010 = vst [vmem:[#allocation24_spill] sm:$0xff] %v11672_v4  ;;  %v8509_v4 = vld [vmem:[#allocation4 + $0xbb8] sm:$0xf0] }
 0x2ca   :  { %v8507_v7 = vld [vmem:[#allocation4 + $0xb98] sm:$0xf]  ;;  %v8220_v8 = vor.u32 %v10648_v1, %v8219_v60  ;;  %4186 = vmatpush.bf16.msrb.mxu3 %v9052_v56 }
 0x2cb   :  { %v10720_v9 = vld [vmem:[#allocation4 + $0xbb4] sm:$0xf0] }
 0x2cc   :  { %v8763_v10 = vld [vmem:[#allocation4 + $0xd98] sm:$0xf]  ;;  %v8508_v15 = vor.u32 %v10720_v9, %v8507_v7  ;;  %4146 = vmatpush.bf16.msrb.mxu0 %v8220_v8 }
 0x2cd   :  { %v10784_v32 = vld [vmem:[#allocation4 + $0xdb4] sm:$0xf0] }
 0x2ce   :  { %v9019_v18 = vld [vmem:[#allocation4 + $0xf98] sm:$0xf]  ;;  %v8764_v59 = vor.u32 %v10784_v32, %v8763_v10  ;;  %4159 = vmatpush.bf16.msrb.mxu1 %v8508_v15 }
 0x2cf   :  { %v10848_v11 = vld [vmem:[#allocation4 + $0xfb4] sm:$0xf0] }
 0x2d0   :  { %v8187_v27 = vld [vmem:[#allocation4 + $0x918] sm:$0xf]  ;;  %v9020_v44 = vor.u32 %v10848_v11, %v9019_v18  ;;  %4173 = vmatpush.bf16.msrb.mxu2 %v8764_v59 }
 0x2d1   :  { %v10640_v30 = vld [vmem:[#allocation4 + $0x934] sm:$0xf0] }
 0x2d2   :  { %v8475_v31 = vld [vmem:[#allocation4 + $0xb58] sm:$0xf]  ;;  %v8188_v50 = vor.u32 %v10640_v30, %v8187_v27  ;;  %4187 = vmatpush.bf16.msrb.mxu3 %v9020_v44 }
 0x2d3   :  { %v10712_v22 = vld [vmem:[#allocation4 + $0xb74] sm:$0xf0] }
 0x2d4   :  { %v8731_v40 = vld [vmem:[#allocation4 + $0xd58] sm:$0xf]  ;;  %v8476_v54 = vor.u32 %v10712_v22, %v8475_v31  ;;  %4147 = vmatpush.bf16.msrb.mxu0 %v8188_v50  ;;  %v11674_v31 = vpop.f32.mrf.mxu1  ;;  %v11676_v50 = vpop.f32.mrf.mxu2 }
 0x2d5   :  { %v10776_v45 = vld [vmem:[#allocation4 + $0xd74] sm:$0xf0]  ;;  %12011 = vst [vmem:[#allocation25_spill] sm:$0xff] %v11674_v31 }
 0x2d6   :  { %v8987_v36 = vld [vmem:[#allocation4 + $0xf58] sm:$0xf]  ;;  %v8732_v38 = vor.u32 %v10776_v45, %v8731_v40  ;;  %4160 = vmatpush.bf16.msrb.mxu1 %v8476_v54  ;;  %12012 = vst [vmem:[#allocation26_spill] sm:$0xff] %v11676_v50 }
 0x2d7   :  { %v10840_v46 = vld [vmem:[#allocation4 + $0xf74] sm:$0xf0] }
 0x2d8   :  { %v8155_v52 = vld [vmem:[#allocation4 + $0x8d8] sm:$0xf]  ;;  %v8988_v60 = vor.u32 %v10840_v46, %v8987_v36  ;;  %4174 = vmatpush.bf16.msrb.mxu2 %v8732_v38 }
 0x2d9   :  { %v10632_v47 = vld [vmem:[#allocation4 + $0x8f4] sm:$0xf0] }
 0x2da   :  { %v8443_v58 = vld [vmem:[#allocation4 + $0xb18] sm:$0xf]  ;;  %v8156_v56 = vor.u32 %v10632_v47, %v8155_v52  ;;  %4188 = vmatpush.bf16.msrb.mxu3 %v8988_v60  ;;  %v11678_v60 = vpop.f32.mrf.mxu0 }
 0x2db   :  { %v10704_v62 = vld [vmem:[#allocation4 + $0xb34] sm:$0xf0] }
 0x2dc   :  { %v8699_v1 = vld [vmem:[#allocation4 + $0xd18] sm:$0xf]  ;;  %v8444_v10 = vor.u32 %v10704_v62, %v8443_v58  ;;  %4148 = vmatpush.bf16.msrb.mxu0 %v8156_v56 }
 0x2dd   :  { %v10768_v3 = vld [vmem:[#allocation4 + $0xd34] sm:$0xf0] }
 0x2de   :  { %v8955_v7 = vld [vmem:[#allocation4 + $0xf18] sm:$0xf]  ;;  %v8700_v11 = vor.u32 %v10768_v3, %v8699_v1  ;;  %4161 = vmatpush.bf16.msrb.mxu1 %v8444_v10 }
 0x2df   :  { %v10832_v9 = vld [vmem:[#allocation4 + $0xf34] sm:$0xf0] }
 0x2e0   :  { %v8123_v32 = vld [vmem:[#allocation4 + $0x898] sm:$0xf]  ;;  %v8956_v27 = vor.u32 %v10832_v9, %v8955_v7  ;;  %4175 = vmatpush.bf16.msrb.mxu2 %v8700_v11 }
 0x2e1   :  { %v10624_v18 = vld [vmem:[#allocation4 + $0x8b4] sm:$0xf0] }
 0x2e2   :  { %v8411_v8 = vld [vmem:[#allocation4 + $0xad8] sm:$0xf]  ;;  %v8124_v40 = vor.u32 %v10624_v18, %v8123_v32  ;;  %4189 = vmatpush.bf16.msrb.mxu3 %v8956_v27  ;;  %v11680_v18 = vpop.f32.mrf.mxu3  ;;  %v7261_v27 = vld [vmem:[#allocation4 + $0x1f8] sm:$0xf0] }
 0x2e3   :  { %v10696_v15 = vld [vmem:[#allocation4 + $0xaf4] sm:$0xf0]  ;;  %12013 = vst [vmem:[#allocation27_spill] sm:$0xff] %v11680_v18 }
 0x2e4   :  { %v8667_v30 = vld [vmem:[#allocation4 + $0xcd8] sm:$0xf]  ;;  %v8412_v45 = vor.u32 %v10696_v15, %v8411_v8  ;;  %4149 = vmatpush.bf16.msrb.mxu0 %v8124_v40  ;;  %v10404_v15 = vld [vmem:[#allocation4 + $0x1dc] sm:$0xf] }
 0x2e5   :  { %v10760_v59 = vld [vmem:[#allocation4 + $0xcf4] sm:$0xf0] }
 0x2e6   :  { %v8923_v22 = vld [vmem:[#allocation4 + $0xed8] sm:$0xf]  ;;  %v8668_v54 = vor.u32 %v10760_v59, %v8667_v30  ;;  %4162 = vmatpush.bf16.msrb.mxu1 %v8412_v45 }
 0x2e7   :  { %v10824_v44 = vld [vmem:[#allocation4 + $0xef4] sm:$0xf0] }
 0x2e8   :  { %v8091_v36 = vld [vmem:[#allocation4 + $0x858] sm:$0xf]  ;;  %v8924_v38 = vor.u32 %v10824_v44, %v8923_v22  ;;  %4176 = vmatpush.bf16.msrb.mxu2 %v8668_v54  ;;  %v11682_v44 = vpop.f32.mrf.mxu1  ;;  %v7264_v54 = vor.u32 %v10404_v15, %v7261_v27  ;;  %v8029_v15 = vld [vmem:[#allocation4 + $0x7f8] sm:$0xf0] }
 0x2e9   :  { %v10616_v46 = vld [vmem:[#allocation4 + $0x874] sm:$0xf0] }
 0x2ea   :  { %v8379_v52 = vld [vmem:[#allocation4 + $0xa98] sm:$0xf]  ;;  %v8092_v7 = vor.u32 %v10616_v46, %v8091_v36  ;;  %4190 = vmatpush.bf16.msrb.mxu3 %v8924_v38 }
 0x2eb   :  { %v10688_v47 = vld [vmem:[#allocation4 + $0xab4] sm:$0xf0] }
 0x2ec   :  { %v8635_v58 = vld [vmem:[#allocation4 + $0xc98] sm:$0xf]  ;;  %v8380_v9 = vor.u32 %v10688_v47, %v8379_v52  ;;  %4150 = vmatpush.bf16.msrb.mxu0 %v8092_v7  ;;  %v10468_v7 = vld [vmem:[#allocation4 + $0x3dc] sm:$0xf] }
 0x2ed   :  { %v10752_v62 = vld [vmem:[#allocation4 + $0xcb4] sm:$0xf0] }
 0x2ee   :  { %v8891_v1 = vld [vmem:[#allocation4 + $0xe98] sm:$0xf]  ;;  %v8636_v11 = vor.u32 %v10752_v62, %v8635_v58  ;;  %4163 = vmatpush.bf16.msrb.mxu1 %v8380_v9  ;;  %v11684_v58 = vpop.f32.mrf.mxu2  ;;  %v10532_v9 = vld [vmem:[#allocation4 + $0x5dc] sm:$0xf] }
 0x2ef   :  { %v10816_v3 = vld [vmem:[#allocation4 + $0xeb4] sm:$0xf0] }
 0x2f0   :  { %v8347_v56 = vld [vmem:[#allocation4 + $0xa58] sm:$0xf]  ;;  %v8892_v30 = vor.u32 %v10816_v3, %v8891_v1  ;;  %4177 = vmatpush.bf16.msrb.mxu2 %v8636_v11  ;;  %v10396_v1 = vld [vmem:[#allocation4 + $0x19c] sm:$0xf]  ;;  %v11686_v11 = vpop.f32.mrf.mxu0 }
 0x2f1   :  { %v8059_v10 = vld [vmem:[#allocation4 + $0x818] sm:$0xf]  ;;  %v7229_v3 = vld [vmem:[#allocation4 + $0x1b8] sm:$0xf0] }
 0x2f2   :  { %v10608_v32 = vld [vmem:[#allocation4 + $0x834] sm:$0xf0]  ;;  %4191 = vmatpush.bf16.msrb.mxu3 %v8892_v30  ;;  %v7232_v27 = vor.u32 %v10396_v1, %v7229_v3  ;;  %v10588_v1 = vld [vmem:[#allocation4 + $0x79c] sm:$0xf] }
 0x2f3   :  { %v10680_v8 = vld [vmem:[#allocation4 + $0xa74] sm:$0xf0]  ;;  %v8060_v36 = vor.u32 %v10608_v32, %v8059_v10  ;;  %v7997_v3 = vld [vmem:[#allocation4 + $0x7b8] sm:$0xf0] }
 0x2f4   :  { %v8603_v59 = vld [vmem:[#allocation4 + $0xc58] sm:$0xf]  ;;  %v8348_v46 = vor.u32 %v10680_v8, %v8347_v56  ;;  %v7773_v56 = vld [vmem:[#allocation4 + $0x5f8] sm:$0xf0] }
 0x2f5   :  { %v10744_v22 = vld [vmem:[#allocation4 + $0xc74] sm:$0xf0]  ;;  %4151 = vmatpush.bf16.msrb.mxu0 %v8060_v36  ;;  %v10596_v8 = vld [vmem:[#allocation4 + $0x7dc] sm:$0xf]  ;;  %v7776_v50 = vor.u32 %v10532_v9, %v7773_v56  ;;  %v8000_v9 = vor.u32 %v10588_v1, %v7997_v3 }
 0x2f6   :  { %v8859_v40 = vld [vmem:[#allocation4 + $0xe58] sm:$0xf]  ;;  %v8604_v62 = vor.u32 %v10744_v22, %v8603_v59  ;;  %4164 = vmatpush.bf16.msrb.mxu1 %v8348_v46  ;;  %v11688_v59 = vpop.f32.mrf.mxu3  ;;  %v7520_v22 = vor.u32 %v10468_v7, %v7517_v63  ;;  %v10460_v46 = vld [vmem:[#allocation4 + $0x39c] sm:$0xf] }
 0x2f7   :  { %v10808_v45 = vld [vmem:[#allocation4 + $0xe74] sm:$0xf0]  ;;  %12014 = vst [vmem:[#allocation28_spill] sm:$0xff] %v11688_v59  ;;  %v7165_v63 = vld [vmem:[#allocation4 + $0x138] sm:$0xf0] }
 0x2f8   :  { %v8315_v52 = vld [vmem:[#allocation4 + $0xa18] sm:$0xf]  ;;  %v8860_v26 = vor.u32 %v10808_v45, %v8859_v40  ;;  %4178 = vmatpush.bf16.msrb.mxu2 %v8604_v62  ;;  %v10388_v40 = vld [vmem:[#allocation4 + $0x15c] sm:$0xf]  ;;  %4152 = vmatmul.bf16.vlgmr.msrb.gmra.mxu0 %v11550_v17  ;;  %v11691_v62 = vpop.f32.mrf.mxu1 }
 0x2f9   :  { %v10672_v47 = vld [vmem:[#allocation4 + $0xa34] sm:$0xf0]  ;;  %4200 = vmatpush.bf16.msra.mxu0 %v7264_v54  ;;  %v7197_v45 = vld [vmem:[#allocation4 + $0x178] sm:$0xf0] }
 0x2fa   :  { %v10736_v38 = vld [vmem:[#allocation4 + $0xc34] sm:$0xf0]  ;;  %v8316_v32 = vor.u32 %v10672_v47, %v8315_v52  ;;  %4192 = vmatpush.bf16.msrb.mxu3 %v8860_v26  ;;  %v7485_v52 = vld [vmem:[#allocation4 + $0x3b8] sm:$0xf0]  ;;  %v8032_v47 = vor.u32 %v10596_v8, %v8029_v15  ;;  %v7200_v31 = vor.u32 %v10388_v40, %v7197_v45 }
 0x2fb   :  { %v8827_v18 = vld [vmem:[#allocation4 + $0xe18] sm:$0xf]  ;;  %v8572_v30 = vor.u32 %v10736_v38, %v8571_v24  ;;  %v10524_v54 = vld [vmem:[#allocation4 + $0x59c] sm:$0xf]  ;;  %v7488_v24 = vor.u32 %v10460_v46, %v7485_v52  ;;  %v11700_v46 = vpop.f32.mrf.mxu0 }
 0x2fc   :  { %v10800_v10 = vld [vmem:[#allocation4 + $0xe34] sm:$0xf0]  ;;  %4165 = vmatpush.bf16.msrb.mxu1 %v8316_v32  ;;  %v10380_v26 = vld [vmem:[#allocation4 + $0x11c] sm:$0xf]  ;;  %12015 = vst [vmem:[#allocation29_spill] sm:$0xff] %v11700_v46 }
 0x2fd   :  { %v8828_v36 = vor.u32 %v10800_v10, %v8827_v18  ;;  %4201 = vmatpush.bf16.msra.mxu0 %v7232_v27  ;;  %4179 = vmatpush.bf16.msrb.mxu2 %v8572_v30  ;;  %v7744_v18 = vor.u32 %v10524_v54, %v7741_v35  ;;  %v10452_v38 = vld [vmem:[#allocation4 + $0x35c] sm:$0xf]  ;;  %v11693_v10 = vpop.f32.mrf.mxu2  ;;  %v7168_v27 = vor.u32 %v10380_v26, %v7165_v63 }
 0x2fe   :  { %v7453_v7 = vld [vmem:[#allocation4 + $0x378] sm:$0xf0] }
 0x2ff   :  { %4193 = vmatpush.bf16.msrb.mxu3 %v8828_v36  ;;  %4166 = vmatmul.bf16.vlgmr.msrb.gmra.mxu1 %v11558_v43  ;;  %v10516_v56 = vld [vmem:[#allocation4 + $0x55c] sm:$0xf]  ;;  %v7456_v35 = vor.u32 %v10452_v38, %v7453_v7  ;;  %v11698_v36 = vpop.f32.mrf.mxu3 }
 0x300   :  { %4214 = vmatpush.bf16.msra.mxu1 %v7520_v22  ;;  %v7709_v32 = vld [vmem:[#allocation4 + $0x578] sm:$0xf0]  ;;  %4180 = vmatmul.bf16.vlgmr.msrb.gmra.mxu2 %v11556_v42 }
 0x301   :  { %4228 = vmatpush.bf16.msra.mxu2 %v7776_v50  ;;  %4202 = vmatpush.bf16.msra.mxu0 %v7200_v31  ;;  %v10580_v8 = vld [vmem:[#allocation4 + $0x75c] sm:$0xf]  ;;  %v7712_v22 = vor.u32 %v10516_v56, %v7709_v32  ;;  %v11702_v56 = vpop.f32.mrf.mxu1 }
 0x302   :  { %v7965_v15 = vld [vmem:[#allocation4 + $0x778] sm:$0xf0]  ;;  %4194 = vmatmul.bf16.vlgmr.msrb.gmra.mxu3 %v11563_v51  ;;  %12016 = vst [vmem:[#allocation30_spill] sm:$0xff] %v11702_v56 }
 0x303   :  { %4242 = vmatpush.bf16.msra.mxu3 %v8032_v47  ;;  %v10372_v50 = vld [vmem:[#allocation4 + $0xdc] sm:$0xf]  ;;  %v7968_v52 = vor.u32 %v10580_v8, %v7965_v15  ;;  %v11706_v56 = vpop.f32.mrf.mxu0 }
 0x304   :  { %4215 = vmatpush.bf16.msra.mxu1 %v7488_v24  ;;  %v7133_v30 = vld [vmem:[#allocation4 + $0xf8] sm:$0xf0]  ;;  %12018 = vst [vmem:[#allocation32_spill] sm:$0xff] %v11706_v56 }
 0x305   :  { %4229 = vmatpush.bf16.msra.mxu2 %v7744_v18  ;;  %v10444_v40 = vld [vmem:[#allocation4 + $0x31c] sm:$0xf]  ;;  %4203 = vmatpush.bf16.msra.mxu0 %v7168_v27  ;;  %v7136_v3 = vor.u32 %v10372_v50, %v7133_v30  ;;  %v11704_v33 = vpop.f32.mrf.mxu2 }
 0x306   :  { %v7421_v45 = vld [vmem:[#allocation4 + $0x338] sm:$0xf0]  ;;  %12017 = vst [vmem:[#allocation31_spill] sm:$0xff] %v11704_v33 }
 0x307   :  { %4243 = vmatpush.bf16.msra.mxu3 %v8000_v9  ;;  %v10508_v31 = vld [vmem:[#allocation4 + $0x51c] sm:$0xf]  ;;  %v7424_v24 = vor.u32 %v10444_v40, %v7421_v45 }
 0x308   :  { %v7677_v47 = vld [vmem:[#allocation4 + $0x538] sm:$0xf0]  ;;  %4216 = vmatpush.bf16.msra.mxu1 %v7456_v35 }
 0x309   :  { %v10572_v54 = vld [vmem:[#allocation4 + $0x71c] sm:$0xf]  ;;  %4230 = vmatpush.bf16.msra.mxu2 %v7712_v22  ;;  %v7680_v18 = vor.u32 %v10508_v31, %v7677_v47  ;;  %4204 = vmatpush.bf16.msra.mxu0 %v7136_v3  ;;  %v11710_v12 = vpop.f32.mrf.mxu1 }
 0x30a   :  { %v7933_v1 = vld [vmem:[#allocation4 + $0x738] sm:$0xf0]  ;;  %12020 = vst [vmem:[#allocation34_spill] sm:$0xff] %v11710_v12 }
 0x30b   :  { %v10364_v26 = vld [vmem:[#allocation4 + $0x9c] sm:$0xf]  ;;  %4244 = vmatpush.bf16.msra.mxu3 %v7968_v52  ;;  %v7936_v32 = vor.u32 %v10572_v54, %v7933_v1 }
 0x30c   :  { %v7101_v63 = vld [vmem:[#allocation4 + $0xb8] sm:$0xf0]  ;;  %4217 = vmatpush.bf16.msra.mxu1 %v7424_v24 }
 0x30d   :  { %v10436_v38 = vld [vmem:[#allocation4 + $0x2dc] sm:$0xf]  ;;  %v7104_v46 = vor.u32 %v10364_v26, %v7101_v63  ;;  %4231 = vmatpush.bf16.msra.mxu2 %v7680_v18  ;;  %v11708_v26 = vpop.f32.mrf.mxu3 }
 0x30e   :  { %v7389_v7 = vld [vmem:[#allocation4 + $0x2f8] sm:$0xf0]  ;;  %12019 = vst [vmem:[#allocation33_spill] sm:$0xff] %v11708_v26 }
 0x30f   :  { %v10500_v9 = vld [vmem:[#allocation4 + $0x4dc] sm:$0xf]  ;;  %v7392_v35 = vor.u32 %v10436_v38, %v7389_v7  ;;  %4245 = vmatpush.bf16.msra.mxu3 %v7936_v32  ;;  %4205 = vmatpush.bf16.msra.mxu0 %v7104_v46 }
 0x310   :  { %v7645_v8 = vld [vmem:[#allocation4 + $0x4f8] sm:$0xf0] }
 0x311   :  { %v10564_v15 = vld [vmem:[#allocation4 + $0x6dc] sm:$0xf]  ;;  %v7648_v22 = vor.u32 %v10500_v9, %v7645_v8  ;;  %4218 = vmatpush.bf16.msra.mxu1 %v7392_v35 }
 0x312   :  { %v7901_v27 = vld [vmem:[#allocation4 + $0x6f8] sm:$0xf0] }
 0x313   :  { %v10356_v50 = vld [vmem:[#allocation4 + $0x5c] sm:$0xf]  ;;  %v7904_v31 = vor.u32 %v10564_v15, %v7901_v27  ;;  %4232 = vmatpush.bf16.msra.mxu2 %v7648_v22 }
 0x314   :  { %v7069_v30 = vld [vmem:[#allocation4 + $0x78] sm:$0xf0] }
 0x315   :  { %v10428_v40 = vld [vmem:[#allocation4 + $0x29c] sm:$0xf]  ;;  %v7072_v3 = vor.u32 %v10356_v50, %v7069_v30  ;;  %4246 = vmatpush.bf16.msra.mxu3 %v7904_v31 }
 0x316   :  { %v7357_v45 = vld [vmem:[#allocation4 + $0x2b8] sm:$0xf0] }
 0x317   :  { %v10492_v52 = vld [vmem:[#allocation4 + $0x49c] sm:$0xf]  ;;  %v7360_v24 = vor.u32 %v10428_v40, %v7357_v45  ;;  %4206 = vmatpush.bf16.msra.mxu0 %v7072_v3 }
 0x318   :  { %v7613_v47 = vld [vmem:[#allocation4 + $0x4b8] sm:$0xf0] }
 0x319   :  { %v10556_v54 = vld [vmem:[#allocation4 + $0x69c] sm:$0xf]  ;;  %v7616_v7 = vor.u32 %v10492_v52, %v7613_v47  ;;  %4219 = vmatpush.bf16.msra.mxu1 %v7360_v24 }
 0x31a   :  { %v7869_v1 = vld [vmem:[#allocation4 + $0x6b8] sm:$0xf0] }
 0x31b   :  { %v10420_v63 = vld [vmem:[#allocation4 + $0x25c] sm:$0xf]  ;;  %v7872_v15 = vor.u32 %v10556_v54, %v7869_v1  ;;  %4233 = vmatpush.bf16.msra.mxu2 %v7616_v7  ;;  %v11712_v54 = vpop.f32.mrf.mxu2 }
 0x31c   :  { %v10348_v38 = vld [vmem:[#allocation4 + $0x1c] sm:$0xf]  ;;  %12021 = vst [vmem:[#allocation35_spill] sm:$0xff] %v11712_v54 }
 0x31d   :  { %v7037_v18 = vld [vmem:[#allocation4 + $0x38] sm:$0xf0]  ;;  %4247 = vmatpush.bf16.msra.mxu3 %v7872_v15 }
 0x31e   :  { %v7325_v9 = vld [vmem:[#allocation4 + $0x278] sm:$0xf0]  ;;  %v7040_v33 = vor.u32 %v10348_v38, %v7037_v18 }
 0x31f   :  { %v10660_v32 = vld [vmem:[#allocation4 + $0x9dc] sm:$0xf]  ;;  %v7328_v35 = vor.u32 %v10420_v63, %v7325_v9  ;;  %v11714_v9 = vpop.f32.mrf.mxu0 }
 0x320   :  { %v8285_v8 = vld [vmem:[#allocation4 + $0x9f8] sm:$0xf0]  ;;  %4207 = vmatpush.bf16.msra.mxu0 %v7040_v33 }
 0x321   :  { %v10484_v46 = vld [vmem:[#allocation4 + $0x45c] sm:$0xf]  ;;  %v8288_v22 = vor.u32 %v10660_v32, %v8285_v8  ;;  %4220 = vmatpush.bf16.msra.mxu1 %v7328_v35 }
 0x322   :  { %v7581_v27 = vld [vmem:[#allocation4 + $0x478] sm:$0xf0] }
 0x323   :  { %v10548_v50 = vld [vmem:[#allocation4 + $0x65c] sm:$0xf]  ;;  %v7584_v52 = vor.u32 %v10484_v46, %v7581_v27  ;;  %4208 = vmatmul.bf16.vlgmr.msra.gmra.mxu0 %v11512_v2 }
 0x324   :  { %v7837_v30 = vld [vmem:[#allocation4 + $0x678] sm:$0xf0]  ;;  %4256 = vmatpush.bf16.msrb.mxu0 %v8288_v22  ;;  %v11719_v22 = vpop.f32.mrf.mxu1 }
 0x325   :  { %v10412_v40 = vld [vmem:[#allocation4 + $0x21c] sm:$0xf]  ;;  %v7840_v1 = vor.u32 %v10548_v50, %v7837_v30  ;;  %4234 = vmatpush.bf16.msra.mxu2 %v7584_v52  ;;  %v11716_v30 = vpop.f32.mrf.mxu3 }
 0x326   :  { %v7293_v45 = vld [vmem:[#allocation4 + $0x238] sm:$0xf0] }
 0x327   :  { %v10476_v26 = vld [vmem:[#allocation4 + $0x41c] sm:$0xf]  ;;  %v7296_v32 = vor.u32 %v10412_v40, %v7293_v45  ;;  %4248 = vmatpush.bf16.msra.mxu3 %v7840_v1  ;;  %v11721_v1 = vpop.f32.mrf.mxu2 }
 0x328   :  { %v7549_v47 = vld [vmem:[#allocation4 + $0x438] sm:$0xf0] }
 0x329   :  { %v10652_v59 = vld [vmem:[#allocation4 + $0x99c] sm:$0xf]  ;;  %v7552_v27 = vor.u32 %v10476_v26, %v7549_v47  ;;  %4221 = vmatpush.bf16.msra.mxu1 %v7296_v32 }
 0x32a   :  { %v8253_v31 = vld [vmem:[#allocation4 + $0x9b8] sm:$0xf0] }
 0x32b   :  { %v10540_v3 = vld [vmem:[#allocation4 + $0x61c] sm:$0xf]  ;;  %v8256_v46 = vor.u32 %v10652_v59, %v8253_v31  ;;  %4235 = vmatpush.bf16.msra.mxu2 %v7552_v27 }
 0x32c   :  { %v10724_v56 = vld [vmem:[#allocation4 + $0xbdc] sm:$0xf]  ;;  %4222 = vmatmul.bf16.vlgmr.msra.gmra.mxu1 %v11538_v6 }
 0x32d   :  { %v8541_v38 = vld [vmem:[#allocation4 + $0xbf8] sm:$0xf0]  ;;  %4257 = vmatpush.bf16.msrb.mxu0 %v8256_v46  ;;  %v11728_v46 = vpop.f32.mrf.mxu3 }
 0x32e   :  { %v7805_v18 = vld [vmem:[#allocation4 + $0x638] sm:$0xf0]  ;;  %v8544_v54 = vor.u32 %v10724_v56, %v8541_v38  ;;  %4236 = vmatmul.bf16.vlgmr.msra.gmra.mxu2 %v11536_v5 }
 0x32f   :  { %v10788_v24 = vld [vmem:[#allocation4 + $0xddc] sm:$0xf]  ;;  %v7808_v33 = vor.u32 %v10540_v3, %v7805_v18 }
 0x330   :  { %v8797_v63 = vld [vmem:[#allocation4 + $0xdf8] sm:$0xf0]  ;;  %4270 = vmatpush.bf16.msrb.mxu1 %v8544_v54 }
 0x331   :  { %v10852_v7 = vld [vmem:[#allocation4 + $0xfdc] sm:$0xf]  ;;  %v8800_v12 = vor.u32 %v10788_v24, %v8797_v63  ;;  %4249 = vmatpush.bf16.msra.mxu3 %v7808_v33 }
 0x332   :  { %v9053_v8 = vld [vmem:[#allocation4 + $0xff8] sm:$0xf0] }
 0x333   :  { %v10644_v15 = vld [vmem:[#allocation4 + $0x95c] sm:$0xf]  ;;  %v9056_v35 = vor.u32 %v10852_v7, %v9053_v8  ;;  %4284 = vmatpush.bf16.msrb.mxu2 %v8800_v12  ;;  %v11726_v8 = vpop.f32.mrf.mxu0 }
 0x334   :  { %v8221_v50 = vld [vmem:[#allocation4 + $0x978] sm:$0xf0]  ;;  %4250 = vmatmul.bf16.vlgmr.msra.gmra.mxu3 %v11548_v16 }
 0x335   :  { %v10716_v51 = vld [vmem:[#allocation4 + $0xb9c] sm:$0xf]  ;;  %v8224_v26 = vor.u32 %v10644_v15, %v8221_v50  ;;  %4298 = vmatpush.bf16.msrb.mxu3 %v9056_v35  ;;  %v12022_v35 = vperm.slane %v11578_v13, 0 }
 0x336   :  { %v10780_v40 = vld [vmem:[#allocation4 + $0xd9c] sm:$0xf]  ;;  %v8512_v52 = vor.u32 %v10716_v51, %v8509_v4 }
 0x337   :  { %v8765_v45 = vld [vmem:[#allocation4 + $0xdb8] sm:$0xf0]  ;;  %4258 = vmatpush.bf16.msrb.mxu0 %v8224_v26 }
 0x338   :  { %v10844_v59 = vld [vmem:[#allocation4 + $0xf9c] sm:$0xf]  ;;  %v8768_v2 = vor.u32 %v10780_v40, %v8765_v45  ;;  %4271 = vmatpush.bf16.msrb.mxu1 %v8512_v52  ;;  %v3428_v40 = vadd.f32 %v11586_v53, %v12022_v35 }
 0x339   :  { %v9021_v56 = vld [vmem:[#allocation4 + $0xfb8] sm:$0xf0] }
 0x33a   :  { %v10636_v47 = vld [vmem:[#allocation4 + $0x91c] sm:$0xf]  ;;  %v9024_v18 = vor.u32 %v10844_v59, %v9021_v56  ;;  %4285 = vmatpush.bf16.msrb.mxu2 %v8768_v2  ;;  %v11736_v2 = vpop.f32.mrf.mxu1 }
 0x33b   :  { %v8189_v31 = vld [vmem:[#allocation4 + $0x938] sm:$0xf0] }
 0x33c   :  { %v10708_v3 = vld [vmem:[#allocation4 + $0xb5c] sm:$0xf]  ;;  %v8192_v4 = vor.u32 %v10636_v47, %v8189_v31  ;;  %4299 = vmatpush.bf16.msrb.mxu3 %v9024_v18  ;;  %v12023_v47 = vperm.slane %v11578_v13, 1 }
 0x33d   :  { %v8477_v38 = vld [vmem:[#allocation4 + $0xb78] sm:$0xf0] }
 0x33e   :  { %v10772_v24 = vld [vmem:[#allocation4 + $0xd5c] sm:$0xf]  ;;  %v8480_v32 = vor.u32 %v10708_v3, %v8477_v38  ;;  %4259 = vmatpush.bf16.msrb.mxu0 %v8192_v4  ;;  %v3540_v31 = vadd.f32 %v11614_v23, %v12023_v47 }
 0x33f   :  { %v8733_v63 = vld [vmem:[#allocation4 + $0xd78] sm:$0xf0] }
 0x340   :  { %v10836_v54 = vld [vmem:[#allocation4 + $0xf5c] sm:$0xf]  ;;  %v8736_v27 = vor.u32 %v10772_v24, %v8733_v63  ;;  %4272 = vmatpush.bf16.msrb.mxu1 %v8480_v32 }
 0x341   :  { %v8989_v51 = vld [vmem:[#allocation4 + $0xf78] sm:$0xf0] }
 0x342   :  { %v10628_v12 = vld [vmem:[#allocation4 + $0x8dc] sm:$0xf]  ;;  %v8992_v5 = vor.u32 %v10836_v54, %v8989_v51  ;;  %4286 = vmatpush.bf16.msrb.mxu2 %v8736_v27  ;;  %v3442_v54 = vadd.f32 %v11590_v55, %v3428_v40  ;;  %v11739_v51 = vpop.f32.mrf.mxu2  ;;  %v3554_v27 = vadd.f32 %v11618_v61, %v3540_v31 }
 0x343   :  { %v8157_v7 = vld [vmem:[#allocation4 + $0x8f8] sm:$0xf0] }
 0x344   :  { %v10700_v15 = vld [vmem:[#allocation4 + $0xb1c] sm:$0xf]  ;;  %v8160_v59 = vor.u32 %v10628_v12, %v8157_v7  ;;  %4300 = vmatpush.bf16.msrb.mxu3 %v8992_v5  ;;  %v3456_v40 = vadd.f32 %v11593_v20, %v3442_v54  ;;  %v12024_v20 = vperm.slane %v11578_v13, 2  ;;  %v9171_v54 = vld [vmem:[#allocation8 + $0xe0] sm:$0xf] }
 0x345   :  { %v8445_v6 = vld [vmem:[#allocation4 + $0xb38] sm:$0xf0] }
 0x346   :  { %v10764_v50 = vld [vmem:[#allocation4 + $0xd1c] sm:$0xf]  ;;  %v8448_v56 = vor.u32 %v10700_v15, %v8445_v6  ;;  %4260 = vmatpush.bf16.msrb.mxu0 %v8160_v59  ;;  %v11746_v59 = vpop.f32.mrf.mxu3 }
 0x347   :  { %v8701_v33 = vld [vmem:[#allocation4 + $0xd38] sm:$0xf0] }
 0x348   :  { %v10828_v16 = vld [vmem:[#allocation4 + $0xf1c] sm:$0xf]  ;;  %v8704_v3 = vor.u32 %v10764_v50, %v8701_v33  ;;  %4273 = vmatpush.bf16.msrb.mxu1 %v8448_v56  ;;  %v11748_v56 = vpop.f32.mrf.mxu0 }
 0x349   :  { %v8957_v45 = vld [vmem:[#allocation4 + $0xf38] sm:$0xf0] }
 0x34a   :  { %v10620_v26 = vld [vmem:[#allocation4 + $0x89c] sm:$0xf]  ;;  %v8960_v53 = vor.u32 %v10828_v16, %v8957_v45  ;;  %4287 = vmatpush.bf16.msrb.mxu2 %v8704_v3  ;;  %v11743_v16 = vld [vmem:[#allocation6] sm:$0xff] }
 0x34b   :  { %v8125_v52 = vld [vmem:[#allocation4 + $0x8b8] sm:$0xf0]  ;;  %v803_v45 = vperm.slane %v11743_v16, 3 }
 0x34c   :  { %v10692_v38 = vld [vmem:[#allocation4 + $0xadc] sm:$0xf]  ;;  %v8128_v12 = vor.u32 %v10620_v26, %v8125_v52  ;;  %4301 = vmatpush.bf16.msrb.mxu3 %v8960_v53  ;;  %v3652_v53 = vadd.f32 %v11645_v0, %v12024_v20 }
 0x34d   :  { %v8413_v18 = vld [vmem:[#allocation4 + $0xaf8] sm:$0xf0] }
 0x34e   :  { %v10756_v24 = vld [vmem:[#allocation4 + $0xcdc] sm:$0xf]  ;;  %v8416_v23 = vor.u32 %v10692_v38, %v8413_v18  ;;  %4261 = vmatpush.bf16.msrb.mxu0 %v8128_v12  ;;  %v3568_v18 = vadd.f32 %v11622_v25, %v3554_v27 }
 0x34f   :  { %v8669_v63 = vld [vmem:[#allocation4 + $0xcf8] sm:$0xf0] }
 0x350   :  { %v10820_v4 = vld [vmem:[#allocation4 + $0xedc] sm:$0xf]  ;;  %v8672_v6 = vor.u32 %v10756_v24, %v8669_v63  ;;  %4274 = vmatpush.bf16.msrb.mxu1 %v8416_v23 }
 0x351   :  { %v8925_v32 = vld [vmem:[#allocation4 + $0xef8] sm:$0xf0] }
 0x352   :  { %v10612_v7 = vld [vmem:[#allocation4 + $0x85c] sm:$0xf]  ;;  %v8928_v33 = vor.u32 %v10820_v4, %v8925_v32  ;;  %4288 = vmatpush.bf16.msrb.mxu2 %v8672_v6  ;;  %v10887_v4 = vld [vmem:[#allocation8 + $0xec] sm:$0xf0]  ;;  %v3764_v32 = vadd.f32 %v11686_v11, %v803_v45  ;;  %v3582_v11 = vadd.f32 %v11624_v34, %v3568_v18  ;;  %v3762_v34 = vadd.f32 %v11678_v60, %v803_v45  ;;  %v9427_v18 = vld [vmem:[#allocation8 + $0x2e0] sm:$0xf] }
 0x353   :  { %v8093_v15 = vld [vmem:[#allocation4 + $0x878] sm:$0xf0]  ;;  %v9139_v45 = vld [vmem:[#allocation8 + $0xa0] sm:$0xf] }
 0x354   :  { %v10684_v5 = vld [vmem:[#allocation4 + $0xa9c] sm:$0xf]  ;;  %v8096_v52 = vor.u32 %v10612_v7, %v8093_v15  ;;  %4302 = vmatpush.bf16.msrb.mxu3 %v8928_v33  ;;  %v3470_v15 = vadd.f32 %v11595_v28, %v3456_v40  ;;  %v3666_v33 = vadd.f32 %v11648_v41, %v3652_v53  ;;  %v3778_v20 = vadd.f32 %v11691_v62, %v3764_v32  ;;  %v10951_v53 = vld [vmem:[#allocation8 + $0x2ec] sm:$0xf0] }
 0x355   :  { %v8381_v50 = vld [vmem:[#allocation4 + $0xab8] sm:$0xf0]  ;;  %v3596_v62 = vadd.f32 %v11629_v29, %v3582_v11  ;;  %v10915_v29 = vld [vmem:[#allocation8 + $0x1cc] sm:$0xf0] }
 0x356   :  { %v10748_v35 = vld [vmem:[#allocation4 + $0xc9c] sm:$0xf]  ;;  %v8384_v47 = vor.u32 %v10684_v5, %v8381_v50  ;;  %v11756_v5 = vpop.f32.mrf.mxu1  ;;  %4262 = vmatpush.bf16.msrb.mxu0 %v8096_v52  ;;  %v10883_v52 = vld [vmem:[#allocation8 + $0xcc] sm:$0xf0]  ;;  %v3680_v32 = vadd.f32 %v11654_v21, %v3666_v33 }
 0x357   :  { %v8637_v55 = vld [vmem:[#allocation4 + $0xcb8] sm:$0xf0]  ;;  %v10947_v11 = vld [vmem:[#allocation8 + $0x2cc] sm:$0xf0] }
 0x358   :  { %v10812_v61 = vld [vmem:[#allocation4 + $0xe9c] sm:$0xf]  ;;  %v8640_v24 = vor.u32 %v10748_v35, %v8637_v55  ;;  %4275 = vmatpush.bf16.msrb.mxu1 %v8384_v47  ;;  %v9172_v55 = vor.u32 %v10887_v4, %v9171_v54  ;;  %v9555_v54 = vld [vmem:[#allocation8 + $0x3e0] sm:$0xf]  ;;  %v10983_v4 = vld [vmem:[#allocation8 + $0x3ec] sm:$0xf0] }
 0x359   :  { %v8893_v26 = vld [vmem:[#allocation4 + $0xeb8] sm:$0xf0]  ;;  %v10979_v33 = vld [vmem:[#allocation8 + $0x3cc] sm:$0xf0] }
 0x35a   :  { %v10676_v31 = vld [vmem:[#allocation4 + $0xa5c] sm:$0xf]  ;;  %v8896_v12 = vor.u32 %v10812_v61, %v8893_v26  ;;  %v11760_v61 = vpop.f32.mrf.mxu2  ;;  %4289 = vmatpush.bf16.msrb.mxu2 %v8640_v24  ;;  %v9155_v26 = vld [vmem:[#allocation8 + $0xc0] sm:$0xf] }
 0x35b   :  { %v10604_v3 = vld [vmem:[#allocation4 + $0x81c] sm:$0xf] }
 0x35c   :  { %v8061_v38 = vld [vmem:[#allocation4 + $0x838] sm:$0xf0]  ;;  %4303 = vmatpush.bf16.msrb.mxu3 %v8896_v12  ;;  %v11767_v12 = vpop.f32.mrf.mxu0 }
 0x35d   :  { %v8349_v63 = vld [vmem:[#allocation4 + $0xa78] sm:$0xf0]  ;;  %v8064_v27 = vor.u32 %v10604_v3, %v8061_v38  ;;  %v9299_v3 = vld [vmem:[#allocation8 + $0x1e0] sm:$0xf]  ;;  %v10919_v38 = vld [vmem:[#allocation8 + $0x1ec] sm:$0xf0] }
 0x35e   :  { %v10740_v23 = vld [vmem:[#allocation4 + $0xc5c] sm:$0xf]  ;;  %v8352_v0 = vor.u32 %v10676_v31, %v8349_v63  ;;  %v3484_v63 = vadd.f32 %v11601_v49, %v3470_v15  ;;  %v9300_v60 = vor.u32 %v10919_v38, %v9299_v3  ;;  %v10879_v15 = vld [vmem:[#allocation8 + $0xac] sm:$0xf0] }
 0x35f   :  { %v8605_v7 = vld [vmem:[#allocation4 + $0xc78] sm:$0xf0]  ;;  %4263 = vmatpush.bf16.msrb.mxu0 %v8064_v27  ;;  %v9428_v27 = vor.u32 %v10951_v53, %v9427_v18  ;;  %v10911_v3 = vld [vmem:[#allocation8 + $0x1ac] sm:$0xf0] }
 0x360   :  { %v10804_v25 = vld [vmem:[#allocation4 + $0xe5c] sm:$0xf]  ;;  %v8608_v28 = vor.u32 %v10740_v23, %v8605_v7  ;;  %4276 = vmatpush.bf16.msrb.mxu1 %v8352_v0  ;;  %v9156_v23 = vor.u32 %v10883_v52, %v9155_v26  ;;  %v11769_v7 = vpop.f32.mrf.mxu3  ;;  %v9283_v0 = vld [vmem:[#allocation8 + $0x1c0] sm:$0xf]  ;;  %v3498_v21 = vadd.f32 %v11605_v14, %v3484_v63  ;;  %v11777_v26 = vpop.f32.mrf.mxu1  ;;  %v10875_v52 = vld [vmem:[#allocation8 + $0x8c] sm:$0xf0] }
 0x361   :  { %v8861_v13 = vld [vmem:[#allocation4 + $0xe78] sm:$0xf0]  ;;  %v9123_v14 = vld [vmem:[#allocation8 + $0x80] sm:$0xf] }
 0x362   :  { %v10668_v6 = vld [vmem:[#allocation4 + $0xa1c] sm:$0xf]  ;;  %v8864_v47 = vor.u32 %v10804_v25, %v8861_v13  ;;  %4290 = vmatpush.bf16.msrb.mxu2 %v8608_v28  ;;  %v3792_v25 = vadd.f32 %v11693_v10, %v3778_v20  ;;  %4264 = vmatmul.bf16.vlgmr.msrb.gmra.mxu0 %v11550_v17  ;;  %v9140_v28 = vor.u32 %v10879_v15, %v9139_v45  ;;  %v11782_v38 = vpop.f32.mrf.mxu2  ;;  %v9395_v63 = vld [vmem:[#allocation8 + $0x2a0] sm:$0xf] }
 0x363   :  { %v8317_v50 = vld [vmem:[#allocation4 + $0xa38] sm:$0xf0]  ;;  %5914 = vmatpush.bf16.msra.mxu0 %v9172_v55  ;;  %v9411_v55 = vld [vmem:[#allocation8 + $0x2c0] sm:$0xf]  ;;  %v3512_v10 = vadd.f32 %v11608_v39, %v3498_v21  ;;  %v9284_v17 = vor.u32 %v10915_v29, %v9283_v0  ;;  %v9124_v18 = vor.u32 %v10875_v52, %v9123_v14  ;;  %v12030_v21 = vld [vmem:[#allocation22_spill] sm:$0xff] }
 0x364   :  { %v10732_v35 = vld [vmem:[#allocation4 + $0xc1c] sm:$0xf]  ;;  %v8320_v24 = vor.u32 %v10668_v6, %v8317_v50  ;;  %4304 = vmatpush.bf16.msrb.mxu3 %v8864_v47  ;;  %v3776_v6 = vadd.f32 %v11682_v44, %v3762_v34  ;;  %v9556_v50 = vor.u32 %v10983_v4, %v9555_v54  ;;  %v3610_v44 = vadd.f32 %v11633_v48, %v3596_v62  ;;  %v10943_v34 = vld [vmem:[#allocation8 + $0x2ac] sm:$0xf0]  ;;  %v9523_v48 = vld [vmem:[#allocation8 + $0x3a0] sm:$0xf]  ;;  %v11791_v54 = vpop.f32.mrf.mxu0 }
 0x365   :  { %v8573_v40 = vld [vmem:[#allocation4 + $0xc38] sm:$0xf0]  ;;  %v3806_v20 = vadd.f32 %v11698_v36, %v3792_v25  ;;  %v9412_v47 = vor.u32 %v10947_v11, %v9411_v55  ;;  %v10975_v36 = vld [vmem:[#allocation8 + $0x3ac] sm:$0xf0]  ;;  %v11788_v53 = vadd.f32 %v11612_v57, %v3512_v10  ;;  %v12032_v52 = vld [vmem:[#allocation34_spill] sm:$0xff] }
 0x366   :  { %v10796_v31 = vld [vmem:[#allocation4 + $0xe1c] sm:$0xf]  ;;  %v8576_v49 = vor.u32 %v10732_v35, %v8573_v40  ;;  %4277 = vmatpush.bf16.msrb.mxu1 %v8320_v24  ;;  %v9539_v35 = vld [vmem:[#allocation8 + $0x3c0] sm:$0xf]  ;;  %v3694_v40 = vadd.f32 %v11656_v37, %v3680_v32  ;;  %v3790_v39 = vadd.f32 %v11684_v58, %v3776_v6  ;;  %v10871_v62 = vld [vmem:[#allocation8 + $0x6c] sm:$0xf0]  ;;  %v9524_v25 = vor.u32 %v10975_v36, %v9523_v48 }
 0x367   :  { %v8829_v41 = vld [vmem:[#allocation4 + $0xe38] sm:$0xf0]  ;;  %5915 = vmatpush.bf16.msra.mxu0 %v9156_v23  ;;  %v9540_v37 = vor.u32 %v10979_v33, %v9539_v35  ;;  %v9107_v23 = vld [vmem:[#allocation8 + $0x60] sm:$0xf]  ;;  %v10971_v55 = vld [vmem:[#allocation8 + $0x38c] sm:$0xf0] }
 0x368   :  { %v8832_v13 = vor.u32 %v10796_v31, %v8829_v41  ;;  %4291 = vmatpush.bf16.msrb.mxu2 %v8576_v49  ;;  %v9267_v31 = vld [vmem:[#allocation8 + $0x1a0] sm:$0xf]  ;;  %v3624_v41 = vadd.f32 %v11639_v19, %v3610_v44  ;;  %v12025_v58 = vld [vmem:[#allocation24_spill] sm:$0xff]  ;;  %v12026_v4 = vld [vmem:[#allocation19_spill] sm:$0xff]  ;;  %v11796_v57 = vpop.f32.mrf.mxu3  ;;  %v9108_v11 = vor.u32 %v10871_v62, %v9107_v23  ;;  %vm4320_vm1 = vcmp.ge.f32.partialorder %v11788_v53, 0.0 }
 0x369   :  { %4278 = vmatmul.bf16.vlgmr.msrb.gmra.mxu1 %v11558_v43  ;;  %v3708_v24 = vadd.f32 %v12025_v58, %v3694_v40  ;;  %v9268_v43 = vor.u32 %v10911_v3, %v9267_v31  ;;  %v12027_v19 = vld [vmem:[#allocation32_spill] sm:$0xff]  ;;  %v9251_v49 = vld [vmem:[#allocation8 + $0x180] sm:$0xf]  ;;  %v11809_v14 = vmul.f32 0.2, %v11788_v53 }
 0x36a   :  { %5928 = vmatpush.bf16.msra.mxu1 %v9300_v60  ;;  %4305 = vmatpush.bf16.msrb.mxu3 %v8832_v13  ;;  %v3820_v32 = vadd.f32 %v12027_v19, %v3806_v20  ;;  %v10907_v60 = vld [vmem:[#allocation8 + $0x18c] sm:$0xf0]  ;;  %v12028_v45 = vld [vmem:[#allocation28_spill] sm:$0xff]  ;;  %v9379_v13 = vld [vmem:[#allocation8 + $0x280] sm:$0xf]  ;;  %v11802_v6 = vadd.f32 %v12030_v21, %v3624_v41  ;;  %v11818_v48 = vpop.f32.mrf.mxu2 }
 0x36b   :  { %4292 = vmatmul.bf16.vlgmr.msrb.gmra.mxu2 %v11556_v42  ;;  %5916 = vmatpush.bf16.msra.mxu0 %v9140_v28  ;;  %v9396_v42 = vor.u32 %v10943_v34, %v9395_v63  ;;  %v3804_v15 = vadd.f32 %v12028_v45, %v3790_v39  ;;  %v12029_v0 = vld [vmem:[#allocation20_spill] sm:$0xff]  ;;  %v12031_v35 = vld [vmem:[#allocation25_spill] sm:$0xff]  ;;  %v11806_v28 = vpop.f32.mrf.mxu1  ;;  %v9252_v10 = vor.u32 %v10907_v60, %v9251_v49  ;;  %v10903_v31 = vld [vmem:[#allocation8 + $0x16c] sm:$0xf0] }
 0x36c   :  { %5942 = vmatpush.bf16.msra.mxu2 %v9428_v27  ;;  %v10939_v27 = vld [vmem:[#allocation8 + $0x28c] sm:$0xf0]  ;;  %v11799_v29 = vmul.f32 0.2, %v12029_v0  ;;  %v3722_v33 = vadd.f32 %v12031_v35, %v3708_v24  ;;  %v9091_v40 = vld [vmem:[#allocation8 + $0x40] sm:$0xf]  ;;  %v3834_v44 = vadd.f32 %v12032_v52, %v3820_v32 }
 0x36d   :  { %4306 = vmatmul.bf16.vlgmr.msrb.gmra.mxu3 %v12026_v4  ;;  %v9380_v20 = vor.u32 %v10939_v27, %v9379_v13  ;;  %vm4312_vm2 = vcmp.ge.f32.partialorder %v12029_v0, 0.0  ;;  %v12033_v3 = vld [vmem:[#allocation21_spill] sm:$0xff]  ;;  %v10935_v58 = vld [vmem:[#allocation8 + $0x26c] sm:$0xf0]  ;;  %v11821_v24 = vmul.f32 0.2, %v11802_v6 }
 0x36e   :  { %5956 = vmatpush.bf16.msra.mxu3 %v9556_v50  ;;  %5929 = vmatpush.bf16.msra.mxu1 %v9284_v17  ;;  %v9507_v50 = vld [vmem:[#allocation8 + $0x380] sm:$0xf]  ;;  %v10867_v17 = vld [vmem:[#allocation8 + $0x4c] sm:$0xf0]  ;;  %v11814_v39 = vmul.f32 0.2, %v12033_v3 }
 0x36f   :  { %5917 = vmatpush.bf16.msra.mxu0 %v9124_v18  ;;  %v12035_v34 = vld [vmem:[#allocation29_spill] sm:$0xff]  ;;  %v9508_v36 = vor.u32 %v10971_v55, %v9507_v50  ;;  %v12036_v4 = vld [vmem:[#allocation35_spill] sm:$0xff]  ;;  %v9092_v19 = vor.u32 %v10867_v17, %v9091_v40  ;;  %vm4313_vm3 = vcmp.ge.f32.partialorder %v12033_v3, 0.0  ;;  %vm4321_vm4 = vcmp.ge.f32.partialorder %v11802_v6, 0.0  ;;  %v12039_v55 = vld [vmem:[#allocation30_spill] sm:$0xff] }
 0x370   :  { %5943 = vmatpush.bf16.msra.mxu2 %v9412_v47  ;;  %v9235_v47 = vld [vmem:[#allocation8 + $0x160] sm:$0xf]  ;;  %v3818_v41 = vadd.f32 %v12035_v34, %v3804_v15  ;;  %v10967_v62 = vld [vmem:[#allocation8 + $0x36c] sm:$0xf0]  ;;  %v804_v32 = vperm.slane %v11743_v16, 4  ;;  %v11835_v40 = vpop.f32.mrf.mxu3 }
 0x371   :  { %v9363_v18 = vld [vmem:[#allocation8 + $0x260] sm:$0xf]  ;;  %v10863_v60 = vld [vmem:[#allocation8 + $0x2c] sm:$0xf0] }
 0x372   :  { %5957 = vmatpush.bf16.msra.mxu3 %v9540_v37  ;;  %5930 = vmatpush.bf16.msra.mxu1 %v9268_v43  ;;  %v12034_v37 = vld [vmem:[#allocation26_spill] sm:$0xff]  ;;  %v3848_v43 = vadd.f32 %v12036_v4, %v3834_v44  ;;  %v9491_v23 = vld [vmem:[#allocation8 + $0x360] sm:$0xf]  ;;  %v12037_v45 = vld [vmem:[#allocation23_spill] sm:$0xff]  ;;  %v3876_v35 = vadd.f32 %v11726_v8, %v804_v32  ;;  %v3874_v8 = vadd.f32 %v11714_v9, %v804_v32 }
 0x373   :  { %v3736_v63 = vadd.f32 %v12034_v37, %v3722_v33  ;;  %5918 = vmatpush.bf16.msra.mxu0 %v9108_v11  ;;  %v9075_v49 = vld [vmem:[#allocation8 + $0x20] sm:$0xf]  ;;  %v11828_v15 = vmul.f32 0.2, %v12037_v45  ;;  %v10899_v27 = vld [vmem:[#allocation8 + $0x14c] sm:$0xf0]  ;;  %v3832_v11 = vadd.f32 %v12039_v55, %v3818_v41  ;;  %v3987_v33 = vpop.f32.mrf.mxu0 }
 0x374   :  { %5944 = vmatpush.bf16.msra.mxu2 %v9396_v42  ;;  %v9236_v42 = vor.u32 %v10903_v31, %v9235_v47  ;;  %v9219_v13 = vld [vmem:[#allocation8 + $0x140] sm:$0xf]  ;;  %v12038_v21 = vld [vmem:[#allocation27_spill] sm:$0xff]  ;;  %vm4314_vm5 = vcmp.ge.f32.partialorder %v12037_v45, 0.0  ;;  %v11839_v44 = vadd.f32 %v11716_v30, %v3848_v43  ;;  %v9076_v37 = vor.u32 %v10863_v60, %v9075_v49 }
 0x375   :  { %v11831_v50 = vadd.f32 %v12038_v21, %v3736_v63  ;;  %v9347_v17 = vld [vmem:[#allocation8 + $0x240] sm:$0xf]  ;;  %v10931_v52 = vld [vmem:[#allocation8 + $0x24c] sm:$0xf0]  ;;  %v9220_v63 = vor.u32 %v10899_v27, %v9219_v13  ;;  %v4001_v21 = vpop.f32.mrf.mxu1  ;;  %v11853_v27 = vpop.f32.mrf.mxu2 }
 0x376   :  { %5958 = vmatpush.bf16.msra.mxu3 %v9524_v25  ;;  %5931 = vmatpush.bf16.msra.mxu1 %v9252_v10  ;;  %v9364_v25 = vor.u32 %v10935_v58, %v9363_v18  ;;  %v9492_v10 = vor.u32 %v10967_v62, %v9491_v23  ;;  %v9475_v47 = vld [vmem:[#allocation8 + $0x340] sm:$0xf]  ;;  %v10963_v31 = vld [vmem:[#allocation8 + $0x34c] sm:$0xf0]  ;;  %v9348_v18 = vor.u32 %v10931_v52, %v9347_v17  ;;  %vm4323_vm7 = vcmp.ge.f32.partialorder %v11839_v44, 0.0 }
 0x377   :  { %5919 = vmatpush.bf16.msra.mxu0 %v9092_v19  ;;  %v9203_v34 = vld [vmem:[#allocation8 + $0x120] sm:$0xf]  ;;  %v10895_v58 = vld [vmem:[#allocation8 + $0x12c] sm:$0xf0]  ;;  %v4338_v30 = vmul.f32 0.2, %v11831_v50  ;;  %v3890_v19 = vadd.f32 %v11736_v2, %v3876_v35  ;;  %v9476_v49 = vor.u32 %v10963_v31, %v9475_v47  ;;  %v3888_v2 = vadd.f32 %v11719_v22, %v3874_v8 }
 0x378   :  { %5945 = vmatpush.bf16.msra.mxu2 %v9380_v20  ;;  %v805_v20 = vperm.slane %v11743_v16, 5  ;;  %v9059_v41 = vld [vmem:[#allocation8] sm:$0xf]  ;;  %v11015_v23 = vld [vmem:[#allocation8 + $0x4ec] sm:$0xf0]  ;;  %vm4322_vm6 = vcmp.ge.f32.partialorder %v11831_v50, 0.0  ;;  %v9204_v55 = vor.u32 %v10895_v58, %v9203_v34 }
 0x379   :  { %v9683_v4 = vld [vmem:[#allocation8 + $0x4e0] sm:$0xf]  ;;  %v12040_v43 = vld [vmem:[#allocation31_spill] sm:$0xff] }
 0x37a   :  { %5959 = vmatpush.bf16.msra.mxu3 %v9508_v36  ;;  %5932 = vmatpush.bf16.msra.mxu1 %v9236_v42  ;;  %v10859_v36 = vld [vmem:[#allocation8 + $0xc] sm:$0xf0]  ;;  %v3846_v62 = vadd.f32 %v12040_v43, %v3832_v11  ;;  %v9331_v9 = vld [vmem:[#allocation8 + $0x220] sm:$0xf]  ;;  %v4352_v42 = vsel %vm4320_vm1, %v11788_v53, %v11809_v14  ;;  %v9684_v17 = vor.u32 %v11015_v23, %v9683_v4  ;;  %v4029_v43 = vpop.f32.mrf.mxu3 }
 0x37b   :  { %v10927_v32 = vld [vmem:[#allocation8 + $0x22c] sm:$0xf0]  ;;  %5920 = vmatpush.bf16.msra.mxu0 %v9076_v37  ;;  %v9459_v60 = vld [vmem:[#allocation8 + $0x320] sm:$0xf]  ;;  %v9060_v13 = vor.u32 %v10859_v36, %v9059_v41  ;;  %v4344_v53 = vsel %vm4312_vm2, %v12029_v0, %v11799_v29  ;;  %v3986_v14 = vadd.f32 %v11791_v54, %v805_v20  ;;  %v3988_v52 = vadd.f32 %v3987_v33, %v805_v20 }
 0x37c   :  { %5946 = vmatpush.bf16.msra.mxu2 %v9364_v25  ;;  %v10959_v25 = vld [vmem:[#allocation8 + $0x32c] sm:$0xf0]  ;;  %v9187_v11 = vld [vmem:[#allocation8 + $0x100] sm:$0xf]  ;;  %v9332_v47 = vor.u32 %v10927_v32, %v9331_v9  ;;  %v11860_v8 = vpack.c.bf16 %v4352_v42, %v4344_v53  ;;  %v3904_v41 = vadd.f32 %v11739_v51, %v3890_v19  ;;  %v4345_v54 = vsel %vm4313_vm3, %v12033_v3, %v11814_v39 }
 0x37d   :  { %v10891_v35 = vld [vmem:[#allocation8 + $0x10c] sm:$0xf0]  ;;  %v9667_v22 = vld [vmem:[#allocation8 + $0x4c0] sm:$0xf]  ;;  %v9460_v36 = vor.u32 %v10959_v25, %v9459_v60  ;;  %v4353_v0 = vsel %vm4321_vm4, %v11802_v6, %v11821_v24  ;;  %v4346_v51 = vsel %vm4314_vm5, %v12037_v45, %v11828_v15  ;;  %v4354_v29 = vsel %vm4322_vm6, %v11831_v50, %v4338_v30 }
 0x37e   :  { %5960 = vmatpush.bf16.msra.mxu3 %v9492_v10  ;;  %5933 = vmatpush.bf16.msra.mxu1 %v9220_v63  ;;  %v9315_v10 = vld [vmem:[#allocation8 + $0x200] sm:$0xf]  ;;  %v10923_v31 = vld [vmem:[#allocation8 + $0x20c] sm:$0xf0]  ;;  %v4339_v3 = vmul.f32 0.2, %v11839_v44  ;;  %v3902_v39 = vadd.f32 %v11721_v1, %v3888_v2  ;;  %v9188_v6 = vor.u32 %v10891_v35, %v9187_v11  ;;  %v4000_v45 = vadd.f32 %v11806_v28, %v3986_v14  ;;  %v11894_v11 = vpop.f32.mrf.mxu1 }
 0x37f   :  { %v11011_v37 = vld [vmem:[#allocation8 + $0x4cc] sm:$0xf0]  ;;  %v12041_v63 = vld [vmem:[#allocation33_spill] sm:$0xff]  ;;  %5921 = vmatpush.bf16.msra.mxu0 %v9060_v13  ;;  %v4002_v15 = vadd.f32 %v4001_v21, %v3988_v52  ;;  %v9316_v50 = vor.u32 %v10923_v31, %v9315_v10  ;;  %v3918_v32 = vadd.f32 %v11746_v59, %v3904_v41  ;;  %v11886_v13 = vpack.c.bf16 %v4353_v0, %v4345_v54  ;;  %v11900_v31 = vpop.f32.mrf.mxu2 }
 0x380   :  { %5947 = vmatpush.bf16.msra.mxu2 %v9348_v18  ;;  %v3860_v34 = vadd.f32 %v12041_v63, %v3846_v62  ;;  %v9443_v58 = vld [vmem:[#allocation8 + $0x300] sm:$0xf]  ;;  %v11047_v23 = vld [vmem:[#allocation8 + $0x5ec] sm:$0xf0]  ;;  %v11881_v62 = vpop.f32.mrf.mxu0  ;;  %v9668_v24 = vor.u32 %v11011_v37, %v9667_v22  ;;  %v11888_v2 = vpack.c.bf16 %v4354_v29, %v4346_v51  ;;  %v3916_v59 = vadd.f32 %v11728_v46, %v3902_v39 }
 0x381   :  { %v9811_v4 = vld [vmem:[#allocation8 + $0x5e0] sm:$0xf]  ;;  %v10955_v33 = vld [vmem:[#allocation8 + $0x30c] sm:$0xf0]  ;;  %v4014_v10 = vadd.f32 %v11818_v48, %v4000_v45 }
 0x382   :  { %5961 = vmatpush.bf16.msra.mxu3 %v9476_v49  ;;  %v9939_v20 = vld [vmem:[#allocation8 + $0x6e0] sm:$0xf]  ;;  %v11079_v18 = vld [vmem:[#allocation8 + $0x6ec] sm:$0xf0]  ;;  %5934 = vmatpush.bf16.msra.mxu1 %v9204_v55  ;;  %v9812_v30 = vor.u32 %v11047_v23, %v9811_v4  ;;  %v4331_v9 = vmul.f32 0.2, %v3860_v34  ;;  %v9444_v1 = vor.u32 %v10955_v33, %v9443_v58  ;;  %v4355_v55 = vsel %vm4323_vm7, %v11839_v44, %v4339_v3  ;;  %v11910_v51 = vpop.f32.mrf.mxu3 }
 0x383   :  { %5970 = vmatpush.bf16.msrb.mxu0 %v9684_v17  ;;  %v9651_v19 = vld [vmem:[#allocation8 + $0x4a0] sm:$0xf]  ;;  %v11007_v49 = vld [vmem:[#allocation8 + $0x4ac] sm:$0xf0]  ;;  %v9940_v25 = vor.u32 %v11079_v18, %v9939_v20  ;;  %vm4315_vm8 = vcmp.ge.f32.partialorder %v3860_v34, 0.0  ;;  %v4016_v17 = vadd.f32 %v11853_v27, %v4002_v15  ;;  %v3932_v44 = vadd.f32 %v11767_v12, %v3918_v32 }
 0x384   :  { %5948 = vmatpush.bf16.msra.mxu2 %v9332_v47  ;;  %5922 = vmatmul.bf16.vlgmr.msra.gmra.mxu0 %v11860_v8  ;;  %v9795_v42 = vld [vmem:[#allocation8 + $0x5c0] sm:$0xf]  ;;  %v11043_v60 = vld [vmem:[#allocation8 + $0x5cc] sm:$0xf0]  ;;  %v9652_v35 = vor.u32 %v11007_v49, %v9651_v19  ;;  %v4347_v47 = vsel %vm4315_vm8, %v3860_v34, %v4331_v9  ;;  %v3930_v41 = vadd.f32 %v11748_v56, %v3916_v59 }
 0x385   :  { %v9923_v28 = vld [vmem:[#allocation8 + $0x6c0] sm:$0xf]  ;;  %v11075_v21 = vld [vmem:[#allocation8 + $0x6cc] sm:$0xf0]  ;;  %v9796_v53 = vor.u32 %v11043_v60, %v9795_v42  ;;  %v11902_v63 = vpack.c.bf16 %v4355_v55, %v4347_v47  ;;  %v4028_v12 = vadd.f32 %v11835_v40, %v4014_v10  ;;  %v3946_v54 = vadd.f32 %v11777_v26, %v3932_v44 }
 0x386   :  { %5962 = vmatpush.bf16.msra.mxu3 %v9460_v36  ;;  %5935 = vmatpush.bf16.msra.mxu1 %v9188_v6  ;;  %v9635_v14 = vld [vmem:[#allocation8 + $0x480] sm:$0xf]  ;;  %v11003_v52 = vld [vmem:[#allocation8 + $0x48c] sm:$0xf0]  ;;  %v9924_v37 = vor.u32 %v11075_v21, %v9923_v28  ;;  %v4030_v36 = vadd.f32 %v4029_v43, %v4016_v17  ;;  %v3944_v40 = vadd.f32 %v11756_v5, %v3930_v41  ;;  %v4057_v15 = vpop.f32.mrf.mxu1  ;;  %v9173_v41 = vld [vmem:[#allocation8 + $0xf0] sm:$0xf0] }
 0x387   :  { %5971 = vmatpush.bf16.msrb.mxu0 %v9668_v24  ;;  %v9779_v46 = vld [vmem:[#allocation8 + $0x5a0] sm:$0xf]  ;;  %v11039_v22 = vld [vmem:[#allocation8 + $0x5ac] sm:$0xf0]  ;;  %v9636_v34 = vor.u32 %v11003_v52, %v9635_v14  ;;  %v3960_v3 = vadd.f32 %v11782_v38, %v3946_v54  ;;  %v4042_v43 = vadd.f32 %v11881_v62, %v4028_v12  ;;  %v4071_v32 = vpop.f32.mrf.mxu2 }
 0x388   :  { %5949 = vmatpush.bf16.msra.mxu2 %v9316_v50  ;;  %v9907_v48 = vld [vmem:[#allocation8 + $0x6a0] sm:$0xf]  ;;  %v11071_v27 = vld [vmem:[#allocation8 + $0x6ac] sm:$0xf0]  ;;  %v9780_v58 = vor.u32 %v11039_v22, %v9779_v46  ;;  %v4043_v0 = vpop.f32.mrf.mxu0  ;;  %v3958_v5 = vadd.f32 %v11760_v61, %v3944_v40 }
 0x389   :  { %5936 = vmatmul.bf16.vlgmr.msra.gmra.mxu1 %v11886_v13  ;;  %v9619_v4 = vld [vmem:[#allocation8 + $0x460] sm:$0xf]  ;;  %v10999_v23 = vld [vmem:[#allocation8 + $0x46c] sm:$0xf0]  ;;  %v9908_v33 = vor.u32 %v11071_v27, %v9907_v48  ;;  %v4044_v6 = vadd.f32 %v4043_v0, %v4030_v36  ;;  %v3974_v38 = vadd.f32 %v11796_v57, %v3960_v3  ;;  %v4056_v62 = vadd.f32 %v11894_v11, %v4042_v43  ;;  %v10885_v27 = vld [vmem:[#allocation8 + $0xe4] sm:$0xf] }
 0x38a   :  { %5984 = vmatpush.bf16.msrb.mxu1 %v9812_v30  ;;  %5963 = vmatpush.bf16.msra.mxu3 %v9444_v1  ;;  %v9763_v56 = vld [vmem:[#allocation8 + $0x580] sm:$0xf]  ;;  %v11035_v29 = vld [vmem:[#allocation8 + $0x58c] sm:$0xf0]  ;;  %v9620_v39 = vor.u32 %v10999_v23, %v9619_v4  ;;  %v3972_v61 = vadd.f32 %v11769_v7, %v3958_v5  ;;  %v10881_v3 = vld [vmem:[#allocation8 + $0xc4] sm:$0xf] }
 0x38b   :  { %5950 = vmatmul.bf16.vlgmr.msra.gmra.mxu2 %v11888_v2  ;;  %5972 = vmatpush.bf16.msrb.mxu0 %v9652_v35  ;;  %v9891_v20 = vld [vmem:[#allocation8 + $0x680] sm:$0xf]  ;;  %v11067_v18 = vld [vmem:[#allocation8 + $0x68c] sm:$0xf0]  ;;  %v9764_v26 = vor.u32 %v11035_v29, %v9763_v56  ;;  %v4058_v42 = vadd.f32 %v4057_v15, %v4044_v6  ;;  %v4340_v57 = vmul.f32 0.2, %v3974_v38  ;;  %v4070_v11 = vadd.f32 %v11900_v31, %v4056_v62 }
 0x38c   :  { %5998 = vmatpush.bf16.msrb.mxu2 %v9940_v25  ;;  %v9603_v24 = vld [vmem:[#allocation8 + $0x440] sm:$0xf]  ;;  %v10995_v45 = vld [vmem:[#allocation8 + $0x44c] sm:$0xf0]  ;;  %v9892_v19 = vor.u32 %v11067_v18, %v9891_v20  ;;  %vm4324_vm9 = vcmp.ge.f32.partialorder %v3974_v38, 0.0  ;;  %vm4316_vm10 = vcmp.ge.f32.partialorder %v3972_v61, 0.0  ;;  %v9176_v56 = vor.u32 %v10885_v27, %v9173_v41 }
 0x38d   :  { %5964 = vmatmul.bf16.vlgmr.msra.gmra.mxu3 %v11902_v63  ;;  %v9747_v50 = vld [vmem:[#allocation8 + $0x560] sm:$0xf]  ;;  %v11031_v30 = vld [vmem:[#allocation8 + $0x56c] sm:$0xf0]  ;;  %v9604_v1 = vor.u32 %v10995_v45, %v9603_v24  ;;  %v4072_v35 = vadd.f32 %v4071_v32, %v4058_v42  ;;  %v4332_v36 = vmul.f32 0.2, %v3972_v61  ;;  %v4084_v4 = vadd.f32 %v11910_v51, %v4070_v11 }
 0x38e   :  { %5985 = vmatpush.bf16.msrb.mxu1 %v9796_v53  ;;  %v9875_v49 = vld [vmem:[#allocation8 + $0x660] sm:$0xf]  ;;  %v11063_v9 = vld [vmem:[#allocation8 + $0x66c] sm:$0xf0]  ;;  %v9748_v60 = vor.u32 %v11031_v30, %v9747_v50  ;;  %v4085_v53 = vpop.f32.mrf.mxu3  ;;  %v10917_v29 = vld [vmem:[#allocation8 + $0x1e4] sm:$0xf]  ;;  %v4111_v20 = vpop.f32.mrf.mxu1 }
 0x38f   :  { %5973 = vmatpush.bf16.msrb.mxu0 %v9636_v34  ;;  %v9587_v25 = vld [vmem:[#allocation8 + $0x420] sm:$0xf]  ;;  %v10991_v28 = vld [vmem:[#allocation8 + $0x42c] sm:$0xf0]  ;;  %v9876_v59 = vor.u32 %v11063_v9, %v9875_v49  ;;  %v4086_v34 = vadd.f32 %v4085_v53, %v4072_v35  ;;  %v9301_v18 = vld [vmem:[#allocation8 + $0x1f0] sm:$0xf0]  ;;  %v4348_v24 = vsel %vm4316_vm10, %v3972_v61, %v4332_v36 }
 0x390   :  { %5999 = vmatpush.bf16.msrb.mxu2 %v9924_v37  ;;  %v9731_v21 = vld [vmem:[#allocation8 + $0x540] sm:$0xf]  ;;  %v11027_v55 = vld [vmem:[#allocation8 + $0x54c] sm:$0xf0]  ;;  %v9588_v14 = vor.u32 %v10991_v28, %v9587_v25  ;;  %v4097_v22 = vpop.f32.mrf.mxu0  ;;  %v10949_v51 = vld [vmem:[#allocation8 + $0x2e4] sm:$0xf]  ;;  %v9304_v49 = vor.u32 %v10917_v29, %v9301_v18  ;;  %v4125_v25 = vpop.f32.mrf.mxu2 }
 0x391   :  { %v9859_v10 = vld [vmem:[#allocation8 + $0x640] sm:$0xf]  ;;  %v11059_v17 = vld [vmem:[#allocation8 + $0x64c] sm:$0xf0]  ;;  %v9732_v52 = vor.u32 %v11027_v55, %v9731_v21  ;;  %v4341_v43 = vmul.f32 0.2, %v4086_v34 }
 0x392   :  { %5986 = vmatpush.bf16.msrb.mxu1 %v9780_v58  ;;  %v9715_v47 = vld [vmem:[#allocation8 + $0x520] sm:$0xf]  ;;  %v10987_v46 = vld [vmem:[#allocation8 + $0x40c] sm:$0xf0]  ;;  %v9860_v48 = vor.u32 %v11059_v17, %v9859_v10  ;;  %v806_v58 = vperm.slane %v11743_v16, 6  ;;  %vm4325_vm11 = vcmp.ge.f32.partialorder %v4086_v34, 0.0 }
 0x393   :  { %5974 = vmatpush.bf16.msrb.mxu0 %v9620_v39  ;;  %v9571_v44 = vld [vmem:[#allocation8 + $0x400] sm:$0xf]  ;;  %v11023_v37 = vld [vmem:[#allocation8 + $0x52c] sm:$0xf0]  ;;  %v9157_v39 = vld [vmem:[#allocation8 + $0xd0] sm:$0xf0]  ;;  %v4357_v32 = vsel %vm4325_vm11, %v4086_v34, %v4341_v43 }
 0x394   :  { %6000 = vmatpush.bf16.msrb.mxu2 %v9908_v33  ;;  %v9843_v7 = vld [vmem:[#allocation8 + $0x620] sm:$0xf]  ;;  %v11055_v12 = vld [vmem:[#allocation8 + $0x62c] sm:$0xf0]  ;;  %v9572_v31 = vor.u32 %v10987_v46, %v9571_v44  ;;  %v9716_v23 = vor.u32 %v11023_v37, %v9715_v47  ;;  %v4356_v33 = vsel %vm4324_vm9, %v3974_v38, %v4340_v57  ;;  %v9429_v45 = vld [vmem:[#allocation8 + $0x2f0] sm:$0xf0] }
 0x395   :  { %v9699_v54 = vld [vmem:[#allocation8 + $0x500] sm:$0xf]  ;;  %v11019_v0 = vld [vmem:[#allocation8 + $0x50c] sm:$0xf0]  ;;  %v9844_v40 = vor.u32 %v11055_v12, %v9843_v7  ;;  %v11924_v15 = vpack.c.bf16 %v4356_v33, %v4348_v24  ;;  %v4333_v50 = vmul.f32 0.2, %v4084_v4 }
 0x396   :  { %5987 = vmatpush.bf16.msrb.mxu1 %v9764_v26  ;;  %v9827_v6 = vld [vmem:[#allocation8 + $0x600] sm:$0xf]  ;;  %v11051_v26 = vld [vmem:[#allocation8 + $0x60c] sm:$0xf0]  ;;  %v9700_v30 = vor.u32 %v11019_v0, %v9699_v54  ;;  %vm4317_vm12 = vcmp.ge.f32.partialorder %v4084_v4, 0.0  ;;  %v4139_v35 = vpop.f32.mrf.mxu3  ;;  %v4113_v44 = vpop.f32.mrf.mxu1 }
 0x397   :  { %5975 = vmatpush.bf16.msrb.mxu0 %v9604_v1  ;;  %v9828_v9 = vor.u32 %v11051_v26, %v9827_v6  ;;  %v10877_v5 = vld [vmem:[#allocation8 + $0xa4] sm:$0xf]  ;;  %v9141_v38 = vld [vmem:[#allocation8 + $0xb0] sm:$0xf0]  ;;  %v4098_v1 = vadd.f32 %v4097_v22, %v806_v58  ;;  %v10067_v0 = vld [vmem:[#allocation8 + $0x7e0] sm:$0xf] }
 0x398   :  { %6001 = vmatpush.bf16.msrb.mxu2 %v9892_v19  ;;  %v9160_v19 = vor.u32 %v10881_v3, %v9157_v39  ;;  %v10913_v62 = vld [vmem:[#allocation8 + $0x1c4] sm:$0xf]  ;;  %v9285_v42 = vld [vmem:[#allocation8 + $0x1d0] sm:$0xf0]  ;;  %v4099_v28 = vpop.f32.mrf.mxu0  ;;  %v9144_v10 = vor.u32 %v10877_v5, %v9141_v38  ;;  %v4127_v29 = vpop.f32.mrf.mxu2 }
 0x399   :  { %v10945_v21 = vld [vmem:[#allocation8 + $0x2c4] sm:$0xf]  ;;  %v9413_v55 = vld [vmem:[#allocation8 + $0x2d0] sm:$0xf0]  ;;  %v9288_v61 = vor.u32 %v10913_v62, %v9285_v42  ;;  %v4100_v7 = vadd.f32 %v4099_v28, %v806_v58  ;;  %v11103_v28 = vld [vmem:[#allocation8 + $0x7ac] sm:$0xf0] }
 0x39a   :  { %5988 = vmatpush.bf16.msrb.mxu1 %v9748_v60  ;;  %v9432_v60 = vor.u32 %v10949_v51, %v9429_v45  ;;  %v10873_v57 = vld [vmem:[#allocation8 + $0x84] sm:$0xf]  ;;  %v9125_v53 = vld [vmem:[#allocation8 + $0x90] sm:$0xf0]  ;;  %v9416_v47 = vor.u32 %v10945_v21, %v9413_v55  ;;  %v10051_v45 = vld [vmem:[#allocation8 + $0x7c0] sm:$0xf] }
 0x39b   :  { %5976 = vmatpush.bf16.msrb.mxu0 %v9588_v14  ;;  %v4112_v14 = vadd.f32 %v4111_v20, %v4098_v1  ;;  %v10909_v11 = vld [vmem:[#allocation8 + $0x1a4] sm:$0xf]  ;;  %v9397_v22 = vld [vmem:[#allocation8 + $0x2b0] sm:$0xf0]  ;;  %v9128_v37 = vor.u32 %v10873_v57, %v9125_v53  ;;  %v4114_v16 = vadd.f32 %v4113_v44, %v4100_v7 }
 0x39c   :  { %6002 = vmatpush.bf16.msrb.mxu2 %v9876_v59  ;;  %v4349_v59 = vsel %vm4317_vm12, %v4084_v4, %v4333_v50  ;;  %v10941_v46 = vld [vmem:[#allocation8 + $0x2a4] sm:$0xf]  ;;  %v9109_v41 = vld [vmem:[#allocation8 + $0x70] sm:$0xf0]  ;;  %v11107_v50 = vld [vmem:[#allocation8 + $0x7cc] sm:$0xf0] }
 0x39d   :  { %v11931_v17 = vpack.c.bf16 %v4357_v32, %v4349_v59  ;;  %v10869_v27 = vld [vmem:[#allocation8 + $0x64] sm:$0xf]  ;;  %v4126_v34 = vadd.f32 %v4125_v25, %v4112_v14  ;;  %v9253_v36 = vld [vmem:[#allocation8 + $0x190] sm:$0xf0]  ;;  %v10035_v32 = vld [vmem:[#allocation8 + $0x7a0] sm:$0xf]  ;;  %v4128_v1 = vadd.f32 %v4127_v29, %v4114_v16 }
 0x39e   :  { %5989 = vmatpush.bf16.msrb.mxu1 %v9732_v52  ;;  %v9269_v52 = vld [vmem:[#allocation8 + $0x1b0] sm:$0xf0]  ;;  %v10905_v12 = vld [vmem:[#allocation8 + $0x184] sm:$0xf]  ;;  %v9112_v54 = vor.u32 %v10869_v27, %v9109_v41  ;;  %v4141_v58 = vpop.f32.mrf.mxu3  ;;  %v10036_v59 = vor.u32 %v11103_v28, %v10035_v32 }
 0x39f   :  { %5977 = vmatpush.bf16.msrb.mxu0 %v9572_v31  ;;  %v9400_v31 = vor.u32 %v10941_v46, %v9397_v22  ;;  %v10937_v4 = vld [vmem:[#allocation8 + $0x284] sm:$0xf]  ;;  %v9256_v20 = vor.u32 %v10905_v12, %v9253_v36  ;;  %v4140_v39 = vadd.f32 %v4139_v35, %v4126_v34  ;;  %v9237_v6 = vld [vmem:[#allocation8 + $0x170] sm:$0xf0] }
 0x3a0   :  { %6003 = vmatpush.bf16.msrb.mxu2 %v9860_v48  ;;  %v9272_v48 = vor.u32 %v10909_v11, %v9269_v52  ;;  %v4153_v33 = vpop.f32.mrf.mxu0  ;;  %v10865_v18 = vld [vmem:[#allocation8 + $0x44] sm:$0xf]  ;;  %v9365_v51 = vld [vmem:[#allocation8 + $0x270] sm:$0xf0]  ;;  %v11099_v11 = vld [vmem:[#allocation8 + $0x78c] sm:$0xf0]  ;;  %v4142_v52 = vadd.f32 %v4141_v58, %v4128_v1 }
 0x3a1   :  { %v10901_v43 = vld [vmem:[#allocation8 + $0x164] sm:$0xf]  ;;  %v9077_v38 = vld [vmem:[#allocation8 + $0x30] sm:$0xf0]  ;;  %v4154_v62 = vadd.f32 %v4153_v33, %v4140_v39 }
 0x3a2   :  { %5990 = vmatpush.bf16.msrb.mxu1 %v9716_v23  ;;  %5978 = vmatmul.bf16.vlgmr.msrb.gmra.mxu0 %v11924_v15  ;;  %v9381_v23 = vld [vmem:[#allocation8 + $0x290] sm:$0xf0]  ;;  %v10933_v24 = vld [vmem:[#allocation8 + $0x264] sm:$0xf] }
 0x3a3   :  { %6026 = vmatpush.bf16.msra.mxu0 %v9176_v56  ;;  %v11111_v56 = vld [vmem:[#allocation8 + $0x7ec] sm:$0xf0]  ;;  %v9384_v26 = vor.u32 %v10937_v4, %v9381_v23  ;;  %v10861_v5 = vld [vmem:[#allocation8 + $0x24] sm:$0xf]  ;;  %v9368_v25 = vor.u32 %v10933_v24, %v9365_v51  ;;  %v9349_v55 = vld [vmem:[#allocation8 + $0x250] sm:$0xf0] }
 0x3a4   :  { %6004 = vmatpush.bf16.msrb.mxu2 %v9844_v40  ;;  %v9093_v40 = vld [vmem:[#allocation8 + $0x50] sm:$0xf0]  ;;  %v10068_v3 = vor.u32 %v11111_v56, %v10067_v0  ;;  %v10897_v42 = vld [vmem:[#allocation8 + $0x144] sm:$0xf]  ;;  %v9080_v35 = vor.u32 %v10861_v5, %v9077_v38  ;;  %v11095_v4 = vld [vmem:[#allocation8 + $0x76c] sm:$0xf0] }
 0x3a5   :  { %v10929_v21 = vld [vmem:[#allocation8 + $0x244] sm:$0xf]  ;;  %v9061_v14 = vld [vmem:[#allocation8 + $0x10] sm:$0xf0]  ;;  %v11091_v24 = vld [vmem:[#allocation8 + $0x74c] sm:$0xf0] }
 0x3a6   :  { %5991 = vmatpush.bf16.msrb.mxu1 %v9700_v30  ;;  %6012 = vmatpush.bf16.msrb.mxu3 %v10068_v3  ;;  %v9096_v30 = vor.u32 %v10865_v18, %v9093_v40  ;;  %v10857_v53 = vld [vmem:[#allocation8 + $0x4] sm:$0xf]  ;;  %v9205_v44 = vld [vmem:[#allocation8 + $0x130] sm:$0xf0]  ;;  %v9352_v46 = vor.u32 %v10929_v21, %v9349_v55  ;;  %v4195_v12 = vpop.f32.mrf.mxu3 }
 0x3a7   :  { %6027 = vmatpush.bf16.msra.mxu0 %v9160_v19  ;;  %v10052_v19 = vor.u32 %v11107_v50, %v10051_v45  ;;  %v11013_v22 = vld [vmem:[#allocation8 + $0x4e4] sm:$0xf]  ;;  %v9333_v34 = vld [vmem:[#allocation8 + $0x230] sm:$0xf0]  ;;  %v9064_v36 = vor.u32 %v10857_v53, %v9061_v14 }
 0x3a8   :  { %6005 = vmatpush.bf16.msrb.mxu2 %v9828_v9  ;;  %v9240_v9 = vor.u32 %v10901_v43, %v9237_v6  ;;  %v4155_v27 = vpop.f32.mrf.mxu0  ;;  %v10925_v41 = vld [vmem:[#allocation8 + $0x224] sm:$0xf]  ;;  %v9189_v0 = vld [vmem:[#allocation8 + $0x110] sm:$0xf0] }
 0x3a9   :  { %5992 = vmatmul.bf16.vlgmr.msrb.gmra.mxu1 %v11931_v17  ;;  %v4156_v33 = vadd.f32 %v4155_v27, %v4142_v52  ;;  %v9336_v18 = vor.u32 %v10925_v41, %v9333_v34  ;;  %v11009_v40 = vld [vmem:[#allocation8 + $0x4c4] sm:$0xf]  ;;  %v9669_v3 = vld [vmem:[#allocation8 + $0x4d0] sm:$0xf0] }
 0x3aa   :  { %6040 = vmatpush.bf16.msra.mxu1 %v9304_v49  ;;  %v4167_v49 = vpop.f32.mrf.mxu1  ;;  %6013 = vmatpush.bf16.msrb.mxu3 %v10052_v19  ;;  %v9813_v16 = vld [vmem:[#allocation8 + $0x5f0] sm:$0xf0]  ;;  %v10921_v58 = vld [vmem:[#allocation8 + $0x204] sm:$0xf]  ;;  %v9672_v45 = vor.u32 %v11009_v40, %v9669_v3 }
 0x3ab   :  { %6028 = vmatpush.bf16.msra.mxu0 %v9144_v10  ;;  %v10893_v10 = vld [vmem:[#allocation8 + $0x124] sm:$0xf]  ;;  %v9317_v43 = vld [vmem:[#allocation8 + $0x210] sm:$0xf0] }
 0x3ac   :  { %6054 = vmatpush.bf16.msra.mxu2 %v9432_v60  ;;  %v9221_v60 = vld [vmem:[#allocation8 + $0x150] sm:$0xf0]  ;;  %v9208_v23 = vor.u32 %v10893_v10, %v9205_v44  ;;  %v11041_v32 = vld [vmem:[#allocation8 + $0x5c4] sm:$0xf] }
 0x3ad   :  { %v9224_v57 = vor.u32 %v10897_v42, %v9221_v60  ;;  %v9653_v5 = vld [vmem:[#allocation8 + $0x4b0] sm:$0xf0]  ;;  %v11077_v28 = vld [vmem:[#allocation8 + $0x6e4] sm:$0xf] }
 0x3ae   :  { %6041 = vmatpush.bf16.msra.mxu1 %v9288_v61  ;;  %v10019_v61 = vld [vmem:[#allocation8 + $0x780] sm:$0xf]  ;;  %6014 = vmatpush.bf16.msrb.mxu3 %v10036_v59  ;;  %v9797_v1 = vld [vmem:[#allocation8 + $0x5d0] sm:$0xf0]  ;;  %v4197_v60 = vpop.f32.mrf.mxu3  ;;  %v11037_v59 = vld [vmem:[#allocation8 + $0x5a4] sm:$0xf] }
 0x3af   :  { %6029 = vmatpush.bf16.msra.mxu0 %v9128_v37  ;;  %v9685_v37 = vld [vmem:[#allocation8 + $0x4f0] sm:$0xf0]  ;;  %v10020_v7 = vor.u32 %v11099_v11, %v10019_v61  ;;  %v11001_v53 = vld [vmem:[#allocation8 + $0x484] sm:$0xf] }
 0x3b0   :  { %6055 = vmatpush.bf16.msra.mxu2 %v9416_v47  ;;  %v4168_v47 = vadd.f32 %v4167_v49, %v4154_v62  ;;  %v9688_v56 = vor.u32 %v11013_v22, %v9685_v37  ;;  %v9320_v49 = vor.u32 %v10921_v58, %v9317_v43  ;;  %v9941_v21 = vld [vmem:[#allocation8 + $0x6f0] sm:$0xf0]  ;;  %v11073_v22 = vld [vmem:[#allocation8 + $0x6c4] sm:$0xf] }
 0x3b1   :  { %v9637_v14 = vld [vmem:[#allocation8 + $0x490] sm:$0xf0]  ;;  %v9944_v34 = vor.u32 %v11077_v28, %v9941_v21  ;;  %v11061_v28 = vld [vmem:[#allocation8 + $0x664] sm:$0xf] }
 0x3b2   :  { %6042 = vmatpush.bf16.msra.mxu1 %v9272_v48  ;;  %v4181_v48 = vpop.f32.mrf.mxu2  ;;  %v4169_v39 = vpop.f32.mrf.mxu1  ;;  %6015 = vmatpush.bf16.msrb.mxu3 %v10020_v7  ;;  %v9781_v11 = vld [vmem:[#allocation8 + $0x5b0] sm:$0xf0]  ;;  %v9640_v37 = vor.u32 %v11001_v53, %v9637_v14  ;;  %v10985_v21 = vld [vmem:[#allocation8 + $0x404] sm:$0xf] }
 0x3b3   :  { %6030 = vmatpush.bf16.msra.mxu0 %v9112_v54  ;;  %v10889_v54 = vld [vmem:[#allocation8 + $0x104] sm:$0xf]  ;;  %v4182_v29 = vadd.f32 %v4181_v48, %v4168_v47  ;;  %v9955_v47 = vld [vmem:[#allocation8 + $0x700] sm:$0xf]  ;;  %v9784_v7 = vor.u32 %v11037_v59, %v9781_v11  ;;  %v9605_v58 = vld [vmem:[#allocation8 + $0x450] sm:$0xf0]  ;;  %v4209_v53 = vpop.f32.mrf.mxu0 }
 0x3b4   :  { %6056 = vmatpush.bf16.msra.mxu2 %v9400_v31  ;;  %v10003_v31 = vld [vmem:[#allocation8 + $0x760] sm:$0xf]  ;;  %v9192_v51 = vor.u32 %v10889_v54, %v9189_v0  ;;  %v10997_v48 = vld [vmem:[#allocation8 + $0x464] sm:$0xf]  ;;  %v9765_v0 = vld [vmem:[#allocation8 + $0x590] sm:$0xf0] }
 0x3b5   :  { %v10004_v6 = vor.u32 %v11095_v4, %v10003_v31  ;;  %v4196_v50 = vadd.f32 %v4195_v12, %v4182_v29  ;;  %v9621_v12 = vld [vmem:[#allocation8 + $0x470] sm:$0xf0]  ;;  %v11033_v54 = vld [vmem:[#allocation8 + $0x584] sm:$0xf] }
 0x3b6   :  { %6043 = vmatpush.bf16.msra.mxu1 %v9256_v20  ;;  %v11045_v20 = vld [vmem:[#allocation8 + $0x5e4] sm:$0xf]  ;;  %v9557_v31 = vld [vmem:[#allocation8 + $0x3f0] sm:$0xf0]  ;;  %v9768_v3 = vor.u32 %v11033_v54, %v9765_v0 }
 0x3b7   :  { %6031 = vmatpush.bf16.msra.mxu0 %v9096_v30  ;;  %v4170_v30 = vadd.f32 %v4169_v39, %v4156_v33  ;;  %v9816_v19 = vor.u32 %v11045_v20, %v9813_v16  ;;  %6016 = vmatpush.bf16.msrb.mxu3 %v10004_v6  ;;  %v4334_v10 = vmul.f32 0.2, %v4196_v50  ;;  %vm4318_vm13 = vcmp.ge.f32.partialorder %v4196_v50, 0.0  ;;  %v10977_v20 = vld [vmem:[#allocation8 + $0x3c4] sm:$0xf] }
 0x3b8   :  { %6057 = vmatpush.bf16.msra.mxu2 %v9384_v26  ;;  %v9987_v26 = vld [vmem:[#allocation8 + $0x740] sm:$0xf]  ;;  %v9624_v33 = vor.u32 %v10997_v48, %v9621_v12  ;;  %v11069_v39 = vld [vmem:[#allocation8 + $0x6a4] sm:$0xf]  ;;  %v9909_v43 = vld [vmem:[#allocation8 + $0x6b0] sm:$0xf0] }
 0x3b9   :  { %v9988_v62 = vor.u32 %v11091_v24, %v9987_v26  ;;  %v4350_v27 = vsel %vm4318_vm13, %v4196_v50, %v4334_v10  ;;  %v10993_v16 = vld [vmem:[#allocation8 + $0x444] sm:$0xf]  ;;  %v9749_v26 = vld [vmem:[#allocation8 + $0x570] sm:$0xf0]  ;;  %v9307_v48 = vld [vmem:[#allocation8 + $0x1e8] sm:$0xf] }
 0x3ba   :  { %6044 = vmatpush.bf16.msra.mxu1 %v9240_v9  ;;  %v11005_v9 = vld [vmem:[#allocation8 + $0x4a4] sm:$0xf]  ;;  %v4183_v38 = vpop.f32.mrf.mxu2  ;;  %v9525_v50 = vld [vmem:[#allocation8 + $0x3b0] sm:$0xf0] }
 0x3bb   :  { %6032 = vmatpush.bf16.msra.mxu0 %v9080_v35  ;;  %v4184_v42 = vadd.f32 %v4183_v38, %v4170_v30  ;;  %v9656_v55 = vor.u32 %v11005_v9, %v9653_v5  ;;  %v11087_v35 = vld [vmem:[#allocation8 + $0x72c] sm:$0xf0]  ;;  %6017 = vmatpush.bf16.msrb.mxu3 %v9988_v62  ;;  %v11029_v6 = vld [vmem:[#allocation8 + $0x564] sm:$0xf]  ;;  %v9912_v30 = vor.u32 %v11069_v39, %v9909_v43  ;;  %v9589_v5 = vld [vmem:[#allocation8 + $0x430] sm:$0xf0] }
 0x3bc   :  { %6058 = vmatpush.bf16.msra.mxu2 %v9368_v25  ;;  %v9971_v25 = vld [vmem:[#allocation8 + $0x720] sm:$0xf]  ;;  %v10989_v9 = vld [vmem:[#allocation8 + $0x424] sm:$0xf]  ;;  %v9893_v38 = vld [vmem:[#allocation8 + $0x690] sm:$0xf0] }
 0x3bd   :  { %v4198_v61 = vadd.f32 %v4197_v60, %v4184_v42  ;;  %v9972_v52 = vor.u32 %v11087_v35, %v9971_v25  ;;  %v9592_v42 = vor.u32 %v10989_v9, %v9589_v5  ;;  %v9877_v59 = vld [vmem:[#allocation8 + $0x670] sm:$0xf0]  ;;  %v11021_v35 = vld [vmem:[#allocation8 + $0x524] sm:$0xf]  ;;  %v10880_v43 = vld [vmem:[#allocation8 + $0xb4] sm:$0xf0] }
 0x3be   :  { %6045 = vmatpush.bf16.msra.mxu1 %v9224_v57  ;;  %v9800_v57 = vor.u32 %v11041_v32, %v9797_v1  ;;  %v11025_v32 = vld [vmem:[#allocation8 + $0x544] sm:$0xf]  ;;  %v9733_v1 = vld [vmem:[#allocation8 + $0x550] sm:$0xf0] }
 0x3bf   :  { %6033 = vmatpush.bf16.msra.mxu0 %v9064_v36  ;;  %vm4326_vm14 = vcmp.ge.f32.partialorder %v4198_v61, 0.0  ;;  %v4342_v44 = vmul.f32 0.2, %v4198_v61  ;;  %v10981_v36 = vld [vmem:[#allocation8 + $0x3e4] sm:$0xf]  ;;  %6018 = vmatpush.bf16.msrb.mxu3 %v9972_v52  ;;  %v9736_v25 = vor.u32 %v11025_v32, %v9733_v1  ;;  %v9880_v52 = vor.u32 %v11061_v28, %v9877_v59 }
 0x3c0   :  { %6059 = vmatpush.bf16.msra.mxu2 %v9352_v46  ;;  %v11083_v46 = vld [vmem:[#allocation8 + $0x70c] sm:$0xf0]  ;;  %v9560_v29 = vor.u32 %v10981_v36, %v9557_v31  ;;  %v9717_v10 = vld [vmem:[#allocation8 + $0x530] sm:$0xf0]  ;;  %v11057_v14 = vld [vmem:[#allocation8 + $0x644] sm:$0xf] }
 0x3c1   :  { %v4358_v41 = vsel %vm4326_vm14, %v4198_v61, %v4342_v44  ;;  %v9179_v61 = vld [vmem:[#allocation8 + $0xe8] sm:$0xf]  ;;  %v9861_v44 = vld [vmem:[#allocation8 + $0x650] sm:$0xf0]  ;;  %v11942_v31 = vld [vmem:[#allocation6] sm:$0xff] }
 0x3c2   :  { %6046 = vmatpush.bf16.msra.mxu1 %v9208_v23  ;;  %6034 = vmatmul.bf16.vlgmr.msra.gmra.mxu0 %v11860_v8  ;;  %v11938_v4 = vpack.c.bf16 %v4358_v41, %v4350_v27  ;;  %v9925_v23 = vld [vmem:[#allocation8 + $0x6d0] sm:$0xf0]  ;;  %v10920_v27 = vld [vmem:[#allocation8 + $0x1f4] sm:$0xf0]  ;;  %v9163_v41 = vld [vmem:[#allocation8 + $0xc8] sm:$0xf]  ;;  %v9864_v54 = vor.u32 %v11057_v14, %v9861_v44 }
 0x3c3   :  { %6082 = vmatpush.bf16.msrb.mxu0 %v9688_v56  ;;  %v9956_v56 = vor.u32 %v11083_v46, %v9955_v47  ;;  %v9928_v40 = vor.u32 %v11073_v22, %v9925_v23  ;;  %v9720_v47 = vor.u32 %v11021_v35, %v9717_v10  ;;  %v11017_v46 = vld [vmem:[#allocation8 + $0x504] sm:$0xf]  ;;  %v9701_v22 = vld [vmem:[#allocation8 + $0x510] sm:$0xf0]  ;;  %v807_v23 = vperm.slane %v11942_v31, 7 }
 0x3c4   :  { %6060 = vmatpush.bf16.msra.mxu2 %v9336_v18  ;;  %v9541_v18 = vld [vmem:[#allocation8 + $0x3d0] sm:$0xf0]  ;;  %v9704_v0 = vor.u32 %v11017_v46, %v9701_v22  ;;  %v9275_v32 = vld [vmem:[#allocation8 + $0x1a8] sm:$0xf]  ;;  %v10912_v1 = vld [vmem:[#allocation8 + $0x1b4] sm:$0xf0] }
 0x3c5   :  { %6006 = vmatmul.bf16.vlgmr.msrb.gmra.mxu2 %v11938_v4  ;;  %6019 = vmatpush.bf16.msrb.mxu3 %v9956_v56  ;;  %v9544_v24 = vor.u32 %v10977_v20, %v9541_v18  ;;  %v9509_v12 = vld [vmem:[#allocation8 + $0x390] sm:$0xf0]  ;;  %v11053_v56 = vld [vmem:[#allocation8 + $0x624] sm:$0xf]  ;;  %v9308_v20 = vor.u32 %v10920_v27, %v9307_v48  ;;  %v4210_v5 = vadd.f32 %v4209_v53, %v807_v23  ;;  %v9419_v35 = vld [vmem:[#allocation8 + $0x2c8] sm:$0xf] }
 0x3c6   :  { %6047 = vmatpush.bf16.msra.mxu1 %v9192_v51  ;;  %v9608_v51 = vor.u32 %v10993_v16, %v9605_v58  ;;  %v9845_v18 = vld [vmem:[#allocation8 + $0x630] sm:$0xf0]  ;;  %v10916_v16 = vld [vmem:[#allocation8 + $0x1d4] sm:$0xf0]  ;;  %v9147_v58 = vld [vmem:[#allocation8 + $0xa8] sm:$0xf]  ;;  %v9276_v59 = vor.u32 %v10912_v1, %v9275_v32 }
 0x3c7   :  { %6083 = vmatpush.bf16.msrb.mxu0 %v9672_v45  ;;  %v10973_v45 = vld [vmem:[#allocation8 + $0x3a4] sm:$0xf]  ;;  %v9493_v39 = vld [vmem:[#allocation8 + $0x370] sm:$0xf0]  ;;  %v9148_v9 = vor.u32 %v10880_v43, %v9147_v58  ;;  %v10948_v10 = vld [vmem:[#allocation8 + $0x2d4] sm:$0xf0] }
 0x3c8   :  { %6061 = vmatpush.bf16.msra.mxu2 %v9320_v49  ;;  %v11065_v49 = vld [vmem:[#allocation8 + $0x684] sm:$0xf]  ;;  %v9528_v62 = vor.u32 %v10973_v45, %v9525_v50  ;;  %v4211_v45 = vpop.f32.mrf.mxu0  ;;  %v9259_v53 = vld [vmem:[#allocation8 + $0x188] sm:$0xf]  ;;  %v10908_v14 = vld [vmem:[#allocation8 + $0x194] sm:$0xf0]  ;;  %v9420_v48 = vor.u32 %v10948_v10, %v9419_v35 }
 0x3c9   :  { %6048 = vmatmul.bf16.vlgmr.msra.gmra.mxu1 %v11886_v13  ;;  %6068 = vmatpush.bf16.msra.mxu3 %v9560_v29  ;;  %v9896_v60 = vor.u32 %v11065_v49, %v9893_v38  ;;  %v10965_v29 = vld [vmem:[#allocation8 + $0x364] sm:$0xf]  ;;  %v10952_v49 = vld [vmem:[#allocation8 + $0x2f4] sm:$0xf0]  ;;  %v4251_v38 = vpop.f32.mrf.mxu3  ;;  %v9461_v46 = vld [vmem:[#allocation8 + $0x330] sm:$0xf0]  ;;  %v4212_v22 = vadd.f32 %v4211_v45, %v807_v23 }
 0x3ca   :  { %6096 = vmatpush.bf16.msrb.mxu1 %v9816_v19  ;;  %v9752_v19 = vor.u32 %v11029_v6, %v9749_v26  ;;  %v9496_v6 = vor.u32 %v10965_v29, %v9493_v39  ;;  %v9848_v26 = vor.u32 %v11053_v56, %v9845_v18  ;;  %v10957_v44 = vld [vmem:[#allocation8 + $0x324] sm:$0xf]  ;;  %v9445_v56 = vld [vmem:[#allocation8 + $0x310] sm:$0xf0]  ;;  %v9099_v23 = vld [vmem:[#allocation8 + $0x48] sm:$0xf] }
 0x3cb   :  { %6084 = vmatpush.bf16.msrb.mxu0 %v9656_v55  ;;  %v9573_v55 = vld [vmem:[#allocation8 + $0x410] sm:$0xf0]  ;;  %v10940_v43 = vld [vmem:[#allocation8 + $0x294] sm:$0xf0]  ;;  %v9083_v45 = vld [vmem:[#allocation8 + $0x28] sm:$0xf] }
 0x3cc   :  { %6110 = vmatpush.bf16.msrb.mxu2 %v9944_v34  ;;  %v9576_v11 = vor.u32 %v10985_v21, %v9573_v55  ;;  %v10884_v34 = vld [vmem:[#allocation8 + $0xd4] sm:$0xf0]  ;;  %v9691_v35 = vld [vmem:[#allocation8 + $0x4e8] sm:$0xf] }
 0x3cd   :  { %6069 = vmatpush.bf16.msra.mxu3 %v9544_v24  ;;  %v11049_v24 = vld [vmem:[#allocation8 + $0x604] sm:$0xf]  ;;  %v10936_v32 = vld [vmem:[#allocation8 + $0x274] sm:$0xf0] }
 0x3ce   :  { %6097 = vmatpush.bf16.msrb.mxu1 %v9800_v57  ;;  %v10888_v57 = vld [vmem:[#allocation8 + $0xf4] sm:$0xf0] }
 0x3cf   :  { %6085 = vmatpush.bf16.msrb.mxu0 %v9640_v37  ;;  %v9180_v37 = vor.u32 %v10888_v57, %v9179_v61  ;;  %v11016_v10 = vld [vmem:[#allocation8 + $0x4f4] sm:$0xf0] }
 0x3d0   :  { %6111 = vmatpush.bf16.msrb.mxu2 %v9928_v40  ;;  %v9164_v40 = vor.u32 %v10884_v34, %v9163_v41  ;;  %v9260_v41 = vor.u32 %v10908_v14, %v9259_v53  ;;  %v9403_v34 = vld [vmem:[#allocation8 + $0x2a8] sm:$0xf] }
 0x3d1   :  { %6070 = vmatpush.bf16.msra.mxu3 %v9528_v62  ;;  %v9131_v62 = vld [vmem:[#allocation8 + $0x88] sm:$0xf] }
 0x3d2   :  { %6098 = vmatpush.bf16.msrb.mxu1 %v9784_v7  ;;  %v10969_v7 = vld [vmem:[#allocation8 + $0x384] sm:$0xf]  ;;  %v9355_v53 = vld [vmem:[#allocation8 + $0x248] sm:$0xf] }
 0x3d3   :  { %6086 = vmatpush.bf16.msrb.mxu0 %v9624_v33  ;;  %v9512_v36 = vor.u32 %v10969_v7, %v9509_v12  ;;  %v4223_v33 = vpop.f32.mrf.mxu1  ;;  %v10944_v7 = vld [vmem:[#allocation8 + $0x2b4] sm:$0xf0]  ;;  %v10953_v12 = vld [vmem:[#allocation8 + $0x304] sm:$0xf] }
 0x3d4   :  { %6112 = vmatpush.bf16.msrb.mxu2 %v9912_v30  ;;  %v9829_v30 = vld [vmem:[#allocation8 + $0x610] sm:$0xf0]  ;;  %v4224_v61 = vadd.f32 %v4223_v33, %v4210_v5  ;;  %v10868_v33 = vld [vmem:[#allocation8 + $0x54] sm:$0xf0]  ;;  %v9371_v5 = vld [vmem:[#allocation8 + $0x268] sm:$0xf] }
 0x3d5   :  { %6062 = vmatmul.bf16.vlgmr.msra.gmra.mxu2 %v11888_v2  ;;  %6071 = vmatpush.bf16.msra.mxu3 %v9512_v36  ;;  %v9832_v28 = vor.u32 %v11049_v24, %v9829_v30  ;;  %v10900_v24 = vld [vmem:[#allocation8 + $0x154] sm:$0xf0] }
 0x3d6   :  { %6099 = vmatpush.bf16.msrb.mxu1 %v9768_v3  ;;  %v9291_v3 = vld [vmem:[#allocation8 + $0x1c8] sm:$0xf] }
 0x3d7   :  { %6087 = vmatpush.bf16.msrb.mxu0 %v9608_v51  ;;  %v4237_v51 = vpop.f32.mrf.mxu2  ;;  %v9292_v50 = vor.u32 %v10916_v16, %v9291_v3  ;;  %v9404_v3 = vor.u32 %v10944_v7, %v9403_v34  ;;  %v9387_v16 = vld [vmem:[#allocation8 + $0x288] sm:$0xf] }
 0x3d8   :  { %6113 = vmatpush.bf16.msrb.mxu2 %v9896_v60  ;;  %v10961_v60 = vld [vmem:[#allocation8 + $0x344] sm:$0xf]  ;;  %v4238_v36 = vadd.f32 %v4237_v51, %v4224_v61  ;;  %v9372_v61 = vor.u32 %v10936_v32, %v9371_v5  ;;  %v9643_v5 = vld [vmem:[#allocation8 + $0x488] sm:$0xf] }
 0x3d9   :  { %6072 = vmatpush.bf16.msra.mxu3 %v9496_v6  ;;  %v9100_v6 = vor.u32 %v10868_v33, %v9099_v23  ;;  %v9803_v33 = vld [vmem:[#allocation8 + $0x5c8] sm:$0xf] }
 0x3da   :  { %6100 = vmatpush.bf16.msrb.mxu1 %v9752_v19  ;;  %v9435_v19 = vld [vmem:[#allocation8 + $0x2e8] sm:$0xf]  ;;  %v4252_v58 = vadd.f32 %v4251_v38, %v4238_v36 }
 0x3db   :  { %6088 = vmatpush.bf16.msrb.mxu0 %v9592_v42  ;;  %v10876_v42 = vld [vmem:[#allocation8 + $0x94] sm:$0xf0]  ;;  %v9436_v55 = vor.u32 %v10952_v49, %v9435_v19  ;;  %v9388_v49 = vor.u32 %v10940_v43, %v9387_v16  ;;  %v9211_v38 = vld [vmem:[#allocation8 + $0x128] sm:$0xf] }
 0x3dc   :  { %6114 = vmatpush.bf16.msrb.mxu2 %v9880_v52  ;;  %v9132_v57 = vor.u32 %v10876_v42, %v9131_v62  ;;  %v4225_v52 = vpop.f32.mrf.mxu1  ;;  %v10896_v62 = vld [vmem:[#allocation8 + $0x134] sm:$0xf0] }
 0x3dd   :  { %v4226_v18 = vadd.f32 %v4225_v52, %v4212_v22  ;;  %v10932_v52 = vld [vmem:[#allocation8 + $0x254] sm:$0xf0]  ;;  %v9692_v22 = vor.u32 %v11016_v10, %v9691_v35  ;;  %v9931_v35 = vld [vmem:[#allocation8 + $0x6c8] sm:$0xf] }
 0x3de   :  { %6101 = vmatpush.bf16.msrb.mxu1 %v9736_v25  ;;  %v9477_v25 = vld [vmem:[#allocation8 + $0x350] sm:$0xf0]  ;;  %v9356_v7 = vor.u32 %v10932_v52, %v9355_v53  ;;  %v11008_v16 = vld [vmem:[#allocation8 + $0x4b4] sm:$0xf0] }
 0x3df   :  { %6089 = vmatpush.bf16.msrb.mxu0 %v9576_v11  ;;  %v9480_v21 = vor.u32 %v10961_v60, %v9477_v25  ;;  %v9115_v11 = vld [vmem:[#allocation8 + $0x68] sm:$0xf]  ;;  %v4265_v27 = vpop.f32.mrf.mxu0  ;;  %v4239_v29 = vpop.f32.mrf.mxu2  ;;  %v11076_v10 = vld [vmem:[#allocation8 + $0x6d4] sm:$0xf0] }
 0x3e0   :  { %6115 = vmatpush.bf16.msrb.mxu2 %v9864_v54  ;;  %v9243_v54 = vld [vmem:[#allocation8 + $0x168] sm:$0xf]  ;;  %v4240_v30 = vadd.f32 %v4239_v29, %v4226_v18  ;;  %v4266_v19 = vadd.f32 %v4265_v27, %v4252_v58  ;;  %v11036_v53 = vld [vmem:[#allocation8 + $0x594] sm:$0xf0] }
 0x3e1   :  { %6073 = vmatpush.bf16.msra.mxu3 %v9480_v21  ;;  %v9067_v25 = vld [vmem:[#allocation8 + $0x8] sm:$0xf] }
 0x3e2   :  { %6102 = vmatpush.bf16.msrb.mxu1 %v9720_v47  ;;  %6090 = vmatmul.bf16.vlgmr.msrb.gmra.mxu0 %v11924_v15  ;;  %v10872_v47 = vld [vmem:[#allocation8 + $0x74] sm:$0xf0]  ;;  %v9675_v27 = vld [vmem:[#allocation8 + $0x4c8] sm:$0xf] }
 0x3e3   :  { %6138 = vmatpush.bf16.msra.mxu0 %v9180_v37  ;;  %v9464_v37 = vor.u32 %v10957_v44, %v9461_v46  ;;  %v9116_v31 = vor.u32 %v10872_v47, %v9115_v11  ;;  %v9195_v44 = vld [vmem:[#allocation8 + $0x108] sm:$0xf]  ;;  %v10892_v46 = vld [vmem:[#allocation8 + $0x114] sm:$0xf0] }
 0x3e4   :  { %6116 = vmatpush.bf16.msrb.mxu2 %v9848_v26  ;;  %v9227_v26 = vld [vmem:[#allocation8 + $0x148] sm:$0xf] }
 0x3e5   :  { %6074 = vmatpush.bf16.msra.mxu3 %v9464_v37  ;;  %v9819_v37 = vld [vmem:[#allocation8 + $0x5e8] sm:$0xf] }
 0x3e6   :  { %6103 = vmatpush.bf16.msrb.mxu1 %v9704_v0  ;;  %v10904_v0 = vld [vmem:[#allocation8 + $0x174] sm:$0xf0]  ;;  %v4279_v51 = vpop.f32.mrf.mxu1 }
 0x3e7   :  { %6139 = vmatpush.bf16.msra.mxu0 %v9164_v40  ;;  %v4253_v40 = vpop.f32.mrf.mxu3  ;;  %v9244_v39 = vor.u32 %v10904_v0, %v9243_v54  ;;  %v4267_v60 = vpop.f32.mrf.mxu0  ;;  %v9339_v0 = vld [vmem:[#allocation8 + $0x228] sm:$0xf] }
 0x3e8   :  { %6117 = vmatpush.bf16.msrb.mxu2 %v9832_v28  ;;  %v10860_v28 = vld [vmem:[#allocation8 + $0x14] sm:$0xf0]  ;;  %v4254_v21 = vadd.f32 %v4253_v40, %v4240_v30  ;;  %v9323_v40 = vld [vmem:[#allocation8 + $0x208] sm:$0xf] }
 0x3e9   :  { %6104 = vmatmul.bf16.vlgmr.msrb.gmra.mxu1 %v11931_v17  ;;  %v9068_v47 = vor.u32 %v10860_v28, %v9067_v25  ;;  %v11080_v30 = vld [vmem:[#allocation8 + $0x6f4] sm:$0xf0]  ;;  %v11105_v28 = vld [vmem:[#allocation8 + $0x7c4] sm:$0xf] }
 0x3ea   :  { %6152 = vmatpush.bf16.msra.mxu1 %v9308_v20  ;;  %v9448_v20 = vor.u32 %v10953_v12, %v9445_v56  ;;  %v4268_v11 = vadd.f32 %v4267_v60, %v4254_v21  ;;  %v9196_v12 = vor.u32 %v10892_v46, %v9195_v44  ;;  %v10928_v56 = vld [vmem:[#allocation8 + $0x234] sm:$0xf0]  ;;  %v10053_v21 = vld [vmem:[#allocation8 + $0x7d0] sm:$0xf0]  ;;  %v11101_v44 = vld [vmem:[#allocation8 + $0x7a4] sm:$0xf] }
 0x3eb   :  { %6140 = vmatpush.bf16.msra.mxu0 %v9148_v9  ;;  %6118 = vmatmul.bf16.vlgmr.msrb.gmra.mxu2 %v11938_v4  ;;  %v9228_v9 = vor.u32 %v10900_v24, %v9227_v26  ;;  %v9340_v43 = vor.u32 %v10928_v56, %v9339_v0  ;;  %v10069_v26 = vld [vmem:[#allocation8 + $0x7f0] sm:$0xf0]  ;;  %v9947_v24 = vld [vmem:[#allocation8 + $0x6e8] sm:$0xf]  ;;  %v10056_v52 = vor.u32 %v11105_v28, %v10053_v21  ;;  %v11020_v21 = vld [vmem:[#allocation8 + $0x514] sm:$0xf0] }
 0x3ec   :  { %6166 = vmatpush.bf16.msra.mxu2 %v9436_v55  ;;  %6075 = vmatpush.bf16.msra.mxu3 %v9448_v20  ;;  %v4280_v55 = vadd.f32 %v4279_v51, %v4266_v19  ;;  %v11044_v20 = vld [vmem:[#allocation8 + $0x5d4] sm:$0xf0]  ;;  %v9787_v19 = vld [vmem:[#allocation8 + $0x5a8] sm:$0xf]  ;;  %v9948_v25 = vor.u32 %v11080_v30, %v9947_v24  ;;  %v10037_v46 = vld [vmem:[#allocation8 + $0x7b0] sm:$0xf0] }
 0x3ed   :  { %v10021_v0 = vld [vmem:[#allocation8 + $0x790] sm:$0xf0]  ;;  %v11064_v24 = vld [vmem:[#allocation8 + $0x674] sm:$0xf0]  ;;  %v9579_v30 = vld [vmem:[#allocation8 + $0x408] sm:$0xf] }
 0x3ee   :  { %6153 = vmatpush.bf16.msra.mxu1 %v9292_v50  ;;  %v10864_v50 = vld [vmem:[#allocation8 + $0x34] sm:$0xf0]  ;;  %v4293_v42 = vpop.f32.mrf.mxu2  ;;  %v4281_v34 = vpop.f32.mrf.mxu1  ;;  %v9707_v28 = vld [vmem:[#allocation8 + $0x508] sm:$0xf] }
 0x3ef   :  { %6141 = vmatpush.bf16.msra.mxu0 %v9132_v57  ;;  %v9084_v1 = vor.u32 %v10864_v50, %v9083_v45  ;;  %v9212_v57 = vor.u32 %v10896_v62, %v9211_v38  ;;  %v4294_v14 = vadd.f32 %v4293_v42, %v4280_v55  ;;  %v9804_v50 = vor.u32 %v11044_v20, %v9803_v33  ;;  %v9739_v20 = vld [vmem:[#allocation8 + $0x548] sm:$0xf] }
 0x3f0   :  { %6167 = vmatpush.bf16.msra.mxu2 %v9420_v48  ;;  %v11048_v48 = vld [vmem:[#allocation8 + $0x5f4] sm:$0xf0] }
 0x3f1   :  { %v9820_v54 = vor.u32 %v11048_v48, %v9819_v37  ;;  %v9915_v37 = vld [vmem:[#allocation8 + $0x6a8] sm:$0xf]  ;;  %v11072_v48 = vld [vmem:[#allocation8 + $0x6b4] sm:$0xf0] }
 0x3f2   :  { %6154 = vmatpush.bf16.msra.mxu1 %v9276_v59  ;;  %v4307_v59 = vpop.f32.mrf.mxu3 }
 0x3f3   :  { %6142 = vmatpush.bf16.msra.mxu0 %v9116_v31  ;;  %v4308_v36 = vadd.f32 %v4307_v59, %v4294_v14  ;;  %v4282_v31 = vadd.f32 %v4281_v34, %v4268_v11  ;;  %v9627_v14 = vld [vmem:[#allocation8 + $0x468] sm:$0xf]  ;;  %v11000_v11 = vld [vmem:[#allocation8 + $0x474] sm:$0xf0] }
 0x3f4   :  { %6168 = vmatpush.bf16.msra.mxu2 %v9404_v3  ;;  %v10924_v3 = vld [vmem:[#allocation8 + $0x214] sm:$0xf0] }
 0x3f5   :  { %v4335_v51 = vmul.f32 0.2, %v4308_v36  ;;  %vm4319_vm15 = vcmp.ge.f32.partialorder %v4308_v36, 0.0  ;;  %v9324_v38 = vor.u32 %v10924_v3, %v9323_v40  ;;  %v11032_v34 = vld [vmem:[#allocation8 + $0x574] sm:$0xf0] }
 0x3f6   :  { %6155 = vmatpush.bf16.msra.mxu1 %v9260_v41  ;;  %v11012_v41 = vld [vmem:[#allocation8 + $0x4d4] sm:$0xf0]  ;;  %v4295_v29 = vpop.f32.mrf.mxu2  ;;  %v9595_v40 = vld [vmem:[#allocation8 + $0x428] sm:$0xf] }
 0x3f7   :  { %6143 = vmatpush.bf16.msra.mxu0 %v9100_v6  ;;  %v9676_v23 = vor.u32 %v11012_v41, %v9675_v27  ;;  %v4296_v18 = vadd.f32 %v4295_v29, %v4282_v31  ;;  %v11109_v6 = vld [vmem:[#allocation8 + $0x7e4] sm:$0xf]  ;;  %v4351_v62 = vsel %vm4319_vm15, %v4308_v36, %v4335_v51  ;;  %v9628_v27 = vor.u32 %v11000_v11, %v9627_v14  ;;  %v9755_v41 = vld [vmem:[#allocation8 + $0x568] sm:$0xf]  ;;  %v10992_v3 = vld [vmem:[#allocation8 + $0x434] sm:$0xf0] }
 0x3f8   :  { %6169 = vmatpush.bf16.msra.mxu2 %v9388_v49  ;;  %v10072_v60 = vor.u32 %v11109_v6, %v10069_v26  ;;  %v10040_v36 = vor.u32 %v11101_v44, %v10037_v46  ;;  %v9916_v31 = vor.u32 %v11072_v48, %v9915_v37  ;;  %v9756_v56 = vor.u32 %v11032_v34, %v9755_v41  ;;  %v9899_v29 = vld [vmem:[#allocation8 + $0x688] sm:$0xf]  ;;  %v11085_v11 = vld [vmem:[#allocation8 + $0x724] sm:$0xf]  ;;  %v11056_v46 = vld [vmem:[#allocation8 + $0x634] sm:$0xf0] }
 0x3f9   :  { %v9883_v26 = vld [vmem:[#allocation8 + $0x668] sm:$0xf]  ;;  %v9596_v51 = vor.u32 %v10992_v3, %v9595_v40  ;;  %v10914_v48 = vld [vmem:[#allocation8 + $0x1cc] sm:$0xf]  ;;  %v9149_v34 = vld [vmem:[#allocation8 + $0xb8] sm:$0xf0] }
 0x3fa   :  { %6156 = vmatpush.bf16.msra.mxu1 %v9244_v39  ;;  %v9659_v39 = vld [vmem:[#allocation8 + $0x4a8] sm:$0xf]  ;;  %v4309_v58 = vpop.f32.mrf.mxu3  ;;  %v10878_v41 = vld [vmem:[#allocation8 + $0xac] sm:$0xf]  ;;  %v9277_v3 = vld [vmem:[#allocation8 + $0x1b8] sm:$0xf0] }
 0x3fb   :  { %6144 = vmatpush.bf16.msra.mxu0 %v9084_v1  ;;  %v4310_v45 = vadd.f32 %v4309_v58, %v4296_v18  ;;  %v9660_v49 = vor.u32 %v11008_v16, %v9659_v39  ;;  %v11004_v1 = vld [vmem:[#allocation8 + $0x494] sm:$0xf0]  ;;  %v11093_v58 = vld [vmem:[#allocation8 + $0x764] sm:$0xf]  ;;  %v9851_v44 = vld [vmem:[#allocation8 + $0x628] sm:$0xf] }
 0x3fc   :  { %6170 = vmatpush.bf16.msra.mxu2 %v9372_v61  ;;  %v9644_v61 = vor.u32 %v11004_v1, %v9643_v5  ;;  %v11028_v18 = vld [vmem:[#allocation8 + $0x554] sm:$0xf0]  ;;  %v11089_v1 = vld [vmem:[#allocation8 + $0x744] sm:$0xf]  ;;  %v10910_v40 = vld [vmem:[#allocation8 + $0x1ac] sm:$0xf] }
 0x3fd   :  { %vm4327_vm0 = vcmp.ge.f32.partialorder %v4310_v45, 0.0  ;;  %v4343_v32 = vmul.f32 0.2, %v4310_v45  ;;  %v9740_v6 = vor.u32 %v11028_v18, %v9739_v20  ;;  %v9437_v20 = vld [vmem:[#allocation8 + $0x2f8] sm:$0xf0]  ;;  %v9152_v18 = vor.u32 %v10878_v41, %v9149_v34 }
 0x3fe   :  { %6157 = vmatpush.bf16.msra.mxu1 %v9228_v9  ;;  %v11040_v9 = vld [vmem:[#allocation8 + $0x5b4] sm:$0xf0] }
 0x3ff   :  { %6145 = vmatpush.bf16.msra.mxu0 %v9068_v47  ;;  %v4359_v42 = vsel %vm4327_vm0, %v4310_v45, %v4343_v32  ;;  %v9788_v59 = vor.u32 %v11040_v9, %v9787_v19  ;;  %v9932_v47 = vor.u32 %v11076_v10, %v9931_v35  ;;  %v9723_v45 = vld [vmem:[#allocation8 + $0x528] sm:$0xf]  ;;  %v10988_v19 = vld [vmem:[#allocation8 + $0x414] sm:$0xf0]  ;;  %v9181_v9 = vld [vmem:[#allocation8 + $0xf8] sm:$0xf0]  ;;  %v9884_v32 = vor.u32 %v11064_v24, %v9883_v26 }
 0x400   :  { %6171 = vmatpush.bf16.msra.mxu2 %v9356_v7  ;;  %v11950_v55 = vpack.c.bf16 %v4359_v42, %v4351_v62  ;;  %v9611_v7 = vld [vmem:[#allocation8 + $0x448] sm:$0xf]  ;;  %v9989_v62 = vld [vmem:[#allocation8 + $0x750] sm:$0xf0]  ;;  %v10918_v35 = vld [vmem:[#allocation8 + $0x1ec] sm:$0xf] }
 0x401   :  { %v9867_v42 = vld [vmem:[#allocation8 + $0x648] sm:$0xf]  ;;  %v9309_v10 = vld [vmem:[#allocation8 + $0x1f8] sm:$0xf0]  ;;  %vm6967_vm0 = vcmask 122880  }
 0x402   :  { %6158 = vmatpush.bf16.msra.mxu1 %v9212_v57  ;;  %6146 = vmatmul.bf16.vlgmr.msra.gmra.mxu0 %v11860_v8  ;;  %v9771_v57 = vld [vmem:[#allocation8 + $0x588] sm:$0xf] }
 0x403   :  { %6194 = vmatpush.bf16.msrb.mxu0 %v9692_v22  ;;  %6020 = vmatmul.bf16.vlgmr.msrb.gmra.mxu3 %v11950_v55  ;;  %v9772_v22 = vor.u32 %v11036_v53, %v9771_v57  ;;  %v9165_v57 = vld [vmem:[#allocation8 + $0xd8] sm:$0xf0]  ;;  %v9992_v53 = vor.u32 %v11089_v1, %v9989_v62  ;;  %v9547_v24 = vld [vmem:[#allocation8 + $0x3c8] sm:$0xf] }
 0x404   :  { %6172 = vmatpush.bf16.msra.mxu2 %v9340_v43  ;;  %6124 = vmatpush.bf16.msrb.mxu3 %v10072_v60  ;;  %v10005_v43 = vld [vmem:[#allocation8 + $0x770] sm:$0xf0]  ;;  %v11060_v60 = vld [vmem:[#allocation8 + $0x654] sm:$0xf0]  ;;  %v9531_v62 = vld [vmem:[#allocation8 + $0x3a8] sm:$0xf] }
 0x405   :  { %v10008_v5 = vor.u32 %v11093_v58, %v10005_v43  ;;  %v9868_v14 = vor.u32 %v11060_v60, %v9867_v42  ;;  %v10976_v42 = vld [vmem:[#allocation8 + $0x3b4] sm:$0xf0] }
 0x406   :  { %6159 = vmatpush.bf16.msra.mxu1 %v9196_v12  ;;  %v10996_v12 = vld [vmem:[#allocation8 + $0x454] sm:$0xf0] }
 0x407   :  { %6195 = vmatpush.bf16.msrb.mxu0 %v9676_v23  ;;  %v11068_v23 = vld [vmem:[#allocation8 + $0x694] sm:$0xf0]  ;;  %v9612_v33 = vor.u32 %v10996_v12, %v9611_v7  ;;  %v9852_v12 = vor.u32 %v11056_v46, %v9851_v44  ;;  %v9389_v44 = vld [vmem:[#allocation8 + $0x298] sm:$0xf0] }
 0x408   :  { %6173 = vmatpush.bf16.msra.mxu2 %v9324_v38  ;;  %6125 = vmatpush.bf16.msrb.mxu3 %v10056_v52  ;;  %v9900_v16 = vor.u32 %v11068_v23, %v9899_v29  ;;  %v9708_v52 = vor.u32 %v11020_v21, %v9707_v28  ;;  %v10984_v29 = vld [vmem:[#allocation8 + $0x3f4] sm:$0xf0]  ;;  %v9405_v28 = vld [vmem:[#allocation8 + $0x2b8] sm:$0xf0] }
 0x409   :  { %6160 = vmatmul.bf16.vlgmr.msra.gmra.mxu1 %v11886_v13 }
 0x40a   :  { %6208 = vmatpush.bf16.msrb.mxu1 %v9820_v54  ;;  %v11097_v54 = vld [vmem:[#allocation8 + $0x784] sm:$0xf] }
 0x40b   :  { %6196 = vmatpush.bf16.msrb.mxu0 %v9660_v49  ;;  %6174 = vmatmul.bf16.vlgmr.msra.gmra.mxu2 %v11888_v2  ;;  %v10024_v39 = vor.u32 %v11097_v54, %v10021_v0  ;;  %v10886_v49 = vld [vmem:[#allocation8 + $0xec] sm:$0xf]  ;;  %v9835_v54 = vld [vmem:[#allocation8 + $0x608] sm:$0xf]  ;;  %v11052_v0 = vld [vmem:[#allocation8 + $0x614] sm:$0xf0] }
 0x40c   :  { %6222 = vmatpush.bf16.msrb.mxu2 %v9948_v25  ;;  %6126 = vmatpush.bf16.msrb.mxu3 %v10040_v36  ;;  %v9580_v25 = vor.u32 %v10988_v19, %v9579_v30  ;;  %v11081_v36 = vld [vmem:[#allocation8 + $0x704] sm:$0xf]  ;;  %v9836_v43 = vor.u32 %v11052_v0, %v9835_v54  ;;  %v9421_v30 = vld [vmem:[#allocation8 + $0x2d8] sm:$0xf0] }
 0x40d   :  { %v9373_v54 = vld [vmem:[#allocation8 + $0x278] sm:$0xf0] }
 0x40e   :  { %6209 = vmatpush.bf16.msrb.mxu1 %v9804_v50  ;;  %v11024_v50 = vld [vmem:[#allocation8 + $0x534] sm:$0xf0] }
 0x40f   :  { %6197 = vmatpush.bf16.msrb.mxu0 %v9644_v61  ;;  %v9724_v38 = vor.u32 %v11024_v50, %v9723_v45  ;;  %v10882_v61 = vld [vmem:[#allocation8 + $0xcc] sm:$0xf]  ;;  %v9280_v45 = vor.u32 %v10910_v40, %v9277_v3 }
 0x410   :  { %6223 = vmatpush.bf16.msrb.mxu2 %v9932_v47  ;;  %6127 = vmatpush.bf16.msrb.mxu3 %v10024_v39  ;;  %v9973_v47 = vld [vmem:[#allocation8 + $0x730] sm:$0xf0]  ;;  %v9168_v37 = vor.u32 %v10882_v61, %v9165_v57  ;;  %v10874_v39 = vld [vmem:[#allocation8 + $0x8c] sm:$0xf]  ;;  %v9101_v61 = vld [vmem:[#allocation8 + $0x58] sm:$0xf0]  ;;  %v9532_v57 = vor.u32 %v10976_v42, %v9531_v62 }
 0x411   :  { %v9976_v7 = vor.u32 %v11085_v11, %v9973_v47  ;;  %v10946_v50 = vld [vmem:[#allocation8 + $0x2cc] sm:$0xf]  ;;  %v10972_v11 = vld [vmem:[#allocation8 + $0x394] sm:$0xf0]  ;;  %v9341_v42 = vld [vmem:[#allocation8 + $0x238] sm:$0xf0] }
 0x412   :  { %6210 = vmatpush.bf16.msrb.mxu1 %v9788_v59  ;;  %v9184_v59 = vor.u32 %v10886_v49, %v9181_v9  ;;  %v10906_v49 = vld [vmem:[#allocation8 + $0x18c] sm:$0xf]  ;;  %v9261_v9 = vld [vmem:[#allocation8 + $0x198] sm:$0xf0] }
 0x413   :  { %6198 = vmatpush.bf16.msrb.mxu0 %v9628_v27  ;;  %6076 = vmatmul.bf16.vlgmr.msra.gmra.mxu3 %v11902_v63  ;;  %v9293_v27 = vld [vmem:[#allocation8 + $0x1d8] sm:$0xf0]  ;;  %v9264_v60 = vor.u32 %v10906_v49, %v9261_v9  ;;  %v10938_v47 = vld [vmem:[#allocation8 + $0x28c] sm:$0xf] }
 0x414   :  { %6224 = vmatpush.bf16.msrb.mxu2 %v9916_v31  ;;  %6128 = vmatpush.bf16.msrb.mxu3 %v10008_v5  ;;  %v9957_v31 = vld [vmem:[#allocation8 + $0x710] sm:$0xf0]  ;;  %v9296_v23 = vor.u32 %v10914_v48, %v9293_v27  ;;  %v10870_v5 = vld [vmem:[#allocation8 + $0x6c] sm:$0xf]  ;;  %v9085_v27 = vld [vmem:[#allocation8 + $0x38] sm:$0xf0]  ;;  %v9392_v34 = vor.u32 %v10938_v47, %v9389_v44 }
 0x415   :  { %v9960_v58 = vor.u32 %v11081_v36, %v9957_v31  ;;  %v10862_v48 = vld [vmem:[#allocation8 + $0x2c] sm:$0xf]  ;;  %v9677_v49 = vld [vmem:[#allocation8 + $0x4d8] sm:$0xf0]  ;;  %v11112_v47 = vld [vmem:[#allocation8 + $0x7f4] sm:$0xf0] }
 0x416   :  { %6211 = vmatpush.bf16.msrb.mxu1 %v9772_v22  ;;  %v9312_v22 = vor.u32 %v10918_v35, %v9309_v10  ;;  %v9245_v35 = vld [vmem:[#allocation8 + $0x178] sm:$0xf0]  ;;  %v10866_v10 = vld [vmem:[#allocation8 + $0x4c] sm:$0xf]  ;;  %v9088_v0 = vor.u32 %v10862_v48, %v9085_v27 }
 0x417   :  { %6199 = vmatpush.bf16.msrb.mxu0 %v9612_v33  ;;  %v10950_v33 = vld [vmem:[#allocation8 + $0x2ec] sm:$0xf]  ;;  %v9104_v46 = vor.u32 %v10866_v10, %v9101_v61  ;;  %v9789_v27 = vld [vmem:[#allocation8 + $0x5b8] sm:$0xf0] }
 0x418   :  { %6225 = vmatpush.bf16.msrb.mxu2 %v9900_v16  ;;  %6129 = vmatpush.bf16.msrb.mxu3 %v9992_v53  ;;  %v9133_v16 = vld [vmem:[#allocation8 + $0x98] sm:$0xf0]  ;;  %v9440_v26 = vor.u32 %v10950_v33, %v9437_v20  ;;  %v10934_v31 = vld [vmem:[#allocation8 + $0x26c] sm:$0xf] }
 0x419   :  { %v9136_v19 = vor.u32 %v10874_v39, %v9133_v16  ;;  %v9069_v33 = vld [vmem:[#allocation8 + $0x18] sm:$0xf0]  ;;  %v11014_v20 = vld [vmem:[#allocation8 + $0x4ec] sm:$0xf]  ;;  %v9376_v3 = vor.u32 %v10934_v31, %v9373_v54  ;;  %v9483_v39 = vld [vmem:[#allocation8 + $0x348] sm:$0xf] }
 0x41a   :  { %6212 = vmatpush.bf16.msrb.mxu1 %v9756_v56  ;;  %v9563_v56 = vld [vmem:[#allocation8 + $0x3e8] sm:$0xf]  ;;  %v10926_v62 = vld [vmem:[#allocation8 + $0x22c] sm:$0xf]  ;;  %v11108_v54 = vld [vmem:[#allocation8 + $0x7d4] sm:$0xf0] }
 0x41b   :  { %6200 = vmatpush.bf16.msrb.mxu0 %v9596_v51  ;;  %v10980_v51 = vld [vmem:[#allocation8 + $0x3d4] sm:$0xf0]  ;;  %v9344_v61 = vor.u32 %v10926_v62, %v9341_v42  ;;  %v11038_v48 = vld [vmem:[#allocation8 + $0x5ac] sm:$0xf]  ;;  %v10059_v31 = vld [vmem:[#allocation8 + $0x7c8] sm:$0xf] }
 0x41c   :  { %6226 = vmatpush.bf16.msrb.mxu2 %v9884_v32  ;;  %6130 = vmatpush.bf16.msrb.mxu3 %v9976_v7  ;;  %v9117_v32 = vld [vmem:[#allocation8 + $0x78] sm:$0xf0]  ;;  %v9548_v1 = vor.u32 %v10980_v51, %v9547_v24  ;;  %v9499_v7 = vld [vmem:[#allocation8 + $0x368] sm:$0xf]  ;;  %v10890_v24 = vld [vmem:[#allocation8 + $0x10c] sm:$0xf] }
 0x41d   :  { %v9120_v21 = vor.u32 %v10870_v5, %v9117_v32  ;;  %v9197_v51 = vld [vmem:[#allocation8 + $0x118] sm:$0xf0]  ;;  %v9467_v32 = vld [vmem:[#allocation8 + $0x328] sm:$0xf]  ;;  %v11026_v62 = vld [vmem:[#allocation8 + $0x54c] sm:$0xf] }
 0x41e   :  { %6213 = vmatpush.bf16.msrb.mxu1 %v9740_v6  ;;  %v9564_v6 = vor.u32 %v10984_v29, %v9563_v56  ;;  %v10894_v56 = vld [vmem:[#allocation8 + $0x12c] sm:$0xf]  ;;  %v9213_v29 = vld [vmem:[#allocation8 + $0x138] sm:$0xf0] }
 0x41f   :  { %6201 = vmatpush.bf16.msrb.mxu0 %v9580_v25  ;;  %v10942_v25 = vld [vmem:[#allocation8 + $0x2ac] sm:$0xf]  ;;  %v9216_v16 = vor.u32 %v10894_v56, %v9213_v29  ;;  %v9933_v29 = vld [vmem:[#allocation8 + $0x6d8] sm:$0xf0] }
 0x420   :  { %6227 = vmatpush.bf16.msrb.mxu2 %v9868_v14  ;;  %6131 = vmatpush.bf16.msrb.mxu3 %v9960_v58  ;;  %v9408_v53 = vor.u32 %v10942_v25, %v9405_v28  ;;  %v9515_v14 = vld [vmem:[#allocation8 + $0x388] sm:$0xf]  ;;  %v10964_v58 = vld [vmem:[#allocation8 + $0x354] sm:$0xf0]  ;;  %v11042_v28 = vld [vmem:[#allocation8 + $0x5cc] sm:$0xf] }
 0x421   :  { %v9516_v41 = vor.u32 %v10972_v11, %v9515_v14  ;;  %v9484_v9 = vor.u32 %v10964_v58, %v9483_v39  ;;  %v10922_v14 = vld [vmem:[#allocation8 + $0x20c] sm:$0xf]  ;;  %v9325_v11 = vld [vmem:[#allocation8 + $0x218] sm:$0xf0]  ;;  %v10043_v39 = vld [vmem:[#allocation8 + $0x7a8] sm:$0xf] }
 0x422   :  { %6214 = vmatpush.bf16.msrb.mxu1 %v9724_v38  ;;  %6202 = vmatmul.bf16.vlgmr.msrb.gmra.mxu0 %v11924_v15  ;;  %v9424_v38 = vor.u32 %v10946_v50, %v9421_v30  ;;  %v11046_v50 = vld [vmem:[#allocation8 + $0x5ec] sm:$0xf]  ;;  %v9821_v30 = vld [vmem:[#allocation8 + $0x5f8] sm:$0xf0] }
 0x423   :  { %6250 = vmatpush.bf16.msra.mxu0 %v9184_v59  ;;  %v10902_v59 = vld [vmem:[#allocation8 + $0x16c] sm:$0xf]  ;;  %6132 = vmatmul.bf16.vlgmr.msrb.gmra.mxu3 %v11950_v55  ;;  %v9741_v42 = vld [vmem:[#allocation8 + $0x558] sm:$0xf0] }
 0x424   :  { %6228 = vmatpush.bf16.msrb.mxu2 %v9852_v12  ;;  %6180 = vmatpush.bf16.msra.mxu3 %v9564_v6  ;;  %v10968_v12 = vld [vmem:[#allocation8 + $0x374] sm:$0xf0]  ;;  %v9357_v6 = vld [vmem:[#allocation8 + $0x258] sm:$0xf0]  ;;  %v11074_v56 = vld [vmem:[#allocation8 + $0x6cc] sm:$0xf] }
 0x425   :  { %v9500_v40 = vor.u32 %v10968_v12, %v9499_v7  ;;  %v9328_v12 = vor.u32 %v10922_v14, %v9325_v11  ;;  %v9725_v14 = vld [vmem:[#allocation8 + $0x538] sm:$0xf0]  ;;  %v10986_v11 = vld [vmem:[#allocation8 + $0x40c] sm:$0xf] }
 0x426   :  { %6215 = vmatpush.bf16.msrb.mxu1 %v9708_v52  ;;  %v9248_v52 = vor.u32 %v10902_v59, %v9245_v35  ;;  %v11006_v59 = vld [vmem:[#allocation8 + $0x4ac] sm:$0xf]  ;;  %v9661_v35 = vld [vmem:[#allocation8 + $0x4b8] sm:$0xf0] }
 0x427   :  { %6251 = vmatpush.bf16.msra.mxu0 %v9168_v37  ;;  %v9229_v37 = vld [vmem:[#allocation8 + $0x158] sm:$0xf0] }
 0x428   :  { %6229 = vmatpush.bf16.msrb.mxu2 %v9836_v43  ;;  %6181 = vmatpush.bf16.msra.mxu3 %v9548_v1  ;;  %v10930_v43 = vld [vmem:[#allocation8 + $0x24c] sm:$0xf]  ;;  %v9200_v1 = vor.u32 %v10890_v24, %v9197_v51  ;;  %v9757_v51 = vld [vmem:[#allocation8 + $0x578] sm:$0xf0] }
 0x429   :  { %6216 = vmatmul.bf16.vlgmr.msrb.gmra.mxu1 %v11931_v17  ;;  %v9360_v5 = vor.u32 %v10930_v43, %v9357_v6  ;;  %v11070_v43 = vld [vmem:[#allocation8 + $0x6ac] sm:$0xf]  ;;  %v9917_v6 = vld [vmem:[#allocation8 + $0x6b8] sm:$0xf0] }
 0x42a   :  { %6264 = vmatpush.bf16.msra.mxu1 %v9312_v22  ;;  %v10898_v22 = vld [vmem:[#allocation8 + $0x14c] sm:$0xf] }
 0x42b   :  { %6252 = vmatpush.bf16.msra.mxu0 %v9152_v18  ;;  %6230 = vmatmul.bf16.vlgmr.msrb.gmra.mxu2 %v11938_v4  ;;  %v9232_v36 = vor.u32 %v10898_v22, %v9229_v37  ;;  %v9693_v18 = vld [vmem:[#allocation8 + $0x4f8] sm:$0xf0]  ;;  %v9664_v37 = vor.u32 %v11006_v59, %v9661_v35  ;;  %v11030_v24 = vld [vmem:[#allocation8 + $0x56c] sm:$0xf]  ;;  %v11096_v59 = vld [vmem:[#allocation8 + $0x774] sm:$0xf0]  ;;  %v9744_v35 = vor.u32 %v11026_v62, %v9741_v42 }
 0x42c   :  { %6278 = vmatpush.bf16.msra.mxu2 %v9440_v26  ;;  %6182 = vmatpush.bf16.msra.mxu3 %v9532_v57  ;;  %v9451_v57 = vld [vmem:[#allocation8 + $0x308] sm:$0xf]  ;;  %v9949_v22 = vld [vmem:[#allocation8 + $0x6f8] sm:$0xf0]  ;;  %v10974_v42 = vld [vmem:[#allocation8 + $0x3ac] sm:$0xf] }
 0x42e   :  { %6265 = vmatpush.bf16.msra.mxu1 %v9296_v23  ;;  %v10858_v23 = vld [vmem:[#allocation8 + $0xc] sm:$0xf] }
 0x42f   :  { %6253 = vmatpush.bf16.msra.mxu0 %v9136_v19  ;;  %v9072_v26 = vor.u32 %v10858_v23, %v9069_v33  ;;  %v11010_v19 = vld [vmem:[#allocation8 + $0x4cc] sm:$0xf] }
 0x430   :  { %6279 = vmatpush.bf16.msra.mxu2 %v9424_v38  ;;  %6183 = vmatpush.bf16.msra.mxu3 %v9516_v41  ;;  %v10960_v38 = vld [vmem:[#allocation8 + $0x334] sm:$0xf0]  ;;  %v9680_v25 = vor.u32 %v11010_v19, %v9677_v49  ;;  %v11002_v41 = vld [vmem:[#allocation8 + $0x48c] sm:$0xf]  ;;  %v9920_v19 = vor.u32 %v11070_v43, %v9917_v6  ;;  %v10027_v49 = vld [vmem:[#allocation8 + $0x788] sm:$0xf] }
 0x431   :  { %v9468_v10 = vor.u32 %v10960_v38, %v9467_v32  ;;  %v11034_v33 = vld [vmem:[#allocation8 + $0x58c] sm:$0xf]  ;;  %v9837_v43 = vld [vmem:[#allocation8 + $0x618] sm:$0xf0]  ;;  %v10123_v6 = vld [vmem:[#allocation11 + $0x50] sm:$0xf] }
 0x432   :  { %6266 = vmatpush.bf16.msra.mxu1 %v9280_v45  ;;  %v9696_v45 = vor.u32 %v11014_v20, %v9693_v18  ;;  %v9773_v20 = vld [vmem:[#allocation8 + $0x598] sm:$0xf0]  ;;  %v10998_v18 = vld [vmem:[#allocation8 + $0x46c] sm:$0xf] }
 0x433   :  { %6254 = vmatpush.bf16.msra.mxu0 %v9120_v21  ;;  %v9805_v21 = vld [vmem:[#allocation8 + $0x5d8] sm:$0xf0]  ;;  %v9776_v58 = vor.u32 %v11034_v33, %v9773_v20  ;;  %v11066_v32 = vld [vmem:[#allocation8 + $0x68c] sm:$0xf]  ;;  %v10131_v20 = vld [vmem:[#allocation11 + $0x60] sm:$0xf] }
 0x434   :  { %6280 = vmatpush.bf16.msra.mxu2 %v9408_v53  ;;  %6184 = vmatpush.bf16.msra.mxu3 %v9500_v40  ;;  %v10956_v53 = vld [vmem:[#allocation8 + $0x314] sm:$0xf0]  ;;  %v9808_v44 = vor.u32 %v11042_v28, %v9805_v21  ;;  %v9629_v40 = vld [vmem:[#allocation8 + $0x478] sm:$0xf0]  ;;  %v10011_v21 = vld [vmem:[#allocation8 + $0x768] sm:$0xf] }
 0x435   :  { %v9452_v7 = vor.u32 %v10956_v53, %v9451_v57  ;;  %v11022_v53 = vld [vmem:[#allocation8 + $0x52c] sm:$0xf]  ;;  %v9853_v33 = vld [vmem:[#allocation8 + $0x638] sm:$0xf0] }
 0x436   :  { %6267 = vmatpush.bf16.msra.mxu1 %v9264_v60  ;;  %v9824_v60 = vor.u32 %v11046_v50, %v9821_v30  ;;  %v9613_v50 = vld [vmem:[#allocation8 + $0x458] sm:$0xf0] }
 0x437   :  { %6255 = vmatpush.bf16.msra.mxu0 %v9104_v46  ;;  %v11078_v46 = vld [vmem:[#allocation8 + $0x6ec] sm:$0xf] }
 0x438   :  { %6281 = vmatpush.bf16.msra.mxu2 %v9392_v34  ;;  %6185 = vmatpush.bf16.msra.mxu3 %v9484_v9  ;;  %v9645_v34 = vld [vmem:[#allocation8 + $0x498] sm:$0xf0]  ;;  %v11100_v9 = vld [vmem:[#allocation8 + $0x794] sm:$0xf0] }
 0x439   :  { %v9648_v23 = vor.u32 %v11002_v41, %v9645_v34  ;;  %v10139_v34 = vld [vmem:[#allocation11 + $0x70] sm:$0xf] }
 0x43a   :  { %6268 = vmatpush.bf16.msra.mxu1 %v9248_v52  ;;  %v10075_v52 = vld [vmem:[#allocation8 + $0x7e8] sm:$0xf] }
 0x43b   :  { %6256 = vmatpush.bf16.msra.mxu0 %v9088_v0  ;;  %v9792_v0 = vor.u32 %v11038_v48, %v9789_v27  ;;  %v9728_v48 = vor.u32 %v11022_v53, %v9725_v14  ;;  %v9869_v27 = vld [vmem:[#allocation8 + $0x658] sm:$0xf0]  ;;  %v5923_v53 = vpop.f32.mrf.mxu0  ;;  %v10966_v14 = vld [vmem:[#allocation8 + $0x36c] sm:$0xf] }
 0x43c   :  { %6282 = vmatpush.bf16.msra.mxu2 %v9376_v3  ;;  %6186 = vmatpush.bf16.msra.mxu3 %v9468_v10  ;;  %v10060_v3 = vor.u32 %v11108_v54, %v10059_v31  ;;  %v11062_v10 = vld [vmem:[#allocation8 + $0x66c] sm:$0xf] }
 0x43e   :  { %6269 = vmatpush.bf16.msra.mxu1 %v9232_v36  ;;  %v9952_v36 = vor.u32 %v11078_v46, %v9949_v22  ;;  %v9995_v46 = vld [vmem:[#allocation8 + $0x748] sm:$0xf]  ;;  %v11092_v22 = vld [vmem:[#allocation8 + $0x754] sm:$0xf0] }
 0x43f   :  { %6257 = vmatpush.bf16.msra.mxu0 %v9072_v26  ;;  %v9632_v26 = vor.u32 %v10998_v18, %v9629_v40  ;;  %v9996_v31 = vor.u32 %v11092_v22, %v9995_v46  ;;  %v11126_v18 = vld [vmem:[#allocation11 + $0x64] sm:$0xf0]  ;;  %v9485_v22 = vld [vmem:[#allocation8 + $0x358] sm:$0xf0] }
 0x440   :  { %6283 = vmatpush.bf16.msra.mxu2 %v9360_v5  ;;  %6187 = vmatpush.bf16.msra.mxu3 %v9452_v7  ;;  %v9760_v5 = vor.u32 %v11030_v24, %v9757_v51  ;;  %v11128_v7 = vld [vmem:[#allocation11 + $0x74] sm:$0xf0]  ;;  %v10132_v40 = vor.u32 %v11126_v18, %v10131_v20  ;;  %v10982_v24 = vld [vmem:[#allocation8 + $0x3ec] sm:$0xf]  ;;  %v11971_v18 = vld [vmem:[#allocation9] sm:$0xf] }
 0x441   :  { %v9565_v51 = vld [vmem:[#allocation8 + $0x3f8] sm:$0xf0]  ;;  %v10962_v46 = vld [vmem:[#allocation8 + $0x34c] sm:$0xf] }
 0x442   :  { %6270 = vmatpush.bf16.msra.mxu1 %v9216_v16  ;;  %6258 = vmatmul.bf16.vlgmr.msra.gmra.mxu0 %v11860_v8  ;;  %v10076_v8 = vor.u32 %v11112_v47, %v10075_v52  ;;  %v11104_v16 = vld [vmem:[#allocation8 + $0x7b4] sm:$0xf0]  ;;  %v9581_v52 = vld [vmem:[#allocation8 + $0x418] sm:$0xf0]  ;;  %v10012_v47 = vor.u32 %v11096_v59, %v10011_v21  ;;  %v10970_v21 = vld [vmem:[#allocation8 + $0x38c] sm:$0xf] }
 0x443   :  { %6306 = vmatpush.bf16.msrb.mxu0 %v9696_v45  ;;  %6188 = vmatmul.bf16.vlgmr.msra.gmra.mxu3 %v11902_v63  ;;  %v10994_v45 = vld [vmem:[#allocation8 + $0x44c] sm:$0xf]  ;;  %v10044_v30 = vor.u32 %v11104_v16, %v10043_v39  ;;  %v9584_v41 = vor.u32 %v10986_v11, %v9581_v52  ;;  %v9963_v39 = vld [vmem:[#allocation8 + $0x708] sm:$0xf]  ;;  %v11084_v16 = vld [vmem:[#allocation8 + $0x714] sm:$0xf0] }
 0x444   :  { %6284 = vmatpush.bf16.msra.mxu2 %v9344_v61  ;;  %6236 = vmatpush.bf16.msrb.mxu3 %v10076_v8  ;;  %v9616_v38 = vor.u32 %v10994_v45, %v9613_v50  ;;  %v9885_v61 = vld [vmem:[#allocation8 + $0x678] sm:$0xf0]  ;;  %v9964_v50 = vor.u32 %v11084_v16, %v9963_v39 }
 0x445   :  { %v9709_v8 = vld [vmem:[#allocation8 + $0x518] sm:$0xf0] }
 0x446   :  { %6271 = vmatpush.bf16.msra.mxu1 %v9200_v1  ;;  %v9901_v1 = vld [vmem:[#allocation8 + $0x698] sm:$0xf0] }
 0x447   :  { %6307 = vmatpush.bf16.msrb.mxu0 %v9680_v25  ;;  %v9597_v25 = vld [vmem:[#allocation8 + $0x438] sm:$0xf0]  ;;  %v9904_v28 = vor.u32 %v11066_v32, %v9901_v1  ;;  %v10107_v1 = vld [vmem:[#allocation11 + $0x30] sm:$0xf] }
 0x448   :  { %6285 = vmatpush.bf16.msra.mxu2 %v9328_v12  ;;  %6237 = vmatpush.bf16.msrb.mxu3 %v10060_v3  ;;  %v11018_v12 = vld [vmem:[#allocation8 + $0x50c] sm:$0xf]  ;;  %v9549_v32 = vld [vmem:[#allocation8 + $0x3d8] sm:$0xf0] }
 0x449   :  { %6272 = vmatmul.bf16.vlgmr.msra.gmra.mxu1 %v11886_v13  ;;  %v9936_v13 = vor.u32 %v11074_v56, %v9933_v29  ;;  %v11088_v56 = vld [vmem:[#allocation8 + $0x734] sm:$0xf0]  ;;  %v11054_v29 = vld [vmem:[#allocation8 + $0x62c] sm:$0xf]  ;;  %v9517_v59 = vld [vmem:[#allocation8 + $0x398] sm:$0xf0] }
 0x44a   :  { %6320 = vmatpush.bf16.msrb.mxu1 %v9824_v60  ;;  %v10990_v60 = vld [vmem:[#allocation8 + $0x42c] sm:$0xf]  ;;  %v9501_v11 = vld [vmem:[#allocation8 + $0x378] sm:$0xf0] }
 0x44b   :  { %6308 = vmatpush.bf16.msrb.mxu0 %v9664_v37  ;;  %6286 = vmatmul.bf16.vlgmr.msra.gmra.mxu2 %v11888_v2  ;;  %v10028_v2 = vor.u32 %v11100_v9, %v10027_v49  ;;  %v9600_v57 = vor.u32 %v10990_v60, %v9597_v25  ;;  %v11058_v37 = vld [vmem:[#allocation8 + $0x64c] sm:$0xf]  ;;  %v10115_v49 = vld [vmem:[#allocation11 + $0x40] sm:$0xf]  ;;  %v9533_v60 = vld [vmem:[#allocation8 + $0x3b8] sm:$0xf0] }
 0x44c   :  { %6334 = vmatpush.bf16.msrb.mxu2 %v9952_v36  ;;  %6238 = vmatpush.bf16.msrb.mxu3 %v10044_v30  ;;  %v10140_v36 = vor.u32 %v11128_v7, %v10139_v34  ;;  %v9872_v54 = vor.u32 %v11058_v37, %v9869_v27  ;;  %v11122_v9 = vld [vmem:[#allocation11 + $0x44] sm:$0xf0]  ;;  %v9488_v37 = vor.u32 %v10962_v46, %v9485_v22  ;;  %v10083_v27 = vld [vmem:[#allocation11] sm:$0xf]  ;;  %v9469_v34 = vld [vmem:[#allocation8 + $0x338] sm:$0xf0] }
 0x44d   :  { %v10077_v39 = vld [vmem:[#allocation8 + $0x7f8] sm:$0xf0]  ;;  %v10171_v22 = vld [vmem:[#allocation11 + $0xb0] sm:$0xf] }
 0x44e   :  { %6321 = vmatpush.bf16.msrb.mxu1 %v9808_v44  ;;  %v9888_v44 = vor.u32 %v11062_v10, %v9885_v61  ;;  %v10091_v10 = vld [vmem:[#allocation11 + $0x10] sm:$0xf]  ;;  %v11116_v61 = vld [vmem:[#allocation11 + $0x14] sm:$0xf0] }
 0x44f   :  { %6309 = vmatpush.bf16.msrb.mxu0 %v9648_v23  ;;  %v9712_v23 = vor.u32 %v11018_v12, %v9709_v8  ;;  %v10092_v52 = vor.u32 %v11116_v61, %v10091_v10  ;;  %v11127_v12 = vld [vmem:[#allocation11 + $0x74] sm:$0xf]  ;;  %v10141_v8 = vld [vmem:[#allocation11 + $0x78] sm:$0xf0] }
 0x450   :  { %6335 = vmatpush.bf16.msrb.mxu2 %v9936_v13  ;;  %6239 = vmatpush.bf16.msrb.mxu3 %v10028_v2  ;;  %v9856_v13 = vor.u32 %v11054_v29, %v9853_v33  ;;  %v11118_v2 = vld [vmem:[#allocation11 + $0x24] sm:$0xf0]  ;;  %v11125_v29 = vld [vmem:[#allocation11 + $0x64] sm:$0xf] }
 0x452   :  { %6322 = vmatpush.bf16.msrb.mxu1 %v9792_v0  ;;  %v9979_v0 = vld [vmem:[#allocation8 + $0x728] sm:$0xf] }
 0x453   :  { %6310 = vmatpush.bf16.msrb.mxu0 %v9632_v26  ;;  %v9980_v3 = vor.u32 %v11088_v56, %v9979_v0  ;;  %v11124_v26 = vld [vmem:[#allocation11 + $0x54] sm:$0xf0]  ;;  %v5925_v0 = vpop.f32.mrf.mxu0 }
 0x454   :  { %6336 = vmatpush.bf16.msrb.mxu2 %v9920_v19  ;;  %6240 = vmatpush.bf16.msrb.mxu3 %v10012_v47  ;;  %v10124_v45 = vor.u32 %v11124_v26, %v10123_v6  ;;  %v9568_v19 = vor.u32 %v10982_v24, %v9565_v51  ;;  %v9504_v47 = vor.u32 %v10966_v14, %v9501_v11  ;;  %v5965_v26 = vpop.f32.mrf.mxu3  ;;  %v11106_v51 = vld [vmem:[#allocation8 + $0x7cc] sm:$0xf] }
 0x456   :  { %6323 = vmatpush.bf16.msrb.mxu1 %v9776_v58  ;;  %v11050_v58 = vld [vmem:[#allocation8 + $0x60c] sm:$0xf] }
 0x457   :  { %6311 = vmatpush.bf16.msrb.mxu0 %v9616_v38  ;;  %v9840_v30 = vor.u32 %v11050_v58, %v9837_v43  ;;  %v11120_v38 = vld [vmem:[#allocation11 + $0x34] sm:$0xf0]  ;;  %v4626_v43 = vperm.slane %v11971_v18, 0 }
 0x458   :  { %6337 = vmatpush.bf16.msrb.mxu2 %v9904_v28  ;;  %6241 = vmatpush.bf16.msrb.mxu3 %v9996_v31  ;;  %v10108_v25 = vor.u32 %v11120_v38, %v10107_v1  ;;  %v9536_v28 = vor.u32 %v10974_v42, %v9533_v60  ;;  %v10203_v31 = vld [vmem:[#allocation11 + $0xf0] sm:$0xf]  ;;  %v11140_v1 = vld [vmem:[#allocation11 + $0xd4] sm:$0xf0]  ;;  %v11121_v42 = vld [vmem:[#allocation11 + $0x44] sm:$0xf] }
 0x459   :  { %v5924_v38 = vadd.f32 %v5923_v53, %v4626_v43  ;;  %v10117_v60 = vld [vmem:[#allocation11 + $0x48] sm:$0xf0]  ;;  %v5926_v14 = vadd.f32 %v5925_v0, %v4626_v43 }
 0x45a   :  { %6324 = vmatpush.bf16.msrb.mxu1 %v9760_v5  ;;  %v10978_v5 = vld [vmem:[#allocation8 + $0x3cc] sm:$0xf] }
 0x45b   :  { %6312 = vmatpush.bf16.msrb.mxu0 %v9600_v57  ;;  %v9552_v62 = vor.u32 %v10978_v5, %v9549_v32  ;;  %v9520_v57 = vor.u32 %v10970_v21, %v9517_v59  ;;  %v5979_v5 = vpop.f32.mrf.mxu0  ;;  %v10179_v21 = vld [vmem:[#allocation11 + $0xc0] sm:$0xf]  ;;  %v11138_v59 = vld [vmem:[#allocation11 + $0xc4] sm:$0xf0] }
 0x45c   :  { %6338 = vmatpush.bf16.msrb.mxu2 %v9888_v44  ;;  %6242 = vmatpush.bf16.msrb.mxu3 %v9980_v3  ;;  %v11969_v44 = vpop.f32.mrf.mxu2  ;;  %v9453_v3 = vld [vmem:[#allocation8 + $0x318] sm:$0xf0]  ;;  %v10180_v11 = vor.u32 %v11138_v59, %v10179_v21  ;;  %v11082_v21 = vld [vmem:[#allocation8 + $0x70c] sm:$0xf] }
 0x45e   :  { %6325 = vmatpush.bf16.msrb.mxu1 %v9744_v35 }
 0x45f   :  { %6313 = vmatpush.bf16.msrb.mxu0 %v9584_v41  ;;  %v11114_v41 = vld [vmem:[#allocation11 + $0x4] sm:$0xf0] }
 0x460   :  { %6339 = vmatpush.bf16.msrb.mxu2 %v9872_v54  ;;  %6243 = vmatpush.bf16.msrb.mxu3 %v9964_v50  ;;  %v10084_v7 = vor.u32 %v11114_v41, %v10083_v27  ;;  %v11144_v54 = vld [vmem:[#allocation11 + $0xf4] sm:$0xf0]  ;;  %v11142_v50 = vld [vmem:[#allocation11 + $0xe4] sm:$0xf0]  ;;  %v11117_v41 = vld [vmem:[#allocation11 + $0x24] sm:$0xf] }
 0x461   :  { %v10204_v56 = vor.u32 %v11144_v54, %v10203_v31  ;;  %v10029_v27 = vld [vmem:[#allocation8 + $0x798] sm:$0xf0] }
 0x462   :  { %6326 = vmatpush.bf16.msrb.mxu1 %v9728_v48  ;;  %6314 = vmatmul.bf16.vlgmr.msrb.gmra.mxu0 %v11924_v15  ;;  %v10116_v15 = vor.u32 %v11122_v9, %v10115_v49  ;;  %v10958_v48 = vld [vmem:[#allocation8 + $0x32c] sm:$0xf]  ;;  %v11123_v49 = vld [vmem:[#allocation11 + $0x54] sm:$0xf]  ;;  %v10125_v9 = vld [vmem:[#allocation11 + $0x58] sm:$0xf0] }
 0x463   :  { %6780 = vmatpush.bf16.msra.mxu0 %v10140_v36  ;;  %6244 = vmatmul.bf16.vlgmr.msrb.gmra.mxu3 %v11950_v55  ;;  %v10144_v36 = vor.u32 %v11127_v12, %v10141_v8  ;;  %v9472_v33 = vor.u32 %v10958_v48, %v9469_v34  ;;  %v10128_v32 = vor.u32 %v11123_v49, %v10125_v9  ;;  %v10101_v34 = vld [vmem:[#allocation11 + $0x28] sm:$0xf0]  ;;  %v10013_v31 = vld [vmem:[#allocation8 + $0x778] sm:$0xf0] }
 0x464   :  { %6340 = vmatpush.bf16.msrb.mxu2 %v9856_v13  ;;  %6292 = vmatpush.bf16.msra.mxu3 %v9568_v19  ;;  %v11110_v13 = vld [vmem:[#allocation8 + $0x7ec] sm:$0xf]  ;;  %v11973_v58 = vpop.f32.mrf.mxu2  ;;  %v10104_v54 = vor.u32 %v11117_v41, %v10101_v34 }
 0x465   :  { %v10080_v24 = vor.u32 %v11110_v13, %v10077_v39 }
 0x466   :  { %6327 = vmatpush.bf16.msrb.mxu1 %v9712_v23  ;;  %v10133_v23 = vld [vmem:[#allocation11 + $0x68] sm:$0xf0] }
 0x467   :  { %6781 = vmatpush.bf16.msra.mxu0 %v10132_v40  ;;  %v10136_v20 = vor.u32 %v11125_v29, %v10133_v23  ;;  %v10954_v40 = vld [vmem:[#allocation8 + $0x30c] sm:$0xf]  ;;  %v10163_v29 = vld [vmem:[#allocation11 + $0xa0] sm:$0xf] }
 0x468   :  { %6341 = vmatpush.bf16.msrb.mxu2 %v9840_v30  ;;  %6293 = vmatpush.bf16.msra.mxu3 %v9552_v62  ;;  %v9456_v6 = vor.u32 %v10954_v40, %v9453_v3  ;;  %v10061_v30 = vld [vmem:[#allocation8 + $0x7d8] sm:$0xf0]  ;;  %v11134_v23 = vld [vmem:[#allocation11 + $0xa4] sm:$0xf0] }
 0x469   :  { %6328 = vmatmul.bf16.vlgmr.msrb.gmra.mxu1 %v11931_v17  ;;  %v10099_v17 = vld [vmem:[#allocation11 + $0x20] sm:$0xf]  ;;  %v10164_v40 = vor.u32 %v11134_v23, %v10163_v29 }
 0x46a   :  { %v10100_v35 = vor.u32 %v11118_v2, %v10099_v17  ;;  %6794 = vmatpush.bf16.msra.mxu1 %v10204_v56  ;;  %v11102_v17 = vld [vmem:[#allocation8 + $0x7ac] sm:$0xf]  ;;  %v10045_v2 = vld [vmem:[#allocation8 + $0x7b8] sm:$0xf0] }
 0x46b   :  { %6782 = vmatpush.bf16.msra.mxu0 %v10124_v45  ;;  %6342 = vmatmul.bf16.vlgmr.msrb.gmra.mxu2 %v11938_v4  ;;  %v11967_v4 = vpop.f32.mrf.mxu1  ;;  %v10195_v45 = vld [vmem:[#allocation11 + $0xe0] sm:$0xf] }
 0x46c   :  { %6294 = vmatpush.bf16.msra.mxu3 %v9536_v28  ;;  %v10196_v19 = vor.u32 %v11142_v50, %v10195_v45  ;;  %v10120_v28 = vor.u32 %v11121_v42, %v10117_v60  ;;  %v6007_v61 = vpop.f32.mrf.mxu2  ;;  %v5938_v53 = vadd.f32 %v11967_v4, %v5924_v38  ;;  %v5981_v4 = vpop.f32.mrf.mxu0  ;;  %v11113_v45 = vld [vmem:[#allocation11 + $0x4] sm:$0xf]  ;;  %v9981_v38 = vld [vmem:[#allocation8 + $0x738] sm:$0xf0]  ;;  %v10147_v60 = vld [vmem:[#allocation11 + $0x80] sm:$0xf] }
 0x46e   :  { %6795 = vmatpush.bf16.msra.mxu1 %v10196_v19  ;;  %v5952_v48 = vadd.f32 %v11969_v44, %v5938_v53  ;;  %v11115_v44 = vld [vmem:[#allocation11 + $0x14] sm:$0xf] }
 0x46f   :  { %6783 = vmatpush.bf16.msra.mxu0 %v10116_v15  ;;  %v10187_v15 = vld [vmem:[#allocation11 + $0xd0] sm:$0xf] }
 0x470   :  { %6295 = vmatpush.bf16.msra.mxu3 %v9520_v57  ;;  %v10188_v62 = vor.u32 %v11140_v1, %v10187_v15  ;;  %v10109_v57 = vld [vmem:[#allocation11 + $0x38] sm:$0xf0]  ;;  %v5966_v0 = vadd.f32 %v5965_v26, %v5952_v48  ;;  %v9997_v26 = vld [vmem:[#allocation8 + $0x758] sm:$0xf0]  ;;  %v11086_v1 = vld [vmem:[#allocation8 + $0x72c] sm:$0xf] }
 0x471   :  { %v4627_v48 = vperm.slane %v11971_v18, 1 }
 0x472   :  { %6796 = vmatpush.bf16.msra.mxu1 %v10188_v62 }
 0x473   :  { %6784 = vmatpush.bf16.msra.mxu0 %v10108_v25  ;;  %v5939_v16 = vpop.f32.mrf.mxu1  ;;  %v10064_v25 = vor.u32 %v11106_v51, %v10061_v30 }
 0x474   :  { %6296 = vmatpush.bf16.msra.mxu3 %v9504_v47  ;;  %v11098_v47 = vld [vmem:[#allocation8 + $0x78c] sm:$0xf]  ;;  %v6009_v13 = vpop.f32.mrf.mxu2  ;;  %v6035_v9 = vpop.f32.mrf.mxu0 }
 0x475   :  { %v10032_v8 = vor.u32 %v11098_v47, %v10029_v27 }
 0x476   :  { %6797 = vmatpush.bf16.msra.mxu1 %v10180_v11 }
 0x477   :  { %6785 = vmatpush.bf16.msra.mxu0 %v10100_v35  ;;  %v11119_v35 = vld [vmem:[#allocation11 + $0x34] sm:$0xf] }
 0x478   :  { %6297 = vmatpush.bf16.msra.mxu3 %v9488_v37  ;;  %v10112_v46 = vor.u32 %v11119_v35, %v10109_v57  ;;  %v11136_v37 = vld [vmem:[#allocation11 + $0xb4] sm:$0xf0]  ;;  %v10205_v35 = vld [vmem:[#allocation11 + $0xf8] sm:$0xf0] }
 0x479   :  { %v10172_v12 = vor.u32 %v11136_v37, %v10171_v22  ;;  %v9965_v57 = vld [vmem:[#allocation8 + $0x718] sm:$0xf0] }
 0x47a   :  { %v9968_v22 = vor.u32 %v11082_v21, %v9965_v57 }
 0x47b   :  { %6786 = vmatpush.bf16.msra.mxu0 %v10092_v52  ;;  %v5993_v10 = vpop.f32.mrf.mxu1  ;;  %v10048_v52 = vor.u32 %v11102_v17, %v10045_v2  ;;  %6798 = vmatpush.bf16.msra.mxu1 %v10172_v12  ;;  %v11143_v17 = vld [vmem:[#allocation11 + $0xf4] sm:$0xf] }
 0x47c   :  { %6298 = vmatpush.bf16.msra.mxu3 %v9472_v33  ;;  %v10093_v33 = vld [vmem:[#allocation11 + $0x18] sm:$0xf0]  ;;  %v10208_v53 = vor.u32 %v11143_v17, %v10205_v35  ;;  %v6063_v11 = vpop.f32.mrf.mxu2  ;;  %v6037_v41 = vpop.f32.mrf.mxu0  ;;  %v11139_v12 = vld [vmem:[#allocation11 + $0xd4] sm:$0xf]  ;;  %v10259_v17 = vld [vmem:[#allocation11 + $0x160] sm:$0xf] }
 0x47d   :  { %v10096_v43 = vor.u32 %v11115_v44, %v10093_v33  ;;  %v6038_v33 = vadd.f32 %v6037_v41, %v4627_v48 }
 0x47f   :  { %6787 = vmatpush.bf16.msra.mxu0 %v10084_v7  ;;  %v5967_v7 = vpop.f32.mrf.mxu3  ;;  %6799 = vmatpush.bf16.msra.mxu1 %v10164_v40  ;;  %v10173_v40 = vld [vmem:[#allocation11 + $0xb8] sm:$0xf0] }
 0x480   :  { %6299 = vmatpush.bf16.msra.mxu3 %v9456_v6  ;;  %v10155_v6 = vld [vmem:[#allocation11 + $0x90] sm:$0xf] }
 0x483   :  { %6836 = vmatpush.bf16.msrb.mxu0 %v10144_v36  ;;  %6300 = vmatmul.bf16.vlgmr.msra.gmra.mxu3 %v11902_v63  ;;  %v5940_v63 = vadd.f32 %v5939_v16, %v5926_v14  ;;  %v11094_v36 = vld [vmem:[#allocation8 + $0x76c] sm:$0xf]  ;;  %v5995_v3 = vpop.f32.mrf.mxu1  ;;  %v11141_v14 = vld [vmem:[#allocation11 + $0xe4] sm:$0xf] }
 0x484   :  { %6348 = vmatpush.bf16.msrb.mxu3 %v10080_v24  ;;  %v10016_v39 = vor.u32 %v11094_v36, %v10013_v31  ;;  %v11090_v16 = vld [vmem:[#allocation8 + $0x74c] sm:$0xf]  ;;  %v11132_v24 = vld [vmem:[#allocation11 + $0x94] sm:$0xf0]  ;;  %v11137_v31 = vld [vmem:[#allocation11 + $0xc4] sm:$0xf]  ;;  %v6065_v29 = vpop.f32.mrf.mxu2 }
 0x485   :  { %v5954_v56 = vadd.f32 %v11973_v58, %v5940_v63  ;;  %v10085_v58 = vld [vmem:[#allocation11 + $0x8] sm:$0xf0]  ;;  %v10156_v49 = vor.u32 %v11132_v24, %v10155_v6  ;;  %v11133_v6 = vld [vmem:[#allocation11 + $0xa4] sm:$0xf] }
 0x486   :  { %v10165_v24 = vld [vmem:[#allocation11 + $0xa8] sm:$0xf0] }
 0x487   :  { %6837 = vmatpush.bf16.msrb.mxu0 %v10136_v20  ;;  %v5980_v20 = vadd.f32 %v5979_v5, %v5966_v0  ;;  %v5968_v51 = vadd.f32 %v5967_v7, %v5954_v56  ;;  %v6021_v50 = vpop.f32.mrf.mxu3  ;;  %v10000_v5 = vor.u32 %v11090_v16, %v9997_v26  ;;  %6800 = vmatpush.bf16.msra.mxu1 %v10156_v49 }
 0x488   :  { %6349 = vmatpush.bf16.msrb.mxu3 %v10064_v25  ;;  %v11130_v25 = vld [vmem:[#allocation11 + $0x84] sm:$0xf0] }
 0x489   :  { %v5994_v30 = vadd.f32 %v5993_v10, %v5980_v20  ;;  %v5982_v19 = vadd.f32 %v5981_v4, %v5968_v51  ;;  %v10148_v59 = vor.u32 %v11130_v25, %v10147_v60  ;;  %v10189_v4 = vld [vmem:[#allocation11 + $0xd8] sm:$0xf0]  ;;  %v11135_v20 = vld [vmem:[#allocation11 + $0xb4] sm:$0xf]  ;;  %v10149_v25 = vld [vmem:[#allocation11 + $0x88] sm:$0xf0] }
 0x48a   :  { %v10192_v36 = vor.u32 %v11139_v12, %v10189_v4  ;;  %v10235_v12 = vld [vmem:[#allocation11 + $0x130] sm:$0xf]  ;;  %v11152_v4 = vld [vmem:[#allocation11 + $0x134] sm:$0xf0] }
 0x48b   :  { %6838 = vmatpush.bf16.msrb.mxu0 %v10128_v32  ;;  %v10088_v32 = vor.u32 %v11113_v45, %v10085_v58  ;;  %v6008_v15 = vadd.f32 %v6007_v61, %v5994_v30  ;;  %v5996_v62 = vadd.f32 %v5995_v3, %v5982_v19  ;;  %v6049_v2 = vpop.f32.mrf.mxu1  ;;  %v10197_v61 = vld [vmem:[#allocation11 + $0xe8] sm:$0xf0]  ;;  %6801 = vmatpush.bf16.msra.mxu1 %v10148_v59  ;;  %v6091_v3 = vpop.f32.mrf.mxu0  ;;  %v11131_v30 = vld [vmem:[#allocation11 + $0x94] sm:$0xf]  ;;  %v10157_v19 = vld [vmem:[#allocation11 + $0x98] sm:$0xf0] }
 0x48c   :  { %6350 = vmatpush.bf16.msrb.mxu3 %v10048_v52  ;;  %v10200_v37 = vor.u32 %v11141_v14, %v10197_v61  ;;  %v6119_v49 = vpop.f32.mrf.mxu2 }
 0x48d   :  { %v6022_v42 = vadd.f32 %v6021_v50, %v6008_v15  ;;  %v6010_v10 = vadd.f32 %v6009_v13, %v5996_v62  ;;  %v11160_v62 = vld [vmem:[#allocation11 + $0x174] sm:$0xf0] }
 0x48f   :  { %6839 = vmatpush.bf16.msrb.mxu0 %v10120_v28  ;;  %v9984_v28 = vor.u32 %v11086_v1, %v9981_v38  ;;  %v6023_v52 = vpop.f32.mrf.mxu3  ;;  %v6370_v47 = vmul.f32 0.2, %v6022_v42  ;;  %vm6362_vm1 = vcmp.ge.f32.partialorder %v6022_v42, 0.0  ;;  %6850 = vmatpush.bf16.msrb.mxu1 %v10208_v53  ;;  %v10267_v38 = vld [vmem:[#allocation11 + $0x170] sm:$0xf] }
 0x490   :  { %6351 = vmatpush.bf16.msrb.mxu3 %v10032_v8  ;;  %v6036_v8 = vadd.f32 %v6035_v9, %v4627_v48  ;;  %v10268_v60 = vor.u32 %v11160_v62, %v10267_v38  ;;  %v11154_v48 = vld [vmem:[#allocation11 + $0x144] sm:$0xf0] }
 0x491   :  { %v6378_v34 = vsel %vm6362_vm1, %v6022_v42, %v6370_v47  ;;  %v11129_v42 = vld [vmem:[#allocation11 + $0x84] sm:$0xf]  ;;  %v10243_v47 = vld [vmem:[#allocation11 + $0x140] sm:$0xf] }
 0x492   :  { %v6050_v44 = vadd.f32 %v6049_v2, %v6036_v8  ;;  %v11158_v2 = vld [vmem:[#allocation11 + $0x164] sm:$0xf0]  ;;  %v10152_v21 = vor.u32 %v11129_v42, %v10149_v25  ;;  %6808 = vmatpush.bf16.msra.mxu2 %v10268_v60  ;;  %v10244_v41 = vor.u32 %v11154_v48, %v10243_v47  ;;  %v10236_v8 = vor.u32 %v11152_v4, %v10235_v12  ;;  %v10323_v12 = vld [vmem:[#allocation11 + $0x1e0] sm:$0xf] }
 0x493   :  { %6840 = vmatpush.bf16.msrb.mxu0 %v10112_v46  ;;  %v6024_v46 = vadd.f32 %v6023_v52, %v6010_v10  ;;  %6851 = vmatpush.bf16.msrb.mxu1 %v10200_v37  ;;  %v6051_v0 = vpop.f32.mrf.mxu1  ;;  %v6093_v9 = vpop.f32.mrf.mxu0  ;;  %v10260_v10 = vor.u32 %v11158_v2, %v10259_v17  ;;  %v11156_v52 = vld [vmem:[#allocation11 + $0x154] sm:$0xf0]  ;;  %v11149_v17 = vld [vmem:[#allocation11 + $0x124] sm:$0xf]  ;;  %v10229_v2 = vld [vmem:[#allocation11 + $0x128] sm:$0xf0] }
 0x494   :  { %6352 = vmatpush.bf16.msrb.mxu3 %v10016_v39  ;;  %v6064_v13 = vadd.f32 %v6063_v11, %v6050_v44  ;;  %v10176_v39 = vor.u32 %v11135_v20, %v10173_v40  ;;  %v6052_v16 = vadd.f32 %v6051_v0, %v6038_v33  ;;  %v6121_v53 = vpop.f32.mrf.mxu2  ;;  %v10251_v11 = vld [vmem:[#allocation11 + $0x150] sm:$0xf]  ;;  %v10211_v44 = vld [vmem:[#allocation11 + $0x100] sm:$0xf]  ;;  %v11146_v33 = vld [vmem:[#allocation11 + $0x104] sm:$0xf0] }
 0x495   :  { %vm6366_vm2 = vcmp.ge.f32.partialorder %v6024_v46, 0.0  ;;  %v6374_v27 = vmul.f32 0.2, %v6024_v46  ;;  %v10252_v37 = vor.u32 %v11156_v52, %v10251_v11  ;;  %v10219_v0 = vld [vmem:[#allocation11 + $0x110] sm:$0xf] }
 0x496   :  { %v6066_v45 = vadd.f32 %v6065_v29, %v6052_v16  ;;  %6809 = vmatpush.bf16.msra.mxu2 %v10260_v10  ;;  %v11159_v20 = vld [vmem:[#allocation11 + $0x174] sm:$0xf]  ;;  %v10261_v16 = vld [vmem:[#allocation11 + $0x168] sm:$0xf0]  ;;  %v11174_v4 = vld [vmem:[#allocation11 + $0x1e4] sm:$0xf0] }
 0x497   :  { %6841 = vmatpush.bf16.msrb.mxu0 %v10104_v54  ;;  %v6382_v7 = vsel %vm6366_vm2, %v6024_v46, %v6374_v27  ;;  %v10181_v54 = vld [vmem:[#allocation11 + $0xc8] sm:$0xf0]  ;;  %v6077_v56 = vpop.f32.mrf.mxu3  ;;  %6852 = vmatpush.bf16.msrb.mxu1 %v10192_v36  ;;  %v10227_v36 = vld [vmem:[#allocation11 + $0x120] sm:$0xf] }
 0x498   :  { %6353 = vmatpush.bf16.msrb.mxu3 %v10000_v5  ;;  %v6386_v63 = vpack.c.bf16 %v6382_v7, %v6378_v34  ;;  %v10184_v23 = vor.u32 %v11137_v31, %v10181_v54  ;;  %v10160_v5 = vor.u32 %v11131_v30, %v10157_v19  ;;  %v11150_v31 = vld [vmem:[#allocation11 + $0x124] sm:$0xf0] }
 0x499   :  { %v10228_v54 = vor.u32 %v11150_v31, %v10227_v36 }
 0x49a   :  { %6788 = vmatmul.bf16.vlgmr.msra.gmra.mxu0 %v6386_v63  ;;  %6810 = vmatpush.bf16.msra.mxu2 %v10252_v37 }
 0x49b   :  { %6842 = vmatpush.bf16.msrb.mxu0 %v10096_v43  ;;  %6853 = vmatpush.bf16.msrb.mxu1 %v10184_v23  ;;  %v6078_v43 = vadd.f32 %v6077_v56, %v6064_v13  ;;  %v6105_v51 = vpop.f32.mrf.mxu1  ;;  %v11148_v56 = vld [vmem:[#allocation11 + $0x114] sm:$0xf0]  ;;  %v6147_v23 = vpop.f32.mrf.mxu0  ;;  %v10269_v13 = vld [vmem:[#allocation11 + $0x178] sm:$0xf0] }
 0x49c   :  { %6354 = vmatpush.bf16.msrb.mxu3 %v9984_v28  ;;  %v10220_v29 = vor.u32 %v11148_v56, %v10219_v0  ;;  %v10324_v0 = vor.u32 %v11174_v4, %v10323_v12  ;;  %v10293_v12 = vld [vmem:[#allocation11 + $0x1a8] sm:$0xf0] }
 0x49d   :  { %v6092_v58 = vadd.f32 %v6091_v3, %v6078_v43  ;;  %v10212_v3 = vor.u32 %v11146_v33, %v10211_v44  ;;  %v10272_v43 = vor.u32 %v11159_v20, %v10269_v13  ;;  %v10315_v33 = vld [vmem:[#allocation11 + $0x1d0] sm:$0xf]  ;;  %v11172_v20 = vld [vmem:[#allocation11 + $0x1d4] sm:$0xf0] }
 0x49e   :  { %6811 = vmatpush.bf16.msra.mxu2 %v10244_v41  ;;  %v10213_v41 = vld [vmem:[#allocation11 + $0x108] sm:$0xf0]  ;;  %v10316_v13 = vor.u32 %v11172_v20, %v10315_v33 }
 0x49f   :  { %6843 = vmatpush.bf16.msrb.mxu0 %v10088_v32  ;;  %v6079_v26 = vpop.f32.mrf.mxu3  ;;  %6854 = vmatpush.bf16.msrb.mxu1 %v10176_v39  ;;  %v6106_v15 = vadd.f32 %v6105_v51, %v6092_v58  ;;  %v11157_v39 = vld [vmem:[#allocation11 + $0x164] sm:$0xf]  ;;  %v4628_v51 = vperm.slane %v11971_v18, 2  ;;  %v10253_v58 = vld [vmem:[#allocation11 + $0x158] sm:$0xf0] }
 0x4a0   :  { %6355 = vmatpush.bf16.msrb.mxu3 %v9968_v22  ;;  %v6080_v50 = vadd.f32 %v6079_v26, %v6066_v45 }
 0x4a1   :  { %v6120_v59 = vadd.f32 %v6119_v49, %v6106_v15  ;;  %v6148_v30 = vadd.f32 %v6147_v23, %v4628_v51  ;;  %v10245_v49 = vld [vmem:[#allocation11 + $0x148] sm:$0xf0]  ;;  %v10237_v15 = vld [vmem:[#allocation11 + $0x138] sm:$0xf0] }
 0x4a2   :  { %v6094_v32 = vadd.f32 %v6093_v9, %v6080_v50  ;;  %6812 = vmatpush.bf16.msra.mxu2 %v10236_v8  ;;  %v11153_v50 = vld [vmem:[#allocation11 + $0x144] sm:$0xf] }
 0x4a3   :  { %6356 = vmatmul.bf16.vlgmr.msrb.gmra.mxu3 %v11950_v55  ;;  %v10168_v55 = vor.u32 %v11133_v6, %v10165_v24  ;;  %v6107_v28 = vpop.f32.mrf.mxu1  ;;  %v10264_v6 = vor.u32 %v11157_v39, %v10261_v16  ;;  %v6175_v24 = vpop.f32.mrf.mxu2  ;;  %v10307_v39 = vld [vmem:[#allocation11 + $0x1c0] sm:$0xf]  ;;  %v11170_v16 = vld [vmem:[#allocation11 + $0x1c4] sm:$0xf0] }
 0x4a4   :  { %v6108_v35 = vadd.f32 %v6107_v28, %v6094_v32  ;;  %v6149_v26 = vpop.f32.mrf.mxu0  ;;  %v11151_v32 = vld [vmem:[#allocation11 + $0x134] sm:$0xf] }
 0x4a5   :  { %6855 = vmatpush.bf16.msrb.mxu1 %v10168_v55  ;;  %v11155_v55 = vld [vmem:[#allocation11 + $0x154] sm:$0xf]  ;;  %v6150_v38 = vadd.f32 %v6149_v26, %v4628_v51  ;;  %v10240_v25 = vor.u32 %v11151_v32, %v10237_v15  ;;  %v10299_v26 = vld [vmem:[#allocation11 + $0x1b0] sm:$0xf]  ;;  %v10275_v15 = vld [vmem:[#allocation11 + $0x180] sm:$0xf] }
 0x4a6   :  { %v6122_v14 = vadd.f32 %v6121_v53, %v6108_v35  ;;  %6813 = vmatpush.bf16.msra.mxu2 %v10228_v54  ;;  %v10256_v19 = vor.u32 %v11155_v55, %v10253_v58  ;;  %v11147_v53 = vld [vmem:[#allocation11 + $0x114] sm:$0xf] }
 0x4a7   :  { %v6133_v1 = vpop.f32.mrf.mxu3 }
 0x4a8   :  { %v6134_v57 = vadd.f32 %v6133_v1, %v6120_v59 }
 0x4a9   :  { %6856 = vmatpush.bf16.msrb.mxu1 %v10160_v5  ;;  %v10248_v5 = vor.u32 %v11153_v50, %v10245_v49  ;;  %v10291_v50 = vld [vmem:[#allocation11 + $0x1a0] sm:$0xf]  ;;  %v10283_v49 = vld [vmem:[#allocation11 + $0x190] sm:$0xf] }
 0x4aa   :  { %6844 = vmatmul.bf16.vlgmr.msrb.gmra.mxu0 %v6386_v63  ;;  %v6371_v46 = vmul.f32 0.2, %v6134_v57  ;;  %vm6363_vm3 = vcmp.ge.f32.partialorder %v6134_v57, 0.0  ;;  %6814 = vmatpush.bf16.msra.mxu2 %v10220_v29 }
 0x4ab   :  { %v6161_v40 = vpop.f32.mrf.mxu1  ;;  %v6177_v62 = vpop.f32.mrf.mxu2 }
 0x4ac   :  { %v6379_v34 = vsel %vm6363_vm3, %v6134_v57, %v6371_v46  ;;  %v6162_v1 = vadd.f32 %v6161_v40, %v6148_v30  ;;  %v6203_v42 = vpop.f32.mrf.mxu0  ;;  %v10232_v57 = vor.u32 %v11149_v17, %v10229_v2  ;;  %v11166_v30 = vld [vmem:[#allocation11 + $0x1a4] sm:$0xf0]  ;;  %v10325_v17 = vld [vmem:[#allocation11 + $0x1e8] sm:$0xf0] }
 0x4ad   :  { %6857 = vmatpush.bf16.msrb.mxu1 %v10152_v21 }
 0x4ae   :  { %6815 = vmatpush.bf16.msra.mxu2 %v10212_v3  ;;  %v6176_v60 = vadd.f32 %v6175_v24, %v6162_v1  ;;  %v11162_v1 = vld [vmem:[#allocation11 + $0x184] sm:$0xf0] }
 0x4af   :  { %v6135_v61 = vpop.f32.mrf.mxu3 }
 0x4b0   :  { %v6136_v22 = vadd.f32 %v6135_v61, %v6122_v14  ;;  %v10221_v14 = vld [vmem:[#allocation11 + $0x118] sm:$0xf0] }
 0x4b1   :  { %v10224_v47 = vor.u32 %v11147_v53, %v10221_v14  ;;  %v10317_v53 = vld [vmem:[#allocation11 + $0x1d8] sm:$0xf0] }
 0x4b2   :  { %vm6367_vm4 = vcmp.ge.f32.partialorder %v6136_v22, 0.0  ;;  %v6375_v27 = vmul.f32 0.2, %v6136_v22  ;;  %6864 = vmatpush.bf16.msrb.mxu2 %v10272_v43 }
 0x4b3   :  { %v6163_v9 = vpop.f32.mrf.mxu1  ;;  %v6231_v52 = vpop.f32.mrf.mxu2 }
 0x4b4   :  { %v6383_v7 = vsel %vm6367_vm4, %v6136_v22, %v6375_v27  ;;  %v6164_v28 = vadd.f32 %v6163_v9, %v6150_v38  ;;  %v6205_v46 = vpop.f32.mrf.mxu0  ;;  %v11145_v27 = vld [vmem:[#allocation11 + $0x104] sm:$0xf]  ;;  %v11164_v9 = vld [vmem:[#allocation11 + $0x194] sm:$0xf0]  ;;  %v11175_v38 = vld [vmem:[#allocation11 + $0x1f4] sm:$0xf] }
 0x4b5   :  { %v6387_v63 = vpack.c.bf16 %v6383_v7, %v6379_v34  ;;  %v10331_v34 = vld [vmem:[#allocation11 + $0x1f0] sm:$0xf]  ;;  %v10216_v7 = vor.u32 %v11145_v27, %v10213_v41 }
 0x4b6   :  { %6865 = vmatpush.bf16.msrb.mxu2 %v10264_v6  ;;  %v6178_v10 = vadd.f32 %v6177_v62, %v6164_v28  ;;  %v10308_v6 = vor.u32 %v11170_v16, %v10307_v39 }
 0x4b7   :  { %6802 = vmatmul.bf16.vlgmr.msra.gmra.mxu1 %v6387_v63 }
 0x4ba   :  { %6866 = vmatpush.bf16.msrb.mxu2 %v10256_v19  ;;  %v10292_v19 = vor.u32 %v11166_v30, %v10291_v50 }
 0x4bb   :  { %v6217_v59 = vpop.f32.mrf.mxu1  ;;  %v6233_v29 = vpop.f32.mrf.mxu2 }
 0x4be   :  { %6867 = vmatpush.bf16.msrb.mxu2 %v10248_v5  ;;  %v10284_v5 = vor.u32 %v11164_v9, %v10283_v49 }
 0x4bf   :  { %v6259_v32 = vpop.f32.mrf.mxu0 }
 0x4c2   :  { %6868 = vmatpush.bf16.msrb.mxu2 %v10240_v25  ;;  %v11173_v25 = vld [vmem:[#allocation11 + $0x1e4] sm:$0xf] }
 0x4c3   :  { %v6219_v8 = vpop.f32.mrf.mxu1  ;;  %v10328_v28 = vor.u32 %v11173_v25, %v10325_v17 }
 0x4c6   :  { %v6189_v45 = vpop.f32.mrf.mxu3  ;;  %6869 = vmatpush.bf16.msrb.mxu2 %v10232_v57  ;;  %v11171_v57 = vld [vmem:[#allocation11 + $0x1d4] sm:$0xf] }
 0x4c7   :  { %6858 = vmatmul.bf16.vlgmr.msrb.gmra.mxu1 %v6387_v63  ;;  %v6190_v21 = vadd.f32 %v6189_v45, %v6176_v60  ;;  %v11176_v63 = vld [vmem:[#allocation11 + $0x1f4] sm:$0xf0]  ;;  %v10333_v60 = vld [vmem:[#allocation11 + $0x1f8] sm:$0xf0] }
 0x4c8   :  { %v10332_v36 = vor.u32 %v11176_v63, %v10331_v34  ;;  %v11168_v45 = vld [vmem:[#allocation11 + $0x1b4] sm:$0xf0]  ;;  %v10336_v2 = vor.u32 %v11175_v38, %v10333_v60  ;;  %v11165_v63 = vld [vmem:[#allocation11 + $0x1a4] sm:$0xf] }
 0x4c9   :  { %v6204_v61 = vadd.f32 %v6203_v42, %v6190_v21  ;;  %v10300_v58 = vor.u32 %v11168_v45, %v10299_v26  ;;  %v10276_v42 = vor.u32 %v11162_v1, %v10275_v15 }
 0x4ca   :  { %6870 = vmatpush.bf16.msrb.mxu2 %v10224_v47  ;;  %6822 = vmatpush.bf16.msra.mxu3 %v10332_v36 }
 0x4cb   :  { %v6218_v37 = vadd.f32 %v6217_v59, %v6204_v61  ;;  %v6273_v62 = vpop.f32.mrf.mxu1  ;;  %v4629_v59 = vperm.slane %v11971_v18, 3  ;;  %v10320_v61 = vor.u32 %v11171_v57, %v10317_v53 }
 0x4cd   :  { %v6232_v31 = vadd.f32 %v6231_v52, %v6218_v37  ;;  %v6260_v14 = vadd.f32 %v6259_v32, %v4629_v59  ;;  %v10309_v52 = vld [vmem:[#allocation11 + $0x1c8] sm:$0xf0]  ;;  %v10301_v37 = vld [vmem:[#allocation11 + $0x1b8] sm:$0xf0] }
 0x4ce   :  { %v6191_v35 = vpop.f32.mrf.mxu3  ;;  %6871 = vmatpush.bf16.msrb.mxu2 %v10216_v7  ;;  %6823 = vmatpush.bf16.msra.mxu3 %v10324_v0  ;;  %v6287_v21 = vpop.f32.mrf.mxu2  ;;  %v10296_v0 = vor.u32 %v11165_v63, %v10293_v12 }
 0x4cf   :  { %v6192_v11 = vadd.f32 %v6191_v35, %v6178_v10  ;;  %v6261_v35 = vpop.f32.mrf.mxu0 }
 0x4d0   :  { %v6262_v27 = vadd.f32 %v6261_v35, %v4629_v59 }
 0x4d1   :  { %v6206_v22 = vadd.f32 %v6205_v46, %v6192_v11  ;;  %v11169_v11 = vld [vmem:[#allocation11 + $0x1c4] sm:$0xf] }
 0x4d2   :  { %6824 = vmatpush.bf16.msra.mxu3 %v10316_v13  ;;  %v10312_v46 = vor.u32 %v11169_v11, %v10309_v52  ;;  %v10277_v13 = vld [vmem:[#allocation11 + $0x188] sm:$0xf0] }
 0x4d3   :  { %v6220_v54 = vadd.f32 %v6219_v8, %v6206_v22  ;;  %v6275_v47 = vpop.f32.mrf.mxu1  ;;  %v11167_v22 = vld [vmem:[#allocation11 + $0x1b4] sm:$0xf] }
 0x4d4   :  { %v10304_v18 = vor.u32 %v11167_v22, %v10301_v37  ;;  %v6276_v4 = vadd.f32 %v6275_v47, %v6262_v27  ;;  %v6904_v27 = vld [vmem:[#allocation14] sm:$0xff] }
 0x4d5   :  { %v6234_v23 = vadd.f32 %v6233_v29, %v6220_v54  ;;  %v10285_v29 = vld [vmem:[#allocation11 + $0x198] sm:$0xf0]  ;;  %v6908_v63 = vunpack.c.l.b16 %v6904_v27 }
 0x4d6   :  { %6825 = vmatpush.bf16.msra.mxu3 %v10308_v6  ;;  %v6289_v41 = vpop.f32.mrf.mxu2 }
 0x4d7   :  { %v6290_v54 = vadd.f32 %v6289_v41, %v6276_v4 }
 0x4da   :  { %6826 = vmatpush.bf16.msra.mxu3 %v10300_v58 }
 0x4de   :  { %6827 = vmatpush.bf16.msra.mxu3 %v10292_v19 }
 0x4df   :  { %v6315_v34 = vpop.f32.mrf.mxu0 }
 0x4e2   :  { %6828 = vmatpush.bf16.msra.mxu3 %v10284_v5 }
 0x4e6   :  { %v6245_v48 = vpop.f32.mrf.mxu3  ;;  %6829 = vmatpush.bf16.msra.mxu3 %v10276_v42  ;;  %v6329_v36 = vpop.f32.mrf.mxu1 }
 0x4e7   :  { %v6246_v56 = vadd.f32 %v6245_v48, %v6232_v31  ;;  %v6274_v48 = vadd.f32 %v6273_v62, %v6260_v14  ;;  %v6454_v62 = vld [vmem:[#allocation12] sm:$0x3] }
 0x4e8   :  { %v6456_v42 = vperm.slane %v6454_v62, 0  ;;  %v6457_v37 = vperm.slane %v6454_v62, 1 }
 0x4e9   :  { %v6372_v40 = vmul.f32 0.2, %v6246_v56  ;;  %vm6364_vm5 = vcmp.ge.f32.partialorder %v6246_v56, 0.0  ;;  %v6288_v7 = vadd.f32 %v6287_v21, %v6274_v48 }
 0x4ea   :  { %6878 = vmatpush.bf16.msrb.mxu3 %v10336_v2 }
 0x4eb   :  { %v6380_v24 = vsel %vm6364_vm5, %v6246_v56, %v6372_v40  ;;  %v11163_v56 = vld [vmem:[#allocation11 + $0x194] sm:$0xf]  ;;  %v6317_v40 = vpop.f32.mrf.mxu0 }
 0x4ec   :  { %v10288_v20 = vor.u32 %v11163_v56, %v10285_v29 }
 0x4ee   :  { %v6247_v44 = vpop.f32.mrf.mxu3  ;;  %6879 = vmatpush.bf16.msrb.mxu3 %v10328_v28  ;;  %v6343_v33 = vpop.f32.mrf.mxu2 }
 0x4ef   :  { %v6248_v3 = vadd.f32 %v6247_v44, %v6234_v23 }
 0x4f1   :  { %vm6368_vm6 = vcmp.ge.f32.partialorder %v6248_v3, 0.0  ;;  %v6376_v43 = vmul.f32 0.2, %v6248_v3 }
 0x4f2   :  { %6880 = vmatpush.bf16.msrb.mxu3 %v10320_v61  ;;  %v6940_v61 = vld [vmem:[#allocation3] sm:$0x1] }
 0x4f3   :  { %v6384_v51 = vsel %vm6368_vm6, %v6248_v3, %v6376_v43  ;;  %v11161_v3 = vld [vmem:[#allocation11 + $0x184] sm:$0xf]  ;;  %6943 = vperm.xlu0 %11191, %v6940_v61  }
 0x4f4   :  { %v6388_v55 = vpack.c.bf16 %v6384_v51, %v6380_v24  ;;  %v10280_v6 = vor.u32 %v11161_v3, %v10277_v13  ;;  %v6331_v24 = vpop.f32.mrf.mxu1 }
 0x4f6   :  { %6816 = vmatmul.bf16.vlgmr.msra.gmra.mxu2 %v6388_v55  ;;  %6881 = vmatpush.bf16.msrb.mxu3 %v10312_v46 }
 0x4fa   :  { %6882 = vmatpush.bf16.msrb.mxu3 %v10304_v18 }
 0x4fe   :  { %6883 = vmatpush.bf16.msrb.mxu3 %v10296_v0  ;;  %v6910_v0 = vpack.c.b16 %v6908_v63, %v6908_v63 }
 0x502   :  { %6884 = vmatpush.bf16.msrb.mxu3 %v10288_v20 }
 0x506   :  { %6872 = vmatmul.bf16.vlgmr.msrb.gmra.mxu2 %v6388_v55  ;;  %v6301_v10 = vpop.f32.mrf.mxu3  ;;  %6885 = vmatpush.bf16.msrb.mxu3 %v10280_v6  ;;  %v6345_v55 = vpop.f32.mrf.mxu2 }
 0x507   :  { %v6302_v8 = vadd.f32 %v6301_v10, %v6288_v7 }
 0x509   :  { %v6316_v23 = vadd.f32 %v6315_v34, %v6302_v8 }
 0x50b   :  { %v6330_v16 = vadd.f32 %v6329_v36, %v6316_v23 }
 0x50d   :  { %v6344_v51 = vadd.f32 %v6343_v33, %v6330_v16 }
 0x50e   :  { %v6303_v31 = vpop.f32.mrf.mxu3 }
 0x50f   :  { %v6304_v44 = vadd.f32 %v6303_v31, %v6290_v54 }
 0x511   :  { %v6318_v39 = vadd.f32 %v6317_v40, %v6304_v44 }
 0x513   :  { %v6332_v26 = vadd.f32 %v6331_v24, %v6318_v39 }
 0x515   :  { %v6346_v58 = vadd.f32 %v6345_v55, %v6332_v26 }
 0x517   :  { %v6789_v15 = vpop.f32.mrf.mxu0 }
 0x518   :  { %v6790_v17 = vadd.f32 %v6789_v15, %v6456_v42 }
 0x51f   :  { %v6791_v60 = vpop.f32.mrf.mxu0 }
 0x520   :  { %v6792_v59 = vadd.f32 %v6791_v60, %v6456_v42 }
 0x526   :  { %v6357_v43 = vpop.f32.mrf.mxu3 }
 0x527   :  { %v6358_v45 = vadd.f32 %v6357_v43, %v6344_v51  ;;  %v6845_v53 = vpop.f32.mrf.mxu0  ;;  %v6909_v43 = vunpack.c.h.b16 %v6904_v27 }
 0x528   :  { %v6846_v18 = vadd.f32 %v6845_v53, %v6457_v37 }
 0x529   :  { %v6373_v30 = vmul.f32 0.2, %v6358_v45  ;;  %vm6365_vm7 = vcmp.ge.f32.partialorder %v6358_v45, 0.0  ;;  %v6911_v6 = vpack.c.b16 %v6909_v43, %v6909_v43 }
 0x52b   :  { %v6381_v9 = vsel %vm6365_vm7, %v6358_v45, %v6373_v30 }
 0x52e   :  { %v6359_v50 = vpop.f32.mrf.mxu3 }
 0x52f   :  { %v6360_v19 = vadd.f32 %v6359_v50, %v6346_v58  ;;  %v6847_v12 = vpop.f32.mrf.mxu0 }
 0x530   :  { %v6848_v31 = vadd.f32 %v6847_v12, %v6457_v37 }
 0x531   :  { %vm6369_vm8 = vcmp.ge.f32.partialorder %v6360_v19, 0.0  ;;  %v6377_v49 = vmul.f32 0.2, %v6360_v19 }
 0x533   :  { %v6385_v5 = vsel %vm6369_vm8, %v6360_v19, %v6377_v49 }
 0x534   :  { %v6389_v32 = vpack.c.bf16 %v6385_v5, %v6381_v9  ;;  %v6803_v1 = vpop.f32.mrf.mxu1 }
 0x535   :  { %v6804_v21 = vadd.f32 %v6803_v1, %v6790_v17 }
 0x536   :  { %6830 = vmatmul.bf16.vlgmr.msra.gmra.mxu3 %v6389_v32 }
 0x53c   :  { %v6805_v25 = vpop.f32.mrf.mxu1 }
 0x53d   :  { %v6806_v10 = vadd.f32 %v6805_v25, %v6792_v59 }
 0x544   :  { %v6859_v11 = vpop.f32.mrf.mxu1 }
 0x545   :  { %v6860_v8 = vadd.f32 %v6859_v11, %v6846_v18 }
 0x546   :  { %6886 = vmatmul.bf16.vlgmr.msrb.gmra.mxu3 %v6389_v32 }
 0x54c   :  { %v6861_v36 = vpop.f32.mrf.mxu1 }
 0x54d   :  { %v6862_v29 = vadd.f32 %v6861_v36, %v6848_v31 }
 0x565   :  { %v6944_v26 = vpop.permute.xlu0 %6943 }
 0x566   :  { %v6946_v45 = vperm.slane %v6944_v26, 0 }
 0x579   :  { %v6817_v38 = vpop.f32.mrf.mxu2 }
 0x57a   :  { %v6818_v35 = vadd.f32 %v6817_v38, %v6804_v21 }
 0x581   :  { %v6819_v2 = vpop.f32.mrf.mxu2 }
 0x582   :  { %v6820_v14 = vadd.f32 %v6819_v2, %v6806_v10 }
 0x589   :  { %v6873_v22 = vpop.f32.mrf.mxu2 }
 0x58a   :  { %v6874_v54 = vadd.f32 %v6873_v22, %v6860_v8 }
 0x591   :  { %v6875_v56 = vpop.f32.mrf.mxu2 }
 0x592   :  { %v6876_v44 = vadd.f32 %v6875_v56, %v6862_v29 }
 0x5b9   :  { %v6831_v28 = vpop.f32.mrf.mxu3 }
 0x5ba   :  { %v6832_v57 = vadd.f32 %v6831_v28, %v6818_v35 }
 0x5bc   :  { %v6896_v47 = vmul.f32 0.2, %v6832_v57  ;;  %vm6892_vm9 = vcmp.ge.f32.partialorder %v6832_v57, 0.0 }
 0x5be   :  { %v6900_v41 = vsel %vm6892_vm9, %v6832_v57, %v6896_v47 }
 0x5c1   :  { %v6833_v52 = vpop.f32.mrf.mxu3 }
 0x5c2   :  { %v6834_v46 = vadd.f32 %v6833_v52, %v6820_v14 }
 0x5c4   :  { %vm6894_vm10 = vcmp.ge.f32.partialorder %v6834_v46, 0.0  ;;  %v6898_v48 = vmul.f32 0.2, %v6834_v46 }
 0x5c6   :  { %v6902_v34 = vsel %vm6894_vm10, %v6834_v46, %v6898_v48 }
 0x5c7   :  { %v6905_v7 = vpack.c.bf16 %v6902_v34, %v6900_v41 }
 0x5c9   :  { %v6887_v4 = vpop.f32.mrf.mxu3  ;;  %6921 = vmatpush.bf16.xpose.msra.mxu0 %v6905_v7 }
 0x5ca   :  { %v6888_v23 = vadd.f32 %v6887_v4, %v6874_v54 }
 0x5cc   :  { %v6897_v20 = vmul.f32 0.2, %v6888_v23  ;;  %vm6893_vm11 = vcmp.ge.f32.partialorder %v6888_v23, 0.0 }
 0x5ce   :  { %v6901_v13 = vsel %vm6893_vm11, %v6888_v23, %v6897_v20 }
 0x5d0   :  { %6922 = vmatmul.bf16.vlgmr.msra.gmra.mxu0 %v6910_v0 }
 0x5d1   :  { %v6889_v33 = vpop.f32.mrf.mxu3 }
 0x5d2   :  { %v6890_v40 = vadd.f32 %v6889_v33, %v6876_v44 }
 0x5d4   :  { %vm6895_vm12 = vcmp.ge.f32.partialorder %v6890_v40, 0.0  ;;  %v6899_v3 = vmul.f32 0.2, %v6890_v40 }
 0x5d6   :  { %v6903_v39 = vsel %vm6895_vm12, %v6890_v40, %v6899_v3 }
 0x5d7   :  { %v6906_v16 = vpack.c.bf16 %v6903_v39, %v6901_v13 }
 0x5d9   :  { %6934 = vmatpush.bf16.xpose.msra.mxu1 %v6906_v16 }
 0x5e0   :  { %6935 = vmatmul.bf16.vlgmr.msra.gmra.mxu1 %v6911_v6 }
 0x64d   :  { %v6923_v24 = vpop.f32.mrf.mxu0 }
 0x655   :  { %v6925_v51 = vpop.f32.mrf.mxu0 }
 0x65d   :  { %v6936_v55 = vpop.f32.mrf.mxu1 }
 0x65e   :  { %v6937_v58 = vadd.f32 %v6936_v55, %v6923_v24 }
 0x660   :  { %v6947_v50 = vadd.f32 %v6946_v45, %v6937_v58 }
 0x662   :  { %v6948_v30 = vsub.f32 0.0, %v6947_v50 }
 0x664   :  { %v6949_v19 = vmul.f32 1.442695, %v6948_v30 }
 0x665   :  { %v6938_v49 = vpop.f32.mrf.mxu1 }
 0x666   :  { %11192 = vpow2.f32 %v6949_v19 }
 0x66c   :  { %v11193_v9 = vpop.eup %11192 }
 0x66d   :  { %v6951_v5 = vadd.f32 1.0, %v11193_v9 }
 0x66f   :  { %11194 = vrcp.f32 %v6951_v5  ;;  %v6963_v38 = vand.u32 2147483648, %v6951_v5  ;;  %v6961_v42 = vand.u32 2147483647, %v6951_v5  ;;  %vm6957_vm14 = vweird.f32 %v6951_v5 }
 0x671   :  { %v6964_v25 = vor.u32 1.1754944e-38, %v6963_v38  ;;  %vm6962_vm1 = vcmp.eq.f32.partialorder %v6961_v42, 8.507059e+37 }
 0x675   :  { %v11195_v32 = vpop.eup %11194 }
 0x676   :  { %v6953_v15 = vmul.f32 %v11195_v32, %v6951_v5  ;;  %vm6958_vm13 = vweird.f32 %v11195_v32 }
 0x677   :  { %vm6959_vm15 = vmor %vm6957_vm14, %vm6958_vm13 }
 0x678   :  { %v6954_v1 = vsub.f32 1.0, %v6953_v15 }
 0x67a   :  { %v6955_v62 = vmul.f32 %v11195_v32, %v6954_v1 }
 0x67c   :  { %v6956_v60 = vadd.f32 %v11195_v32, %v6955_v62 }
 0x67e   :  { %v6960_v17 = vsel %vm6959_vm15, %v11195_v32, %v6956_v60 }
 0x67f   :  { %v6965_v2 = vsel %vm6962_vm1, %v6964_v25, %v6960_v17 }
 0x680   :  { %6968 = vst.msk [vmem:[%s11997_s10] sm:$0x1] %vm6967_vm0, %v6965_v2 }
 0x681   :  { %6973 = vsyncpa [#allocation5], 1 }
 0x682   :  { %6974 = vsyncpa [#allocation7], 1 }
 0x683   :  { %6975 = vsyncpa [#allocation10], 1 }
 0x684   :  { %6976 = vsyncpa [#allocation13], 1 }

</bundles_post_ra>
